<compile_context>
chip_gen: v7x
topology: tpu7x:2x2x1
jax: 0.10.0
libtpu: 0.0.40
codegen_flags: <defaults>
</compile_context>

<pallas_src>
import jax
import jax.numpy as jnp
from jax import lax
from jax.experimental import pallas as pl
from jax.experimental.pallas import tpu as pltpu

# Match in-kernel f32 MXU accumulation so the pure-JAX reference agrees tightly.
jax.config.update("jax_default_matmul_precision", "highest")

_EPS = 1e-7
_NEG_BIG = -1e30


def _make_kernel(top_k: int, attn_every_k: int, seq_len: int):
    """Build the fused LSTM + sparse-attention recurrence kernel."""
    T = seq_len

    def kernel(gxi_ref, gxf_ref, gxg_ref, gxo_ref, whh_ref, wh_ref, wold_ref,
               outh_ref, outa_ref, hist_ref, hsc_ref):
        B = gxi_ref.shape[1]
        H = gxi_ref.shape[2]

        # Loop-invariant weights: load from VMEM exactly once.
        whh_i = whh_ref[0]                       # (H, H), already transposed
        whh_f = whh_ref[1]
        whh_g = whh_ref[2]
        whh_o = whh_ref[3]
        wh = wh_ref[...]                         # (1, H)  = w_t[:H]
        wold = wold_ref[...]                     # (1, H)  = w_t[H:]

        # History slot 0 = initial zero hidden state; its cached score
        # tanh(0) @ w_old is 0.  Rows > 0 are written before they are read.
        hist_ref[0] = jnp.zeros((B, H), jnp.float32)
        hsc_ref[0] = jnp.zeros((B, 1), jnp.float32)

        h = jnp.zeros((B, H), jnp.float32)
        c = jnp.zeros((B, H), jnp.float32)
        n_hist = 1                               # static count of valid history rows

        for t in range(T):                       # static unroll (T is small)
            # ---------------- LSTM cell ----------------
            # x @ W_ih^T + (b_ih + b_hh) was precomputed outside the kernel.
            i_g = jax.nn.sigmoid(
                gxi_ref[t] + jnp.dot(h, whh_i, preferred_element_type=jnp.float32))
            f_g = jax.nn.sigmoid(
                gxf_ref[t] + jnp.dot(h, whh_f, preferred_element_type=jnp.float32))
            g_g = jnp.tanh(
                gxg_ref[t] + jnp.dot(h, whh_g, preferred_element_type=jnp.float32))
            o_g = jax.nn.sigmoid(
                gxo_ref[t] + jnp.dot(h, whh_o, preferred_element_type=jnp.float32))
            c = f_g * c + i_g * g_g
            h_lstm = o_g * jnp.tanh(c)

            # --------- sparse attention over the stored history ---------
            R = n_hist                                        # static
            hist = hist_ref[pl.ds(0, R)]                      # (R, B, H)
            sc_old = hsc_ref[pl.ds(0, R)]                     # (R, B, 1) cached tanh(h_old)@w_old
            # score contribution of the current hidden state: tanh(h) @ w_h
            s1 = jnp.sum(jnp.tanh(h_lstm) * wh, axis=1, keepdims=True)   # (B, 1)

            if R <= top_k:
                # Weights are the raw (unnormalized) logits:
                #   logit[r, b] = sc_old[r, b] + s1[b]
                attn_c = (jnp.sum(sc_old * hist, axis=0)
                          + s1 * jnp.sum(hist, axis=0))                   # (B, H)
            else:
                # Subtract the top_k-th largest logit (+eps), relu, normalize.
                # The per-batch constant s1 cancels out of (logit - kth),
                # so this branch works directly on the cached sc_old.
                r_iota = lax.broadcasted_iota(jnp.int32, (R, B, 1), 0)
                work = sc_old
                kth = sc_old
                for _ in range(top_k):                        # static, small
                    kth = jnp.max(work, axis=0, keepdims=True)            # (1, B, 1)
                    hit = jnp.where(work >= kth, r_iota, R)
                    first = jnp.min(hit, axis=0, keepdims=True)           # first argmax
                    work = jnp.where(r_iota == first, jnp.float32(_NEG_BIG), work)
                aw = jnp.maximum(sc_old - (kth + _EPS), 0.0)              # (R, B, 1)
                aw = aw / (jnp.sum(aw, axis=0, keepdims=True) + _EPS)
                attn_c = jnp.sum(aw * hist, axis=0)                       # (B, H)

            h = h_lstm + attn_c
            outh_ref[t] = h
            outa_ref[t] = attn_c

            # Append the updated hidden state (and its cached score) to history.
            if (t + 1) % attn_every_k == 0:
                hist_ref[n_hist] = h
                hsc_ref[n_hist] = jnp.sum(jnp.tanh(h) * wold, axis=1, keepdims=True)
                n_hist += 1

    return kernel


def _full_spec(shape):
    nd = len(shape)
    return pl.BlockSpec(shape, lambda i: (0,) * nd)


def self_lstm_sparse_attn_forward(x, w_ih, w_hh, b_ih, b_hh, w_t, w_fc, b_fc,
                                  *, top_k=5, attn_every_k=1,
                                  truncate_length=100):
    """Forward pass of self_LSTM_sparse_attn.  x: (B, T, D) f32 -> (B, T, C)."""
    del truncate_length          # detach-only (backward); no effect on forward values
    B, T, D = x.shape
    H = w_hh.shape[1]            # w_hh: (4H, H)
    C = w_fc.shape[0]            # w_fc: (C, 2H)

    # ---- hoisted input projection: one MXU-friendly matmul, transpose folded in.
    # gx[t, b, :] = x[b, t, :] @ w_ih.T + (b_ih + b_hh)          -> (T, B, 4H)
    gx = jnp.einsum('btd,gd->tbg', x, w_ih) + (b_ih + b_hh)
    gxi, gxf, gxg, gxo = (gx[:, :, g * H:(g + 1) * H] for g in range(4))

    # per-gate recurrent weights, pre-transposed for h @ W_g^T
    whh = jnp.transpose(w_hh.reshape(4, H, H), (0, 2, 1))        # (4, H, H)

    # attention projection w_t: (2H, 1) split into halves acting on h_t / h_old
    wh = jnp.reshape(w_t[:H, 0], (1, H))
    wold = jnp.reshape(w_t[H:, 0], (1, H))

    hist_cap = 1 + T // attn_every_k                             # history slots needed

    h_seq, a_seq = pl.pallas_call(
        _make_kernel(top_k=top_k, attn_every_k=attn_every_k, seq_len=T),
        out_shape=(jax.ShapeDtypeStruct((T, B, H), jnp.float32),   # outputs  (h_t)
                   jax.ShapeDtypeStruct((T, B, H), jnp.float32)),  # attn_all (attn_c)
        grid_spec=pltpu.PrefetchScalarGridSpec(
            num_scalar_prefetch=0,
            grid=(1,),                                  # whole recurrence in one step
            in_specs=[_full_spec((T, B, H)), _full_spec((T, B, H)),
                      _full_spec((T, B, H)), _full_spec((T, B, H)),
                      _full_spec((4, H, H)),
                      _full_spec((1, H)), _full_spec((1, H))],
            out_specs=[_full_spec((T, B, H)), _full_spec((T, B, H))],
            scratch_shapes=[pltpu.VMEM((hist_cap, B, H), jnp.float32),   # h_old history
                            pltpu.VMEM((hist_cap, B, 1), jnp.float32)],  # cached scores
        ),
        compiler_params=pltpu.CompilerParams(
            dimension_semantics=("arbitrary",)),        # serial recurrence
    )(gxi, gxf, gxg, gxo, whh, wh, wold)

    # ---- hoisted final Linear over [outputs ; attn_all]; (T,B)->(B,T) transpose
    # folded into the einsums.
    out = (jnp.einsum('tbh,ch->btc', h_seq, w_fc[:, :H])
           + jnp.einsum('tbh,ch->btc', a_seq, w_fc[:, H:])
           + b_fc)
    # TODO(synk): attn_w_viz (per-step mean attention for the last print_attention_step
    # steps) is a ragged Python-list visualization output and is not returned here.
    return out


def _reference_forward(x, w_ih, w_hh, b_ih, b_hh, w_t, w_fc, b_fc,
                       *, top_k=5, attn_every_k=1):
    """Pure-JAX re-implementation mirroring the PyTorch module step by step."""
    B, T, D = x.shape
    H = w_hh.shape[1]
    eps = 1e-7
    h = jnp.zeros((B, H), jnp.float32)
    c = jnp.zeros((B, H), jnp.float32)
    h_old = [jnp.zeros((B, H), jnp.float32)]
    outs, attns = [], []
    for i in range(T):
        gates = x[:, i, :] @ w_ih.T + b_ih + h @ w_hh.T + b_hh
        ig = jax.nn.sigmoid(gates[:, 0 * H:1 * H])
        fg = jax.nn.sigmoid(gates[:, 1 * H:2 * H])
        gg = jnp.tanh(gates[:, 2 * H:3 * H])
        og = jax.nn.sigmoid(gates[:, 3 * H:4 * H])
        c = fg * c + ig * gg
        h = og * jnp.tanh(c)

        hist = jnp.stack(h_old, axis=1)                        # (B, R, H)
        R = hist.shape[1]
        h_rep = jnp.broadcast_to(h[:, None, :], (B, R, H))
        mlp = jnp.tanh(jnp.concatenate([h_rep, hist], axis=2))  # (B, R, 2H)
        attn_w = (mlp.reshape(B * R, 2 * H) @ w_t).reshape(B, R)
        if R > top_k:
            delta = lax.top_k(attn_w, top_k)[0][:, -1:] + eps
            attn_w = jnp.maximum(attn_w - delta, 0.0)
            attn_w = attn_w / (jnp.sum(attn_w, axis=1, keepdims=True) + eps)
        attn_c = jnp.sum(attn_w[:, :, None] * hist, axis=1)     # (B, H)
        h = h + attn_c
        if (i + 1) % attn_every_k == 0:
            h_old.append(h)
        outs.append(h)
        attns.append(attn_c)
    feats = jnp.concatenate([jnp.stack(outs, 1), jnp.stack(attns, 1)], axis=2)
    return feats @ w_fc.T + b_fc                                 # (B, T, C)


if __name__ == "__main__":
    # Small, TPU-friendly shapes consistent with the module.
    B, T, D, H, C = 8, 8, 16, 32, 4
    top_k, attn_every_k = 3, 1            # T > top_k so both attention branches run

    key = jax.random.PRNGKey(0)
    ks = jax.random.split(key, 8)
    bound = 1.0 / (H ** 0.5)
    w_ih = jax.random.uniform(ks[0], (4 * H, D), jnp.float32, -bound, bound)
    w_hh = jax.random.uniform(ks[1], (4 * H, H), jnp.float32, -bound, bound)
    b_ih = jax.random.uniform(ks[2], (4 * H,), jnp.float32, -bound, bound)
    b_hh = jax.random.uniform(ks[3], (4 * H,), jnp.float32, -bound, bound)
    w_fc = jax.random.uniform(ks[4], (C, 2 * H), jnp.float32, -bound, bound)
    b_fc = jax.random.uniform(ks[5], (C,), jnp.float32, -bound, bound)
    w_t = 0.01 * jax.random.normal(ks[6], (2 * H, 1), jnp.float32)   # module: normal(0, 0.01)
    x = jax.random.normal(ks[7], (B, T, D), jnp.float32)

    out = self_lstm_sparse_attn_forward(x, w_ih, w_hh, b_ih, b_hh, w_t, w_fc, b_fc,
                                        top_k=top_k, attn_every_k=attn_every_k)
    out = jax.block_until_ready(out)

    ref = _reference_forward(x, w_ih, w_hh, b_ih, b_hh, w_t, w_fc, b_fc,
                             top_k=top_k, attn_every_k=attn_every_k)
    ref = jax.block_until_ready(ref)

    assert out.shape == (B, T, C)
    err = float(jnp.max(jnp.abs(out - ref)))
    assert err < 1e-4, f"mismatch vs reference: max abs err = {err}"
    print("KERNEL_OK")
</pallas_src>

<mosaic_0001>
module attributes {stable_mosaic.version = 11 : i64} {
  func.func @kernel(%arg0: i32, %arg1: memref<8x8x32xf32, #tpu.memory_space<vmem>>, %arg2: memref<8x8x32xf32, #tpu.memory_space<vmem>>, %arg3: memref<8x8x32xf32, #tpu.memory_space<vmem>>, %arg4: memref<8x8x32xf32, #tpu.memory_space<vmem>>, %arg5: memref<4x32x32xf32, #tpu.memory_space<vmem>>, %arg6: memref<1x32xf32, #tpu.memory_space<vmem>>, %arg7: memref<1x32xf32, #tpu.memory_space<vmem>>, %arg8: memref<8x8x32xf32, #tpu.memory_space<vmem>>, %arg9: memref<8x8x32xf32, #tpu.memory_space<vmem>>, %arg10: memref<9x8x32xf32, #tpu.memory_space<vmem>>, %arg11: memref<9x8x1xf32, #tpu.memory_space<vmem>>) attributes {dimension_semantics = [#tpu.dimension_semantics<arbitrary>], iteration_bounds = array<i64: 1>, scalar_prefetch = 0 : i64, scratch_operands = 2 : i64, tpu.core_type = #tpu.core_type<tc>, window_params = [{pipeline_mode = #tpu.pipeline_mode<synchronous>, transform_indices = @transform_0, window_bounds = array<i64: 8, 8, 32>}, {pipeline_mode = #tpu.pipeline_mode<synchronous>, transform_indices = @transform_1, window_bounds = array<i64: 8, 8, 32>}, {pipeline_mode = #tpu.pipeline_mode<synchronous>, transform_indices = @transform_2, window_bounds = array<i64: 8, 8, 32>}, {pipeline_mode = #tpu.pipeline_mode<synchronous>, transform_indices = @transform_3, window_bounds = array<i64: 8, 8, 32>}, {pipeline_mode = #tpu.pipeline_mode<synchronous>, transform_indices = @transform_4, window_bounds = array<i64: 4, 32, 32>}, {pipeline_mode = #tpu.pipeline_mode<synchronous>, transform_indices = @transform_5, window_bounds = array<i64: 1, 32>}, {pipeline_mode = #tpu.pipeline_mode<synchronous>, transform_indices = @transform_6, window_bounds = array<i64: 1, 32>}, {pipeline_mode = #tpu.pipeline_mode<synchronous>, transform_indices = @transform_7, window_bounds = array<i64: 8, 8, 32>}, {pipeline_mode = #tpu.pipeline_mode<synchronous>, transform_indices = @transform_8, window_bounds = array<i64: 8, 8, 32>}]} {
    %c0 = arith.constant 0 : index
    %c0_0 = arith.constant 0 : index
    %c0_1 = arith.constant 0 : index
    %0 = vector.load %arg5[%c0, %c0_0, %c0_1] : memref<4x32x32xf32, #tpu.memory_space<vmem>>, vector<1x32x32xf32>
    %1 = vector.shape_cast %0 : vector<1x32x32xf32> to vector<32x32xf32>
    %c1 = arith.constant 1 : index
    %c0_2 = arith.constant 0 : index
    %c0_3 = arith.constant 0 : index
    %2 = vector.load %arg5[%c1, %c0_2, %c0_3] : memref<4x32x32xf32, #tpu.memory_space<vmem>>, vector<1x32x32xf32>
    %3 = vector.shape_cast %2 : vector<1x32x32xf32> to vector<32x32xf32>
    %c2 = arith.constant 2 : index
    %c0_4 = arith.constant 0 : index
    %c0_5 = arith.constant 0 : index
    %4 = vector.load %arg5[%c2, %c0_4, %c0_5] : memref<4x32x32xf32, #tpu.memory_space<vmem>>, vector<1x32x32xf32>
    %5 = vector.shape_cast %4 : vector<1x32x32xf32> to vector<32x32xf32>
    %c3 = arith.constant 3 : index
    %c0_6 = arith.constant 0 : index
    %c0_7 = arith.constant 0 : index
    %6 = vector.load %arg5[%c3, %c0_6, %c0_7] : memref<4x32x32xf32, #tpu.memory_space<vmem>>, vector<1x32x32xf32>
    %7 = vector.shape_cast %6 : vector<1x32x32xf32> to vector<32x32xf32>
    %c0_8 = arith.constant 0 : index
    %c0_9 = arith.constant 0 : index
    %8 = vector.load %arg6[%c0_8, %c0_9] : memref<1x32xf32, #tpu.memory_space<vmem>>, vector<1x32xf32>
    %c0_10 = arith.constant 0 : index
    %c0_11 = arith.constant 0 : index
    %9 = vector.load %arg7[%c0_10, %c0_11] : memref<1x32xf32, #tpu.memory_space<vmem>>, vector<1x32xf32>
    %cst = arith.constant 0.000000e+00 : f32
    %10 = vector.broadcast %cst : f32 to vector<8x32xf32>
    %c0_12 = arith.constant 0 : index
    %c0_13 = arith.constant 0 : index
    %c0_14 = arith.constant 0 : index
    %11 = vector.load %arg10[%c0_12, %c0_13, %c0_14] : memref<9x8x32xf32, #tpu.memory_space<vmem>>, vector<1x8x32xf32>
    %12 = vector.shape_cast %11 : vector<1x8x32xf32> to vector<8x32xf32>
    %13 = vector.shape_cast %10 : vector<8x32xf32> to vector<1x8x32xf32>
    tpu.vector_store %arg10[%c0_12, %c0_13, %c0_14], %13 {strides = array<i32>} : memref<9x8x32xf32, #tpu.memory_space<vmem>>, vector<1x8x32xf32>,
    %cst_15 = arith.constant 0.000000e+00 : f32
    %14 = vector.broadcast %cst_15 : f32 to vector<8x1xf32>
    %c0_16 = arith.constant 0 : index
    %c0_17 = arith.constant 0 : index
    %c0_18 = arith.constant 0 : index
    %15 = vector.load %arg11[%c0_16, %c0_17, %c0_18] : memref<9x8x1xf32, #tpu.memory_space<vmem>>, vector<1x8x1xf32>
    %16 = vector.shape_cast %15 : vector<1x8x1xf32> to vector<8x1xf32>
    %17 = vector.shape_cast %14 : vector<8x1xf32> to vector<1x8x1xf32>
    tpu.vector_store %arg11[%c0_16, %c0_17, %c0_18], %17 {strides = array<i32>} : memref<9x8x1xf32, #tpu.memory_space<vmem>>, vector<1x8x1xf32>,
    %cst_19 = arith.constant 0.000000e+00 : f32
    %18 = vector.broadcast %cst_19 : f32 to vector<8x32xf32>
    %cst_20 = arith.constant 0.000000e+00 : f32
    %19 = vector.broadcast %cst_20 : f32 to vector<8x32xf32>
    %c0_21 = arith.constant 0 : index
    %c0_22 = arith.constant 0 : index
    %c0_23 = arith.constant 0 : index
    %20 = vector.load %arg1[%c0_21, %c0_22, %c0_23] : memref<8x8x32xf32, #tpu.memory_space<vmem>>, vector<1x8x32xf32>
    %21 = vector.shape_cast %20 : vector<1x8x32xf32> to vector<8x32xf32>
    %cst_24 = arith.constant dense<0.000000e+00> : vector<8x32xf32>
    %22 = tpu.matmul %18, %1, %cst_24 {dimension_numbers = #tpu.dot_dimension_numbers<[1], [0], [0], [1], [0, 0, 1, 1], [], []>, precision = #tpu.contract_precision<fp32>} : vector<8x32xf32>, vector<32x32xf32>, vector<8x32xf32> -> vector<8x32xf32>
    %23 = arith.addf %21, %22 : vector<8x32xf32>
    %24 = arith.negf %23 : vector<8x32xf32>
    %25 = math.exp %24 : vector<8x32xf32>
    %cst_25 = arith.constant 1.000000e+00 : f32
    %26 = vector.broadcast %cst_25 : f32 to vector<8x32xf32>
    %27 = arith.addf %26, %25 : vector<8x32xf32>
    %28 = arith.divf %26, %27 : vector<8x32xf32>
    %c0_26 = arith.constant 0 : index
    %c0_27 = arith.constant 0 : index
    %c0_28 = arith.constant 0 : index
    %29 = vector.load %arg2[%c0_26, %c0_27, %c0_28] : memref<8x8x32xf32, #tpu.memory_space<vmem>>, vector<1x8x32xf32>
    %30 = vector.shape_cast %29 : vector<1x8x32xf32> to vector<8x32xf32>
    %cst_29 = arith.constant dense<0.000000e+00> : vector<8x32xf32>
    %31 = tpu.matmul %18, %3, %cst_29 {dimension_numbers = #tpu.dot_dimension_numbers<[1], [0], [0], [1], [0, 0, 1, 1], [], []>, precision = #tpu.contract_precision<fp32>} : vector<8x32xf32>, vector<32x32xf32>, vector<8x32xf32> -> vector<8x32xf32>
    %32 = arith.addf %30, %31 : vector<8x32xf32>
    %33 = arith.negf %32 : vector<8x32xf32>
    %34 = math.exp %33 : vector<8x32xf32>
    %cst_30 = arith.constant 1.000000e+00 : f32
    %35 = vector.broadcast %cst_30 : f32 to vector<8x32xf32>
    %36 = arith.addf %35, %34 : vector<8x32xf32>
    %37 = arith.divf %35, %36 : vector<8x32xf32>
    %c0_31 = arith.constant 0 : index
    %c0_32 = arith.constant 0 : index
    %c0_33 = arith.constant 0 : index
    %38 = vector.load %arg3[%c0_31, %c0_32, %c0_33] : memref<8x8x32xf32, #tpu.memory_space<vmem>>, vector<1x8x32xf32>
    %39 = vector.shape_cast %38 : vector<1x8x32xf32> to vector<8x32xf32>
    %cst_34 = arith.constant dense<0.000000e+00> : vector<8x32xf32>
    %40 = tpu.matmul %18, %5, %cst_34 {dimension_numbers = #tpu.dot_dimension_numbers<[1], [0], [0], [1], [0, 0, 1, 1], [], []>, precision = #tpu.contract_precision<fp32>} : vector<8x32xf32>, vector<32x32xf32>, vector<8x32xf32> -> vector<8x32xf32>
    %41 = arith.addf %39, %40 : vector<8x32xf32>
    %42 = math.tanh %41 : vector<8x32xf32>
    %c0_35 = arith.constant 0 : index
    %c0_36 = arith.constant 0 : index
    %c0_37 = arith.constant 0 : index
    %43 = vector.load %arg4[%c0_35, %c0_36, %c0_37] : memref<8x8x32xf32, #tpu.memory_space<vmem>>, vector<1x8x32xf32>
    %44 = vector.shape_cast %43 : vector<1x8x32xf32> to vector<8x32xf32>
    %cst_38 = arith.constant dense<0.000000e+00> : vector<8x32xf32>
    %45 = tpu.matmul %18, %7, %cst_38 {dimension_numbers = #tpu.dot_dimension_numbers<[1], [0], [0], [1], [0, 0, 1, 1], [], []>, precision = #tpu.contract_precision<fp32>} : vector<8x32xf32>, vector<32x32xf32>, vector<8x32xf32> -> vector<8x32xf32>
    %46 = arith.addf %44, %45 : vector<8x32xf32>
    %47 = arith.negf %46 : vector<8x32xf32>
    %48 = math.exp %47 : vector<8x32xf32>
    %cst_39 = arith.constant 1.000000e+00 : f32
    %49 = vector.broadcast %cst_39 : f32 to vector<8x32xf32>
    %50 = arith.addf %49, %48 : vector<8x32xf32>
    %51 = arith.divf %49, %50 : vector<8x32xf32>
    %52 = arith.mulf %37, %19 : vector<8x32xf32>
    %53 = arith.mulf %28, %42 : vector<8x32xf32>
    %54 = arith.addf %52, %53 : vector<8x32xf32>
    %55 = math.tanh %54 : vector<8x32xf32>
    %56 = arith.mulf %51, %55 : vector<8x32xf32>
    %c0_40 = arith.constant 0 : index
    %c0_41 = arith.constant 0 : index
    %c0_42 = arith.constant 0 : index
    %57 = vector.load %arg10[%c0_40, %c0_41, %c0_42] : memref<9x8x32xf32, #tpu.memory_space<vmem>>, vector<1x8x32xf32>
    %c0_43 = arith.constant 0 : index
    %c0_44 = arith.constant 0 : index
    %c0_45 = arith.constant 0 : index
    %58 = vector.load %arg11[%c0_43, %c0_44, %c0_45] : memref<9x8x1xf32, #tpu.memory_space<vmem>>, vector<1x8x1xf32>
    %59 = math.tanh %56 : vector<8x32xf32>
    %60 = vector.broadcast %8 : vector<1x32xf32> to vector<8x32xf32>
    %61 = arith.mulf %59, %60 : vector<8x32xf32>
    %cst_46 = arith.constant dense<0.000000e+00> : vector<8xf32>
    %62 = vector.multi_reduction <add>, %61, %cst_46 [1] : vector<8x32xf32> to vector<8xf32>
    %63 = vector.shape_cast %62 : vector<8xf32> to vector<8x1xf32>
    %64 = vector.broadcast %58 : vector<1x8x1xf32> to vector<1x8x32xf32>
    %65 = arith.mulf %64, %57 : vector<1x8x32xf32>
    %cst_47 = arith.constant dense<0.000000e+00> : vector<8x32xf32>
    %66 = vector.multi_reduction <add>, %65, %cst_47 [0] : vector<1x8x32xf32> to vector<8x32xf32>
    %cst_48 = arith.constant dense<0.000000e+00> : vector<8x32xf32>
    %67 = vector.multi_reduction <add>, %57, %cst_48 [0] : vector<1x8x32xf32> to vector<8x32xf32>
    %68 = vector.broadcast %63 : vector<8x1xf32> to vector<8x32xf32>
    %69 = arith.mulf %68, %67 : vector<8x32xf32>
    %70 = arith.addf %66, %69 : vector<8x32xf32>
    %71 = arith.addf %56, %70 : vector<8x32xf32>
    %c0_49 = arith.constant 0 : index
    %c0_50 = arith.constant 0 : index
    %c0_51 = arith.constant 0 : index
    %72 = vector.load %arg8[%c0_49, %c0_50, %c0_51] : memref<8x8x32xf32, #tpu.memory_space<vmem>>, vector<1x8x32xf32>
    %73 = vector.shape_cast %72 : vector<1x8x32xf32> to vector<8x32xf32>
    %74 = vector.shape_cast %71 : vector<8x32xf32> to vector<1x8x32xf32>
    tpu.vector_store %arg8[%c0_49, %c0_50, %c0_51], %74 {strides = array<i32>} : memref<8x8x32xf32, #tpu.memory_space<vmem>>, vector<1x8x32xf32>,
    %c0_52 = arith.constant 0 : index
    %c0_53 = arith.constant 0 : index
    %c0_54 = arith.constant 0 : index
    %75 = vector.load %arg9[%c0_52, %c0_53, %c0_54] : memref<8x8x32xf32, #tpu.memory_space<vmem>>, vector<1x8x32xf32>
    %76 = vector.shape_cast %75 : vector<1x8x32xf32> to vector<8x32xf32>
    %77 = vector.shape_cast %70 : vector<8x32xf32> to vector<1x8x32xf32>
    tpu.vector_store %arg9[%c0_52, %c0_53, %c0_54], %77 {strides = array<i32>} : memref<8x8x32xf32, #tpu.memory_space<vmem>>, vector<1x8x32xf32>,
    %c1_55 = arith.constant 1 : index
    %c0_56 = arith.constant 0 : index
    %c0_57 = arith.constant 0 : index
    %78 = vector.load %arg10[%c1_55, %c0_56, %c0_57] : memref<9x8x32xf32, #tpu.memory_space<vmem>>, vector<1x8x32xf32>
    %79 = vector.shape_cast %78 : vector<1x8x32xf32> to vector<8x32xf32>
    %80 = vector.shape_cast %71 : vector<8x32xf32> to vector<1x8x32xf32>
    tpu.vector_store %arg10[%c1_55, %c0_56, %c0_57], %80 {strides = array<i32>} : memref<9x8x32xf32, #tpu.memory_space<vmem>>, vector<1x8x32xf32>,
    %81 = math.tanh %71 : vector<8x32xf32>
    %82 = vector.broadcast %9 : vector<1x32xf32> to vector<8x32xf32>
    %83 = arith.mulf %81, %82 : vector<8x32xf32>
    %cst_58 = arith.constant dense<0.000000e+00> : vector<8xf32>
    %84 = vector.multi_reduction <add>, %83, %cst_58 [1] : vector<8x32xf32> to vector<8xf32>
    %85 = vector.shape_cast %84 : vector<8xf32> to vector<8x1xf32>
    %c1_59 = arith.constant 1 : index
    %c0_60 = arith.constant 0 : index
    %c0_61 = arith.constant 0 : index
    %86 = vector.load %arg11[%c1_59, %c0_60, %c0_61] : memref<9x8x1xf32, #tpu.memory_space<vmem>>, vector<1x8x1xf32>
    %87 = vector.shape_cast %86 : vector<1x8x1xf32> to vector<8x1xf32>
    %88 = vector.shape_cast %85 : vector<8x1xf32> to vector<1x8x1xf32>
    tpu.vector_store %arg11[%c1_59, %c0_60, %c0_61], %88 {strides = array<i32>} : memref<9x8x1xf32, #tpu.memory_space<vmem>>, vector<1x8x1xf32>,
    %c1_62 = arith.constant 1 : index
    %c0_63 = arith.constant 0 : index
    %c0_64 = arith.constant 0 : index
    %89 = vector.load %arg1[%c1_62, %c0_63, %c0_64] : memref<8x8x32xf32, #tpu.memory_space<vmem>>, vector<1x8x32xf32>
    %90 = vector.shape_cast %89 : vector<1x8x32xf32> to vector<8x32xf32>
    %cst_65 = arith.constant dense<0.000000e+00> : vector<8x32xf32>
    %91 = tpu.matmul %71, %1, %cst_65 {dimension_numbers = #tpu.dot_dimension_numbers<[1], [0], [0], [1], [0, 0, 1, 1], [], []>, precision = #tpu.contract_precision<fp32>} : vector<8x32xf32>, vector<32x32xf32>, vector<8x32xf32> -> vector<8x32xf32>
    %92 = arith.addf %90, %91 : vector<8x32xf32>
    %93 = arith.negf %92 : vector<8x32xf32>
    %94 = math.exp %93 : vector<8x32xf32>
    %cst_66 = arith.constant 1.000000e+00 : f32
    %95 = vector.broadcast %cst_66 : f32 to vector<8x32xf32>
    %96 = arith.addf %95, %94 : vector<8x32xf32>
    %97 = arith.divf %95, %96 : vector<8x32xf32>
    %c1_67 = arith.constant 1 : index
    %c0_68 = arith.constant 0 : index
    %c0_69 = arith.constant 0 : index
    %98 = vector.load %arg2[%c1_67, %c0_68, %c0_69] : memref<8x8x32xf32, #tpu.memory_space<vmem>>, vector<1x8x32xf32>
    %99 = vector.shape_cast %98 : vector<1x8x32xf32> to vector<8x32xf32>
    %cst_70 = arith.constant dense<0.000000e+00> : vector<8x32xf32>
    %100 = tpu.matmul %71, %3, %cst_70 {dimension_numbers = #tpu.dot_dimension_numbers<[1], [0], [0], [1], [0, 0, 1, 1], [], []>, precision = #tpu.contract_precision<fp32>} : vector<8x32xf32>, vector<32x32xf32>, vector<8x32xf32> -> vector<8x32xf32>
    %101 = arith.addf %99, %100 : vector<8x32xf32>
    %102 = arith.negf %101 : vector<8x32xf32>
    %103 = math.exp %102 : vector<8x32xf32>
    %cst_71 = arith.constant 1.000000e+00 : f32
    %104 = vector.broadcast %cst_71 : f32 to vector<8x32xf32>
    %105 = arith.addf %104, %103 : vector<8x32xf32>
    %106 = arith.divf %104, %105 : vector<8x32xf32>
    %c1_72 = arith.constant 1 : index
    %c0_73 = arith.constant 0 : index
    %c0_74 = arith.constant 0 : index
    %107 = vector.load %arg3[%c1_72, %c0_73, %c0_74] : memref<8x8x32xf32, #tpu.memory_space<vmem>>, vector<1x8x32xf32>
    %108 = vector.shape_cast %107 : vector<1x8x32xf32> to vector<8x32xf32>
    %cst_75 = arith.constant dense<0.000000e+00> : vector<8x32xf32>
    %109 = tpu.matmul %71, %5, %cst_75 {dimension_numbers = #tpu.dot_dimension_numbers<[1], [0], [0], [1], [0, 0, 1, 1], [], []>, precision = #tpu.contract_precision<fp32>} : vector<8x32xf32>, vector<32x32xf32>, vector<8x32xf32> -> vector<8x32xf32>
    %110 = arith.addf %108, %109 : vector<8x32xf32>
    %111 = math.tanh %110 : vector<8x32xf32>
    %c1_76 = arith.constant 1 : index
    %c0_77 = arith.constant 0 : index
    %c0_78 = arith.constant 0 : index
    %112 = vector.load %arg4[%c1_76, %c0_77, %c0_78] : memref<8x8x32xf32, #tpu.memory_space<vmem>>, vector<1x8x32xf32>
    %113 = vector.shape_cast %112 : vector<1x8x32xf32> to vector<8x32xf32>
    %cst_79 = arith.constant dense<0.000000e+00> : vector<8x32xf32>
    %114 = tpu.matmul %71, %7, %cst_79 {dimension_numbers = #tpu.dot_dimension_numbers<[1], [0], [0], [1], [0, 0, 1, 1], [], []>, precision = #tpu.contract_precision<fp32>} : vector<8x32xf32>, vector<32x32xf32>, vector<8x32xf32> -> vector<8x32xf32>
    %115 = arith.addf %113, %114 : vector<8x32xf32>
    %116 = arith.negf %115 : vector<8x32xf32>
    %117 = math.exp %116 : vector<8x32xf32>
    %cst_80 = arith.constant 1.000000e+00 : f32
    %118 = vector.broadcast %cst_80 : f32 to vector<8x32xf32>
    %119 = arith.addf %118, %117 : vector<8x32xf32>
    %120 = arith.divf %118, %119 : vector<8x32xf32>
    %121 = arith.mulf %106, %54 : vector<8x32xf32>
    %122 = arith.mulf %97, %111 : vector<8x32xf32>
    %123 = arith.addf %121, %122 : vector<8x32xf32>
    %124 = math.tanh %123 : vector<8x32xf32>
    %125 = arith.mulf %120, %124 : vector<8x32xf32>
    %c0_81 = arith.constant 0 : index
    %c0_82 = arith.constant 0 : index
    %c0_83 = arith.constant 0 : index
    %126 = vector.load %arg10[%c0_81, %c0_82, %c0_83] : memref<9x8x32xf32, #tpu.memory_space<vmem>>, vector<2x8x32xf32>
    %c0_84 = arith.constant 0 : index
    %c0_85 = arith.constant 0 : index
    %c0_86 = arith.constant 0 : index
    %127 = vector.load %arg11[%c0_84, %c0_85, %c0_86] : memref<9x8x1xf32, #tpu.memory_space<vmem>>, vector<2x8x1xf32>
    %128 = math.tanh %125 : vector<8x32xf32>
    %129 = vector.broadcast %8 : vector<1x32xf32> to vector<8x32xf32>
    %130 = arith.mulf %128, %129 : vector<8x32xf32>
    %cst_87 = arith.constant dense<0.000000e+00> : vector<8xf32>
    %131 = vector.multi_reduction <add>, %130, %cst_87 [1] : vector<8x32xf32> to vector<8xf32>
    %132 = vector.shape_cast %131 : vector<8xf32> to vector<8x1xf32>
    %133 = vector.broadcast %127 : vector<2x8x1xf32> to vector<2x8x32xf32>
    %134 = arith.mulf %133, %126 : vector<2x8x32xf32>
    %cst_88 = arith.constant dense<0.000000e+00> : vector<8x32xf32>
    %135 = vector.multi_reduction <add>, %134, %cst_88 [0] : vector<2x8x32xf32> to vector<8x32xf32>
    %cst_89 = arith.constant dense<0.000000e+00> : vector<8x32xf32>
    %136 = vector.multi_reduction <add>, %126, %cst_89 [0] : vector<2x8x32xf32> to vector<8x32xf32>
    %137 = vector.broadcast %132 : vector<8x1xf32> to vector<8x32xf32>
    %138 = arith.mulf %137, %136 : vector<8x32xf32>
    %139 = arith.addf %135, %138 : vector<8x32xf32>
    %140 = arith.addf %125, %139 : vector<8x32xf32>
    %c1_90 = arith.constant 1 : index
    %c0_91 = arith.constant 0 : index
    %c0_92 = arith.constant 0 : index
    %141 = vector.load %arg8[%c1_90, %c0_91, %c0_92] : memref<8x8x32xf32, #tpu.memory_space<vmem>>, vector<1x8x32xf32>
    %142 = vector.shape_cast %141 : vector<1x8x32xf32> to vector<8x32xf32>
    %143 = vector.shape_cast %140 : vector<8x32xf32> to vector<1x8x32xf32>
    tpu.vector_store %arg8[%c1_90, %c0_91, %c0_92], %143 {strides = array<i32>} : memref<8x8x32xf32, #tpu.memory_space<vmem>>, vector<1x8x32xf32>,
    %c1_93 = arith.constant 1 : index
    %c0_94 = arith.constant 0 : index
    %c0_95 = arith.constant 0 : index
    %144 = vector.load %arg9[%c1_93, %c0_94, %c0_95] : memref<8x8x32xf32, #tpu.memory_space<vmem>>, vector<1x8x32xf32>
    %145 = vector.shape_cast %144 : vector<1x8x32xf32> to vector<8x32xf32>
    %146 = vector.shape_cast %139 : vector<8x32xf32> to vector<1x8x32xf32>
    tpu.vector_store %arg9[%c1_93, %c0_94, %c0_95], %146 {strides = array<i32>} : memref<8x8x32xf32, #tpu.memory_space<vmem>>, vector<1x8x32xf32>,
    %c2_96 = arith.constant 2 : index
    %c0_97 = arith.constant 0 : index
    %c0_98 = arith.constant 0 : index
    %147 = vector.load %arg10[%c2_96, %c0_97, %c0_98] : memref<9x8x32xf32, #tpu.memory_space<vmem>>, vector<1x8x32xf32>
    %148 = vector.shape_cast %147 : vector<1x8x32xf32> to vector<8x32xf32>
    %149 = vector.shape_cast %140 : vector<8x32xf32> to vector<1x8x32xf32>
    tpu.vector_store %arg10[%c2_96, %c0_97, %c0_98], %149 {strides = array<i32>} : memref<9x8x32xf32, #tpu.memory_space<vmem>>, vector<1x8x32xf32>,
    %150 = math.tanh %140 : vector<8x32xf32>
    %151 = vector.broadcast %9 : vector<1x32xf32> to vector<8x32xf32>
    %152 = arith.mulf %150, %151 : vector<8x32xf32>
    %cst_99 = arith.constant dense<0.000000e+00> : vector<8xf32>
    %153 = vector.multi_reduction <add>, %152, %cst_99 [1] : vector<8x32xf32> to vector<8xf32>
    %154 = vector.shape_cast %153 : vector<8xf32> to vector<8x1xf32>
    %c2_100 = arith.constant 2 : index
    %c0_101 = arith.constant 0 : index
    %c0_102 = arith.constant 0 : index
    %155 = vector.load %arg11[%c2_100, %c0_101, %c0_102] : memref<9x8x1xf32, #tpu.memory_space<vmem>>, vector<1x8x1xf32>
    %156 = vector.shape_cast %155 : vector<1x8x1xf32> to vector<8x1xf32>
    %157 = vector.shape_cast %154 : vector<8x1xf32> to vector<1x8x1xf32>
    tpu.vector_store %arg11[%c2_100, %c0_101, %c0_102], %157 {strides = array<i32>} : memref<9x8x1xf32, #tpu.memory_space<vmem>>, vector<1x8x1xf32>,
    %c2_103 = arith.constant 2 : index
    %c0_104 = arith.constant 0 : index
    %c0_105 = arith.constant 0 : index
    %158 = vector.load %arg1[%c2_103, %c0_104, %c0_105] : memref<8x8x32xf32, #tpu.memory_space<vmem>>, vector<1x8x32xf32>
    %159 = vector.shape_cast %158 : vector<1x8x32xf32> to vector<8x32xf32>
    %cst_106 = arith.constant dense<0.000000e+00> : vector<8x32xf32>
    %160 = tpu.matmul %140, %1, %cst_106 {dimension_numbers = #tpu.dot_dimension_numbers<[1], [0], [0], [1], [0, 0, 1, 1], [], []>, precision = #tpu.contract_precision<fp32>} : vector<8x32xf32>, vector<32x32xf32>, vector<8x32xf32> -> vector<8x32xf32>
    %161 = arith.addf %159, %160 : vector<8x32xf32>
    %162 = arith.negf %161 : vector<8x32xf32>
    %163 = math.exp %162 : vector<8x32xf32>
    %cst_107 = arith.constant 1.000000e+00 : f32
    %164 = vector.broadcast %cst_107 : f32 to vector<8x32xf32>
    %165 = arith.addf %164, %163 : vector<8x32xf32>
    %166 = arith.divf %164, %165 : vector<8x32xf32>
    %c2_108 = arith.constant 2 : index
    %c0_109 = arith.constant 0 : index
    %c0_110 = arith.constant 0 : index
    %167 = vector.load %arg2[%c2_108, %c0_109, %c0_110] : memref<8x8x32xf32, #tpu.memory_space<vmem>>, vector<1x8x32xf32>
    %168 = vector.shape_cast %167 : vector<1x8x32xf32> to vector<8x32xf32>
    %cst_111 = arith.constant dense<0.000000e+00> : vector<8x32xf32>
    %169 = tpu.matmul %140, %3, %cst_111 {dimension_numbers = #tpu.dot_dimension_numbers<[1], [0], [0], [1], [0, 0, 1, 1], [], []>, precision = #tpu.contract_precision<fp32>} : vector<8x32xf32>, vector<32x32xf32>, vector<8x32xf32> -> vector<8x32xf32>
    %170 = arith.addf %168, %169 : vector<8x32xf32>
    %171 = arith.negf %170 : vector<8x32xf32>
    %172 = math.exp %171 : vector<8x32xf32>
    %cst_112 = arith.constant 1.000000e+00 : f32
    %173 = vector.broadcast %cst_112 : f32 to vector<8x32xf32>
    %174 = arith.addf %173, %172 : vector<8x32xf32>
    %175 = arith.divf %173, %174 : vector<8x32xf32>
    %c2_113 = arith.constant 2 : index
    %c0_114 = arith.constant 0 : index
    %c0_115 = arith.constant 0 : index
    %176 = vector.load %arg3[%c2_113, %c0_114, %c0_115] : memref<8x8x32xf32, #tpu.memory_space<vmem>>, vector<1x8x32xf32>
    %177 = vector.shape_cast %176 : vector<1x8x32xf32> to vector<8x32xf32>
    %cst_116 = arith.constant dense<0.000000e+00> : vector<8x32xf32>
    %178 = tpu.matmul %140, %5, %cst_116 {dimension_numbers = #tpu.dot_dimension_numbers<[1], [0], [0], [1], [0, 0, 1, 1], [], []>, precision = #tpu.contract_precision<fp32>} : vector<8x32xf32>, vector<32x32xf32>, vector<8x32xf32> -> vector<8x32xf32>
    %179 = arith.addf %177, %178 : vector<8x32xf32>
    %180 = math.tanh %179 : vector<8x32xf32>
    %c2_117 = arith.constant 2 : index
    %c0_118 = arith.constant 0 : index
    %c0_119 = arith.constant 0 : index
    %181 = vector.load %arg4[%c2_117, %c0_118, %c0_119] : memref<8x8x32xf32, #tpu.memory_space<vmem>>, vector<1x8x32xf32>
    %182 = vector.shape_cast %181 : vector<1x8x32xf32> to vector<8x32xf32>
    %cst_120 = arith.constant dense<0.000000e+00> : vector<8x32xf32>
    %183 = tpu.matmul %140, %7, %cst_120 {dimension_numbers = #tpu.dot_dimension_numbers<[1], [0], [0], [1], [0, 0, 1, 1], [], []>, precision = #tpu.contract_precision<fp32>} : vector<8x32xf32>, vector<32x32xf32>, vector<8x32xf32> -> vector<8x32xf32>
    %184 = arith.addf %182, %183 : vector<8x32xf32>
    %185 = arith.negf %184 : vector<8x32xf32>
    %186 = math.exp %185 : vector<8x32xf32>
    %cst_121 = arith.constant 1.000000e+00 : f32
    %187 = vector.broadcast %cst_121 : f32 to vector<8x32xf32>
    %188 = arith.addf %187, %186 : vector<8x32xf32>
    %189 = arith.divf %187, %188 : vector<8x32xf32>
    %190 = arith.mulf %175, %123 : vector<8x32xf32>
    %191 = arith.mulf %166, %180 : vector<8x32xf32>
    %192 = arith.addf %190, %191 : vector<8x32xf32>
    %193 = math.tanh %192 : vector<8x32xf32>
    %194 = arith.mulf %189, %193 : vector<8x32xf32>
    %c0_122 = arith.constant 0 : index
    %c0_123 = arith.constant 0 : index
    %c0_124 = arith.constant 0 : index
    %195 = vector.load %arg10[%c0_122, %c0_123, %c0_124] : memref<9x8x32xf32, #tpu.memory_space<vmem>>, vector<3x8x32xf32>
    %c0_125 = arith.constant 0 : index
    %c0_126 = arith.constant 0 : index
    %c0_127 = arith.constant 0 : index
    %196 = vector.load %arg11[%c0_125, %c0_126, %c0_127] : memref<9x8x1xf32, #tpu.memory_space<vmem>>, vector<3x8x1xf32>
    %197 = math.tanh %194 : vector<8x32xf32>
    %198 = vector.broadcast %8 : vector<1x32xf32> to vector<8x32xf32>
    %199 = arith.mulf %197, %198 : vector<8x32xf32>
    %cst_128 = arith.constant dense<0.000000e+00> : vector<8xf32>
    %200 = vector.multi_reduction <add>, %199, %cst_128 [1] : vector<8x32xf32> to vector<8xf32>
    %201 = vector.shape_cast %200 : vector<8xf32> to vector<8x1xf32>
    %202 = vector.broadcast %196 : vector<3x8x1xf32> to vector<3x8x32xf32>
    %203 = arith.mulf %202, %195 : vector<3x8x32xf32>
    %cst_129 = arith.constant dense<0.000000e+00> : vector<8x32xf32>
    %204 = vector.multi_reduction <add>, %203, %cst_129 [0] : vector<3x8x32xf32> to vector<8x32xf32>
    %cst_130 = arith.constant dense<0.000000e+00> : vector<8x32xf32>
    %205 = vector.multi_reduction <add>, %195, %cst_130 [0] : vector<3x8x32xf32> to vector<8x32xf32>
    %206 = vector.broadcast %201 : vector<8x1xf32> to vector<8x32xf32>
    %207 = arith.mulf %206, %205 : vector<8x32xf32>
    %208 = arith.addf %204, %207 : vector<8x32xf32>
    %209 = arith.addf %194, %208 : vector<8x32xf32>
    %c2_131 = arith.constant 2 : index
    %c0_132 = arith.constant 0 : index
    %c0_133 = arith.constant 0 : index
    %210 = vector.load %arg8[%c2_131, %c0_132, %c0_133] : memref<8x8x32xf32, #tpu.memory_space<vmem>>, vector<1x8x32xf32>
    %211 = vector.shape_cast %210 : vector<1x8x32xf32> to vector<8x32xf32>
    %212 = vector.shape_cast %209 : vector<8x32xf32> to vector<1x8x32xf32>
    tpu.vector_store %arg8[%c2_131, %c0_132, %c0_133], %212 {strides = array<i32>} : memref<8x8x32xf32, #tpu.memory_space<vmem>>, vector<1x8x32xf32>,
    %c2_134 = arith.constant 2 : index
    %c0_135 = arith.constant 0 : index
    %c0_136 = arith.constant 0 : index
    %213 = vector.load %arg9[%c2_134, %c0_135, %c0_136] : memref<8x8x32xf32, #tpu.memory_space<vmem>>, vector<1x8x32xf32>
    %214 = vector.shape_cast %213 : vector<1x8x32xf32> to vector<8x32xf32>
    %215 = vector.shape_cast %208 : vector<8x32xf32> to vector<1x8x32xf32>
    tpu.vector_store %arg9[%c2_134, %c0_135, %c0_136], %215 {strides = array<i32>} : memref<8x8x32xf32, #tpu.memory_space<vmem>>, vector<1x8x32xf32>,
    %c3_137 = arith.constant 3 : index
    %c0_138 = arith.constant 0 : index
    %c0_139 = arith.constant 0 : index
    %216 = vector.load %arg10[%c3_137, %c0_138, %c0_139] : memref<9x8x32xf32, #tpu.memory_space<vmem>>, vector<1x8x32xf32>
    %217 = vector.shape_cast %216 : vector<1x8x32xf32> to vector<8x32xf32>
    %218 = vector.shape_cast %209 : vector<8x32xf32> to vector<1x8x32xf32>
    tpu.vector_store %arg10[%c3_137, %c0_138, %c0_139], %218 {strides = array<i32>} : memref<9x8x32xf32, #tpu.memory_space<vmem>>, vector<1x8x32xf32>,
    %219 = math.tanh %209 : vector<8x32xf32>
    %220 = vector.broadcast %9 : vector<1x32xf32> to vector<8x32xf32>
    %221 = arith.mulf %219, %220 : vector<8x32xf32>
    %cst_140 = arith.constant dense<0.000000e+00> : vector<8xf32>
    %222 = vector.multi_reduction <add>, %221, %cst_140 [1] : vector<8x32xf32> to vector<8xf32>
    %223 = vector.shape_cast %222 : vector<8xf32> to vector<8x1xf32>
    %c3_141 = arith.constant 3 : index
    %c0_142 = arith.constant 0 : index
    %c0_143 = arith.constant 0 : index
    %224 = vector.load %arg11[%c3_141, %c0_142, %c0_143] : memref<9x8x1xf32, #tpu.memory_space<vmem>>, vector<1x8x1xf32>
    %225 = vector.shape_cast %224 : vector<1x8x1xf32> to vector<8x1xf32>
    %226 = vector.shape_cast %223 : vector<8x1xf32> to vector<1x8x1xf32>
    tpu.vector_store %arg11[%c3_141, %c0_142, %c0_143], %226 {strides = array<i32>} : memref<9x8x1xf32, #tpu.memory_space<vmem>>, vector<1x8x1xf32>,
    %c3_144 = arith.constant 3 : index
    %c0_145 = arith.constant 0 : index
    %c0_146 = arith.constant 0 : index
    %227 = vector.load %arg1[%c3_144, %c0_145, %c0_146] : memref<8x8x32xf32, #tpu.memory_space<vmem>>, vector<1x8x32xf32>
    %228 = vector.shape_cast %227 : vector<1x8x32xf32> to vector<8x32xf32>
    %cst_147 = arith.constant dense<0.000000e+00> : vector<8x32xf32>
    %229 = tpu.matmul %209, %1, %cst_147 {dimension_numbers = #tpu.dot_dimension_numbers<[1], [0], [0], [1], [0, 0, 1, 1], [], []>, precision = #tpu.contract_precision<fp32>} : vector<8x32xf32>, vector<32x32xf32>, vector<8x32xf32> -> vector<8x32xf32>
    %230 = arith.addf %228, %229 : vector<8x32xf32>
    %231 = arith.negf %230 : vector<8x32xf32>
    %232 = math.exp %231 : vector<8x32xf32>
    %cst_148 = arith.constant 1.000000e+00 : f32
    %233 = vector.broadcast %cst_148 : f32 to vector<8x32xf32>
    %234 = arith.addf %233, %232 : vector<8x32xf32>
    %235 = arith.divf %233, %234 : vector<8x32xf32>
    %c3_149 = arith.constant 3 : index
    %c0_150 = arith.constant 0 : index
    %c0_151 = arith.constant 0 : index
    %236 = vector.load %arg2[%c3_149, %c0_150, %c0_151] : memref<8x8x32xf32, #tpu.memory_space<vmem>>, vector<1x8x32xf32>
    %237 = vector.shape_cast %236 : vector<1x8x32xf32> to vector<8x32xf32>
    %cst_152 = arith.constant dense<0.000000e+00> : vector<8x32xf32>
    %238 = tpu.matmul %209, %3, %cst_152 {dimension_numbers = #tpu.dot_dimension_numbers<[1], [0], [0], [1], [0, 0, 1, 1], [], []>, precision = #tpu.contract_precision<fp32>} : vector<8x32xf32>, vector<32x32xf32>, vector<8x32xf32> -> vector<8x32xf32>
    %239 = arith.addf %237, %238 : vector<8x32xf32>
    %240 = arith.negf %239 : vector<8x32xf32>
    %241 = math.exp %240 : vector<8x32xf32>
    %cst_153 = arith.constant 1.000000e+00 : f32
    %242 = vector.broadcast %cst_153 : f32 to vector<8x32xf32>
    %243 = arith.addf %242, %241 : vector<8x32xf32>
    %244 = arith.divf %242, %243 : vector<8x32xf32>
    %c3_154 = arith.constant 3 : index
    %c0_155 = arith.constant 0 : index
    %c0_156 = arith.constant 0 : index
    %245 = vector.load %arg3[%c3_154, %c0_155, %c0_156] : memref<8x8x32xf32, #tpu.memory_space<vmem>>, vector<1x8x32xf32>
    %246 = vector.shape_cast %245 : vector<1x8x32xf32> to vector<8x32xf32>
    %cst_157 = arith.constant dense<0.000000e+00> : vector<8x32xf32>
    %247 = tpu.matmul %209, %5, %cst_157 {dimension_numbers = #tpu.dot_dimension_numbers<[1], [0], [0], [1], [0, 0, 1, 1], [], []>, precision = #tpu.contract_precision<fp32>} : vector<8x32xf32>, vector<32x32xf32>, vector<8x32xf32> -> vector<8x32xf32>
    %248 = arith.addf %246, %247 : vector<8x32xf32>
    %249 = math.tanh %248 : vector<8x32xf32>
    %c3_158 = arith.constant 3 : index
    %c0_159 = arith.constant 0 : index
    %c0_160 = arith.constant 0 : index
    %250 = vector.load %arg4[%c3_158, %c0_159, %c0_160] : memref<8x8x32xf32, #tpu.memory_space<vmem>>, vector<1x8x32xf32>
    %251 = vector.shape_cast %250 : vector<1x8x32xf32> to vector<8x32xf32>
    %cst_161 = arith.constant dense<0.000000e+00> : vector<8x32xf32>
    %252 = tpu.matmul %209, %7, %cst_161 {dimension_numbers = #tpu.dot_dimension_numbers<[1], [0], [0], [1], [0, 0, 1, 1], [], []>, precision = #tpu.contract_precision<fp32>} : vector<8x32xf32>, vector<32x32xf32>, vector<8x32xf32> -> vector<8x32xf32>
    %253 = arith.addf %251, %252 : vector<8x32xf32>
    %254 = arith.negf %253 : vector<8x32xf32>
    %255 = math.exp %254 : vector<8x32xf32>
    %cst_162 = arith.constant 1.000000e+00 : f32
    %256 = vector.broadcast %cst_162 : f32 to vector<8x32xf32>
    %257 = arith.addf %256, %255 : vector<8x32xf32>
    %258 = arith.divf %256, %257 : vector<8x32xf32>
    %259 = arith.mulf %244, %192 : vector<8x32xf32>
    %260 = arith.mulf %235, %249 : vector<8x32xf32>
    %261 = arith.addf %259, %260 : vector<8x32xf32>
    %262 = math.tanh %261 : vector<8x32xf32>
    %263 = arith.mulf %258, %262 : vector<8x32xf32>
    %c0_163 = arith.constant 0 : index
    %c0_164 = arith.constant 0 : index
    %c0_165 = arith.constant 0 : index
    %264 = vector.load %arg10[%c0_163, %c0_164, %c0_165] : memref<9x8x32xf32, #tpu.memory_space<vmem>>, vector<4x8x32xf32>
    %c0_166 = arith.constant 0 : index
    %c0_167 = arith.constant 0 : index
    %c0_168 = arith.constant 0 : index
    %265 = vector.load %arg11[%c0_166, %c0_167, %c0_168] : memref<9x8x1xf32, #tpu.memory_space<vmem>>, vector<4x8x1xf32>
    %266 = tpu.iota {dimensions = array<i32: 0>} : vector<4x8x1xi32>
    %cst_169 = arith.constant dense<0xFF800000> : vector<8x1xf32>
    %267 = vector.multi_reduction <maximumf>, %265, %cst_169 [0] : vector<4x8x1xf32> to vector<8x1xf32>
    %268 = vector.shape_cast %267 : vector<8x1xf32> to vector<1x8x1xf32>
    %269 = vector.broadcast %268 : vector<1x8x1xf32> to vector<4x8x1xf32>
    %270 = arith.cmpf oge, %265, %269 : vector<4x8x1xf32>
    %c4_i32 = arith.constant 4 : i32
    %271 = vector.broadcast %c4_i32 : i32 to vector<4x8x1xi32>
    %272 = arith.select %270, %266, %271 : vector<4x8x1xi1>, vector<4x8x1xi32>
    %cst_170 = arith.constant dense<2147483647> : vector<8x1xi32>
    %273 = vector.multi_reduction <minsi>, %272, %cst_170 [0] : vector<4x8x1xi32> to vector<8x1xi32>
    %274 = vector.shape_cast %273 : vector<8x1xi32> to vector<1x8x1xi32>
    %275 = vector.broadcast %274 : vector<1x8x1xi32> to vector<4x8x1xi32>
    %276 = arith.cmpi eq, %266, %275 : vector<4x8x1xi32>
    %cst_171 = arith.constant -1.000000e+30 : f32
    %277 = vector.broadcast %cst_171 : f32 to vector<4x8x1xf32>
    %278 = arith.select %276, %277, %265 : vector<4x8x1xi1>, vector<4x8x1xf32>
    %cst_172 = arith.constant dense<0xFF800000> : vector<8x1xf32>
    %279 = vector.multi_reduction <maximumf>, %278, %cst_172 [0] : vector<4x8x1xf32> to vector<8x1xf32>
    %280 = vector.shape_cast %279 : vector<8x1xf32> to vector<1x8x1xf32>
    %281 = vector.broadcast %280 : vector<1x8x1xf32> to vector<4x8x1xf32>
    %282 = arith.cmpf oge, %278, %281 : vector<4x8x1xf32>
    %c4_i32_173 = arith.constant 4 : i32
    %283 = vector.broadcast %c4_i32_173 : i32 to vector<4x8x1xi32>
    %284 = arith.select %282, %266, %283 : vector<4x8x1xi1>, vector<4x8x1xi32>
    %cst_174 = arith.constant dense<2147483647> : vector<8x1xi32>
    %285 = vector.multi_reduction <minsi>, %284, %cst_174 [0] : vector<4x8x1xi32> to vector<8x1xi32>
    %286 = vector.shape_cast %285 : vector<8x1xi32> to vector<1x8x1xi32>
    %287 = vector.broadcast %286 : vector<1x8x1xi32> to vector<4x8x1xi32>
    %288 = arith.cmpi eq, %266, %287 : vector<4x8x1xi32>
    %cst_175 = arith.constant -1.000000e+30 : f32
    %289 = vector.broadcast %cst_175 : f32 to vector<4x8x1xf32>
    %290 = arith.select %288, %289, %278 : vector<4x8x1xi1>, vector<4x8x1xf32>
    %cst_176 = arith.constant dense<0xFF800000> : vector<8x1xf32>
    %291 = vector.multi_reduction <maximumf>, %290, %cst_176 [0] : vector<4x8x1xf32> to vector<8x1xf32>
    %292 = vector.shape_cast %291 : vector<8x1xf32> to vector<1x8x1xf32>
    %cst_177 = arith.constant 1.000000e-07 : f32
    %293 = vector.broadcast %cst_177 : f32 to vector<1x8x1xf32>
    %294 = arith.addf %292, %293 : vector<1x8x1xf32>
    %295 = vector.broadcast %294 : vector<1x8x1xf32> to vector<4x8x1xf32>
    %296 = arith.subf %265, %295 : vector<4x8x1xf32>
    %cst_178 = arith.constant 0.000000e+00 : f32
    %297 = vector.broadcast %cst_178 : f32 to vector<4x8x1xf32>
    %298 = arith.maximumf %296, %297 : vector<4x8x1xf32>
    %cst_179 = arith.constant dense<0.000000e+00> : vector<8x1xf32>
    %299 = vector.multi_reduction <add>, %298, %cst_179 [0] : vector<4x8x1xf32> to vector<8x1xf32>
    %300 = vector.shape_cast %299 : vector<8x1xf32> to vector<1x8x1xf32>
    %cst_180 = arith.constant 1.000000e-07 : f32
    %301 = vector.broadcast %cst_180 : f32 to vector<1x8x1xf32>
    %302 = arith.addf %300, %301 : vector<1x8x1xf32>
    %303 = vector.broadcast %302 : vector<1x8x1xf32> to vector<4x8x1xf32>
    %304 = arith.divf %298, %303 : vector<4x8x1xf32>
    %305 = vector.broadcast %304 : vector<4x8x1xf32> to vector<4x8x32xf32>
    %306 = arith.mulf %305, %264 : vector<4x8x32xf32>
    %cst_181 = arith.constant dense<0.000000e+00> : vector<8x32xf32>
    %307 = vector.multi_reduction <add>, %306, %cst_181 [0] : vector<4x8x32xf32> to vector<8x32xf32>
    %308 = arith.addf %263, %307 : vector<8x32xf32>
    %c3_182 = arith.constant 3 : index
    %c0_183 = arith.constant 0 : index
    %c0_184 = arith.constant 0 : index
    %309 = vector.load %arg8[%c3_182, %c0_183, %c0_184] : memref<8x8x32xf32, #tpu.memory_space<vmem>>, vector<1x8x32xf32>
    %310 = vector.shape_cast %309 : vector<1x8x32xf32> to vector<8x32xf32>
    %311 = vector.shape_cast %308 : vector<8x32xf32> to vector<1x8x32xf32>
    tpu.vector_store %arg8[%c3_182, %c0_183, %c0_184], %311 {strides = array<i32>} : memref<8x8x32xf32, #tpu.memory_space<vmem>>, vector<1x8x32xf32>,
    %c3_185 = arith.constant 3 : index
    %c0_186 = arith.constant 0 : index
    %c0_187 = arith.constant 0 : index
    %312 = vector.load %arg9[%c3_185, %c0_186, %c0_187] : memref<8x8x32xf32, #tpu.memory_space<vmem>>, vector<1x8x32xf32>
    %313 = vector.shape_cast %312 : vector<1x8x32xf32> to vector<8x32xf32>
    %314 = vector.shape_cast %307 : vector<8x32xf32> to vector<1x8x32xf32>
    tpu.vector_store %arg9[%c3_185, %c0_186, %c0_187], %314 {strides = array<i32>} : memref<8x8x32xf32, #tpu.memory_space<vmem>>, vector<1x8x32xf32>,
    %c4 = arith.constant 4 : index
    %c0_188 = arith.constant 0 : index
    %c0_189 = arith.constant 0 : index
    %315 = vector.load %arg10[%c4, %c0_188, %c0_189] : memref<9x8x32xf32, #tpu.memory_space<vmem>>, vector<1x8x32xf32>
    %316 = vector.shape_cast %315 : vector<1x8x32xf32> to vector<8x32xf32>
    %317 = vector.shape_cast %308 : vector<8x32xf32> to vector<1x8x32xf32>
    tpu.vector_store %arg10[%c4, %c0_188, %c0_189], %317 {strides = array<i32>} : memref<9x8x32xf32, #tpu.memory_space<vmem>>, vector<1x8x32xf32>,
    %318 = math.tanh %308 : vector<8x32xf32>
    %319 = vector.broadcast %9 : vector<1x32xf32> to vector<8x32xf32>
    %320 = arith.mulf %318, %319 : vector<8x32xf32>
    %cst_190 = arith.constant dense<0.000000e+00> : vector<8xf32>
    %321 = vector.multi_reduction <add>, %320, %cst_190 [1] : vector<8x32xf32> to vector<8xf32>
    %322 = vector.shape_cast %321 : vector<8xf32> to vector<8x1xf32>
    %c4_191 = arith.constant 4 : index
    %c0_192 = arith.constant 0 : index
    %c0_193 = arith.constant 0 : index
    %323 = vector.load %arg11[%c4_191, %c0_192, %c0_193] : memref<9x8x1xf32, #tpu.memory_space<vmem>>, vector<1x8x1xf32>
    %324 = vector.shape_cast %323 : vector<1x8x1xf32> to vector<8x1xf32>
    %325 = vector.shape_cast %322 : vector<8x1xf32> to vector<1x8x1xf32>
    tpu.vector_store %arg11[%c4_191, %c0_192, %c0_193], %325 {strides = array<i32>} : memref<9x8x1xf32, #tpu.memory_space<vmem>>, vector<1x8x1xf32>,
    %c4_194 = arith.constant 4 : index
    %c0_195 = arith.constant 0 : index
    %c0_196 = arith.constant 0 : index
    %326 = vector.load %arg1[%c4_194, %c0_195, %c0_196] : memref<8x8x32xf32, #tpu.memory_space<vmem>>, vector<1x8x32xf32>
    %327 = vector.shape_cast %326 : vector<1x8x32xf32> to vector<8x32xf32>
    %cst_197 = arith.constant dense<0.000000e+00> : vector<8x32xf32>
    %328 = tpu.matmul %308, %1, %cst_197 {dimension_numbers = #tpu.dot_dimension_numbers<[1], [0], [0], [1], [0, 0, 1, 1], [], []>, precision = #tpu.contract_precision<fp32>} : vector<8x32xf32>, vector<32x32xf32>, vector<8x32xf32> -> vector<8x32xf32>
    %329 = arith.addf %327, %328 : vector<8x32xf32>
    %330 = arith.negf %329 : vector<8x32xf32>
    %331 = math.exp %330 : vector<8x32xf32>
    %cst_198 = arith.constant 1.000000e+00 : f32
    %332 = vector.broadcast %cst_198 : f32 to vector<8x32xf32>
    %333 = arith.addf %332, %331 : vector<8x32xf32>
    %334 = arith.divf %332, %333 : vector<8x32xf32>
    %c4_199 = arith.constant 4 : index
    %c0_200 = arith.constant 0 : index
    %c0_201 = arith.constant 0 : index
    %335 = vector.load %arg2[%c4_199, %c0_200, %c0_201] : memref<8x8x32xf32, #tpu.memory_space<vmem>>, vector<1x8x32xf32>
    %336 = vector.shape_cast %335 : vector<1x8x32xf32> to vector<8x32xf32>
    %cst_202 = arith.constant dense<0.000000e+00> : vector<8x32xf32>
    %337 = tpu.matmul %308, %3, %cst_202 {dimension_numbers = #tpu.dot_dimension_numbers<[1], [0], [0], [1], [0, 0, 1, 1], [], []>, precision = #tpu.contract_precision<fp32>} : vector<8x32xf32>, vector<32x32xf32>, vector<8x32xf32> -> vector<8x32xf32>
    %338 = arith.addf %336, %337 : vector<8x32xf32>
    %339 = arith.negf %338 : vector<8x32xf32>
    %340 = math.exp %339 : vector<8x32xf32>
    %cst_203 = arith.constant 1.000000e+00 : f32
    %341 = vector.broadcast %cst_203 : f32 to vector<8x32xf32>
    %342 = arith.addf %341, %340 : vector<8x32xf32>
    %343 = arith.divf %341, %342 : vector<8x32xf32>
    %c4_204 = arith.constant 4 : index
    %c0_205 = arith.constant 0 : index
    %c0_206 = arith.constant 0 : index
    %344 = vector.load %arg3[%c4_204, %c0_205, %c0_206] : memref<8x8x32xf32, #tpu.memory_space<vmem>>, vector<1x8x32xf32>
    %345 = vector.shape_cast %344 : vector<1x8x32xf32> to vector<8x32xf32>
    %cst_207 = arith.constant dense<0.000000e+00> : vector<8x32xf32>
    %346 = tpu.matmul %308, %5, %cst_207 {dimension_numbers = #tpu.dot_dimension_numbers<[1], [0], [0], [1], [0, 0, 1, 1], [], []>, precision = #tpu.contract_precision<fp32>} : vector<8x32xf32>, vector<32x32xf32>, vector<8x32xf32> -> vector<8x32xf32>
    %347 = arith.addf %345, %346 : vector<8x32xf32>
    %348 = math.tanh %347 : vector<8x32xf32>
    %c4_208 = arith.constant 4 : index
    %c0_209 = arith.constant 0 : index
    %c0_210 = arith.constant 0 : index
    %349 = vector.load %arg4[%c4_208, %c0_209, %c0_210] : memref<8x8x32xf32, #tpu.memory_space<vmem>>, vector<1x8x32xf32>
    %350 = vector.shape_cast %349 : vector<1x8x32xf32> to vector<8x32xf32>
    %cst_211 = arith.constant dense<0.000000e+00> : vector<8x32xf32>
    %351 = tpu.matmul %308, %7, %cst_211 {dimension_numbers = #tpu.dot_dimension_numbers<[1], [0], [0], [1], [0, 0, 1, 1], [], []>, precision = #tpu.contract_precision<fp32>} : vector<8x32xf32>, vector<32x32xf32>, vector<8x32xf32> -> vector<8x32xf32>
    %352 = arith.addf %350, %351 : vector<8x32xf32>
    %353 = arith.negf %352 : vector<8x32xf32>
    %354 = math.exp %353 : vector<8x32xf32>
    %cst_212 = arith.constant 1.000000e+00 : f32
    %355 = vector.broadcast %cst_212 : f32 to vector<8x32xf32>
    %356 = arith.addf %355, %354 : vector<8x32xf32>
    %357 = arith.divf %355, %356 : vector<8x32xf32>
    %358 = arith.mulf %343, %261 : vector<8x32xf32>
    %359 = arith.mulf %334, %348 : vector<8x32xf32>
    %360 = arith.addf %358, %359 : vector<8x32xf32>
    %361 = math.tanh %360 : vector<8x32xf32>
    %362 = arith.mulf %357, %361 : vector<8x32xf32>
    %c0_213 = arith.constant 0 : index
    %c0_214 = arith.constant 0 : index
    %c0_215 = arith.constant 0 : index
    %363 = vector.load %arg10[%c0_213, %c0_214, %c0_215] : memref<9x8x32xf32, #tpu.memory_space<vmem>>, vector<5x8x32xf32>
    %c0_216 = arith.constant 0 : index
    %c0_217 = arith.constant 0 : index
    %c0_218 = arith.constant 0 : index
    %364 = vector.load %arg11[%c0_216, %c0_217, %c0_218] : memref<9x8x1xf32, #tpu.memory_space<vmem>>, vector<5x8x1xf32>
    %365 = tpu.iota {dimensions = array<i32: 0>} : vector<5x8x1xi32>
    %cst_219 = arith.constant dense<0xFF800000> : vector<8x1xf32>
    %366 = vector.multi_reduction <maximumf>, %364, %cst_219 [0] : vector<5x8x1xf32> to vector<8x1xf32>
    %367 = vector.shape_cast %366 : vector<8x1xf32> to vector<1x8x1xf32>
    %368 = vector.broadcast %367 : vector<1x8x1xf32> to vector<5x8x1xf32>
    %369 = arith.cmpf oge, %364, %368 : vector<5x8x1xf32>
    %c5_i32 = arith.constant 5 : i32
    %370 = vector.broadcast %c5_i32 : i32 to vector<5x8x1xi32>
    %371 = arith.select %369, %365, %370 : vector<5x8x1xi1>, vector<5x8x1xi32>
    %cst_220 = arith.constant dense<2147483647> : vector<8x1xi32>
    %372 = vector.multi_reduction <minsi>, %371, %cst_220 [0] : vector<5x8x1xi32> to vector<8x1xi32>
    %373 = vector.shape_cast %372 : vector<8x1xi32> to vector<1x8x1xi32>
    %374 = vector.broadcast %373 : vector<1x8x1xi32> to vector<5x8x1xi32>
    %375 = arith.cmpi eq, %365, %374 : vector<5x8x1xi32>
    %cst_221 = arith.constant -1.000000e+30 : f32
    %376 = vector.broadcast %cst_221 : f32 to vector<5x8x1xf32>
    %377 = arith.select %375, %376, %364 : vector<5x8x1xi1>, vector<5x8x1xf32>
    %cst_222 = arith.constant dense<0xFF800000> : vector<8x1xf32>
    %378 = vector.multi_reduction <maximumf>, %377, %cst_222 [0] : vector<5x8x1xf32> to vector<8x1xf32>
    %379 = vector.shape_cast %378 : vector<8x1xf32> to vector<1x8x1xf32>
    %380 = vector.broadcast %379 : vector<1x8x1xf32> to vector<5x8x1xf32>
    %381 = arith.cmpf oge, %377, %380 : vector<5x8x1xf32>
    %c5_i32_223 = arith.constant 5 : i32
    %382 = vector.broadcast %c5_i32_223 : i32 to vector<5x8x1xi32>
    %383 = arith.select %381, %365, %382 : vector<5x8x1xi1>, vector<5x8x1xi32>
    %cst_224 = arith.constant dense<2147483647> : vector<8x1xi32>
    %384 = vector.multi_reduction <minsi>, %383, %cst_224 [0] : vector<5x8x1xi32> to vector<8x1xi32>
    %385 = vector.shape_cast %384 : vector<8x1xi32> to vector<1x8x1xi32>
    %386 = vector.broadcast %385 : vector<1x8x1xi32> to vector<5x8x1xi32>
    %387 = arith.cmpi eq, %365, %386 : vector<5x8x1xi32>
    %cst_225 = arith.constant -1.000000e+30 : f32
    %388 = vector.broadcast %cst_225 : f32 to vector<5x8x1xf32>
    %389 = arith.select %387, %388, %377 : vector<5x8x1xi1>, vector<5x8x1xf32>
    %cst_226 = arith.constant dense<0xFF800000> : vector<8x1xf32>
    %390 = vector.multi_reduction <maximumf>, %389, %cst_226 [0] : vector<5x8x1xf32> to vector<8x1xf32>
    %391 = vector.shape_cast %390 : vector<8x1xf32> to vector<1x8x1xf32>
    %cst_227 = arith.constant 1.000000e-07 : f32
    %392 = vector.broadcast %cst_227 : f32 to vector<1x8x1xf32>
    %393 = arith.addf %391, %392 : vector<1x8x1xf32>
    %394 = vector.broadcast %393 : vector<1x8x1xf32> to vector<5x8x1xf32>
    %395 = arith.subf %364, %394 : vector<5x8x1xf32>
    %cst_228 = arith.constant 0.000000e+00 : f32
    %396 = vector.broadcast %cst_228 : f32 to vector<5x8x1xf32>
    %397 = arith.maximumf %395, %396 : vector<5x8x1xf32>
    %cst_229 = arith.constant dense<0.000000e+00> : vector<8x1xf32>
    %398 = vector.multi_reduction <add>, %397, %cst_229 [0] : vector<5x8x1xf32> to vector<8x1xf32>
    %399 = vector.shape_cast %398 : vector<8x1xf32> to vector<1x8x1xf32>
    %cst_230 = arith.constant 1.000000e-07 : f32
    %400 = vector.broadcast %cst_230 : f32 to vector<1x8x1xf32>
    %401 = arith.addf %399, %400 : vector<1x8x1xf32>
    %402 = vector.broadcast %401 : vector<1x8x1xf32> to vector<5x8x1xf32>
    %403 = arith.divf %397, %402 : vector<5x8x1xf32>
    %404 = vector.broadcast %403 : vector<5x8x1xf32> to vector<5x8x32xf32>
    %405 = arith.mulf %404, %363 : vector<5x8x32xf32>
    %cst_231 = arith.constant dense<0.000000e+00> : vector<8x32xf32>
    %406 = vector.multi_reduction <add>, %405, %cst_231 [0] : vector<5x8x32xf32> to vector<8x32xf32>
    %407 = arith.addf %362, %406 : vector<8x32xf32>
    %c4_232 = arith.constant 4 : index
    %c0_233 = arith.constant 0 : index
    %c0_234 = arith.constant 0 : index
    %408 = vector.load %arg8[%c4_232, %c0_233, %c0_234] : memref<8x8x32xf32, #tpu.memory_space<vmem>>, vector<1x8x32xf32>
    %409 = vector.shape_cast %408 : vector<1x8x32xf32> to vector<8x32xf32>
    %410 = vector.shape_cast %407 : vector<8x32xf32> to vector<1x8x32xf32>
    tpu.vector_store %arg8[%c4_232, %c0_233, %c0_234], %410 {strides = array<i32>} : memref<8x8x32xf32, #tpu.memory_space<vmem>>, vector<1x8x32xf32>,
    %c4_235 = arith.constant 4 : index
    %c0_236 = arith.constant 0 : index
    %c0_237 = arith.constant 0 : index
    %411 = vector.load %arg9[%c4_235, %c0_236, %c0_237] : memref<8x8x32xf32, #tpu.memory_space<vmem>>, vector<1x8x32xf32>
    %412 = vector.shape_cast %411 : vector<1x8x32xf32> to vector<8x32xf32>
    %413 = vector.shape_cast %406 : vector<8x32xf32> to vector<1x8x32xf32>
    tpu.vector_store %arg9[%c4_235, %c0_236, %c0_237], %413 {strides = array<i32>} : memref<8x8x32xf32, #tpu.memory_space<vmem>>, vector<1x8x32xf32>,
    %c5 = arith.constant 5 : index
    %c0_238 = arith.constant 0 : index
    %c0_239 = arith.constant 0 : index
    %414 = vector.load %arg10[%c5, %c0_238, %c0_239] : memref<9x8x32xf32, #tpu.memory_space<vmem>>, vector<1x8x32xf32>
    %415 = vector.shape_cast %414 : vector<1x8x32xf32> to vector<8x32xf32>
    %416 = vector.shape_cast %407 : vector<8x32xf32> to vector<1x8x32xf32>
    tpu.vector_store %arg10[%c5, %c0_238, %c0_239], %416 {strides = array<i32>} : memref<9x8x32xf32, #tpu.memory_space<vmem>>, vector<1x8x32xf32>,
    %417 = math.tanh %407 : vector<8x32xf32>
    %418 = vector.broadcast %9 : vector<1x32xf32> to vector<8x32xf32>
    %419 = arith.mulf %417, %418 : vector<8x32xf32>
    %cst_240 = arith.constant dense<0.000000e+00> : vector<8xf32>
    %420 = vector.multi_reduction <add>, %419, %cst_240 [1] : vector<8x32xf32> to vector<8xf32>
    %421 = vector.shape_cast %420 : vector<8xf32> to vector<8x1xf32>
    %c5_241 = arith.constant 5 : index
    %c0_242 = arith.constant 0 : index
    %c0_243 = arith.constant 0 : index
    %422 = vector.load %arg11[%c5_241, %c0_242, %c0_243] : memref<9x8x1xf32, #tpu.memory_space<vmem>>, vector<1x8x1xf32>
    %423 = vector.shape_cast %422 : vector<1x8x1xf32> to vector<8x1xf32>
    %424 = vector.shape_cast %421 : vector<8x1xf32> to vector<1x8x1xf32>
    tpu.vector_store %arg11[%c5_241, %c0_242, %c0_243], %424 {strides = array<i32>} : memref<9x8x1xf32, #tpu.memory_space<vmem>>, vector<1x8x1xf32>,
    %c5_244 = arith.constant 5 : index
    %c0_245 = arith.constant 0 : index
    %c0_246 = arith.constant 0 : index
    %425 = vector.load %arg1[%c5_244, %c0_245, %c0_246] : memref<8x8x32xf32, #tpu.memory_space<vmem>>, vector<1x8x32xf32>
    %426 = vector.shape_cast %425 : vector<1x8x32xf32> to vector<8x32xf32>
    %cst_247 = arith.constant dense<0.000000e+00> : vector<8x32xf32>
    %427 = tpu.matmul %407, %1, %cst_247 {dimension_numbers = #tpu.dot_dimension_numbers<[1], [0], [0], [1], [0, 0, 1, 1], [], []>, precision = #tpu.contract_precision<fp32>} : vector<8x32xf32>, vector<32x32xf32>, vector<8x32xf32> -> vector<8x32xf32>
    %428 = arith.addf %426, %427 : vector<8x32xf32>
    %429 = arith.negf %428 : vector<8x32xf32>
    %430 = math.exp %429 : vector<8x32xf32>
    %cst_248 = arith.constant 1.000000e+00 : f32
    %431 = vector.broadcast %cst_248 : f32 to vector<8x32xf32>
    %432 = arith.addf %431, %430 : vector<8x32xf32>
    %433 = arith.divf %431, %432 : vector<8x32xf32>
    %c5_249 = arith.constant 5 : index
    %c0_250 = arith.constant 0 : index
    %c0_251 = arith.constant 0 : index
    %434 = vector.load %arg2[%c5_249, %c0_250, %c0_251] : memref<8x8x32xf32, #tpu.memory_space<vmem>>, vector<1x8x32xf32>
    %435 = vector.shape_cast %434 : vector<1x8x32xf32> to vector<8x32xf32>
    %cst_252 = arith.constant dense<0.000000e+00> : vector<8x32xf32>
    %436 = tpu.matmul %407, %3, %cst_252 {dimension_numbers = #tpu.dot_dimension_numbers<[1], [0], [0], [1], [0, 0, 1, 1], [], []>, precision = #tpu.contract_precision<fp32>} : vector<8x32xf32>, vector<32x32xf32>, vector<8x32xf32> -> vector<8x32xf32>
    %437 = arith.addf %435, %436 : vector<8x32xf32>
    %438 = arith.negf %437 : vector<8x32xf32>
    %439 = math.exp %438 : vector<8x32xf32>
    %cst_253 = arith.constant 1.000000e+00 : f32
    %440 = vector.broadcast %cst_253 : f32 to vector<8x32xf32>
    %441 = arith.addf %440, %439 : vector<8x32xf32>
    %442 = arith.divf %440, %441 : vector<8x32xf32>
    %c5_254 = arith.constant 5 : index
    %c0_255 = arith.constant 0 : index
    %c0_256 = arith.constant 0 : index
    %443 = vector.load %arg3[%c5_254, %c0_255, %c0_256] : memref<8x8x32xf32, #tpu.memory_space<vmem>>, vector<1x8x32xf32>
    %444 = vector.shape_cast %443 : vector<1x8x32xf32> to vector<8x32xf32>
    %cst_257 = arith.constant dense<0.000000e+00> : vector<8x32xf32>
    %445 = tpu.matmul %407, %5, %cst_257 {dimension_numbers = #tpu.dot_dimension_numbers<[1], [0], [0], [1], [0, 0, 1, 1], [], []>, precision = #tpu.contract_precision<fp32>} : vector<8x32xf32>, vector<32x32xf32>, vector<8x32xf32> -> vector<8x32xf32>
    %446 = arith.addf %444, %445 : vector<8x32xf32>
    %447 = math.tanh %446 : vector<8x32xf32>
    %c5_258 = arith.constant 5 : index
    %c0_259 = arith.constant 0 : index
    %c0_260 = arith.constant 0 : index
    %448 = vector.load %arg4[%c5_258, %c0_259, %c0_260] : memref<8x8x32xf32, #tpu.memory_space<vmem>>, vector<1x8x32xf32>
    %449 = vector.shape_cast %448 : vector<1x8x32xf32> to vector<8x32xf32>
    %cst_261 = arith.constant dense<0.000000e+00> : vector<8x32xf32>
    %450 = tpu.matmul %407, %7, %cst_261 {dimension_numbers = #tpu.dot_dimension_numbers<[1], [0], [0], [1], [0, 0, 1, 1], [], []>, precision = #tpu.contract_precision<fp32>} : vector<8x32xf32>, vector<32x32xf32>, vector<8x32xf32> -> vector<8x32xf32>
    %451 = arith.addf %449, %450 : vector<8x32xf32>
    %452 = arith.negf %451 : vector<8x32xf32>
    %453 = math.exp %452 : vector<8x32xf32>
    %cst_262 = arith.constant 1.000000e+00 : f32
    %454 = vector.broadcast %cst_262 : f32 to vector<8x32xf32>
    %455 = arith.addf %454, %453 : vector<8x32xf32>
    %456 = arith.divf %454, %455 : vector<8x32xf32>
    %457 = arith.mulf %442, %360 : vector<8x32xf32>
    %458 = arith.mulf %433, %447 : vector<8x32xf32>
    %459 = arith.addf %457, %458 : vector<8x32xf32>
    %460 = math.tanh %459 : vector<8x32xf32>
    %461 = arith.mulf %456, %460 : vector<8x32xf32>
    %c0_263 = arith.constant 0 : index
    %c0_264 = arith.constant 0 : index
    %c0_265 = arith.constant 0 : index
    %462 = vector.load %arg10[%c0_263, %c0_264, %c0_265] : memref<9x8x32xf32, #tpu.memory_space<vmem>>, vector<6x8x32xf32>
    %c0_266 = arith.constant 0 : index
    %c0_267 = arith.constant 0 : index
    %c0_268 = arith.constant 0 : index
    %463 = vector.load %arg11[%c0_266, %c0_267, %c0_268] : memref<9x8x1xf32, #tpu.memory_space<vmem>>, vector<6x8x1xf32>
    %464 = tpu.iota {dimensions = array<i32: 0>} : vector<6x8x1xi32>
    %cst_269 = arith.constant dense<0xFF800000> : vector<8x1xf32>
    %465 = vector.multi_reduction <maximumf>, %463, %cst_269 [0] : vector<6x8x1xf32> to vector<8x1xf32>
    %466 = vector.shape_cast %465 : vector<8x1xf32> to vector<1x8x1xf32>
    %467 = vector.broadcast %466 : vector<1x8x1xf32> to vector<6x8x1xf32>
    %468 = arith.cmpf oge, %463, %467 : vector<6x8x1xf32>
    %c6_i32 = arith.constant 6 : i32
    %469 = vector.broadcast %c6_i32 : i32 to vector<6x8x1xi32>
    %470 = arith.select %468, %464, %469 : vector<6x8x1xi1>, vector<6x8x1xi32>
    %cst_270 = arith.constant dense<2147483647> : vector<8x1xi32>
    %471 = vector.multi_reduction <minsi>, %470, %cst_270 [0] : vector<6x8x1xi32> to vector<8x1xi32>
    %472 = vector.shape_cast %471 : vector<8x1xi32> to vector<1x8x1xi32>
    %473 = vector.broadcast %472 : vector<1x8x1xi32> to vector<6x8x1xi32>
    %474 = arith.cmpi eq, %464, %473 : vector<6x8x1xi32>
    %cst_271 = arith.constant -1.000000e+30 : f32
    %475 = vector.broadcast %cst_271 : f32 to vector<6x8x1xf32>
    %476 = arith.select %474, %475, %463 : vector<6x8x1xi1>, vector<6x8x1xf32>
    %cst_272 = arith.constant dense<0xFF800000> : vector<8x1xf32>
    %477 = vector.multi_reduction <maximumf>, %476, %cst_272 [0] : vector<6x8x1xf32> to vector<8x1xf32>
    %478 = vector.shape_cast %477 : vector<8x1xf32> to vector<1x8x1xf32>
    %479 = vector.broadcast %478 : vector<1x8x1xf32> to vector<6x8x1xf32>
    %480 = arith.cmpf oge, %476, %479 : vector<6x8x1xf32>
    %c6_i32_273 = arith.constant 6 : i32
    %481 = vector.broadcast %c6_i32_273 : i32 to vector<6x8x1xi32>
    %482 = arith.select %480, %464, %481 : vector<6x8x1xi1>, vector<6x8x1xi32>
    %cst_274 = arith.constant dense<2147483647> : vector<8x1xi32>
    %483 = vector.multi_reduction <minsi>, %482, %cst_274 [0] : vector<6x8x1xi32> to vector<8x1xi32>
    %484 = vector.shape_cast %483 : vector<8x1xi32> to vector<1x8x1xi32>
    %485 = vector.broadcast %484 : vector<1x8x1xi32> to vector<6x8x1xi32>
    %486 = arith.cmpi eq, %464, %485 : vector<6x8x1xi32>
    %cst_275 = arith.constant -1.000000e+30 : f32
    %487 = vector.broadcast %cst_275 : f32 to vector<6x8x1xf32>
    %488 = arith.select %486, %487, %476 : vector<6x8x1xi1>, vector<6x8x1xf32>
    %cst_276 = arith.constant dense<0xFF800000> : vector<8x1xf32>
    %489 = vector.multi_reduction <maximumf>, %488, %cst_276 [0] : vector<6x8x1xf32> to vector<8x1xf32>
    %490 = vector.shape_cast %489 : vector<8x1xf32> to vector<1x8x1xf32>
    %cst_277 = arith.constant 1.000000e-07 : f32
    %491 = vector.broadcast %cst_277 : f32 to vector<1x8x1xf32>
    %492 = arith.addf %490, %491 : vector<1x8x1xf32>
    %493 = vector.broadcast %492 : vector<1x8x1xf32> to vector<6x8x1xf32>
    %494 = arith.subf %463, %493 : vector<6x8x1xf32>
    %cst_278 = arith.constant 0.000000e+00 : f32
    %495 = vector.broadcast %cst_278 : f32 to vector<6x8x1xf32>
    %496 = arith.maximumf %494, %495 : vector<6x8x1xf32>
    %cst_279 = arith.constant dense<0.000000e+00> : vector<8x1xf32>
    %497 = vector.multi_reduction <add>, %496, %cst_279 [0] : vector<6x8x1xf32> to vector<8x1xf32>
    %498 = vector.shape_cast %497 : vector<8x1xf32> to vector<1x8x1xf32>
    %cst_280 = arith.constant 1.000000e-07 : f32
    %499 = vector.broadcast %cst_280 : f32 to vector<1x8x1xf32>
    %500 = arith.addf %498, %499 : vector<1x8x1xf32>
    %501 = vector.broadcast %500 : vector<1x8x1xf32> to vector<6x8x1xf32>
    %502 = arith.divf %496, %501 : vector<6x8x1xf32>
    %503 = vector.broadcast %502 : vector<6x8x1xf32> to vector<6x8x32xf32>
    %504 = arith.mulf %503, %462 : vector<6x8x32xf32>
    %cst_281 = arith.constant dense<0.000000e+00> : vector<8x32xf32>
    %505 = vector.multi_reduction <add>, %504, %cst_281 [0] : vector<6x8x32xf32> to vector<8x32xf32>
    %506 = arith.addf %461, %505 : vector<8x32xf32>
    %c5_282 = arith.constant 5 : index
    %c0_283 = arith.constant 0 : index
    %c0_284 = arith.constant 0 : index
    %507 = vector.load %arg8[%c5_282, %c0_283, %c0_284] : memref<8x8x32xf32, #tpu.memory_space<vmem>>, vector<1x8x32xf32>
    %508 = vector.shape_cast %507 : vector<1x8x32xf32> to vector<8x32xf32>
    %509 = vector.shape_cast %506 : vector<8x32xf32> to vector<1x8x32xf32>
    tpu.vector_store %arg8[%c5_282, %c0_283, %c0_284], %509 {strides = array<i32>} : memref<8x8x32xf32, #tpu.memory_space<vmem>>, vector<1x8x32xf32>,
    %c5_285 = arith.constant 5 : index
    %c0_286 = arith.constant 0 : index
    %c0_287 = arith.constant 0 : index
    %510 = vector.load %arg9[%c5_285, %c0_286, %c0_287] : memref<8x8x32xf32, #tpu.memory_space<vmem>>, vector<1x8x32xf32>
    %511 = vector.shape_cast %510 : vector<1x8x32xf32> to vector<8x32xf32>
    %512 = vector.shape_cast %505 : vector<8x32xf32> to vector<1x8x32xf32>
    tpu.vector_store %arg9[%c5_285, %c0_286, %c0_287], %512 {strides = array<i32>} : memref<8x8x32xf32, #tpu.memory_space<vmem>>, vector<1x8x32xf32>,
    %c6 = arith.constant 6 : index
    %c0_288 = arith.constant 0 : index
    %c0_289 = arith.constant 0 : index
    %513 = vector.load %arg10[%c6, %c0_288, %c0_289] : memref<9x8x32xf32, #tpu.memory_space<vmem>>, vector<1x8x32xf32>
    %514 = vector.shape_cast %513 : vector<1x8x32xf32> to vector<8x32xf32>
    %515 = vector.shape_cast %506 : vector<8x32xf32> to vector<1x8x32xf32>
    tpu.vector_store %arg10[%c6, %c0_288, %c0_289], %515 {strides = array<i32>} : memref<9x8x32xf32, #tpu.memory_space<vmem>>, vector<1x8x32xf32>,
    %516 = math.tanh %506 : vector<8x32xf32>
    %517 = vector.broadcast %9 : vector<1x32xf32> to vector<8x32xf32>
    %518 = arith.mulf %516, %517 : vector<8x32xf32>
    %cst_290 = arith.constant dense<0.000000e+00> : vector<8xf32>
    %519 = vector.multi_reduction <add>, %518, %cst_290 [1] : vector<8x32xf32> to vector<8xf32>
    %520 = vector.shape_cast %519 : vector<8xf32> to vector<8x1xf32>
    %c6_291 = arith.constant 6 : index
    %c0_292 = arith.constant 0 : index
    %c0_293 = arith.constant 0 : index
    %521 = vector.load %arg11[%c6_291, %c0_292, %c0_293] : memref<9x8x1xf32, #tpu.memory_space<vmem>>, vector<1x8x1xf32>
    %522 = vector.shape_cast %521 : vector<1x8x1xf32> to vector<8x1xf32>
    %523 = vector.shape_cast %520 : vector<8x1xf32> to vector<1x8x1xf32>
    tpu.vector_store %arg11[%c6_291, %c0_292, %c0_293], %523 {strides = array<i32>} : memref<9x8x1xf32, #tpu.memory_space<vmem>>, vector<1x8x1xf32>,
    %c6_294 = arith.constant 6 : index
    %c0_295 = arith.constant 0 : index
    %c0_296 = arith.constant 0 : index
    %524 = vector.load %arg1[%c6_294, %c0_295, %c0_296] : memref<8x8x32xf32, #tpu.memory_space<vmem>>, vector<1x8x32xf32>
    %525 = vector.shape_cast %524 : vector<1x8x32xf32> to vector<8x32xf32>
    %cst_297 = arith.constant dense<0.000000e+00> : vector<8x32xf32>
    %526 = tpu.matmul %506, %1, %cst_297 {dimension_numbers = #tpu.dot_dimension_numbers<[1], [0], [0], [1], [0, 0, 1, 1], [], []>, precision = #tpu.contract_precision<fp32>} : vector<8x32xf32>, vector<32x32xf32>, vector<8x32xf32> -> vector<8x32xf32>
    %527 = arith.addf %525, %526 : vector<8x32xf32>
    %528 = arith.negf %527 : vector<8x32xf32>
    %529 = math.exp %528 : vector<8x32xf32>
    %cst_298 = arith.constant 1.000000e+00 : f32
    %530 = vector.broadcast %cst_298 : f32 to vector<8x32xf32>
    %531 = arith.addf %530, %529 : vector<8x32xf32>
    %532 = arith.divf %530, %531 : vector<8x32xf32>
    %c6_299 = arith.constant 6 : index
    %c0_300 = arith.constant 0 : index
    %c0_301 = arith.constant 0 : index
    %533 = vector.load %arg2[%c6_299, %c0_300, %c0_301] : memref<8x8x32xf32, #tpu.memory_space<vmem>>, vector<1x8x32xf32>
    %534 = vector.shape_cast %533 : vector<1x8x32xf32> to vector<8x32xf32>
    %cst_302 = arith.constant dense<0.000000e+00> : vector<8x32xf32>
    %535 = tpu.matmul %506, %3, %cst_302 {dimension_numbers = #tpu.dot_dimension_numbers<[1], [0], [0], [1], [0, 0, 1, 1], [], []>, precision = #tpu.contract_precision<fp32>} : vector<8x32xf32>, vector<32x32xf32>, vector<8x32xf32> -> vector<8x32xf32>
    %536 = arith.addf %534, %535 : vector<8x32xf32>
    %537 = arith.negf %536 : vector<8x32xf32>
    %538 = math.exp %537 : vector<8x32xf32>
    %cst_303 = arith.constant 1.000000e+00 : f32
    %539 = vector.broadcast %cst_303 : f32 to vector<8x32xf32>
    %540 = arith.addf %539, %538 : vector<8x32xf32>
    %541 = arith.divf %539, %540 : vector<8x32xf32>
    %c6_304 = arith.constant 6 : index
    %c0_305 = arith.constant 0 : index
    %c0_306 = arith.constant 0 : index
    %542 = vector.load %arg3[%c6_304, %c0_305, %c0_306] : memref<8x8x32xf32, #tpu.memory_space<vmem>>, vector<1x8x32xf32>
    %543 = vector.shape_cast %542 : vector<1x8x32xf32> to vector<8x32xf32>
    %cst_307 = arith.constant dense<0.000000e+00> : vector<8x32xf32>
    %544 = tpu.matmul %506, %5, %cst_307 {dimension_numbers = #tpu.dot_dimension_numbers<[1], [0], [0], [1], [0, 0, 1, 1], [], []>, precision = #tpu.contract_precision<fp32>} : vector<8x32xf32>, vector<32x32xf32>, vector<8x32xf32> -> vector<8x32xf32>
    %545 = arith.addf %543, %544 : vector<8x32xf32>
    %546 = math.tanh %545 : vector<8x32xf32>
    %c6_308 = arith.constant 6 : index
    %c0_309 = arith.constant 0 : index
    %c0_310 = arith.constant 0 : index
    %547 = vector.load %arg4[%c6_308, %c0_309, %c0_310] : memref<8x8x32xf32, #tpu.memory_space<vmem>>, vector<1x8x32xf32>
    %548 = vector.shape_cast %547 : vector<1x8x32xf32> to vector<8x32xf32>
    %cst_311 = arith.constant dense<0.000000e+00> : vector<8x32xf32>
    %549 = tpu.matmul %506, %7, %cst_311 {dimension_numbers = #tpu.dot_dimension_numbers<[1], [0], [0], [1], [0, 0, 1, 1], [], []>, precision = #tpu.contract_precision<fp32>} : vector<8x32xf32>, vector<32x32xf32>, vector<8x32xf32> -> vector<8x32xf32>
    %550 = arith.addf %548, %549 : vector<8x32xf32>
    %551 = arith.negf %550 : vector<8x32xf32>
    %552 = math.exp %551 : vector<8x32xf32>
    %cst_312 = arith.constant 1.000000e+00 : f32
    %553 = vector.broadcast %cst_312 : f32 to vector<8x32xf32>
    %554 = arith.addf %553, %552 : vector<8x32xf32>
    %555 = arith.divf %553, %554 : vector<8x32xf32>
    %556 = arith.mulf %541, %459 : vector<8x32xf32>
    %557 = arith.mulf %532, %546 : vector<8x32xf32>
    %558 = arith.addf %556, %557 : vector<8x32xf32>
    %559 = math.tanh %558 : vector<8x32xf32>
    %560 = arith.mulf %555, %559 : vector<8x32xf32>
    %c0_313 = arith.constant 0 : index
    %c0_314 = arith.constant 0 : index
    %c0_315 = arith.constant 0 : index
    %561 = vector.load %arg10[%c0_313, %c0_314, %c0_315] : memref<9x8x32xf32, #tpu.memory_space<vmem>>, vector<7x8x32xf32>
    %c0_316 = arith.constant 0 : index
    %c0_317 = arith.constant 0 : index
    %c0_318 = arith.constant 0 : index
    %562 = vector.load %arg11[%c0_316, %c0_317, %c0_318] : memref<9x8x1xf32, #tpu.memory_space<vmem>>, vector<7x8x1xf32>
    %563 = tpu.iota {dimensions = array<i32: 0>} : vector<7x8x1xi32>
    %cst_319 = arith.constant dense<0xFF800000> : vector<8x1xf32>
    %564 = vector.multi_reduction <maximumf>, %562, %cst_319 [0] : vector<7x8x1xf32> to vector<8x1xf32>
    %565 = vector.shape_cast %564 : vector<8x1xf32> to vector<1x8x1xf32>
    %566 = vector.broadcast %565 : vector<1x8x1xf32> to vector<7x8x1xf32>
    %567 = arith.cmpf oge, %562, %566 : vector<7x8x1xf32>
    %c7_i32 = arith.constant 7 : i32
    %568 = vector.broadcast %c7_i32 : i32 to vector<7x8x1xi32>
    %569 = arith.select %567, %563, %568 : vector<7x8x1xi1>, vector<7x8x1xi32>
    %cst_320 = arith.constant dense<2147483647> : vector<8x1xi32>
    %570 = vector.multi_reduction <minsi>, %569, %cst_320 [0] : vector<7x8x1xi32> to vector<8x1xi32>
    %571 = vector.shape_cast %570 : vector<8x1xi32> to vector<1x8x1xi32>
    %572 = vector.broadcast %571 : vector<1x8x1xi32> to vector<7x8x1xi32>
    %573 = arith.cmpi eq, %563, %572 : vector<7x8x1xi32>
    %cst_321 = arith.constant -1.000000e+30 : f32
    %574 = vector.broadcast %cst_321 : f32 to vector<7x8x1xf32>
    %575 = arith.select %573, %574, %562 : vector<7x8x1xi1>, vector<7x8x1xf32>
    %cst_322 = arith.constant dense<0xFF800000> : vector<8x1xf32>
    %576 = vector.multi_reduction <maximumf>, %575, %cst_322 [0] : vector<7x8x1xf32> to vector<8x1xf32>
    %577 = vector.shape_cast %576 : vector<8x1xf32> to vector<1x8x1xf32>
    %578 = vector.broadcast %577 : vector<1x8x1xf32> to vector<7x8x1xf32>
    %579 = arith.cmpf oge, %575, %578 : vector<7x8x1xf32>
    %c7_i32_323 = arith.constant 7 : i32
    %580 = vector.broadcast %c7_i32_323 : i32 to vector<7x8x1xi32>
    %581 = arith.select %579, %563, %580 : vector<7x8x1xi1>, vector<7x8x1xi32>
    %cst_324 = arith.constant dense<2147483647> : vector<8x1xi32>
    %582 = vector.multi_reduction <minsi>, %581, %cst_324 [0] : vector<7x8x1xi32> to vector<8x1xi32>
    %583 = vector.shape_cast %582 : vector<8x1xi32> to vector<1x8x1xi32>
    %584 = vector.broadcast %583 : vector<1x8x1xi32> to vector<7x8x1xi32>
    %585 = arith.cmpi eq, %563, %584 : vector<7x8x1xi32>
    %cst_325 = arith.constant -1.000000e+30 : f32
    %586 = vector.broadcast %cst_325 : f32 to vector<7x8x1xf32>
    %587 = arith.select %585, %586, %575 : vector<7x8x1xi1>, vector<7x8x1xf32>
    %cst_326 = arith.constant dense<0xFF800000> : vector<8x1xf32>
    %588 = vector.multi_reduction <maximumf>, %587, %cst_326 [0] : vector<7x8x1xf32> to vector<8x1xf32>
    %589 = vector.shape_cast %588 : vector<8x1xf32> to vector<1x8x1xf32>
    %cst_327 = arith.constant 1.000000e-07 : f32
    %590 = vector.broadcast %cst_327 : f32 to vector<1x8x1xf32>
    %591 = arith.addf %589, %590 : vector<1x8x1xf32>
    %592 = vector.broadcast %591 : vector<1x8x1xf32> to vector<7x8x1xf32>
    %593 = arith.subf %562, %592 : vector<7x8x1xf32>
    %cst_328 = arith.constant 0.000000e+00 : f32
    %594 = vector.broadcast %cst_328 : f32 to vector<7x8x1xf32>
    %595 = arith.maximumf %593, %594 : vector<7x8x1xf32>
    %cst_329 = arith.constant dense<0.000000e+00> : vector<8x1xf32>
    %596 = vector.multi_reduction <add>, %595, %cst_329 [0] : vector<7x8x1xf32> to vector<8x1xf32>
    %597 = vector.shape_cast %596 : vector<8x1xf32> to vector<1x8x1xf32>
    %cst_330 = arith.constant 1.000000e-07 : f32
    %598 = vector.broadcast %cst_330 : f32 to vector<1x8x1xf32>
    %599 = arith.addf %597, %598 : vector<1x8x1xf32>
    %600 = vector.broadcast %599 : vector<1x8x1xf32> to vector<7x8x1xf32>
    %601 = arith.divf %595, %600 : vector<7x8x1xf32>
    %602 = vector.broadcast %601 : vector<7x8x1xf32> to vector<7x8x32xf32>
    %603 = arith.mulf %602, %561 : vector<7x8x32xf32>
    %cst_331 = arith.constant dense<0.000000e+00> : vector<8x32xf32>
    %604 = vector.multi_reduction <add>, %603, %cst_331 [0] : vector<7x8x32xf32> to vector<8x32xf32>
    %605 = arith.addf %560, %604 : vector<8x32xf32>
    %c6_332 = arith.constant 6 : index
    %c0_333 = arith.constant 0 : index
    %c0_334 = arith.constant 0 : index
    %606 = vector.load %arg8[%c6_332, %c0_333, %c0_334] : memref<8x8x32xf32, #tpu.memory_space<vmem>>, vector<1x8x32xf32>
    %607 = vector.shape_cast %606 : vector<1x8x32xf32> to vector<8x32xf32>
    %608 = vector.shape_cast %605 : vector<8x32xf32> to vector<1x8x32xf32>
    tpu.vector_store %arg8[%c6_332, %c0_333, %c0_334], %608 {strides = array<i32>} : memref<8x8x32xf32, #tpu.memory_space<vmem>>, vector<1x8x32xf32>,
    %c6_335 = arith.constant 6 : index
    %c0_336 = arith.constant 0 : index
    %c0_337 = arith.constant 0 : index
    %609 = vector.load %arg9[%c6_335, %c0_336, %c0_337] : memref<8x8x32xf32, #tpu.memory_space<vmem>>, vector<1x8x32xf32>
    %610 = vector.shape_cast %609 : vector<1x8x32xf32> to vector<8x32xf32>
    %611 = vector.shape_cast %604 : vector<8x32xf32> to vector<1x8x32xf32>
    tpu.vector_store %arg9[%c6_335, %c0_336, %c0_337], %611 {strides = array<i32>} : memref<8x8x32xf32, #tpu.memory_space<vmem>>, vector<1x8x32xf32>,
    %c7 = arith.constant 7 : index
    %c0_338 = arith.constant 0 : index
    %c0_339 = arith.constant 0 : index
    %612 = vector.load %arg10[%c7, %c0_338, %c0_339] : memref<9x8x32xf32, #tpu.memory_space<vmem>>, vector<1x8x32xf32>
    %613 = vector.shape_cast %612 : vector<1x8x32xf32> to vector<8x32xf32>
    %614 = vector.shape_cast %605 : vector<8x32xf32> to vector<1x8x32xf32>
    tpu.vector_store %arg10[%c7, %c0_338, %c0_339], %614 {strides = array<i32>} : memref<9x8x32xf32, #tpu.memory_space<vmem>>, vector<1x8x32xf32>,
    %615 = math.tanh %605 : vector<8x32xf32>
    %616 = vector.broadcast %9 : vector<1x32xf32> to vector<8x32xf32>
    %617 = arith.mulf %615, %616 : vector<8x32xf32>
    %cst_340 = arith.constant dense<0.000000e+00> : vector<8xf32>
    %618 = vector.multi_reduction <add>, %617, %cst_340 [1] : vector<8x32xf32> to vector<8xf32>
    %619 = vector.shape_cast %618 : vector<8xf32> to vector<8x1xf32>
    %c7_341 = arith.constant 7 : index
    %c0_342 = arith.constant 0 : index
    %c0_343 = arith.constant 0 : index
    %620 = vector.load %arg11[%c7_341, %c0_342, %c0_343] : memref<9x8x1xf32, #tpu.memory_space<vmem>>, vector<1x8x1xf32>
    %621 = vector.shape_cast %620 : vector<1x8x1xf32> to vector<8x1xf32>
    %622 = vector.shape_cast %619 : vector<8x1xf32> to vector<1x8x1xf32>
    tpu.vector_store %arg11[%c7_341, %c0_342, %c0_343], %622 {strides = array<i32>} : memref<9x8x1xf32, #tpu.memory_space<vmem>>, vector<1x8x1xf32>,
    %c7_344 = arith.constant 7 : index
    %c0_345 = arith.constant 0 : index
    %c0_346 = arith.constant 0 : index
    %623 = vector.load %arg1[%c7_344, %c0_345, %c0_346] : memref<8x8x32xf32, #tpu.memory_space<vmem>>, vector<1x8x32xf32>
    %624 = vector.shape_cast %623 : vector<1x8x32xf32> to vector<8x32xf32>
    %cst_347 = arith.constant dense<0.000000e+00> : vector<8x32xf32>
    %625 = tpu.matmul %605, %1, %cst_347 {dimension_numbers = #tpu.dot_dimension_numbers<[1], [0], [0], [1], [0, 0, 1, 1], [], []>, precision = #tpu.contract_precision<fp32>} : vector<8x32xf32>, vector<32x32xf32>, vector<8x32xf32> -> vector<8x32xf32>
    %626 = arith.addf %624, %625 : vector<8x32xf32>
    %627 = arith.negf %626 : vector<8x32xf32>
    %628 = math.exp %627 : vector<8x32xf32>
    %cst_348 = arith.constant 1.000000e+00 : f32
    %629 = vector.broadcast %cst_348 : f32 to vector<8x32xf32>
    %630 = arith.addf %629, %628 : vector<8x32xf32>
    %631 = arith.divf %629, %630 : vector<8x32xf32>
    %c7_349 = arith.constant 7 : index
    %c0_350 = arith.constant 0 : index
    %c0_351 = arith.constant 0 : index
    %632 = vector.load %arg2[%c7_349, %c0_350, %c0_351] : memref<8x8x32xf32, #tpu.memory_space<vmem>>, vector<1x8x32xf32>
    %633 = vector.shape_cast %632 : vector<1x8x32xf32> to vector<8x32xf32>
    %cst_352 = arith.constant dense<0.000000e+00> : vector<8x32xf32>
    %634 = tpu.matmul %605, %3, %cst_352 {dimension_numbers = #tpu.dot_dimension_numbers<[1], [0], [0], [1], [0, 0, 1, 1], [], []>, precision = #tpu.contract_precision<fp32>} : vector<8x32xf32>, vector<32x32xf32>, vector<8x32xf32> -> vector<8x32xf32>
    %635 = arith.addf %633, %634 : vector<8x32xf32>
    %636 = arith.negf %635 : vector<8x32xf32>
    %637 = math.exp %636 : vector<8x32xf32>
    %cst_353 = arith.constant 1.000000e+00 : f32
    %638 = vector.broadcast %cst_353 : f32 to vector<8x32xf32>
    %639 = arith.addf %638, %637 : vector<8x32xf32>
    %640 = arith.divf %638, %639 : vector<8x32xf32>
    %c7_354 = arith.constant 7 : index
    %c0_355 = arith.constant 0 : index
    %c0_356 = arith.constant 0 : index
    %641 = vector.load %arg3[%c7_354, %c0_355, %c0_356] : memref<8x8x32xf32, #tpu.memory_space<vmem>>, vector<1x8x32xf32>
    %642 = vector.shape_cast %641 : vector<1x8x32xf32> to vector<8x32xf32>
    %cst_357 = arith.constant dense<0.000000e+00> : vector<8x32xf32>
    %643 = tpu.matmul %605, %5, %cst_357 {dimension_numbers = #tpu.dot_dimension_numbers<[1], [0], [0], [1], [0, 0, 1, 1], [], []>, precision = #tpu.contract_precision<fp32>} : vector<8x32xf32>, vector<32x32xf32>, vector<8x32xf32> -> vector<8x32xf32>
    %644 = arith.addf %642, %643 : vector<8x32xf32>
    %645 = math.tanh %644 : vector<8x32xf32>
    %c7_358 = arith.constant 7 : index
    %c0_359 = arith.constant 0 : index
    %c0_360 = arith.constant 0 : index
    %646 = vector.load %arg4[%c7_358, %c0_359, %c0_360] : memref<8x8x32xf32, #tpu.memory_space<vmem>>, vector<1x8x32xf32>
    %647 = vector.shape_cast %646 : vector<1x8x32xf32> to vector<8x32xf32>
    %cst_361 = arith.constant dense<0.000000e+00> : vector<8x32xf32>
    %648 = tpu.matmul %605, %7, %cst_361 {dimension_numbers = #tpu.dot_dimension_numbers<[1], [0], [0], [1], [0, 0, 1, 1], [], []>, precision = #tpu.contract_precision<fp32>} : vector<8x32xf32>, vector<32x32xf32>, vector<8x32xf32> -> vector<8x32xf32>
    %649 = arith.addf %647, %648 : vector<8x32xf32>
    %650 = arith.negf %649 : vector<8x32xf32>
    %651 = math.exp %650 : vector<8x32xf32>
    %cst_362 = arith.constant 1.000000e+00 : f32
    %652 = vector.broadcast %cst_362 : f32 to vector<8x32xf32>
    %653 = arith.addf %652, %651 : vector<8x32xf32>
    %654 = arith.divf %652, %653 : vector<8x32xf32>
    %655 = arith.mulf %640, %558 : vector<8x32xf32>
    %656 = arith.mulf %631, %645 : vector<8x32xf32>
    %657 = arith.addf %655, %656 : vector<8x32xf32>
    %658 = math.tanh %657 : vector<8x32xf32>
    %659 = arith.mulf %654, %658 : vector<8x32xf32>
    %c0_363 = arith.constant 0 : index
    %c0_364 = arith.constant 0 : index
    %c0_365 = arith.constant 0 : index
    %660 = vector.load %arg10[%c0_363, %c0_364, %c0_365] : memref<9x8x32xf32, #tpu.memory_space<vmem>>, vector<8x8x32xf32>
    %c0_366 = arith.constant 0 : index
    %c0_367 = arith.constant 0 : index
    %c0_368 = arith.constant 0 : index
    %661 = vector.load %arg11[%c0_366, %c0_367, %c0_368] : memref<9x8x1xf32, #tpu.memory_space<vmem>>, vector<8x8x1xf32>
    %662 = tpu.iota {dimensions = array<i32: 0>} : vector<8x8x1xi32>
    %cst_369 = arith.constant dense<0xFF800000> : vector<8x1xf32>
    %663 = vector.multi_reduction <maximumf>, %661, %cst_369 [0] : vector<8x8x1xf32> to vector<8x1xf32>
    %664 = vector.shape_cast %663 : vector<8x1xf32> to vector<1x8x1xf32>
    %665 = vector.broadcast %664 : vector<1x8x1xf32> to vector<8x8x1xf32>
    %666 = arith.cmpf oge, %661, %665 : vector<8x8x1xf32>
    %c8_i32 = arith.constant 8 : i32
    %667 = vector.broadcast %c8_i32 : i32 to vector<8x8x1xi32>
    %668 = arith.select %666, %662, %667 : vector<8x8x1xi1>, vector<8x8x1xi32>
    %cst_370 = arith.constant dense<2147483647> : vector<8x1xi32>
    %669 = vector.multi_reduction <minsi>, %668, %cst_370 [0] : vector<8x8x1xi32> to vector<8x1xi32>
    %670 = vector.shape_cast %669 : vector<8x1xi32> to vector<1x8x1xi32>
    %671 = vector.broadcast %670 : vector<1x8x1xi32> to vector<8x8x1xi32>
    %672 = arith.cmpi eq, %662, %671 : vector<8x8x1xi32>
    %cst_371 = arith.constant -1.000000e+30 : f32
    %673 = vector.broadcast %cst_371 : f32 to vector<8x8x1xf32>
    %674 = arith.select %672, %673, %661 : vector<8x8x1xi1>, vector<8x8x1xf32>
    %cst_372 = arith.constant dense<0xFF800000> : vector<8x1xf32>
    %675 = vector.multi_reduction <maximumf>, %674, %cst_372 [0] : vector<8x8x1xf32> to vector<8x1xf32>
    %676 = vector.shape_cast %675 : vector<8x1xf32> to vector<1x8x1xf32>
    %677 = vector.broadcast %676 : vector<1x8x1xf32> to vector<8x8x1xf32>
    %678 = arith.cmpf oge, %674, %677 : vector<8x8x1xf32>
    %c8_i32_373 = arith.constant 8 : i32
    %679 = vector.broadcast %c8_i32_373 : i32 to vector<8x8x1xi32>
    %680 = arith.select %678, %662, %679 : vector<8x8x1xi1>, vector<8x8x1xi32>
    %cst_374 = arith.constant dense<2147483647> : vector<8x1xi32>
    %681 = vector.multi_reduction <minsi>, %680, %cst_374 [0] : vector<8x8x1xi32> to vector<8x1xi32>
    %682 = vector.shape_cast %681 : vector<8x1xi32> to vector<1x8x1xi32>
    %683 = vector.broadcast %682 : vector<1x8x1xi32> to vector<8x8x1xi32>
    %684 = arith.cmpi eq, %662, %683 : vector<8x8x1xi32>
    %cst_375 = arith.constant -1.000000e+30 : f32
    %685 = vector.broadcast %cst_375 : f32 to vector<8x8x1xf32>
    %686 = arith.select %684, %685, %674 : vector<8x8x1xi1>, vector<8x8x1xf32>
    %cst_376 = arith.constant dense<0xFF800000> : vector<8x1xf32>
    %687 = vector.multi_reduction <maximumf>, %686, %cst_376 [0] : vector<8x8x1xf32> to vector<8x1xf32>
    %688 = vector.shape_cast %687 : vector<8x1xf32> to vector<1x8x1xf32>
    %cst_377 = arith.constant 1.000000e-07 : f32
    %689 = vector.broadcast %cst_377 : f32 to vector<1x8x1xf32>
    %690 = arith.addf %688, %689 : vector<1x8x1xf32>
    %691 = vector.broadcast %690 : vector<1x8x1xf32> to vector<8x8x1xf32>
    %692 = arith.subf %661, %691 : vector<8x8x1xf32>
    %cst_378 = arith.constant 0.000000e+00 : f32
    %693 = vector.broadcast %cst_378 : f32 to vector<8x8x1xf32>
    %694 = arith.maximumf %692, %693 : vector<8x8x1xf32>
    %cst_379 = arith.constant dense<0.000000e+00> : vector<8x1xf32>
    %695 = vector.multi_reduction <add>, %694, %cst_379 [0] : vector<8x8x1xf32> to vector<8x1xf32>
    %696 = vector.shape_cast %695 : vector<8x1xf32> to vector<1x8x1xf32>
    %cst_380 = arith.constant 1.000000e-07 : f32
    %697 = vector.broadcast %cst_380 : f32 to vector<1x8x1xf32>
    %698 = arith.addf %696, %697 : vector<1x8x1xf32>
    %699 = vector.broadcast %698 : vector<1x8x1xf32> to vector<8x8x1xf32>
    %700 = arith.divf %694, %699 : vector<8x8x1xf32>
    %701 = vector.broadcast %700 : vector<8x8x1xf32> to vector<8x8x32xf32>
    %702 = arith.mulf %701, %660 : vector<8x8x32xf32>
    %cst_381 = arith.constant dense<0.000000e+00> : vector<8x32xf32>
    %703 = vector.multi_reduction <add>, %702, %cst_381 [0] : vector<8x8x32xf32> to vector<8x32xf32>
    %704 = arith.addf %659, %703 : vector<8x32xf32>
    %c7_382 = arith.constant 7 : index
    %c0_383 = arith.constant 0 : index
    %c0_384 = arith.constant 0 : index
    %705 = vector.load %arg8[%c7_382, %c0_383, %c0_384] : memref<8x8x32xf32, #tpu.memory_space<vmem>>, vector<1x8x32xf32>
    %706 = vector.shape_cast %705 : vector<1x8x32xf32> to vector<8x32xf32>
    %707 = vector.shape_cast %704 : vector<8x32xf32> to vector<1x8x32xf32>
    tpu.vector_store %arg8[%c7_382, %c0_383, %c0_384], %707 {strides = array<i32>} : memref<8x8x32xf32, #tpu.memory_space<vmem>>, vector<1x8x32xf32>,
    %c7_385 = arith.constant 7 : index
    %c0_386 = arith.constant 0 : index
    %c0_387 = arith.constant 0 : index
    %708 = vector.load %arg9[%c7_385, %c0_386, %c0_387] : memref<8x8x32xf32, #tpu.memory_space<vmem>>, vector<1x8x32xf32>
    %709 = vector.shape_cast %708 : vector<1x8x32xf32> to vector<8x32xf32>
    %710 = vector.shape_cast %703 : vector<8x32xf32> to vector<1x8x32xf32>
    tpu.vector_store %arg9[%c7_385, %c0_386, %c0_387], %710 {strides = array<i32>} : memref<8x8x32xf32, #tpu.memory_space<vmem>>, vector<1x8x32xf32>,
    %c8 = arith.constant 8 : index
    %c0_388 = arith.constant 0 : index
    %c0_389 = arith.constant 0 : index
    %711 = vector.load %arg10[%c8, %c0_388, %c0_389] : memref<9x8x32xf32, #tpu.memory_space<vmem>>, vector<1x8x32xf32>
    %712 = vector.shape_cast %711 : vector<1x8x32xf32> to vector<8x32xf32>
    %713 = vector.shape_cast %704 : vector<8x32xf32> to vector<1x8x32xf32>
    tpu.vector_store %arg10[%c8, %c0_388, %c0_389], %713 {strides = array<i32>} : memref<9x8x32xf32, #tpu.memory_space<vmem>>, vector<1x8x32xf32>,
    %714 = math.tanh %704 : vector<8x32xf32>
    %715 = vector.broadcast %9 : vector<1x32xf32> to vector<8x32xf32>
    %716 = arith.mulf %714, %715 : vector<8x32xf32>
    %cst_390 = arith.constant dense<0.000000e+00> : vector<8xf32>
    %717 = vector.multi_reduction <add>, %716, %cst_390 [1] : vector<8x32xf32> to vector<8xf32>
    %718 = vector.shape_cast %717 : vector<8xf32> to vector<8x1xf32>
    %c8_391 = arith.constant 8 : index
    %c0_392 = arith.constant 0 : index
    %c0_393 = arith.constant 0 : index
    %719 = vector.load %arg11[%c8_391, %c0_392, %c0_393] : memref<9x8x1xf32, #tpu.memory_space<vmem>>, vector<1x8x1xf32>
    %720 = vector.shape_cast %719 : vector<1x8x1xf32> to vector<8x1xf32>
    %721 = vector.shape_cast %718 : vector<8x1xf32> to vector<1x8x1xf32>
    tpu.vector_store %arg11[%c8_391, %c0_392, %c0_393], %721 {strides = array<i32>} : memref<9x8x1xf32, #tpu.memory_space<vmem>>, vector<1x8x1xf32>,
    return
  }
  func.func @transform_0(%arg0: i32) -> (i32, i32, i32) {
    %c0_i32 = arith.constant 0 : i32
    %c0_i32_0 = arith.constant 0 : i32
    %c0_i32_1 = arith.constant 0 : i32
    %c0_i32_2 = arith.constant 0 : i32
    return %c0_i32, %c0_i32_0, %c0_i32_1 : i32, i32, i32
  }
  func.func @transform_1(%arg0: i32) -> (i32, i32, i32) {
    %c0_i32 = arith.constant 0 : i32
    %c0_i32_0 = arith.constant 0 : i32
    %c0_i32_1 = arith.constant 0 : i32
    %c0_i32_2 = arith.constant 0 : i32
    return %c0_i32, %c0_i32_0, %c0_i32_1 : i32, i32, i32
  }
  func.func @transform_2(%arg0: i32) -> (i32, i32, i32) {
    %c0_i32 = arith.constant 0 : i32
    %c0_i32_0 = arith.constant 0 : i32
    %c0_i32_1 = arith.constant 0 : i32
    %c0_i32_2 = arith.constant 0 : i32
    return %c0_i32, %c0_i32_0, %c0_i32_1 : i32, i32, i32
  }
  func.func @transform_3(%arg0: i32) -> (i32, i32, i32) {
    %c0_i32 = arith.constant 0 : i32
    %c0_i32_0 = arith.constant 0 : i32
    %c0_i32_1 = arith.constant 0 : i32
    %c0_i32_2 = arith.constant 0 : i32
    return %c0_i32, %c0_i32_0, %c0_i32_1 : i32, i32, i32
  }
  func.func @transform_4(%arg0: i32) -> (i32, i32, i32) {
    %c0_i32 = arith.constant 0 : i32
    %c0_i32_0 = arith.constant 0 : i32
    %c0_i32_1 = arith.constant 0 : i32
    %c0_i32_2 = arith.constant 0 : i32
    return %c0_i32, %c0_i32_0, %c0_i32_1 : i32, i32, i32
  }
  func.func @transform_5(%arg0: i32) -> (i32, i32) {
    %c0_i32 = arith.constant 0 : i32
    %c0_i32_0 = arith.constant 0 : i32
    %c0_i32_1 = arith.constant 0 : i32
    return %c0_i32, %c0_i32_0 : i32, i32
  }
  func.func @transform_6(%arg0: i32) -> (i32, i32) {
    %c0_i32 = arith.constant 0 : i32
    %c0_i32_0 = arith.constant 0 : i32
    %c0_i32_1 = arith.constant 0 : i32
    return %c0_i32, %c0_i32_0 : i32, i32
  }
  func.func @transform_7(%arg0: i32) -> (i32, i32, i32) {
    %c0_i32 = arith.constant 0 : i32
    %c0_i32_0 = arith.constant 0 : i32
    %c0_i32_1 = arith.constant 0 : i32
    %c0_i32_2 = arith.constant 0 : i32
    return %c0_i32, %c0_i32_0, %c0_i32_1 : i32, i32, i32
  }
  func.func @transform_8(%arg0: i32) -> (i32, i32, i32) {
    %c0_i32 = arith.constant 0 : i32
    %c0_i32_0 = arith.constant 0 : i32
    %c0_i32_1 = arith.constant 0 : i32
    %c0_i32_2 = arith.constant 0 : i32
    return %c0_i32, %c0_i32_0, %c0_i32_1 : i32, i32, i32
  }
}

</mosaic_0001>

<bundles_post_ra>
// kernel: tpu_custom_call.1
= control target key start
LH: loop header
LB: loop body
LE: loop exit
PB: predicated region body
PF: predicated region fallthrough
CT: control target
= control target key end

     0   :  { %14 = vsyncpa [#allocation5], 0  ;;  %s24212_s0 = inlined_call_operand.hbm [shape: f32[8,8,32], index: 0, kind: input, shape index: {}]   ;;  %s24213_s1 = inlined_call_operand.hbm [shape: f32[8,8,32], index: 1, kind: input, shape index: {}]   ;;  %s24214_s2 = inlined_call_operand.hbm [shape: f32[8,8,32], index: 2, kind: input, shape index: {}]   ;;  %s24215_s3 = inlined_call_operand.hbm [shape: f32[8,8,32], index: 3, kind: input, shape index: {}]   ;;  %s24216_s4 = inlined_call_operand.hbm [shape: f32[4,32,32], index: 4, kind: input, shape index: {}]   ;;  %s24217_s5 = inlined_call_operand.vmem [shape: f32[1,32], index: 5, kind: input, shape index: {}]   ;;  %s24218_s6 = inlined_call_operand.vmem [shape: f32[1,32], index: 6, kind: input, shape index: {}]   ;;  %s24219_s7 = inlined_call_operand.hbm [shape: f32[8,8,32], index: 7, kind: output, shape index: {0}]   ;;  %s24220_s8 = inlined_call_operand.hbm [shape: f32[8,8,32], index: 8, kind: output, shape index: {1}]  }
   0x1   :  { %15 = vsyncpa [#allocation8], 0 }
   0x2   :  { %16 = vsyncpa [#allocation11], 0 }
   0x3   :  { %17 = vsyncpa [#allocation6], 0 }
   0x4   :  { %18 = vsyncpa [#allocation15], 0  ;;  %s21827_s27 = smov [#allocation7]   ;;  %s21828_s29 = smov [#allocation10]  }
   0x5   :  { %s36_s28 = sshll.u32 %s21827_s27, 4  ;;  %s60_s30 = sshll.u32 %s21828_s29, 4  ;;  %s37_s28 = int_to_ptr.vmem [resolvable:$true] %s36_s28  ;;  %s21890_s30 = int_to_ptr.vmem [resolvable:$true] %s60_s30 }
   0x6   :  { %s21663_s11 = scalar_lea.hbm %s24213_s1, 1024 }
   0x7   :  { %p21664_p0 = scmp.ne.s32.totalorder %s24213_s1, %s21663_s11  ;;  %p21667_p1 = scmp.lt.u32.totalorder %s21663_s11, %s24213_s1 }
   0x9   :  { %p21669_p2 = pnand %p21667_p1, %p21664_p0 }
   0xb   :  { %21672 = shalt.err (!%p21669_p2)
}
   0xc   :  { %s21673_s16 = scalar_lea.vmem %s37_s28, 1024  ;;  %p21678_p4 = scmp.lt.s32.totalorder %s37_s28, %s37_s28 }
   0xd   :  { %p21674_p3 = scmp.ne.s32.totalorder %s37_s28, %s21673_s16  ;;  %p21679_p5 = scmp.lt.s32.totalorder %s21673_s16, %s21673_s16 }
   0xf   :  { %p21680_p6 = por %p21679_p5, %p21678_p4 }
  0x11   :  { %p21681_p7 = pnand %p21680_p6, %p21674_p3 }
  0x13   :  { %21684 = shalt.err (!%p21681_p7)
}
  0x14   :  { %s21829_s17 = smov 128   ;;  %s21830_s18 = smov 8  }
  0x15   :  { %42 = dma.hbm_to_vmem [thread:$0]  %s24213_s1, 1024, %s37_s28, [#allocation8], %s21829_s17, %s21829_s17, %s21830_s18  }
  0x16   :  { %s21685_s23 = scalar_lea.hbm %s24215_s3, 1024 }
  0x17   :  { %p21686_p8 = scmp.ne.s32.totalorder %s24215_s3, %s21685_s23  ;;  %p21689_p9 = scmp.lt.u32.totalorder %s21685_s23, %s24215_s3 }
  0x19   :  { %p21691_p10 = pnand %p21689_p9, %p21686_p8 }
  0x1b   :  { %21694 = shalt.err (!%p21691_p10)
}
  0x1c   :  { %s21695_s29 = scalar_lea.vmem %s21890_s30, 1024  ;;  %p21700_p12 = scmp.lt.s32.totalorder %s21890_s30, %s21890_s30 }
  0x1d   :  { %p21696_p11 = scmp.ne.s32.totalorder %s21890_s30, %s21695_s29  ;;  %p21701_p13 = scmp.lt.s32.totalorder %s21695_s29, %s21695_s29 }
  0x1f   :  { %p21702_p0 = por %p21701_p13, %p21700_p12 }
  0x21   :  { %p21703_p1 = pnand %p21702_p0, %p21696_p11 }
  0x23   :  { %21706 = shalt.err (!%p21703_p1)
}
  0x24   :  { %66 = dma.hbm_to_vmem [thread:$0]  %s24215_s3, 1024, %s21890_s30, [#allocation11], %s21829_s17, %s21829_s17, %s21830_s18  }
  0x25   :  { %s21831_s9 = smov [#allocation4]   ;;  %s21832_s11 = smov [#allocation9]  }
  0x26   :  { %s24_s10 = sshll.u32 %s21831_s9, 4  ;;  %s48_s12 = sshll.u32 %s21832_s11, 4  ;;  %s25_s10 = int_to_ptr.vmem [resolvable:$true] %s24_s10  ;;  %s21927_s12 = int_to_ptr.vmem [resolvable:$true] %s48_s12 }
  0x27   :  { %s21707_s15 = scalar_lea.hbm %s24212_s0, 1024 }
  0x28   :  { %p21708_p2 = scmp.ne.s32.totalorder %s24212_s0, %s21707_s15  ;;  %p21711_p3 = scmp.lt.u32.totalorder %s21707_s15, %s24212_s0 }
  0x2a   :  { %p21713_p4 = pnand %p21711_p3, %p21708_p2 }
  0x2c   :  { %21716 = shalt.err (!%p21713_p4)
}
  0x2d   :  { %s21717_s3 = scalar_lea.vmem %s25_s10, 1024  ;;  %p21722_p6 = scmp.lt.s32.totalorder %s25_s10, %s25_s10 }
  0x2e   :  { %p21718_p5 = scmp.ne.s32.totalorder %s25_s10, %s21717_s3  ;;  %p21723_p7 = scmp.lt.s32.totalorder %s21717_s3, %s21717_s3 }
  0x30   :  { %p21724_p8 = por %p21723_p7, %p21722_p6 }
  0x32   :  { %p21725_p9 = pnand %p21724_p8, %p21718_p5 }
  0x34   :  { %21728 = shalt.err (!%p21725_p9)
}
  0x35   :  { %30 = dma.hbm_to_vmem [thread:$0]  %s24212_s0, 1024, %s25_s10, [#allocation5], %s21829_s17, %s21829_s17, %s21830_s18  }
  0x36   :  { %s21729_s25 = scalar_lea.hbm %s24214_s2, 1024 }
  0x37   :  { %p21730_p10 = scmp.ne.s32.totalorder %s24214_s2, %s21729_s25  ;;  %p21733_p11 = scmp.lt.u32.totalorder %s21729_s25, %s24214_s2 }
  0x39   :  { %p21735_p12 = pnand %p21733_p11, %p21730_p10 }
  0x3b   :  { %21738 = shalt.err (!%p21735_p12)
}
  0x3c   :  { %s21739_s28 = scalar_lea.vmem %s21927_s12, 1024  ;;  %p21744_p0 = scmp.lt.s32.totalorder %s21927_s12, %s21927_s12 }
  0x3d   :  { %p21740_p13 = scmp.ne.s32.totalorder %s21927_s12, %s21739_s28  ;;  %p21745_p1 = scmp.lt.s32.totalorder %s21739_s28, %s21739_s28 }
  0x3f   :  { %p21746_p2 = por %p21745_p1, %p21744_p0 }
  0x41   :  { %p21747_p3 = pnand %p21746_p2, %p21740_p13 }
  0x43   :  { %21750 = shalt.err (!%p21747_p3)
}
  0x44   :  { %54 = dma.hbm_to_vmem [thread:$0]  %s24214_s2, 1024, %s21927_s12, [#allocation8], %s21829_s17, %s21829_s17, %s21830_s18  }
  0x45   :  { %s21833_s10 = smov [#allocation12]   ;;  %s21751_s15 = scalar_lea.hbm %s24216_s4, 2048 }
  0x46   :  { %s72_s11 = sshll.u32 %s21833_s10, 4  ;;  %p21752_p4 = scmp.ne.s32.totalorder %s24216_s4, %s21751_s15  ;;  %s73_s11 = int_to_ptr.vmem [resolvable:$true] %s72_s11 }
  0x47   :  { %p21755_p5 = scmp.lt.u32.totalorder %s21751_s15, %s24216_s4 }
  0x49   :  { %p21757_p6 = pnand %p21755_p5, %p21752_p4 }
  0x4b   :  { %21760 = shalt.err (!%p21757_p6)
}
  0x4c   :  { %s21761_s3 = scalar_lea.vmem %s73_s11, 2048  ;;  %p21766_p8 = scmp.lt.s32.totalorder %s73_s11, %s73_s11 }
  0x4d   :  { %p21762_p7 = scmp.ne.s32.totalorder %s73_s11, %s21761_s3  ;;  %p21767_p9 = scmp.lt.s32.totalorder %s21761_s3, %s21761_s3 }
  0x4f   :  { %p21768_p10 = por %p21767_p9, %p21766_p8 }
  0x51   :  { %p21769_p11 = pnand %p21768_p10, %p21762_p7 }
  0x53   :  { %21772 = shalt.err (!%p21769_p11)
}
  0x54   :  { %78 = dma.hbm_to_vmem [thread:$0]  %s24216_s4, 2048, %s73_s11, [#allocation11], %s21829_s17, %s21829_s17, %s21830_s18  }
  0x55   :  { %21817 = dma.done.wait [#allocation5], 1024  }
  0x56   :  { %21818 = vsyncadd [#allocation5], 4294966272 }
  0x57   :  { %21819 = dma.done.wait [#allocation8], 2048  }
  0x58   :  { %21820 = vsyncadd [#allocation8], 4294965248 }
  0x59   :  { %21821 = dma.done.wait [#allocation11], 3072  }
  0x5a   :  { %21822 = vsyncadd [#allocation11], 4294964224  ;;  %v24221_v0 = vmov 0.0|0.0   ;;  %vm21835_vm0 = vmmov 0   ;;  %v24223_v1 = vmov 0.0   ;;  %v98_v2 = vld [vmem:[#allocation12] sm:$0xff] }
  0x5b   :  { %20313 = vmatprep.subr.bf16.mxu0 %v24221_v0  ;;  %20319 = vmatprep.subr.bf16.mxu1 %v24221_v0  ;;  %v99_v3 = vld [vmem:[#allocation12 + $0x8] sm:$0xff]  ;;  %v100_v4 = vld [vmem:[#allocation12 + $0x10] sm:$0xff]  ;;  %v128_v5 = vand.u32 4294901760, %v98_v2  ;;  %v101_v7 = vld [vmem:[#allocation12 + $0x18] sm:$0xff]  ;;  %vm24260_vm1 = vcmask 261120   ;;  %vm121_vm2 = vcmask 7168  }
  0x5c   :  { %18209 = vmatprep.mubr.msk.f32.mxu0 %vm21835_vm0, %v24223_v1  ;;  %18220 = vmatprep.mubr.msk.f32.mxu1 %vm21835_vm0, %v24223_v1  ;;  %v131_v6 = vand.u32 4294901760, %v99_v3  ;;  %v134_v8 = vand.u32 4294901760, %v100_v4  ;;  %v137_v9 = vand.u32 4294901760, %v101_v7  ;;  %v103_v29 = vld [vmem:[#allocation12 + $0x20] sm:$0xff]  ;;  %v104_v30 = vld [vmem:[#allocation12 + $0x28] sm:$0xff]  ;;  %v105_v36 = vld [vmem:[#allocation12 + $0x30] sm:$0xff] }
  0x5d   :  { %v208_v11 = vsub.f32 %v98_v2, %v128_v5  ;;  %v621_v34 = vand.u32 4294901760, %v103_v29  ;;  %v624_v35 = vand.u32 4294901760, %v104_v30  ;;  %v106_v37 = vld [vmem:[#allocation12 + $0x38] sm:$0xff]  ;;  %v627_v38 = vand.u32 4294901760, %v105_v36  ;;  %v108_v62 = vld [vmem:[#allocation12 + $0x40] sm:$0xff]  ;;  %v109_v63 = vld [vmem:[#allocation12 + $0x48] sm:$0xff] }
  0x5e   :  { %v21985_v10 = vpack.c.bf16 %v131_v6, %v128_v5  ;;  %v215_v12 = vsub.f32 %v99_v3, %v131_v6  ;;  %v222_v13 = vsub.f32 %v100_v4, %v134_v8  ;;  %v229_v14 = vsub.f32 %v101_v7, %v137_v9  ;;  %v110_v6 = vld [vmem:[#allocation12 + $0x50] sm:$0xff]  ;;  %v111_v7 = vld [vmem:[#allocation12 + $0x58] sm:$0xff]  ;;  %120 = vst.msk [vmem:[#allocation2] sm:$0xff] %vm24260_vm1, %v24223_v1  ;;  %s21844_s9 = smov [#allocation14]  }
  0x5f   :  { %v21988_v15 = vpack.c.bf16 %v137_v9, %v134_v8  ;;  %v209_v16 = vand.u32 4294901760, %v208_v11  ;;  %v630_v40 = vand.u32 4294901760, %v106_v37  ;;  %v22012_v41 = vsub.f32 %v103_v29, %v621_v34  ;;  %122 = vst.msk [vmem:[#allocation3] sm:$0xff] %vm121_vm2, %v24223_v1  ;;  %s17197_s10 = sshll.u32 %s21844_s9, 4  ;;  %s24175_s10 = int_to_ptr.vmem [resolvable:$true] %s17197_s10 }
  0x60   :  { %20315 = vmatpush3.bf16.msra.mxu0 %v21985_v10  ;;  %v216_v17 = vand.u32 4294901760, %v215_v12  ;;  %v223_v18 = vand.u32 4294901760, %v222_v13  ;;  %v230_v19 = vand.u32 4294901760, %v229_v14  ;;  %v21992_v26 = vpack.c.bf16 %v215_v12, %v208_v11 }
  0x61   :  { %20316 = vmatprep.subr.bf16.mxu0 %v24221_v0  ;;  %v210_v20 = vsub.f32 %v208_v11, %v209_v16  ;;  %v22002_v33 = vpack.c.bf16 %v229_v14, %v222_v13  ;;  %v22014_v42 = vsub.f32 %v104_v30, %v624_v35  ;;  %v702_v44 = vand.u32 4294901760, %v22012_v41 }
  0x62   :  { %v217_v21 = vsub.f32 %v215_v12, %v216_v17  ;;  %v224_v22 = vsub.f32 %v222_v13, %v223_v18  ;;  %v231_v23 = vsub.f32 %v229_v14, %v230_v19  ;;  %v22010_v39 = vpack.c.bf16 %v216_v17, %v209_v16 }
  0x63   :  { %v211_v24 = vand.u32 4294901760, %v210_v20  ;;  %v22020_v43 = vpack.c.bf16 %v230_v19, %v223_v18  ;;  %v709_v45 = vand.u32 4294901760, %v22014_v42  ;;  %v22026_v46 = vsub.f32 %v105_v36, %v627_v38 }
  0x64   :  { %20318 = vmatpush3.bf16.msra.mxu0 %v21988_v15  ;;  %v218_v25 = vand.u32 4294901760, %v217_v21  ;;  %v225_v27 = vand.u32 4294901760, %v224_v22  ;;  %v232_v28 = vand.u32 4294901760, %v231_v23  ;;  %v22028_v47 = vsub.f32 %v106_v37, %v630_v40 }
  0x65   :  { %20325 = vmatprep.subr.bf16.mxu0 %v24221_v0  ;;  %v22036_v48 = vpack.c.bf16 %v624_v35, %v621_v34  ;;  %v703_v49 = vsub.f32 %v22012_v41, %v702_v44  ;;  %v710_v50 = vsub.f32 %v22014_v42, %v709_v45  ;;  %v716_v51 = vand.u32 4294901760, %v22026_v46 }
  0x66   :  { %v21995_v31 = vpack.c.bf16 %v218_v25, %v211_v24  ;;  %v22000_v32 = vpack.c.bf16 %v232_v28, %v225_v27  ;;  %v723_v52 = vand.u32 4294901760, %v22028_v47  ;;  %v22048_v53 = vpack.c.bf16 %v630_v40, %v627_v38  ;;  %v113_v38 = vld [vmem:[#allocation12 + $0x60] sm:$0xff]  ;;  %v114_v40 = vld [vmem:[#allocation12 + $0x68] sm:$0xff] }
  0x67   :  { %18210 = vmatmul.mubr.f32.vlgmr.msra.gmra.mrb[0].mxu0 %v24223_v1  ;;  %v704_v54 = vand.u32 4294901760, %v703_v49  ;;  %v711_v55 = vand.u32 4294901760, %v710_v50  ;;  %v717_v56 = vsub.f32 %v22026_v46, %v716_v51  ;;  %v22066_v59 = vpack.c.bf16 %v22014_v42, %v22012_v41 }
  0x68   :  { %24261 = vst [vmem:[#allocation21_spill] sm:$0xff] %v21995_v31  ;;  %20321 = vmatpush3.bf16.msra.mxu1 %v21995_v31  ;;  %20327 = vmatpush3.bf16.msra.mxu0 %v21992_v26  ;;  %24262 = vst [vmem:[#allocation22_spill] sm:$0xff] %v22000_v32  ;;  %v724_v57 = vsub.f32 %v22028_v47, %v723_v52  ;;  %v22078_v3 = vpack.c.bf16 %v22028_v47, %v22026_v46  ;;  %v1114_v4 = vand.u32 4294901760, %v108_v62  ;;  %v115_v46 = vld [vmem:[#allocation12 + $0x70] sm:$0xff]  ;;  %v116_v47 = vld [vmem:[#allocation12 + $0x78] sm:$0xff] }
  0x69   :  { %20322 = vmatprep.subr.bf16.mxu1 %v24221_v0  ;;  %20328 = vmatprep.subr.bf16.mxu0 %v24221_v0  ;;  %v22062_v58 = vpack.c.bf16 %v711_v55, %v704_v54  ;;  %v718_v60 = vand.u32 4294901760, %v717_v56  ;;  %v1117_v5 = vand.u32 4294901760, %v109_v63  ;;  %v22086_v8 = vpack.c.bf16 %v709_v45, %v702_v44 }
  0x6a   :  { %18231 = vmatprep.mubr.msk.f32.mxu0 %vm21835_vm0, %v24223_v1  ;;  %v725_v61 = vand.u32 4294901760, %v724_v57  ;;  %v1120_v9 = vand.u32 4294901760, %v110_v6  ;;  %v1123_v11 = vand.u32 4294901760, %v111_v7  ;;  %v22090_v12 = vsub.f32 %v108_v62, %v1114_v4 }
  0x6b   :  { %v22092_v13 = vsub.f32 %v109_v63, %v1117_v5  ;;  %v22098_v14 = vpack.c.bf16 %v723_v52, %v716_v51  ;;  %v22114_v20 = vpack.c.bf16 %v1117_v5, %v1114_v4  ;;  %v1602_v44 = vand.u32 4294901760, %v113_v38 }
  0x6c   :  { %20324 = vmatpush3.bf16.msra.mxu1 %v22000_v32  ;;  %20330 = vmatpush3.bf16.msra.mxu0 %v22002_v33  ;;  %v22074_v2 = vpack.c.bf16 %v725_v61, %v718_v60  ;;  %v1195_v16 = vand.u32 4294901760, %v22090_v12  ;;  %v22104_v18 = vsub.f32 %v110_v6, %v1120_v9  ;;  %v22106_v19 = vsub.f32 %v111_v7, %v1123_v11 }
  0x6d   :  { %20331 = vmatprep.subr.bf16.mxu1 %v24221_v0  ;;  %20337 = vmatprep.subr.bf16.mxu0 %v24221_v0  ;;  %v1202_v17 = vand.u32 4294901760, %v22092_v13  ;;  %v22126_v25 = vpack.c.bf16 %v1123_v11, %v1120_v9  ;;  %v22144_v35 = vpack.c.bf16 %v22092_v13, %v22090_v12  ;;  %v1605_v45 = vand.u32 4294901760, %v114_v40 }
  0x6e   :  { %v1196_v21 = vsub.f32 %v22090_v12, %v1195_v16  ;;  %v1209_v23 = vand.u32 4294901760, %v22104_v18  ;;  %v1216_v24 = vand.u32 4294901760, %v22106_v19  ;;  %v22156_v42 = vpack.c.bf16 %v22106_v19, %v22104_v18 }
  0x6f   :  { %18221 = vmatmul.mubr.f32.vlgmr.msra.gmra.mrb[0].mxu1 %v24223_v1  ;;  %18232 = vmatmul.mubr.f32.vlgmr.msra.gmra.mrb[2].mxu0 %v24223_v1  ;;  %v1203_v22 = vsub.f32 %v22092_v13, %v1202_v17  ;;  %v22164_v49 = vpack.c.bf16 %v1202_v17, %v1195_v16  ;;  %v1608_v50 = vand.u32 4294901760, %v115_v46  ;;  %v1611_v51 = vand.u32 4294901760, %v116_v47 }
  0x70   :  { %20333 = vmatpush3.bf16.msra.mxu1 %v21985_v10  ;;  %20339 = vmatpush3.bf16.msra.mxu0 %v22010_v39  ;;  %v1197_v27 = vand.u32 4294901760, %v1196_v21  ;;  %v1210_v29 = vsub.f32 %v22104_v18, %v1209_v23  ;;  %v1217_v30 = vsub.f32 %v22106_v19, %v1216_v24  ;;  %v1682_v52 = vsub.f32 %v113_v38, %v1602_v44 }
  0x71   :  { %20334 = vmatprep.subr.bf16.mxu1 %v24221_v0  ;;  %20340 = vmatprep.subr.bf16.mxu0 %v24221_v0  ;;  %v1204_v28 = vand.u32 4294901760, %v1203_v22  ;;  %v1689_v54 = vsub.f32 %v114_v40, %v1605_v45  ;;  %v22172_v55 = vpack.c.bf16 %v1216_v24, %v1209_v23  ;;  %v1696_v60 = vsub.f32 %v115_v46, %v1608_v50 }
  0x72   :  { %18242 = vmatprep.mubr.msk.f32.mxu1 %vm21835_vm0, %v24223_v1  ;;  %18253 = vmatprep.mubr.msk.f32.mxu0 %vm21835_vm0, %v24223_v1  ;;  %v1211_v36 = vand.u32 4294901760, %v1210_v29  ;;  %v1218_v37 = vand.u32 4294901760, %v1217_v30  ;;  %v1683_v56 = vand.u32 4294901760, %v1682_v52  ;;  %v1703_v61 = vsub.f32 %v116_v47, %v1611_v51 }
  0x73   :  { %v22140_v34 = vpack.c.bf16 %v1204_v28, %v1197_v27  ;;  %v1690_v57 = vand.u32 4294901760, %v1689_v54  ;;  %v22182_v62 = vpack.c.bf16 %v1605_v45, %v1602_v44  ;;  %v1697_v5 = vand.u32 4294901760, %v1696_v60 }
  0x74   :  { %20336 = vmatpush3.bf16.msra.mxu1 %v21988_v15  ;;  %20342 = vmatpush3.bf16.msra.mxu0 %v22020_v43  ;;  %v22152_v41 = vpack.c.bf16 %v1218_v37, %v1211_v36  ;;  %v1684_v63 = vsub.f32 %v1682_v52, %v1683_v56  ;;  %v1704_v6 = vand.u32 4294901760, %v1703_v61  ;;  %v22190_v7 = vpack.c.bf16 %v1611_v51, %v1608_v50 }
  0x75   :  { %20343 = vmatprep.subr.bf16.mxu1 %v24221_v0  ;;  %20349 = vmatprep.subr.bf16.mxu0 %v24221_v0  ;;  %v1691_v4 = vsub.f32 %v1689_v54, %v1690_v57  ;;  %v1698_v12 = vsub.f32 %v1696_v60, %v1697_v5  ;;  %v22204_v17 = vpack.c.bf16 %v1689_v54, %v1682_v52  ;;  %v21837_v46 = vmov 0  }
  0x76   :  { %v1685_v9 = vand.u32 4294901760, %v1684_v63  ;;  %v1705_v13 = vsub.f32 %v1703_v61, %v1704_v6  ;;  %v22214_v22 = vpack.c.bf16 %v1703_v61, %v1696_v60  ;;  %v22224_v23 = vpack.c.bf16 %v1690_v57, %v1683_v56  ;;  %21483 = vset.pattern.permute.xlu0 %v21837_v46  ;;  %21484 = vset.pattern.permute.xlu1 %v21837_v46 }
  0x77   :  { %18243 = vmatmul.mubr.f32.vlgmr.msra.gmra.mrb[2].mxu1 %v24223_v1  ;;  %18254 = vmatmul.mubr.f32.vlgmr.msra.gmra.mrb[4].mxu0 %v24223_v1  ;;  %v1692_v11 = vand.u32 4294901760, %v1691_v4  ;;  %v1699_v18 = vand.u32 4294901760, %v1698_v12  ;;  %v22232_v24 = vpack.c.bf16 %v1704_v6, %v1697_v5 }
  0x78   :  { %20345 = vmatpush3.bf16.msra.mxu1 %v21985_v10  ;;  %20351 = vmatpush3.bf16.msra.mxu0 %v22036_v48  ;;  %v1706_v19 = vand.u32 4294901760, %v1705_v13  ;;  %24263 = vst [vmem:[#allocation23_spill] sm:$0xff] %v22214_v22  ;;  %24264 = vst [vmem:[#allocation24_spill] sm:$0xff] %v22224_v23 }
  0x79   :  { %20346 = vmatprep.subr.bf16.mxu1 %v24221_v0  ;;  %20352 = vmatprep.subr.bf16.mxu0 %v24221_v0  ;;  %v22202_v16 = vpack.c.bf16 %v1692_v11, %v1685_v9  ;;  %24265 = vst [vmem:[#allocation25_spill] sm:$0xff] %v22232_v24 }
  0x7a   :  { %18264 = vmatprep.mubr.msk.f32.mxu1 %vm21835_vm0, %v24223_v1  ;;  %18275 = vmatprep.mubr.msk.f32.mxu0 %vm21835_vm0, %v24223_v1  ;;  %v22212_v21 = vpack.c.bf16 %v1706_v19, %v1699_v18 }
  0x7c   :  { %20348 = vmatpush3.bf16.msra.mxu1 %v21988_v15  ;;  %20354 = vmatpush3.bf16.msra.mxu0 %v22048_v53 }
  0x7d   :  { %20355 = vmatprep.subr.bf16.mxu1 %v24221_v0  ;;  %20361 = vmatprep.subr.bf16.mxu0 %v24221_v0 }
  0x7f   :  { %18265 = vmatmul.mubr.f32.vlgmr.msra.gmra.mrb[4].mxu1 %v24223_v1  ;;  %18276 = vmatmul.mubr.f32.vlgmr.msra.gmra.mrb[6].mxu0 %v24223_v1 }
  0x80   :  { %20357 = vmatpush3.bf16.msra.mxu1 %v22062_v58  ;;  %20363 = vmatpush3.bf16.msra.mxu0 %v22066_v59 }
  0x81   :  { %20358 = vmatprep.subr.bf16.mxu1 %v24221_v0  ;;  %20364 = vmatprep.subr.bf16.mxu0 %v24221_v0 }
  0x82   :  { %18286 = vmatprep.mubr.msk.f32.mxu1 %vm21835_vm0, %v24223_v1  ;;  %18297 = vmatprep.mubr.msk.f32.mxu0 %vm21835_vm0, %v24223_v1 }
  0x84   :  { %20360 = vmatpush3.bf16.msra.mxu1 %v22074_v2  ;;  %20366 = vmatpush3.bf16.msra.mxu0 %v22078_v3 }
  0x85   :  { %20367 = vmatprep.subr.bf16.mxu1 %v24221_v0  ;;  %20373 = vmatprep.subr.bf16.mxu0 %v24221_v0 }
  0x87   :  { %18287 = vmatmul.mubr.f32.vlgmr.msra.gmra.mrb[6].mxu1 %v24223_v1  ;;  %18298 = vmatmul.mubr.f32.vlgmr.msra.gmra.mrb[8].mxu0 %v24223_v1 }
  0x88   :  { %20369 = vmatpush3.bf16.msra.mxu1 %v22036_v48  ;;  %20375 = vmatpush3.bf16.msra.mxu0 %v22086_v8 }
  0x89   :  { %20370 = vmatprep.subr.bf16.mxu1 %v24221_v0  ;;  %20376 = vmatprep.subr.bf16.mxu0 %v24221_v0 }
  0x8a   :  { %18308 = vmatprep.mubr.msk.f32.mxu1 %vm21835_vm0, %v24223_v1  ;;  %18319 = vmatprep.mubr.msk.f32.mxu0 %vm21835_vm0, %v24223_v1 }
  0x8c   :  { %20372 = vmatpush3.bf16.msra.mxu1 %v22048_v53  ;;  %20378 = vmatpush3.bf16.msra.mxu0 %v22098_v14 }
  0x8d   :  { %20379 = vmatprep.subr.bf16.mxu1 %v24221_v0  ;;  %20385 = vmatprep.subr.bf16.mxu0 %v24221_v0 }
  0x8f   :  { %18309 = vmatmul.mubr.f32.vlgmr.msra.gmra.mrb[8].mxu1 %v24223_v1  ;;  %18320 = vmatmul.mubr.f32.vlgmr.msra.gmra.mrb[10].mxu0 %v24223_v1 }
  0x90   :  { %20381 = vmatpush3.bf16.msra.mxu1 %v22036_v48  ;;  %20387 = vmatpush3.bf16.msra.mxu0 %v22114_v20 }
  0x91   :  { %20382 = vmatprep.subr.bf16.mxu1 %v24221_v0  ;;  %20388 = vmatprep.subr.bf16.mxu0 %v24221_v0 }
  0x92   :  { %18330 = vmatprep.mubr.msk.f32.mxu1 %vm21835_vm0, %v24223_v1  ;;  %18341 = vmatprep.mubr.msk.f32.mxu0 %vm21835_vm0, %v24223_v1 }
  0x94   :  { %20384 = vmatpush3.bf16.msra.mxu1 %v22048_v53  ;;  %20390 = vmatpush3.bf16.msra.mxu0 %v22126_v25 }
  0x95   :  { %20391 = vmatprep.subr.bf16.mxu1 %v24221_v0  ;;  %20397 = vmatprep.subr.bf16.mxu0 %v24221_v0 }
  0x97   :  { %18331 = vmatmul.mubr.f32.vlgmr.msra.gmra.mrb[10].mxu1 %v24223_v1  ;;  %18342 = vmatmul.mubr.f32.vlgmr.msra.gmra.mrb[12].mxu0 %v24223_v1 }
  0x98   :  { %20393 = vmatpush3.bf16.msra.mxu1 %v22140_v34  ;;  %20399 = vmatpush3.bf16.msra.mxu0 %v22144_v35 }
  0x99   :  { %20394 = vmatprep.subr.bf16.mxu1 %v24221_v0  ;;  %20400 = vmatprep.subr.bf16.mxu0 %v24221_v0 }
  0x9a   :  { %18352 = vmatprep.mubr.msk.f32.mxu1 %vm21835_vm0, %v24223_v1  ;;  %18363 = vmatprep.mubr.msk.f32.mxu0 %vm21835_vm0, %v24223_v1 }
  0x9c   :  { %20396 = vmatpush3.bf16.msra.mxu1 %v22152_v41  ;;  %20402 = vmatpush3.bf16.msra.mxu0 %v22156_v42 }
  0x9d   :  { %20403 = vmatprep.subr.bf16.mxu1 %v24221_v0  ;;  %20409 = vmatprep.subr.bf16.mxu0 %v24221_v0 }
  0x9f   :  { %18353 = vmatmul.mubr.f32.vlgmr.msra.gmra.mrb[12].mxu1 %v24223_v1  ;;  %18364 = vmatmul.mubr.f32.vlgmr.msra.gmra.mrb[14].mxu0 %v24223_v1 }
  0xa0   :  { %20405 = vmatpush3.bf16.msra.mxu1 %v22114_v20  ;;  %20411 = vmatpush3.bf16.msra.mxu0 %v22164_v49 }
  0xa1   :  { %20406 = vmatprep.subr.bf16.mxu1 %v24221_v0  ;;  %20412 = vmatprep.subr.bf16.mxu0 %v24221_v0 }
  0xa2   :  { %18374 = vmatprep.mubr.msk.f32.mxu1 %vm21835_vm0, %v24223_v1  ;;  %18385 = vmatprep.mubr.msk.f32.mxu0 %vm21835_vm0, %v24223_v1 }
  0xa4   :  { %20408 = vmatpush3.bf16.msra.mxu1 %v22126_v25  ;;  %20414 = vmatpush3.bf16.msra.mxu0 %v22172_v55 }
  0xa5   :  { %20415 = vmatprep.subr.bf16.mxu1 %v24221_v0  ;;  %20421 = vmatprep.subr.bf16.mxu0 %v24221_v0 }
  0xa7   :  { %18375 = vmatmul.mubr.f32.vlgmr.msra.gmra.mrb[14].mxu1 %v24223_v1  ;;  %18386 = vmatmul.mubr.f32.vlgmr.msra.gmra.mrb[16].mxu0 %v24223_v1 }
  0xa8   :  { %20417 = vmatpush3.bf16.msra.mxu1 %v22114_v20  ;;  %20423 = vmatpush3.bf16.msra.mxu0 %v22182_v62 }
  0xa9   :  { %20418 = vmatprep.subr.bf16.mxu1 %v24221_v0  ;;  %20424 = vmatprep.subr.bf16.mxu0 %v24221_v0 }
  0xaa   :  { %18396 = vmatprep.mubr.msk.f32.mxu1 %vm21835_vm0, %v24223_v1  ;;  %18407 = vmatprep.mubr.msk.f32.mxu0 %vm21835_vm0, %v24223_v1 }
  0xac   :  { %20420 = vmatpush3.bf16.msra.mxu1 %v22126_v25  ;;  %20426 = vmatpush3.bf16.msra.mxu0 %v22190_v7 }
  0xad   :  { %20427 = vmatprep.subr.bf16.mxu1 %v24221_v0  ;;  %20433 = vmatprep.subr.bf16.mxu0 %v24221_v0 }
  0xaf   :  { %18397 = vmatmul.mubr.f32.vlgmr.msra.gmra.mrb[16].mxu1 %v24223_v1  ;;  %18408 = vmatmul.mubr.f32.vlgmr.msra.gmra.mrb[18].mxu0 %v24223_v1 }
  0xb0   :  { %20429 = vmatpush3.bf16.msra.mxu1 %v22202_v16  ;;  %20435 = vmatpush3.bf16.msra.mxu0 %v22204_v17 }
  0xb1   :  { %20430 = vmatprep.subr.bf16.mxu1 %v24221_v0  ;;  %20436 = vmatprep.subr.bf16.mxu0 %v24221_v0 }
  0xb2   :  { %18418 = vmatprep.mubr.msk.f32.mxu1 %vm21835_vm0, %v24223_v1  ;;  %18429 = vmatprep.mubr.msk.f32.mxu0 %vm21835_vm0, %v24223_v1 }
  0xb4   :  { %20432 = vmatpush3.bf16.msra.mxu1 %v22212_v21  ;;  %20438 = vmatpush3.bf16.msra.mxu0 %v22214_v22 }
  0xb5   :  { %20439 = vmatprep.subr.bf16.mxu1 %v24221_v0  ;;  %20445 = vmatprep.subr.bf16.mxu0 %v24221_v0 }
  0xb7   :  { %18419 = vmatmul.mubr.f32.vlgmr.msra.gmra.mrb[18].mxu1 %v24223_v1  ;;  %18430 = vmatmul.mubr.f32.vlgmr.msra.gmra.mrb[20].mxu0 %v24223_v1 }
  0xb8   :  { %20441 = vmatpush3.bf16.msra.mxu1 %v22182_v62  ;;  %20447 = vmatpush3.bf16.msra.mxu0 %v22224_v23 }
  0xb9   :  { %20442 = vmatprep.subr.bf16.mxu1 %v24221_v0  ;;  %20448 = vmatprep.subr.bf16.mxu0 %v24221_v0 }
  0xba   :  { %18440 = vmatprep.mubr.msk.f32.mxu1 %vm21835_vm0, %v24223_v1  ;;  %18451 = vmatprep.mubr.msk.f32.mxu0 %vm21835_vm0, %v24223_v1 }
  0xbc   :  { %20444 = vmatpush3.bf16.msra.mxu1 %v22190_v7  ;;  %20450 = vmatpush3.bf16.msra.mxu0 %v22232_v24 }
  0xbd   :  { %20451 = vmatprep.subr.bf16.mxu1 %v24221_v0  ;;  %20457 = vmatprep.subr.bf16.mxu0 %v24221_v0 }
  0xbf   :  { %18441 = vmatmul.mubr.f32.vlgmr.msra.gmra.mrb[20].mxu1 %v24223_v1  ;;  %18452 = vmatmul.mubr.f32.vlgmr.msra.gmra.mrb[22].mxu0 %v24223_v1 }
  0xc0   :  { %20453 = vmatpush3.bf16.msra.mxu1 %v22182_v62  ;;  %18462 = vmatprep.mubr.msk.f32.mxu1 %vm21835_vm0, %v24223_v1 }
  0xc1   :  { %20454 = vmatprep.subr.bf16.mxu1 %v24221_v0  ;;  %20459 = vmatpush3.bf16.msra.mxu0 %v21985_v10 }
  0xc2   :  { %20460 = vmatprep.subr.bf16.mxu0 %v24221_v0  ;;  %18473 = vmatprep.mubr.msk.f32.mxu0 %vm21835_vm0, %v24223_v1 }
  0xc4   :  { %20456 = vmatpush3.bf16.msra.mxu1 %v22190_v7 }
  0xc5   :  { %20463 = vmatprep.subr.bf16.mxu1 %v24221_v0  ;;  %20462 = vmatpush3.bf16.msra.mxu0 %v21988_v15 }
  0xc6   :  { %20469 = vmatprep.subr.bf16.mxu0 %v24221_v0 }
  0xc7   :  { %18463 = vmatmul.mubr.f32.vlgmr.msra.gmra.mrb[22].mxu1 %v24223_v1 }
  0xc8   :  { %20465 = vmatpush3.bf16.msra.mxu1 %v21995_v31  ;;  %18484 = vmatprep.mubr.msk.f32.mxu1 %vm21835_vm0, %v24223_v1 }
  0xc9   :  { %20466 = vmatprep.subr.bf16.mxu1 %v24221_v0 }
  0xcc   :  { %20468 = vmatpush3.bf16.msra.mxu1 %v22000_v32 }
  0xcd   :  { %20475 = vmatprep.subr.bf16.mxu1 %v24221_v0 }
 0x13a   :  { %v202_v27 = vpop.f32.mrb[0].mxu0 }
 0x13b   :  { %v18211_v28 = vpop.f32.mrb[1].mxu0 }
 0x142   :  { %v293_v29 = vpop.f32.mrb[0].mxu1  ;;  %v373_v30 = vpop.f32.mrb[2].mxu0 }
 0x143   :  { %v294_v36 = vadd.f32 %v293_v29, %v202_v27  ;;  %v18222_v37 = vpop.f32.mrb[1].mxu1  ;;  %v18233_v38 = vpop.f32.mrb[3].mxu0  ;;  %v123_v29 = vld [vmem:[#allocation4] sm:$0xff] }
 0x145   :  { %v374_v40 = vadd.f32 %v373_v30, %v294_v36  ;;  %v619_v30 = vld [vmem:[#allocation7] sm:$0xff] }
 0x14a   :  { %v450_v44 = vpop.f32.mrb[2].mxu1  ;;  %v533_v45 = vpop.f32.mrb[4].mxu0 }
 0x14b   :  { %v451_v47 = vadd.f32 %v450_v44, %v374_v40  ;;  %v18244_v50 = vpop.f32.mrb[3].mxu1  ;;  %v18255_v51 = vpop.f32.mrb[5].mxu0 }
 0x14d   :  { %v534_v52 = vadd.f32 %v533_v45, %v451_v47 }
 0x152   :  { %v608_v54 = vpop.f32.mrb[4].mxu1  ;;  %v695_v56 = vpop.f32.mrb[6].mxu0 }
 0x153   :  { %v609_v57 = vadd.f32 %v608_v54, %v534_v52  ;;  %v18266_v60 = vpop.f32.mrb[5].mxu1  ;;  %v18277_v61 = vpop.f32.mrb[7].mxu0 }
 0x155   :  { %v612_v45 = vadd.f32 %v609_v57, %v123_v29 }
 0x157   :  { %v17215_v50 = vmul.f32 -1.442695, %v612_v45 }
 0x15a   :  { %v786_v63 = vpop.f32.mrb[6].mxu1  ;;  %v866_v4 = vpop.f32.mrb[8].mxu0 }
 0x15b   :  { %v787_v5 = vadd.f32 %v786_v63, %v695_v56  ;;  %v18288_v6 = vpop.f32.mrb[7].mxu1  ;;  %v18299_v9 = vpop.f32.mrb[9].mxu0 }
 0x15d   :  { %v867_v11 = vadd.f32 %v866_v4, %v787_v5 }
 0x162   :  { %v943_v12 = vpop.f32.mrb[8].mxu1  ;;  %v1026_v13 = vpop.f32.mrb[10].mxu0 }
 0x163   :  { %v944_v18 = vadd.f32 %v943_v12, %v867_v11  ;;  %v18310_v19 = vpop.f32.mrb[9].mxu1  ;;  %v18321_v27 = vpop.f32.mrb[11].mxu0 }
 0x164   :  { %v1112_v19 = vld [vmem:[#allocation9] sm:$0xff] }
 0x165   :  { %v1027_v28 = vadd.f32 %v1026_v13, %v944_v18 }
 0x16a   :  { %v1101_v36 = vpop.f32.mrb[10].mxu1  ;;  %v1188_v37 = vpop.f32.mrb[12].mxu0 }
 0x16b   :  { %v1102_v38 = vadd.f32 %v1101_v36, %v1027_v28  ;;  %v18332_v40 = vpop.f32.mrb[11].mxu1  ;;  %v18343_v44 = vpop.f32.mrb[13].mxu0 }
 0x16d   :  { %v1105_v46 = vadd.f32 %v1102_v38, %v619_v30 }
 0x16f   :  { %v17216_v47 = vmul.f32 -1.442695, %v1105_v46 }
 0x171   :  { %21485 = vpow2.f32 %v17216_v47 }
 0x172   :  { %v1279_v51 = vpop.f32.mrb[12].mxu1  ;;  %v1359_v52 = vpop.f32.mrb[14].mxu0  ;;  %21487 = vpow2.f32 %v17215_v50 }
 0x173   :  { %v1280_v54 = vadd.f32 %v1279_v51, %v1188_v37  ;;  %v18354_v56 = vpop.f32.mrb[13].mxu1  ;;  %v18365_v60 = vpop.f32.mrb[15].mxu0 }
 0x175   :  { %v1360_v61 = vadd.f32 %v1359_v52, %v1280_v54 }
 0x17a   :  { %v1436_v63 = vpop.f32.mrb[14].mxu1  ;;  %v1519_v4 = vpop.f32.mrb[16].mxu0 }
 0x17b   :  { %v1437_v5 = vadd.f32 %v1436_v63, %v1360_v61  ;;  %v18376_v6 = vpop.f32.mrb[15].mxu1  ;;  %v18387_v9 = vpop.f32.mrb[17].mxu0 }
 0x17c   :  { %v21486_v12 = vpop.eup %21485 }
 0x17d   :  { %v1520_v11 = vadd.f32 %v1519_v4, %v1437_v5  ;;  %v21488_v13 = vpop.eup %21487  ;;  %v1109_v57 = vadd.f32 1.0, %v21486_v12 }
 0x17e   :  { %v616_v18 = vadd.f32 1.0, %v21488_v13 }
 0x17f   :  { %21489 = vrcp.f32 %v1109_v57 }
 0x180   :  { %21491 = vrcp.f32 %v616_v18 }
 0x182   :  { %v1594_v27 = vpop.f32.mrb[16].mxu1  ;;  %v1676_v28 = vpop.f32.mrb[18].mxu0 }
 0x183   :  { %v1595_v29 = vadd.f32 %v1594_v27, %v1520_v11  ;;  %v18398_v30 = vpop.f32.mrb[17].mxu1  ;;  %v18409_v36 = vpop.f32.mrb[19].mxu0  ;;  %v1600_v11 = vld [vmem:[#allocation10] sm:$0xff] }
 0x185   :  { %v1598_v37 = vadd.f32 %v1595_v29, %v1112_v19 }
 0x187   :  { %21493 = vtanh.f32 %v1598_v37  ;;  %v22275_v37 = vld [vmem:[%s24217_s5] ss:$0 sm:$0xff] }
 0x189   :  { %v21490_v50 = vpop.eup %21489 }
 0x18a   :  { %v1767_v38 = vpop.f32.mrb[18].mxu1  ;;  %v1847_v40 = vpop.f32.mrb[20].mxu0  ;;  %v2093_v54 = vmul.f32 0.0, %v21490_v50 }
 0x18b   :  { %v1768_v44 = vadd.f32 %v1767_v38, %v1676_v28  ;;  %v18420_v45 = vpop.f32.mrb[19].mxu1  ;;  %v18431_v46 = vpop.f32.mrb[21].mxu0 }
 0x18c   :  { %v21492_v51 = vpop.eup %21491  ;;  %v22279_v45 = vld [vmem:[#allocation3] sm:$0xff] }
 0x18d   :  { %v1848_v47 = vadd.f32 %v1847_v40, %v1768_v44 }
 0x191   :  { %v21494_v52 = vpop.eup %21493 }
 0x192   :  { %v2094_v56 = vmul.f32 %v21494_v52, %v21492_v51  ;;  %v1924_v60 = vpop.f32.mrb[20].mxu1  ;;  %v2007_v61 = vpop.f32.mrb[22].mxu0 }
 0x193   :  { %v1925_v63 = vadd.f32 %v1924_v60, %v1848_v47  ;;  %v18442_v4 = vpop.f32.mrb[21].mxu1  ;;  %v18453_v5 = vpop.f32.mrb[23].mxu0  ;;  %v22282_v47 = vld [vmem:[#allocation2] sm:$0xff] }
 0x194   :  { %v22269_v6 = vadd.f32 %v2094_v56, %v2093_v54 }
 0x195   :  { %v2008_v9 = vadd.f32 %v2007_v61, %v1925_v63 }
 0x19a   :  { %v2082_v12 = vpop.f32.mrb[22].mxu1 }
 0x19b   :  { %v2083_v13 = vadd.f32 %v2082_v12, %v2008_v9  ;;  %v18464_v57 = vpop.f32.mrb[23].mxu1  ;;  %v22309_v9 = vld [vmem:[%s24218_s6] ss:$0 sm:$0xff] }
 0x19d   :  { %v2086_v18 = vadd.f32 %v2083_v13, %v1600_v11 }
 0x19f   :  { %v17217_v19 = vmul.f32 -1.442695, %v2086_v18 }
 0x1a1   :  { %21495 = vpow2.f32 %v17217_v19 }
 0x1a2   :  { %21497 = vtanh.f32 %v22269_v6 }
 0x1ab   :  { %v21496_v27 = vpop.eup %21495 }
 0x1ac   :  { %v2090_v28 = vadd.f32 1.0, %v21496_v27  ;;  %v21498_v29 = vpop.eup %21497 }
 0x1ae   :  { %21499 = vrcp.f32 %v2090_v28 }
 0x1b8   :  { %v21500_v30 = vpop.eup %21499 }
 0x1b9   :  { %v2097_v36 = vmul.f32 %v21500_v30, %v21498_v29 }
 0x1bb   :  { %21501 = vtanh.f32 %v2097_v36 }
 0x1c5   :  { %v21502_v38 = vpop.eup %21501 }
 0x1c6   :  { %v2107_v40 = vmul.f32 %v21502_v38, %v22275_v37 }
 0x1c8   :  { %v2108_v44 = vsel %vm24260_vm1, %v2107_v40, 0.0 }
 0x1c9   :  { %2109 = vadd.xlane.f32.xlu0 %v2108_v44 }
 0x1df   :  { %2113 = vperm.xlu0 %21483, %v22279_v45  }
 0x256   :  { %v2110_v46 = vpop.xlane.xlu0 %2109 }
 0x257   :  { %v2119_v51 = vmul.f32 %v2110_v46, %v22282_v47 }
 0x25e   :  { %v2114_v50 = vpop.permute.xlu0 %2113 }
 0x25f   :  { %v2116_v52 = vmul.f32 %v2114_v50, %v22282_v47 }
 0x261   :  { %v2120_v54 = vadd.f32 %v2119_v51, %v2116_v52 }
 0x263   :  { %v2121_v56 = vadd.f32 %v2120_v54, %v2097_v36  ;;  %2123 = vst.msk [vmem:[#allocation14] sm:$0xff] %vm24260_vm1, %v2120_v54 }
 0x265   :  { %2122 = vst.msk [vmem:[#allocation13] sm:$0xff] %vm24260_vm1, %v2121_v56  ;;  %2125 = vst.msk [vmem:[#allocation2 + $0x8] sm:$0xff] %vm24260_vm1, %v2121_v56  ;;  %21503 = vtanh.f32 %v2121_v56  ;;  %v2142_v60 = vsel %vm24260_vm1, %v2121_v56, 0 }
 0x266   :  { %v22290_v61 = vand.u32 4294901760, %v2142_v60 }
 0x268   :  { %v22293_v63 = vsub.f32 %v2142_v60, %v22290_v61  ;;  %18485 = vmatmul.mubr.f32.vlgmr.msra.gmra.mrb[24].mxu1 %v22290_v61 }
 0x269   :  { %20477 = vmatpush3.bf16.msra.mxu1 %v21985_v10  ;;  %18506 = vmatprep.mubr.msk.f32.mxu1 %vm21835_vm0, %v24223_v1 }
 0x26a   :  { %20478 = vmatprep.subr.bf16.mxu1 %v24221_v0  ;;  %v22301_v4 = vand.u32 4294901760, %v22293_v63 }
 0x26c   :  { %v2216_v5 = vsub.f32 %v22293_v63, %v22301_v4 }
 0x26d   :  { %20480 = vmatpush3.bf16.msra.mxu1 %v21988_v15 }
 0x26e   :  { %20487 = vmatprep.subr.bf16.mxu1 %v24221_v0  ;;  %v22312_v11 = vand.u32 4294901760, %v2216_v5 }
 0x26f   :  { %v21504_v12 = vpop.eup %21503 }
 0x270   :  { %18507 = vmatmul.mubr.f32.vlgmr.msra.gmra.mrb[26].mxu1 %v22301_v4  ;;  %18474 = vmatmul.mubr.f32.vlgmr.msra.gmra.mrb[24].mxu0 %v22312_v11  ;;  %v2133_v13 = vmul.f32 %v21504_v12, %v22309_v9 }
 0x271   :  { %20471 = vmatpush3.bf16.msra.mxu0 %v21992_v26  ;;  %20489 = vmatpush3.bf16.msra.mxu1 %v21985_v10 }
 0x272   :  { %20472 = vmatprep.subr.bf16.mxu0 %v24221_v0  ;;  %20490 = vmatprep.subr.bf16.mxu1 %v24221_v0  ;;  %v2134_v57 = vsel %vm24260_vm1, %v2133_v13, 0.0 }
 0x273   :  { %2135 = vadd.xlane.f32.xlu1 %v2134_v57  ;;  %18495 = vmatprep.mubr.msk.f32.mxu0 %vm21835_vm0, %v24223_v1 }
 0x274   :  { %18528 = vmatprep.mubr.msk.f32.mxu1 %vm21835_vm0, %v24223_v1 }
 0x275   :  { %20474 = vmatpush3.bf16.msra.mxu0 %v22002_v33  ;;  %20492 = vmatpush3.bf16.msra.mxu1 %v21988_v15 }
 0x276   :  { %20481 = vmatprep.subr.bf16.mxu0 %v24221_v0  ;;  %20499 = vmatprep.subr.bf16.mxu1 %v24221_v0 }
 0x278   :  { %18496 = vmatmul.mubr.f32.vlgmr.msra.gmra.mrb[26].mxu0 %v22293_v63  ;;  %18529 = vmatmul.mubr.f32.vlgmr.msra.gmra.mrb[28].mxu1 %v22290_v61 }
 0x279   :  { %20483 = vmatpush3.bf16.msra.mxu0 %v22010_v39  ;;  %20501 = vmatpush3.bf16.msra.mxu1 %v22062_v58 }
 0x27a   :  { %20484 = vmatprep.subr.bf16.mxu0 %v24221_v0  ;;  %20502 = vmatprep.subr.bf16.mxu1 %v24221_v0 }
 0x27b   :  { %18517 = vmatprep.mubr.msk.f32.mxu0 %vm21835_vm0, %v24223_v1  ;;  %18550 = vmatprep.mubr.msk.f32.mxu1 %vm21835_vm0, %v24223_v1 }
 0x27d   :  { %20486 = vmatpush3.bf16.msra.mxu0 %v22020_v43  ;;  %20504 = vmatpush3.bf16.msra.mxu1 %v22074_v2 }
 0x27e   :  { %20493 = vmatprep.subr.bf16.mxu0 %v24221_v0  ;;  %20511 = vmatprep.subr.bf16.mxu1 %v24221_v0 }
 0x280   :  { %18518 = vmatmul.mubr.f32.vlgmr.msra.gmra.mrb[28].mxu0 %v22290_v61  ;;  %18551 = vmatmul.mubr.f32.vlgmr.msra.gmra.mrb[30].mxu1 %v22290_v61 }
 0x281   :  { %20495 = vmatpush3.bf16.msra.mxu0 %v22036_v48  ;;  %20513 = vmatpush3.bf16.msra.mxu1 %v22036_v48 }
 0x282   :  { %20496 = vmatprep.subr.bf16.mxu0 %v24221_v0  ;;  %20514 = vmatprep.subr.bf16.mxu1 %v24221_v0 }
 0x283   :  { %18539 = vmatprep.mubr.msk.f32.mxu0 %vm21835_vm0, %v24223_v1  ;;  %18572 = vmatprep.mubr.msk.f32.mxu1 %vm21835_vm0, %v24223_v1 }
 0x284   :  { %4129 = vperm.xlu1 %21484, %v22279_v45  }
 0x285   :  { %20498 = vmatpush3.bf16.msra.mxu0 %v22048_v53  ;;  %20516 = vmatpush3.bf16.msra.mxu1 %v22048_v53 }
 0x286   :  { %20505 = vmatprep.subr.bf16.mxu0 %v24221_v0  ;;  %20523 = vmatprep.subr.bf16.mxu1 %v24221_v0 }
 0x288   :  { %18540 = vmatmul.mubr.f32.vlgmr.msra.gmra.mrb[30].mxu0 %v22312_v11  ;;  %18573 = vmatmul.mubr.f32.vlgmr.msra.gmra.mrb[32].mxu1 %v22301_v4 }
 0x289   :  { %20507 = vmatpush3.bf16.msra.mxu0 %v22066_v59  ;;  %20525 = vmatpush3.bf16.msra.mxu1 %v22036_v48 }
 0x28a   :  { %20508 = vmatprep.subr.bf16.mxu0 %v24221_v0  ;;  %20526 = vmatprep.subr.bf16.mxu1 %v24221_v0 }
 0x28b   :  { %18561 = vmatprep.mubr.msk.f32.mxu0 %vm21835_vm0, %v24223_v1  ;;  %18594 = vmatprep.mubr.msk.f32.mxu1 %vm21835_vm0, %v24223_v1 }
 0x28d   :  { %20510 = vmatpush3.bf16.msra.mxu0 %v22078_v3  ;;  %20528 = vmatpush3.bf16.msra.mxu1 %v22048_v53 }
 0x28e   :  { %20517 = vmatprep.subr.bf16.mxu0 %v24221_v0  ;;  %20535 = vmatprep.subr.bf16.mxu1 %v24221_v0 }
 0x290   :  { %18562 = vmatmul.mubr.f32.vlgmr.msra.gmra.mrb[32].mxu0 %v22293_v63  ;;  %18595 = vmatmul.mubr.f32.vlgmr.msra.gmra.mrb[34].mxu1 %v22290_v61 }
 0x291   :  { %20519 = vmatpush3.bf16.msra.mxu0 %v22086_v8  ;;  %20537 = vmatpush3.bf16.msra.mxu1 %v22140_v34 }
 0x292   :  { %20520 = vmatprep.subr.bf16.mxu0 %v24221_v0  ;;  %20538 = vmatprep.subr.bf16.mxu1 %v24221_v0 }
 0x293   :  { %18583 = vmatprep.mubr.msk.f32.mxu0 %vm21835_vm0, %v24223_v1  ;;  %18616 = vmatprep.mubr.msk.f32.mxu1 %vm21835_vm0, %v24223_v1 }
 0x295   :  { %20522 = vmatpush3.bf16.msra.mxu0 %v22098_v14  ;;  %20540 = vmatpush3.bf16.msra.mxu1 %v22152_v41 }
 0x296   :  { %20529 = vmatprep.subr.bf16.mxu0 %v24221_v0  ;;  %20547 = vmatprep.subr.bf16.mxu1 %v24221_v0 }
 0x298   :  { %18584 = vmatmul.mubr.f32.vlgmr.msra.gmra.mrb[34].mxu0 %v22290_v61  ;;  %18617 = vmatmul.mubr.f32.vlgmr.msra.gmra.mrb[36].mxu1 %v22290_v61 }
 0x299   :  { %20531 = vmatpush3.bf16.msra.mxu0 %v22114_v20  ;;  %20549 = vmatpush3.bf16.msra.mxu1 %v22114_v20 }
 0x29a   :  { %20532 = vmatprep.subr.bf16.mxu0 %v24221_v0  ;;  %20550 = vmatprep.subr.bf16.mxu1 %v24221_v0 }
 0x29b   :  { %18605 = vmatprep.mubr.msk.f32.mxu0 %vm21835_vm0, %v24223_v1  ;;  %18638 = vmatprep.mubr.msk.f32.mxu1 %vm21835_vm0, %v24223_v1 }
 0x29d   :  { %20534 = vmatpush3.bf16.msra.mxu0 %v22126_v25  ;;  %20552 = vmatpush3.bf16.msra.mxu1 %v22126_v25 }
 0x29e   :  { %20541 = vmatprep.subr.bf16.mxu0 %v24221_v0  ;;  %20559 = vmatprep.subr.bf16.mxu1 %v24221_v0 }
 0x2a0   :  { %18606 = vmatmul.mubr.f32.vlgmr.msra.gmra.mrb[36].mxu0 %v22312_v11  ;;  %18639 = vmatmul.mubr.f32.vlgmr.msra.gmra.mrb[38].mxu1 %v22301_v4 }
 0x2a1   :  { %20543 = vmatpush3.bf16.msra.mxu0 %v22144_v35  ;;  %20561 = vmatpush3.bf16.msra.mxu1 %v22114_v20 }
 0x2a2   :  { %20544 = vmatprep.subr.bf16.mxu0 %v24221_v0  ;;  %20562 = vmatprep.subr.bf16.mxu1 %v24221_v0 }
 0x2a3   :  { %18627 = vmatprep.mubr.msk.f32.mxu0 %vm21835_vm0, %v24223_v1  ;;  %18660 = vmatprep.mubr.msk.f32.mxu1 %vm21835_vm0, %v24223_v1 }
 0x2a5   :  { %20546 = vmatpush3.bf16.msra.mxu0 %v22156_v42  ;;  %20564 = vmatpush3.bf16.msra.mxu1 %v22126_v25 }
 0x2a6   :  { %20553 = vmatprep.subr.bf16.mxu0 %v24221_v0  ;;  %20571 = vmatprep.subr.bf16.mxu1 %v24221_v0 }
 0x2a8   :  { %18628 = vmatmul.mubr.f32.vlgmr.msra.gmra.mrb[38].mxu0 %v22293_v63  ;;  %18661 = vmatmul.mubr.f32.vlgmr.msra.gmra.mrb[40].mxu1 %v22290_v61 }
 0x2a9   :  { %20555 = vmatpush3.bf16.msra.mxu0 %v22164_v49  ;;  %20573 = vmatpush3.bf16.msra.mxu1 %v22202_v16 }
 0x2aa   :  { %20556 = vmatprep.subr.bf16.mxu0 %v24221_v0  ;;  %20574 = vmatprep.subr.bf16.mxu1 %v24221_v0 }
 0x2ab   :  { %18649 = vmatprep.mubr.msk.f32.mxu0 %vm21835_vm0, %v24223_v1  ;;  %18682 = vmatprep.mubr.msk.f32.mxu1 %vm21835_vm0, %v24223_v1 }
 0x2ad   :  { %20558 = vmatpush3.bf16.msra.mxu0 %v22172_v55  ;;  %20576 = vmatpush3.bf16.msra.mxu1 %v22212_v21 }
 0x2ae   :  { %20565 = vmatprep.subr.bf16.mxu0 %v24221_v0  ;;  %20583 = vmatprep.subr.bf16.mxu1 %v24221_v0 }
 0x2b0   :  { %18650 = vmatmul.mubr.f32.vlgmr.msra.gmra.mrb[40].mxu0 %v22290_v61  ;;  %18683 = vmatmul.mubr.f32.vlgmr.msra.gmra.mrb[42].mxu1 %v22290_v61 }
 0x2b1   :  { %20567 = vmatpush3.bf16.msra.mxu0 %v22182_v62  ;;  %20585 = vmatpush3.bf16.msra.mxu1 %v22182_v62 }
 0x2b2   :  { %20568 = vmatprep.subr.bf16.mxu0 %v24221_v0  ;;  %20586 = vmatprep.subr.bf16.mxu1 %v24221_v0 }
 0x2b3   :  { %18671 = vmatprep.mubr.msk.f32.mxu0 %vm21835_vm0, %v24223_v1  ;;  %18704 = vmatprep.mubr.msk.f32.mxu1 %vm21835_vm0, %v24223_v1 }
 0x2b5   :  { %20570 = vmatpush3.bf16.msra.mxu0 %v22190_v7  ;;  %20588 = vmatpush3.bf16.msra.mxu1 %v22190_v7 }
 0x2b6   :  { %20577 = vmatprep.subr.bf16.mxu0 %v24221_v0  ;;  %20595 = vmatprep.subr.bf16.mxu1 %v24221_v0 }
 0x2b8   :  { %18672 = vmatmul.mubr.f32.vlgmr.msra.gmra.mrb[42].mxu0 %v22312_v11  ;;  %18705 = vmatmul.mubr.f32.vlgmr.msra.gmra.mrb[44].mxu1 %v22301_v4 }
 0x2b9   :  { %20579 = vmatpush3.bf16.msra.mxu0 %v22204_v17  ;;  %20597 = vmatpush3.bf16.msra.mxu1 %v22182_v62 }
 0x2ba   :  { %20580 = vmatprep.subr.bf16.mxu0 %v24221_v0  ;;  %20598 = vmatprep.subr.bf16.mxu1 %v24221_v0 }
 0x2bb   :  { %18693 = vmatprep.mubr.msk.f32.mxu0 %vm21835_vm0, %v24223_v1  ;;  %18726 = vmatprep.mubr.msk.f32.mxu1 %vm21835_vm0, %v24223_v1 }
 0x2bd   :  { %20582 = vmatpush3.bf16.msra.mxu0 %v22214_v22  ;;  %20600 = vmatpush3.bf16.msra.mxu1 %v22190_v7 }
 0x2be   :  { %20589 = vmatprep.subr.bf16.mxu0 %v24221_v0  ;;  %20607 = vmatprep.subr.bf16.mxu1 %v24221_v0 }
 0x2c0   :  { %18694 = vmatmul.mubr.f32.vlgmr.msra.gmra.mrb[44].mxu0 %v22293_v63  ;;  %18727 = vmatmul.mubr.f32.vlgmr.msra.gmra.mrb[46].mxu1 %v22290_v61 }
 0x2c1   :  { %20591 = vmatpush3.bf16.msra.mxu0 %v22224_v23  ;;  %18715 = vmatprep.mubr.msk.f32.mxu0 %vm21835_vm0, %v24223_v1 }
 0x2c2   :  { %20592 = vmatprep.subr.bf16.mxu0 %v24221_v0  ;;  %20609 = vmatpush3.bf16.msra.mxu1 %v21995_v31 }
 0x2c3   :  { %20610 = vmatprep.subr.bf16.mxu1 %v24221_v0  ;;  %18748 = vmatprep.mubr.msk.f32.mxu1 %vm21835_vm0, %v24223_v1 }
 0x2c5   :  { %20594 = vmatpush3.bf16.msra.mxu0 %v22232_v24 }
 0x2c6   :  { %20612 = vmatpush3.bf16.msra.mxu1 %v22000_v32  ;;  %20601 = vmatprep.subr.bf16.mxu0 %v24221_v0 }
 0x2c7   :  { %20619 = vmatprep.subr.bf16.mxu1 %v24221_v0 }
 0x2c8   :  { %18716 = vmatmul.mubr.f32.vlgmr.msra.gmra.mrb[46].mxu0 %v22290_v61 }
 0x2c9   :  { %20603 = vmatpush3.bf16.msra.mxu0 %v21985_v10  ;;  %18737 = vmatprep.mubr.msk.f32.mxu0 %vm21835_vm0, %v24223_v1 }
 0x2ca   :  { %20604 = vmatprep.subr.bf16.mxu0 %v24221_v0 }
 0x2cd   :  { %20606 = vmatpush3.bf16.msra.mxu0 %v21988_v15 }
 0x2ce   :  { %20613 = vmatprep.subr.bf16.mxu0 %v24221_v0 }
 0x300   :  { %v2136_v18 = vpop.xlane.xlu1 %2135 }
 0x301   :  { %2138 = vst.msk [vmem:[#allocation3 + $0x8] sm:$0xff] %vm121_vm2, %v2136_v18 }
 0x33b   :  { %v2310_v19 = vpop.f32.mrb[24].mxu1 }
 0x33c   :  { %v18486_v27 = vpop.f32.mrb[25].mxu1 }
 0x343   :  { %v2467_v28 = vpop.f32.mrb[26].mxu1  ;;  %v2219_v29 = vpop.f32.mrb[24].mxu0 }
 0x344   :  { %v2311_v30 = vadd.f32 %v2310_v19, %v2219_v29  ;;  %v18508_v36 = vpop.f32.mrb[27].mxu1  ;;  %v18475_v38 = vpop.f32.mrb[25].mxu0 }
 0x34b   :  { %v2390_v40 = vpop.f32.mrb[26].mxu0  ;;  %v2625_v44 = vpop.f32.mrb[28].mxu1 }
 0x34c   :  { %v2391_v46 = vadd.f32 %v2390_v40, %v2311_v30  ;;  %v18497_v50 = vpop.f32.mrb[27].mxu0  ;;  %v18530_v51 = vpop.f32.mrb[29].mxu1 }
 0x34d   :  { %v2140_v51 = vld [vmem:[#allocation4 + $0x8] sm:$0xff] }
 0x34e   :  { %v2468_v52 = vadd.f32 %v2467_v28, %v2391_v46 }
 0x353   :  { %v2550_v54 = vpop.f32.mrb[28].mxu0  ;;  %v2804_v56 = vpop.f32.mrb[30].mxu1 }
 0x354   :  { %v2551_v60 = vadd.f32 %v2550_v54, %v2468_v52  ;;  %v18519_v61 = vpop.f32.mrb[29].mxu0  ;;  %v18552_v63 = vpop.f32.mrb[31].mxu1  ;;  %v2637_v52 = vld [vmem:[#allocation7 + $0x8] sm:$0xff] }
 0x356   :  { %v2626_v4 = vadd.f32 %v2625_v44, %v2551_v60 }
 0x358   :  { %v2629_v44 = vadd.f32 %v2626_v4, %v2140_v51 }
 0x35b   :  { %v2713_v5 = vpop.f32.mrb[30].mxu0  ;;  %v2961_v11 = vpop.f32.mrb[32].mxu1 }
 0x35c   :  { %v2805_v12 = vadd.f32 %v2804_v56, %v2713_v5  ;;  %v18541_v13 = vpop.f32.mrb[31].mxu0  ;;  %v18574_v57 = vpop.f32.mrb[33].mxu1  ;;  %v17220_v5 = vmul.f32 -1.442695, %v2629_v44 }
 0x363   :  { %v2884_v18 = vpop.f32.mrb[32].mxu0  ;;  %v3119_v19 = vpop.f32.mrb[34].mxu1 }
 0x364   :  { %v2885_v27 = vadd.f32 %v2884_v18, %v2805_v12  ;;  %v18563_v29 = vpop.f32.mrb[33].mxu0  ;;  %v18596_v36 = vpop.f32.mrb[35].mxu1 }
 0x366   :  { %v2962_v30 = vadd.f32 %v2961_v11, %v2885_v27 }
 0x36b   :  { %v3044_v38 = vpop.f32.mrb[34].mxu0  ;;  %v3298_v40 = vpop.f32.mrb[36].mxu1 }
 0x36c   :  { %v3045_v28 = vadd.f32 %v3044_v38, %v2962_v30  ;;  %v18585_v46 = vpop.f32.mrb[35].mxu0  ;;  %v18618_v50 = vpop.f32.mrb[37].mxu1 }
 0x36e   :  { %v3120_v54 = vadd.f32 %v3119_v19, %v3045_v28 }
 0x370   :  { %v3123_v60 = vadd.f32 %v3120_v54, %v2637_v52 }
 0x372   :  { %v17221_v61 = vmul.f32 -1.442695, %v3123_v60 }
 0x373   :  { %v3207_v56 = vpop.f32.mrb[36].mxu0  ;;  %v3455_v63 = vpop.f32.mrb[38].mxu1 }
 0x374   :  { %v3299_v13 = vadd.f32 %v3298_v40, %v3207_v56  ;;  %v18607_v57 = vpop.f32.mrb[37].mxu0  ;;  %v18640_v12 = vpop.f32.mrb[39].mxu1  ;;  %21505 = vpow2.f32 %v17221_v61  ;;  %v3131_v40 = vld [vmem:[#allocation9 + $0x8] sm:$0xff] }
 0x375   :  { %21507 = vpow2.f32 %v17220_v5 }
 0x37b   :  { %v3378_v11 = vpop.f32.mrb[38].mxu0  ;;  %v3613_v18 = vpop.f32.mrb[40].mxu1 }
 0x37c   :  { %v3379_v27 = vadd.f32 %v3378_v11, %v3299_v13  ;;  %v18629_v29 = vpop.f32.mrb[39].mxu0  ;;  %v18662_v36 = vpop.f32.mrb[41].mxu1 }
 0x37e   :  { %v3456_v30 = vadd.f32 %v3455_v63, %v3379_v27  ;;  %v21506_v38 = vpop.eup %21505 }
 0x37f   :  { %v21508_v46 = vpop.eup %21507  ;;  %v3127_v28 = vadd.f32 1.0, %v21506_v38 }
 0x380   :  { %v2633_v54 = vadd.f32 1.0, %v21508_v46 }
 0x381   :  { %21509 = vrcp.f32 %v3127_v28 }
 0x382   :  { %21511 = vrcp.f32 %v2633_v54 }
 0x383   :  { %v3538_v19 = vpop.f32.mrb[40].mxu0  ;;  %v3787_v4 = vpop.f32.mrb[42].mxu1 }
 0x384   :  { %v3539_v50 = vadd.f32 %v3538_v19, %v3456_v30  ;;  %v18651_v51 = vpop.f32.mrb[41].mxu0  ;;  %v18684_v52 = vpop.f32.mrb[43].mxu1 }
 0x386   :  { %v3614_v44 = vadd.f32 %v3613_v18, %v3539_v50 }
 0x388   :  { %v3617_v60 = vadd.f32 %v3614_v44, %v3131_v40 }
 0x38a   :  { %21513 = vtanh.f32 %v3617_v60 }
 0x38b   :  { %v3696_v61 = vpop.f32.mrb[42].mxu0  ;;  %v3944_v56 = vpop.f32.mrb[44].mxu1 }
 0x38c   :  { %v3788_v5 = vadd.f32 %v3787_v4, %v3696_v61  ;;  %v18673_v13 = vpop.f32.mrb[43].mxu0  ;;  %v18706_v63 = vpop.f32.mrb[45].mxu1  ;;  %v3620_v4 = vld [vmem:[#allocation10 + $0x8] sm:$0xff] }
 0x38d   :  { %v21510_v57 = vpop.eup %21509 }
 0x38e   :  { %v21512_v12 = vpop.eup %21511  ;;  %v4113_v46 = vmul.f32 %v21510_v57, %v22269_v6 }
 0x393   :  { %v3867_v11 = vpop.f32.mrb[44].mxu0  ;;  %v4102_v27 = vpop.f32.mrb[46].mxu1 }
 0x394   :  { %v21514_v29 = vpop.eup %21513  ;;  %v3868_v36 = vadd.f32 %v3867_v11, %v3788_v5  ;;  %v18695_v30 = vpop.f32.mrb[45].mxu0 }
 0x395   :  { %v18728_v38 = vpop.f32.mrb[47].mxu1  ;;  %v4114_v18 = vmul.f32 %v21514_v29, %v21512_v12  ;;  %v22485_v12 = vld [vmem:[#allocation3 + $0x8] sm:$0xff]  ;;  %v4130_v11 = vpop.permute.xlu1 %4129 }
 0x396   :  { %v3945_v19 = vadd.f32 %v3944_v56, %v3868_v36  ;;  %v4142_v36 = vsel %vm24260_vm1, %v22282_v47, 0.0  ;;  %v4137_v30 = vmul.f32 %v4130_v11, %v22282_v47 }
 0x397   :  { %v22480_v28 = vadd.f32 %v4114_v18, %v4113_v46 }
 0x39b   :  { %v4027_v50 = vpop.f32.mrb[46].mxu0 }
 0x39c   :  { %v4028_v51 = vadd.f32 %v4027_v50, %v3945_v19  ;;  %v18717_v52 = vpop.f32.mrb[47].mxu0  ;;  %v4139_v19 = vsel %vm24260_vm1, %v4137_v30, 0.0 }
 0x39e   :  { %v4103_v54 = vadd.f32 %v4102_v27, %v4028_v51  ;;  %v22488_v27 = vld [vmem:[#allocation2 + $0x8] sm:$0xff] }
 0x39f   :  { %v4143_v38 = vsel %vm24260_vm1, %v22488_v27, 0.0 }
 0x3a0   :  { %v4106_v40 = vadd.f32 %v4103_v54, %v3620_v4  ;;  %v22496_v18 = vadd.f32 %v4143_v38, %v4142_v36 }
 0x3a2   :  { %v17222_v44 = vmul.f32 -1.442695, %v4106_v40 }
 0x3a4   :  { %21515 = vpow2.f32 %v17222_v44 }
 0x3a5   :  { %21517 = vtanh.f32 %v22480_v28 }
 0x3ae   :  { %v21516_v60 = vpop.eup %21515 }
 0x3af   :  { %v4110_v61 = vadd.f32 1.0, %v21516_v60  ;;  %v21518_v5 = vpop.eup %21517 }
 0x3b1   :  { %21519 = vrcp.f32 %v4110_v61 }
 0x3bb   :  { %v21520_v13 = vpop.eup %21519 }
 0x3bc   :  { %v4117_v6 = vmul.f32 %v21520_v13, %v21518_v5 }
 0x3be   :  { %21521 = vtanh.f32 %v4117_v6 }
 0x3c8   :  { %v21522_v56 = vpop.eup %21521 }
 0x3c9   :  { %v4123_v63 = vmul.f32 %v21522_v56, %v22275_v37 }
 0x3cb   :  { %v4124_v57 = vsel %vm24260_vm1, %v4123_v63, 0.0 }
 0x3cc   :  { %4125 = vadd.xlane.f32.xlu1 %v4124_v57 }
 0x3dd   :  { %4134 = vperm.xlu1 %21484, %v22485_v12  }
 0x459   :  { %v4126_v29 = vpop.xlane.xlu1 %4125 }
 0x45a   :  { %v4145_v51 = vmul.f32 %v22496_v18, %v4126_v29 }
 0x45d   :  { %v4135_v37 = vpop.permute.xlu1 %4134 }
 0x45e   :  { %v4138_v46 = vmul.f32 %v4135_v37, %v22488_v27 }
 0x460   :  { %v4140_v50 = vsel %vm24260_vm1, %v4138_v46, 0.0 }
 0x461   :  { %v4141_v52 = vadd.f32 %v4140_v50, %v4139_v19 }
 0x463   :  { %v4146_v4 = vadd.f32 %v4145_v51, %v4141_v52 }
 0x465   :  { %v4147_v54 = vadd.f32 %v4146_v4, %v4117_v6  ;;  %4151 = vst.msk [vmem:[#allocation14 + $0x8] sm:$0xff] %vm24260_vm1, %v4146_v4 }
 0x467   :  { %4149 = vst.msk [vmem:[#allocation13 + $0x8] sm:$0xff] %vm24260_vm1, %v4147_v54  ;;  %4153 = vst.msk [vmem:[#allocation2 + $0x10] sm:$0xff] %vm24260_vm1, %v4147_v54  ;;  %v4164_v47 = vsel %vm24260_vm1, %v4147_v54, 0  ;;  %21523 = vtanh.f32 %v4147_v54 }
 0x468   :  { %v22505_v40 = vand.u32 4294901760, %v4164_v47 }
 0x46a   :  { %v22508_v44 = vsub.f32 %v4164_v47, %v22505_v40  ;;  %18749 = vmatmul.mubr.f32.vlgmr.msra.gmra.mrb[48].mxu1 %v22505_v40 }
 0x46b   :  { %20621 = vmatpush3.bf16.msra.mxu1 %v21985_v10  ;;  %18770 = vmatprep.mubr.msk.f32.mxu1 %vm21835_vm0, %v24223_v1 }
 0x46c   :  { %20622 = vmatprep.subr.bf16.mxu1 %v24221_v0  ;;  %v22516_v60 = vand.u32 4294901760, %v22508_v44 }
 0x46e   :  { %v4238_v61 = vsub.f32 %v22508_v44, %v22516_v60 }
 0x46f   :  { %20624 = vmatpush3.bf16.msra.mxu1 %v21988_v15 }
 0x470   :  { %20631 = vmatprep.subr.bf16.mxu1 %v24221_v0  ;;  %v22522_v5 = vand.u32 4294901760, %v4238_v61 }
 0x471   :  { %v21524_v13 = vpop.eup %21523 }
 0x472   :  { %18771 = vmatmul.mubr.f32.vlgmr.msra.gmra.mrb[50].mxu1 %v22516_v60  ;;  %18738 = vmatmul.mubr.f32.vlgmr.msra.gmra.mrb[48].mxu0 %v22522_v5  ;;  %v4155_v6 = vmul.f32 %v21524_v13, %v22309_v9 }
 0x473   :  { %20615 = vmatpush3.bf16.msra.mxu0 %v21992_v26  ;;  %20633 = vmatpush3.bf16.msra.mxu1 %v21985_v10 }
 0x474   :  { %20616 = vmatprep.subr.bf16.mxu0 %v24221_v0  ;;  %20634 = vmatprep.subr.bf16.mxu1 %v24221_v0  ;;  %v4156_v56 = vsel %vm24260_vm1, %v4155_v6, 0.0 }
 0x475   :  { %4157 = vadd.xlane.f32.xlu1 %v4156_v56  ;;  %18759 = vmatprep.mubr.msk.f32.mxu0 %vm21835_vm0, %v24223_v1 }
 0x476   :  { %18792 = vmatprep.mubr.msk.f32.mxu1 %vm21835_vm0, %v24223_v1 }
 0x477   :  { %20618 = vmatpush3.bf16.msra.mxu0 %v22002_v33  ;;  %20636 = vmatpush3.bf16.msra.mxu1 %v21988_v15 }
 0x478   :  { %20625 = vmatprep.subr.bf16.mxu0 %v24221_v0  ;;  %20643 = vmatprep.subr.bf16.mxu1 %v24221_v0 }
 0x47a   :  { %18760 = vmatmul.mubr.f32.vlgmr.msra.gmra.mrb[50].mxu0 %v22508_v44  ;;  %18793 = vmatmul.mubr.f32.vlgmr.msra.gmra.mrb[52].mxu1 %v22505_v40 }
 0x47b   :  { %20627 = vmatpush3.bf16.msra.mxu0 %v22010_v39  ;;  %20645 = vmatpush3.bf16.msra.mxu1 %v22062_v58 }
 0x47c   :  { %20628 = vmatprep.subr.bf16.mxu0 %v24221_v0  ;;  %20646 = vmatprep.subr.bf16.mxu1 %v24221_v0 }
 0x47d   :  { %18781 = vmatprep.mubr.msk.f32.mxu0 %vm21835_vm0, %v24223_v1  ;;  %18814 = vmatprep.mubr.msk.f32.mxu1 %vm21835_vm0, %v24223_v1 }
 0x47f   :  { %20630 = vmatpush3.bf16.msra.mxu0 %v22020_v43  ;;  %20648 = vmatpush3.bf16.msra.mxu1 %v22074_v2 }
 0x480   :  { %20637 = vmatprep.subr.bf16.mxu0 %v24221_v0  ;;  %20655 = vmatprep.subr.bf16.mxu1 %v24221_v0 }
 0x482   :  { %18782 = vmatmul.mubr.f32.vlgmr.msra.gmra.mrb[52].mxu0 %v22505_v40  ;;  %18815 = vmatmul.mubr.f32.vlgmr.msra.gmra.mrb[54].mxu1 %v22505_v40 }
 0x483   :  { %20639 = vmatpush3.bf16.msra.mxu0 %v22036_v48  ;;  %20657 = vmatpush3.bf16.msra.mxu1 %v22036_v48 }
 0x484   :  { %20640 = vmatprep.subr.bf16.mxu0 %v24221_v0  ;;  %20658 = vmatprep.subr.bf16.mxu1 %v24221_v0 }
 0x485   :  { %18803 = vmatprep.mubr.msk.f32.mxu0 %vm21835_vm0, %v24223_v1  ;;  %18836 = vmatprep.mubr.msk.f32.mxu1 %vm21835_vm0, %v24223_v1 }
 0x486   :  { %6153 = vperm.xlu1 %21484, %v22279_v45  }
 0x487   :  { %20642 = vmatpush3.bf16.msra.mxu0 %v22048_v53  ;;  %20660 = vmatpush3.bf16.msra.mxu1 %v22048_v53 }
 0x488   :  { %20649 = vmatprep.subr.bf16.mxu0 %v24221_v0  ;;  %20667 = vmatprep.subr.bf16.mxu1 %v24221_v0 }
 0x48a   :  { %18804 = vmatmul.mubr.f32.vlgmr.msra.gmra.mrb[54].mxu0 %v22522_v5  ;;  %18837 = vmatmul.mubr.f32.vlgmr.msra.gmra.mrb[56].mxu1 %v22516_v60 }
 0x48b   :  { %20651 = vmatpush3.bf16.msra.mxu0 %v22066_v59  ;;  %20669 = vmatpush3.bf16.msra.mxu1 %v22036_v48 }
 0x48c   :  { %20652 = vmatprep.subr.bf16.mxu0 %v24221_v0  ;;  %20670 = vmatprep.subr.bf16.mxu1 %v24221_v0 }
 0x48d   :  { %18825 = vmatprep.mubr.msk.f32.mxu0 %vm21835_vm0, %v24223_v1  ;;  %18858 = vmatprep.mubr.msk.f32.mxu1 %vm21835_vm0, %v24223_v1 }
 0x48f   :  { %20654 = vmatpush3.bf16.msra.mxu0 %v22078_v3  ;;  %20672 = vmatpush3.bf16.msra.mxu1 %v22048_v53 }
 0x490   :  { %20661 = vmatprep.subr.bf16.mxu0 %v24221_v0  ;;  %20679 = vmatprep.subr.bf16.mxu1 %v24221_v0 }
 0x492   :  { %18826 = vmatmul.mubr.f32.vlgmr.msra.gmra.mrb[56].mxu0 %v22508_v44  ;;  %18859 = vmatmul.mubr.f32.vlgmr.msra.gmra.mrb[58].mxu1 %v22505_v40 }
 0x493   :  { %20663 = vmatpush3.bf16.msra.mxu0 %v22086_v8  ;;  %20681 = vmatpush3.bf16.msra.mxu1 %v22140_v34 }
 0x494   :  { %20664 = vmatprep.subr.bf16.mxu0 %v24221_v0  ;;  %20682 = vmatprep.subr.bf16.mxu1 %v24221_v0 }
 0x495   :  { %18847 = vmatprep.mubr.msk.f32.mxu0 %vm21835_vm0, %v24223_v1  ;;  %18880 = vmatprep.mubr.msk.f32.mxu1 %vm21835_vm0, %v24223_v1 }
 0x497   :  { %20666 = vmatpush3.bf16.msra.mxu0 %v22098_v14  ;;  %20684 = vmatpush3.bf16.msra.mxu1 %v22152_v41 }
 0x498   :  { %20673 = vmatprep.subr.bf16.mxu0 %v24221_v0  ;;  %20691 = vmatprep.subr.bf16.mxu1 %v24221_v0 }
 0x49a   :  { %18848 = vmatmul.mubr.f32.vlgmr.msra.gmra.mrb[58].mxu0 %v22505_v40  ;;  %18881 = vmatmul.mubr.f32.vlgmr.msra.gmra.mrb[60].mxu1 %v22505_v40 }
 0x49b   :  { %20675 = vmatpush3.bf16.msra.mxu0 %v22114_v20  ;;  %20693 = vmatpush3.bf16.msra.mxu1 %v22114_v20 }
 0x49c   :  { %20676 = vmatprep.subr.bf16.mxu0 %v24221_v0  ;;  %20694 = vmatprep.subr.bf16.mxu1 %v24221_v0 }
 0x49d   :  { %18869 = vmatprep.mubr.msk.f32.mxu0 %vm21835_vm0, %v24223_v1  ;;  %18902 = vmatprep.mubr.msk.f32.mxu1 %vm21835_vm0, %v24223_v1 }
 0x49f   :  { %20678 = vmatpush3.bf16.msra.mxu0 %v22126_v25  ;;  %20696 = vmatpush3.bf16.msra.mxu1 %v22126_v25 }
 0x4a0   :  { %20685 = vmatprep.subr.bf16.mxu0 %v24221_v0  ;;  %20703 = vmatprep.subr.bf16.mxu1 %v24221_v0 }
 0x4a2   :  { %18870 = vmatmul.mubr.f32.vlgmr.msra.gmra.mrb[60].mxu0 %v22522_v5  ;;  %18903 = vmatmul.mubr.f32.vlgmr.msra.gmra.mrb[62].mxu1 %v22516_v60 }
 0x4a3   :  { %20687 = vmatpush3.bf16.msra.mxu0 %v22144_v35  ;;  %20705 = vmatpush3.bf16.msra.mxu1 %v22114_v20 }
 0x4a4   :  { %20688 = vmatprep.subr.bf16.mxu0 %v24221_v0  ;;  %20706 = vmatprep.subr.bf16.mxu1 %v24221_v0 }
 0x4a5   :  { %18891 = vmatprep.mubr.msk.f32.mxu0 %vm21835_vm0, %v24223_v1  ;;  %18924 = vmatprep.mubr.msk.f32.mxu1 %vm21835_vm0, %v24223_v1 }
 0x4a7   :  { %20690 = vmatpush3.bf16.msra.mxu0 %v22156_v42  ;;  %20708 = vmatpush3.bf16.msra.mxu1 %v22126_v25 }
 0x4a8   :  { %20697 = vmatprep.subr.bf16.mxu0 %v24221_v0  ;;  %20715 = vmatprep.subr.bf16.mxu1 %v24221_v0 }
 0x4aa   :  { %18892 = vmatmul.mubr.f32.vlgmr.msra.gmra.mrb[62].mxu0 %v22508_v44  ;;  %18925 = vmatmul.mubr.f32.vlgmr.msra.gmra.mrb[64].mxu1 %v22505_v40 }
 0x4ab   :  { %20699 = vmatpush3.bf16.msra.mxu0 %v22164_v49  ;;  %20717 = vmatpush3.bf16.msra.mxu1 %v22202_v16 }
 0x4ac   :  { %20700 = vmatprep.subr.bf16.mxu0 %v24221_v0  ;;  %20718 = vmatprep.subr.bf16.mxu1 %v24221_v0 }
 0x4ad   :  { %18913 = vmatprep.mubr.msk.f32.mxu0 %vm21835_vm0, %v24223_v1  ;;  %18946 = vmatprep.mubr.msk.f32.mxu1 %vm21835_vm0, %v24223_v1 }
 0x4af   :  { %20702 = vmatpush3.bf16.msra.mxu0 %v22172_v55  ;;  %20720 = vmatpush3.bf16.msra.mxu1 %v22212_v21 }
 0x4b0   :  { %20709 = vmatprep.subr.bf16.mxu0 %v24221_v0  ;;  %20727 = vmatprep.subr.bf16.mxu1 %v24221_v0 }
 0x4b2   :  { %18914 = vmatmul.mubr.f32.vlgmr.msra.gmra.mrb[64].mxu0 %v22505_v40  ;;  %18947 = vmatmul.mubr.f32.vlgmr.msra.gmra.mrb[66].mxu1 %v22505_v40 }
 0x4b3   :  { %20711 = vmatpush3.bf16.msra.mxu0 %v22182_v62  ;;  %20729 = vmatpush3.bf16.msra.mxu1 %v22182_v62 }
 0x4b4   :  { %20712 = vmatprep.subr.bf16.mxu0 %v24221_v0  ;;  %20730 = vmatprep.subr.bf16.mxu1 %v24221_v0 }
 0x4b5   :  { %18935 = vmatprep.mubr.msk.f32.mxu0 %vm21835_vm0, %v24223_v1  ;;  %18968 = vmatprep.mubr.msk.f32.mxu1 %vm21835_vm0, %v24223_v1 }
 0x4b7   :  { %20714 = vmatpush3.bf16.msra.mxu0 %v22190_v7  ;;  %20732 = vmatpush3.bf16.msra.mxu1 %v22190_v7 }
 0x4b8   :  { %20721 = vmatprep.subr.bf16.mxu0 %v24221_v0  ;;  %20739 = vmatprep.subr.bf16.mxu1 %v24221_v0 }
 0x4ba   :  { %18936 = vmatmul.mubr.f32.vlgmr.msra.gmra.mrb[66].mxu0 %v22522_v5  ;;  %18969 = vmatmul.mubr.f32.vlgmr.msra.gmra.mrb[68].mxu1 %v22516_v60 }
 0x4bb   :  { %20723 = vmatpush3.bf16.msra.mxu0 %v22204_v17  ;;  %20741 = vmatpush3.bf16.msra.mxu1 %v22182_v62 }
 0x4bc   :  { %20724 = vmatprep.subr.bf16.mxu0 %v24221_v0  ;;  %20742 = vmatprep.subr.bf16.mxu1 %v24221_v0 }
 0x4bd   :  { %18957 = vmatprep.mubr.msk.f32.mxu0 %vm21835_vm0, %v24223_v1  ;;  %18990 = vmatprep.mubr.msk.f32.mxu1 %vm21835_vm0, %v24223_v1 }
 0x4bf   :  { %20726 = vmatpush3.bf16.msra.mxu0 %v22214_v22  ;;  %20744 = vmatpush3.bf16.msra.mxu1 %v22190_v7 }
 0x4c0   :  { %20733 = vmatprep.subr.bf16.mxu0 %v24221_v0  ;;  %20751 = vmatprep.subr.bf16.mxu1 %v24221_v0 }
 0x4c2   :  { %18958 = vmatmul.mubr.f32.vlgmr.msra.gmra.mrb[68].mxu0 %v22508_v44  ;;  %18991 = vmatmul.mubr.f32.vlgmr.msra.gmra.mrb[70].mxu1 %v22505_v40 }
 0x4c3   :  { %20735 = vmatpush3.bf16.msra.mxu0 %v22224_v23  ;;  %18979 = vmatprep.mubr.msk.f32.mxu0 %vm21835_vm0, %v24223_v1 }
 0x4c4   :  { %20736 = vmatprep.subr.bf16.mxu0 %v24221_v0  ;;  %20753 = vmatpush3.bf16.msra.mxu1 %v21995_v31 }
 0x4c5   :  { %20754 = vmatprep.subr.bf16.mxu1 %v24221_v0  ;;  %19012 = vmatprep.mubr.msk.f32.mxu1 %vm21835_vm0, %v24223_v1 }
 0x4c7   :  { %20738 = vmatpush3.bf16.msra.mxu0 %v22232_v24 }
 0x4c8   :  { %20756 = vmatpush3.bf16.msra.mxu1 %v22000_v32  ;;  %20745 = vmatprep.subr.bf16.mxu0 %v24221_v0 }
 0x4c9   :  { %20763 = vmatprep.subr.bf16.mxu1 %v24221_v0 }
 0x4ca   :  { %18980 = vmatmul.mubr.f32.vlgmr.msra.gmra.mrb[70].mxu0 %v22505_v40 }
 0x4cb   :  { %20747 = vmatpush3.bf16.msra.mxu0 %v21985_v10  ;;  %19001 = vmatprep.mubr.msk.f32.mxu0 %vm21835_vm0, %v24223_v1 }
 0x4cc   :  { %20748 = vmatprep.subr.bf16.mxu0 %v24221_v0 }
 0x4cf   :  { %20750 = vmatpush3.bf16.msra.mxu0 %v21988_v15 }
 0x4d0   :  { %20757 = vmatprep.subr.bf16.mxu0 %v24221_v0 }
 0x502   :  { %v4158_v45 = vpop.xlane.xlu1 %4157 }
 0x503   :  { %4160 = vst.msk [vmem:[#allocation3 + $0x10] sm:$0xff] %vm121_vm2, %v4158_v45 }
 0x50a   :  { %v22689_v9 = vld [vmem:[#allocation3 + $0x10] sm:$0xff] }
 0x50b   :  { %6163 = vperm.xlu1 %21484, %v22689_v9  }
 0x53d   :  { %v4332_v63 = vpop.f32.mrb[48].mxu1 }
 0x53e   :  { %v18750_v57 = vpop.f32.mrb[49].mxu1 }
 0x545   :  { %v4489_v11 = vpop.f32.mrb[50].mxu1  ;;  %v4241_v29 = vpop.f32.mrb[48].mxu0 }
 0x546   :  { %v4333_v36 = vadd.f32 %v4332_v63, %v4241_v29  ;;  %v18772_v30 = vpop.f32.mrb[51].mxu1  ;;  %v18739_v38 = vpop.f32.mrb[49].mxu0 }
 0x54d   :  { %v4412_v37 = vpop.f32.mrb[50].mxu0  ;;  %v4647_v46 = vpop.f32.mrb[52].mxu1 }
 0x54e   :  { %v4413_v19 = vadd.f32 %v4412_v37, %v4333_v36  ;;  %v18761_v50 = vpop.f32.mrb[51].mxu0  ;;  %v18794_v51 = vpop.f32.mrb[53].mxu1 }
 0x54f   :  { %v4162_v51 = vld [vmem:[#allocation4 + $0x10] sm:$0xff] }
 0x550   :  { %v4490_v52 = vadd.f32 %v4489_v11, %v4413_v19 }
 0x555   :  { %v4572_v4 = vpop.f32.mrb[52].mxu0  ;;  %v4826_v54 = vpop.f32.mrb[54].mxu1 }
 0x556   :  { %v4573_v47 = vadd.f32 %v4572_v4, %v4490_v52  ;;  %v18783_v40 = vpop.f32.mrb[53].mxu0  ;;  %v18816_v44 = vpop.f32.mrb[55].mxu1  ;;  %v4659_v52 = vld [vmem:[#allocation7 + $0x10] sm:$0xff] }
 0x558   :  { %v4648_v60 = vadd.f32 %v4647_v46, %v4573_v47 }
 0x55a   :  { %v4651_v46 = vadd.f32 %v4648_v60, %v4162_v51 }
 0x55d   :  { %v4735_v61 = vpop.f32.mrb[54].mxu0  ;;  %v4983_v5 = vpop.f32.mrb[56].mxu1 }
 0x55e   :  { %v4827_v13 = vadd.f32 %v4826_v54, %v4735_v61  ;;  %v18805_v6 = vpop.f32.mrb[55].mxu0  ;;  %v18838_v56 = vpop.f32.mrb[57].mxu1  ;;  %v17223_v61 = vmul.f32 -1.442695, %v4651_v46 }
 0x565   :  { %v4906_v45 = vpop.f32.mrb[56].mxu0  ;;  %v5141_v63 = vpop.f32.mrb[58].mxu1 }
 0x566   :  { %v4907_v57 = vadd.f32 %v4906_v45, %v4827_v13  ;;  %v18827_v29 = vpop.f32.mrb[57].mxu0  ;;  %v18860_v30 = vpop.f32.mrb[59].mxu1 }
 0x568   :  { %v4984_v36 = vadd.f32 %v4983_v5, %v4907_v57 }
 0x56d   :  { %v5066_v38 = vpop.f32.mrb[58].mxu0  ;;  %v5320_v37 = vpop.f32.mrb[60].mxu1 }
 0x56e   :  { %v5067_v11 = vadd.f32 %v5066_v38, %v4984_v36  ;;  %v18849_v19 = vpop.f32.mrb[59].mxu0  ;;  %v18882_v50 = vpop.f32.mrb[61].mxu1 }
 0x570   :  { %v5142_v4 = vadd.f32 %v5141_v63, %v5067_v11 }
 0x572   :  { %v5145_v47 = vadd.f32 %v5142_v4, %v4659_v52 }
 0x574   :  { %v17224_v40 = vmul.f32 -1.442695, %v5145_v47 }
 0x575   :  { %v5229_v54 = vpop.f32.mrb[60].mxu0  ;;  %v5477_v44 = vpop.f32.mrb[62].mxu1 }
 0x576   :  { %v5321_v6 = vadd.f32 %v5320_v37, %v5229_v54  ;;  %v18871_v56 = vpop.f32.mrb[61].mxu0  ;;  %v18904_v13 = vpop.f32.mrb[63].mxu1  ;;  %21525 = vpow2.f32 %v17224_v40  ;;  %v5153_v37 = vld [vmem:[#allocation9 + $0x10] sm:$0xff] }
 0x577   :  { %21527 = vpow2.f32 %v17223_v61 }
 0x57d   :  { %v5400_v5 = vpop.f32.mrb[62].mxu0  ;;  %v5635_v45 = vpop.f32.mrb[64].mxu1 }
 0x57e   :  { %v5401_v57 = vadd.f32 %v5400_v5, %v5321_v6  ;;  %v18893_v29 = vpop.f32.mrb[63].mxu0  ;;  %v18926_v30 = vpop.f32.mrb[65].mxu1 }
 0x580   :  { %v5478_v36 = vadd.f32 %v5477_v44, %v5401_v57  ;;  %v21526_v38 = vpop.eup %21525 }
 0x581   :  { %v21528_v19 = vpop.eup %21527  ;;  %v5149_v11 = vadd.f32 1.0, %v21526_v38 }
 0x582   :  { %v4655_v4 = vadd.f32 1.0, %v21528_v19 }
 0x583   :  { %21529 = vrcp.f32 %v5149_v11 }
 0x584   :  { %21531 = vrcp.f32 %v4655_v4 }
 0x585   :  { %v5560_v63 = vpop.f32.mrb[64].mxu0  ;;  %v5809_v60 = vpop.f32.mrb[66].mxu1 }
 0x586   :  { %v5561_v50 = vadd.f32 %v5560_v63, %v5478_v36  ;;  %v18915_v51 = vpop.f32.mrb[65].mxu0  ;;  %v18948_v52 = vpop.f32.mrb[67].mxu1 }
 0x588   :  { %v5636_v46 = vadd.f32 %v5635_v45, %v5561_v50 }
 0x58a   :  { %v5639_v47 = vadd.f32 %v5636_v46, %v5153_v37 }
 0x58c   :  { %21533 = vtanh.f32 %v5639_v47 }
 0x58d   :  { %v5718_v40 = vpop.f32.mrb[66].mxu0  ;;  %v5966_v54 = vpop.f32.mrb[68].mxu1 }
 0x58e   :  { %v5810_v61 = vadd.f32 %v5809_v60, %v5718_v40  ;;  %v18937_v6 = vpop.f32.mrb[67].mxu0  ;;  %v18970_v44 = vpop.f32.mrb[69].mxu1  ;;  %v5642_v60 = vld [vmem:[#allocation10 + $0x10] sm:$0xff] }
 0x58f   :  { %v21530_v56 = vpop.eup %21529  ;;  %v21645_v44 = vld [vmem:[%s24217_s5] ss:$0 sm:$0xff] }
 0x590   :  { %v21532_v13 = vpop.eup %21531  ;;  %v6135_v19 = vmul.f32 %v21530_v56, %v22480_v28 }
 0x595   :  { %v5889_v5 = vpop.f32.mrb[68].mxu0  ;;  %v6124_v57 = vpop.f32.mrb[70].mxu1 }
 0x596   :  { %v21534_v29 = vpop.eup %21533  ;;  %v5890_v30 = vadd.f32 %v5889_v5, %v5810_v61  ;;  %v18959_v36 = vpop.f32.mrb[69].mxu0 }
 0x597   :  { %v18992_v38 = vpop.f32.mrb[71].mxu1  ;;  %v6136_v45 = vmul.f32 %v21534_v29, %v21532_v13  ;;  %v6154_v5 = vpop.permute.xlu1 %6153  ;;  %v21646_v36 = vld [vmem:[#allocation2] sm:$0xff] }
 0x598   :  { %v5967_v63 = vadd.f32 %v5966_v54, %v5890_v30  ;;  %v22701_v30 = vld [vmem:[#allocation2 + $0x10] sm:$0xff]  ;;  %v6166_v38 = vmul.f32 %v21646_v36, %v6154_v5  ;;  %v22903_v36 = vld [vmem:[#allocation3] sm:$0xff] }
 0x599   :  { %v22693_v11 = vadd.f32 %v6136_v45, %v6135_v19 }
 0x59b   :  { %v6164_v29 = vpop.permute.xlu1 %6163 }
 0x59c   :  { %v6168_v45 = vmul.f32 %v6164_v29, %v22701_v30 }
 0x59d   :  { %v6049_v50 = vpop.f32.mrb[70].mxu0 }
 0x59e   :  { %v6050_v51 = vadd.f32 %v6049_v50, %v5967_v63  ;;  %v18981_v52 = vpop.f32.mrb[71].mxu0  ;;  %v6177_v63 = vsel %vm24260_vm1, %v22701_v30, 0.0 }
 0x5a0   :  { %v6125_v4 = vadd.f32 %v6124_v57, %v6050_v51  ;;  %v6169_v51 = vsel %vm24260_vm1, %v6166_v38, 0.0  ;;  %v22907_v38 = vsel %vm121_vm2, %v22903_v36, -inf }
 0x5a2   :  { %v6128_v37 = vadd.f32 %v6125_v4, %v5642_v60  ;;  %v6178_v60 = vadd.f32 %v6177_v63, %v22496_v18  ;;  %v8184_v63 = vsel %vm121_vm2, %v22689_v9, -inf }
 0x5a4   :  { %v17225_v46 = vmul.f32 -1.442695, %v6128_v37  ;;  %v6172_v37 = vsel %vm24260_vm1, %v6168_v45, 0.0 }
 0x5a6   :  { %21535 = vpow2.f32 %v17225_v46 }
 0x5a7   :  { %21537 = vtanh.f32 %v22693_v11 }
 0x5b0   :  { %v21536_v47 = vpop.eup %21535 }
 0x5b1   :  { %v6132_v40 = vadd.f32 1.0, %v21536_v47  ;;  %v21538_v61 = vpop.eup %21537 }
 0x5b3   :  { %21539 = vrcp.f32 %v6132_v40 }
 0x5bd   :  { %v21540_v6 = vpop.eup %21539 }
 0x5be   :  { %v6139_v28 = vmul.f32 %v21540_v6, %v21538_v61 }
 0x5c0   :  { %21541 = vtanh.f32 %v6139_v28 }
 0x5ca   :  { %v21542_v54 = vpop.eup %21541 }
 0x5cb   :  { %v6147_v56 = vmul.f32 %v21645_v44, %v21542_v54 }
 0x5cd   :  { %v6148_v13 = vsel %vm24260_vm1, %v6147_v56, 0.0 }
 0x5ce   :  { %6149 = vadd.xlane.f32.xlu0 %v6148_v13  ;;  %v22739_v13 = vld [vmem:[%s24218_s6] ss:$0 sm:$0xff] }
 0x5e4   :  { %6158 = vperm.xlu0 %21483, %v22485_v12  }
 0x65b   :  { %v6150_v57 = vpop.xlane.xlu0 %6149 }
 0x65c   :  { %v6179_v46 = vmul.f32 %v6178_v60, %v6150_v57 }
 0x663   :  { %v6159_v19 = vpop.permute.xlu0 %6158 }
 0x664   :  { %v6167_v50 = vmul.f32 %v6159_v19, %v22488_v27  ;;  %v8183_v19 = vsel %vm121_vm2, %v22485_v12, -inf }
 0x666   :  { %v6170_v52 = vsel %vm24260_vm1, %v6167_v50, 0.0 }
 0x667   :  { %v6171_v4 = vadd.f32 %v6170_v52, %v6169_v51  ;;  %v8186_v51 = vmax.f32 %v22907_v38, %v8183_v19 }
 0x669   :  { %v6173_v47 = vadd.f32 %v6172_v37, %v6171_v4  ;;  %v21838_v4 = vmov 4  }
 0x66b   :  { %v6180_v40 = vadd.f32 %v6179_v46, %v6173_v47 }
 0x66d   :  { %v6181_v61 = vadd.f32 %v6180_v40, %v6139_v28  ;;  %6185 = vst.msk [vmem:[#allocation14 + $0x10] sm:$0xff] %vm24260_vm1, %v6180_v40 }
 0x66f   :  { %6183 = vst.msk [vmem:[#allocation13 + $0x10] sm:$0xff] %vm24260_vm1, %v6181_v61  ;;  %6187 = vst.msk [vmem:[#allocation2 + $0x18] sm:$0xff] %vm24260_vm1, %v6181_v61  ;;  %v6198_v27 = vsel %vm24260_vm1, %v6181_v61, 0  ;;  %21543 = vtanh.f32 %v6181_v61 }
 0x670   :  { %v22715_v6 = vand.u32 4294901760, %v6198_v27 }
 0x672   :  { %v22718_v18 = vsub.f32 %v6198_v27, %v22715_v6  ;;  %19013 = vmatmul.mubr.f32.vlgmr.msra.gmra.mrb[72].mxu1 %v22715_v6 }
 0x673   :  { %20765 = vmatpush3.bf16.msra.mxu1 %v21985_v10  ;;  %19034 = vmatprep.mubr.msk.f32.mxu1 %vm21835_vm0, %v24223_v1 }
 0x674   :  { %20766 = vmatprep.subr.bf16.mxu1 %v24221_v0  ;;  %v22726_v28 = vand.u32 4294901760, %v22718_v18 }
 0x676   :  { %v6272_v54 = vsub.f32 %v22718_v18, %v22726_v28 }
 0x677   :  { %20768 = vmatpush3.bf16.msra.mxu1 %v21988_v15 }
 0x678   :  { %20775 = vmatprep.subr.bf16.mxu1 %v24221_v0  ;;  %v22732_v44 = vand.u32 4294901760, %v6272_v54 }
 0x679   :  { %v21544_v56 = vpop.eup %21543 }
 0x67a   :  { %19035 = vmatmul.mubr.f32.vlgmr.msra.gmra.mrb[74].mxu1 %v22726_v28  ;;  %19002 = vmatmul.mubr.f32.vlgmr.msra.gmra.mrb[72].mxu0 %v22732_v44  ;;  %v6189_v5 = vmul.f32 %v22739_v13, %v21544_v56 }
 0x67b   :  { %20759 = vmatpush3.bf16.msra.mxu0 %v21992_v26  ;;  %20777 = vmatpush3.bf16.msra.mxu1 %v21985_v10 }
 0x67c   :  { %20760 = vmatprep.subr.bf16.mxu0 %v24221_v0  ;;  %20778 = vmatprep.subr.bf16.mxu1 %v24221_v0  ;;  %v6190_v57 = vsel %vm24260_vm1, %v6189_v5, 0.0 }
 0x67d   :  { %6191 = vadd.xlane.f32.xlu1 %v6190_v57  ;;  %19023 = vmatprep.mubr.msk.f32.mxu0 %vm21835_vm0, %v24223_v1 }
 0x67e   :  { %19056 = vmatprep.mubr.msk.f32.mxu1 %vm21835_vm0, %v24223_v1 }
 0x67f   :  { %20762 = vmatpush3.bf16.msra.mxu0 %v22002_v33  ;;  %20780 = vmatpush3.bf16.msra.mxu1 %v21988_v15 }
 0x680   :  { %20769 = vmatprep.subr.bf16.mxu0 %v24221_v0  ;;  %20787 = vmatprep.subr.bf16.mxu1 %v24221_v0 }
 0x682   :  { %19024 = vmatmul.mubr.f32.vlgmr.msra.gmra.mrb[74].mxu0 %v22718_v18  ;;  %19057 = vmatmul.mubr.f32.vlgmr.msra.gmra.mrb[76].mxu1 %v22715_v6 }
 0x683   :  { %20771 = vmatpush3.bf16.msra.mxu0 %v22010_v39  ;;  %20789 = vmatpush3.bf16.msra.mxu1 %v22062_v58 }
 0x684   :  { %20772 = vmatprep.subr.bf16.mxu0 %v24221_v0  ;;  %20790 = vmatprep.subr.bf16.mxu1 %v24221_v0 }
 0x685   :  { %19045 = vmatprep.mubr.msk.f32.mxu0 %vm21835_vm0, %v24223_v1  ;;  %19078 = vmatprep.mubr.msk.f32.mxu1 %vm21835_vm0, %v24223_v1 }
 0x687   :  { %20774 = vmatpush3.bf16.msra.mxu0 %v22020_v43  ;;  %20792 = vmatpush3.bf16.msra.mxu1 %v22074_v2 }
 0x688   :  { %20781 = vmatprep.subr.bf16.mxu0 %v24221_v0  ;;  %20799 = vmatprep.subr.bf16.mxu1 %v24221_v0 }
 0x68a   :  { %19046 = vmatmul.mubr.f32.vlgmr.msra.gmra.mrb[76].mxu0 %v22715_v6  ;;  %19079 = vmatmul.mubr.f32.vlgmr.msra.gmra.mrb[78].mxu1 %v22715_v6 }
 0x68b   :  { %20783 = vmatpush3.bf16.msra.mxu0 %v22036_v48  ;;  %20801 = vmatpush3.bf16.msra.mxu1 %v22036_v48 }
 0x68c   :  { %20784 = vmatprep.subr.bf16.mxu0 %v24221_v0  ;;  %20802 = vmatprep.subr.bf16.mxu1 %v24221_v0 }
 0x68d   :  { %19067 = vmatprep.mubr.msk.f32.mxu0 %vm21835_vm0, %v24223_v1  ;;  %19100 = vmatprep.mubr.msk.f32.mxu1 %vm21835_vm0, %v24223_v1 }
 0x68f   :  { %20786 = vmatpush3.bf16.msra.mxu0 %v22048_v53  ;;  %20804 = vmatpush3.bf16.msra.mxu1 %v22048_v53 }
 0x690   :  { %20793 = vmatprep.subr.bf16.mxu0 %v24221_v0  ;;  %20811 = vmatprep.subr.bf16.mxu1 %v24221_v0 }
 0x692   :  { %19068 = vmatmul.mubr.f32.vlgmr.msra.gmra.mrb[78].mxu0 %v22732_v44  ;;  %19101 = vmatmul.mubr.f32.vlgmr.msra.gmra.mrb[80].mxu1 %v22726_v28 }
 0x693   :  { %20795 = vmatpush3.bf16.msra.mxu0 %v22066_v59  ;;  %20813 = vmatpush3.bf16.msra.mxu1 %v22036_v48 }
 0x694   :  { %20796 = vmatprep.subr.bf16.mxu0 %v24221_v0  ;;  %20814 = vmatprep.subr.bf16.mxu1 %v24221_v0 }
 0x695   :  { %19089 = vmatprep.mubr.msk.f32.mxu0 %vm21835_vm0, %v24223_v1  ;;  %19122 = vmatprep.mubr.msk.f32.mxu1 %vm21835_vm0, %v24223_v1 }
 0x697   :  { %20798 = vmatpush3.bf16.msra.mxu0 %v22078_v3  ;;  %20816 = vmatpush3.bf16.msra.mxu1 %v22048_v53 }
 0x698   :  { %20805 = vmatprep.subr.bf16.mxu0 %v24221_v0  ;;  %20823 = vmatprep.subr.bf16.mxu1 %v24221_v0 }
 0x69a   :  { %19090 = vmatmul.mubr.f32.vlgmr.msra.gmra.mrb[80].mxu0 %v22718_v18  ;;  %19123 = vmatmul.mubr.f32.vlgmr.msra.gmra.mrb[82].mxu1 %v22715_v6 }
 0x69b   :  { %20807 = vmatpush3.bf16.msra.mxu0 %v22086_v8  ;;  %20825 = vmatpush3.bf16.msra.mxu1 %v22140_v34 }
 0x69c   :  { %20808 = vmatprep.subr.bf16.mxu0 %v24221_v0  ;;  %20826 = vmatprep.subr.bf16.mxu1 %v24221_v0 }
 0x69d   :  { %19111 = vmatprep.mubr.msk.f32.mxu0 %vm21835_vm0, %v24223_v1  ;;  %19144 = vmatprep.mubr.msk.f32.mxu1 %vm21835_vm0, %v24223_v1 }
 0x69f   :  { %20810 = vmatpush3.bf16.msra.mxu0 %v22098_v14  ;;  %20828 = vmatpush3.bf16.msra.mxu1 %v22152_v41 }
 0x6a0   :  { %20817 = vmatprep.subr.bf16.mxu0 %v24221_v0  ;;  %20835 = vmatprep.subr.bf16.mxu1 %v24221_v0 }
 0x6a2   :  { %19112 = vmatmul.mubr.f32.vlgmr.msra.gmra.mrb[82].mxu0 %v22715_v6  ;;  %19145 = vmatmul.mubr.f32.vlgmr.msra.gmra.mrb[84].mxu1 %v22715_v6 }
 0x6a3   :  { %20819 = vmatpush3.bf16.msra.mxu0 %v22114_v20  ;;  %20837 = vmatpush3.bf16.msra.mxu1 %v22114_v20 }
 0x6a4   :  { %20820 = vmatprep.subr.bf16.mxu0 %v24221_v0  ;;  %20838 = vmatprep.subr.bf16.mxu1 %v24221_v0 }
 0x6a5   :  { %19133 = vmatprep.mubr.msk.f32.mxu0 %vm21835_vm0, %v24223_v1  ;;  %19166 = vmatprep.mubr.msk.f32.mxu1 %vm21835_vm0, %v24223_v1 }
 0x6a7   :  { %20822 = vmatpush3.bf16.msra.mxu0 %v22126_v25  ;;  %20840 = vmatpush3.bf16.msra.mxu1 %v22126_v25 }
 0x6a8   :  { %20829 = vmatprep.subr.bf16.mxu0 %v24221_v0  ;;  %20847 = vmatprep.subr.bf16.mxu1 %v24221_v0 }
 0x6aa   :  { %19134 = vmatmul.mubr.f32.vlgmr.msra.gmra.mrb[84].mxu0 %v22732_v44  ;;  %19167 = vmatmul.mubr.f32.vlgmr.msra.gmra.mrb[86].mxu1 %v22726_v28 }
 0x6ab   :  { %20831 = vmatpush3.bf16.msra.mxu0 %v22144_v35  ;;  %20849 = vmatpush3.bf16.msra.mxu1 %v22114_v20 }
 0x6ac   :  { %20832 = vmatprep.subr.bf16.mxu0 %v24221_v0  ;;  %20850 = vmatprep.subr.bf16.mxu1 %v24221_v0 }
 0x6ad   :  { %19155 = vmatprep.mubr.msk.f32.mxu0 %vm21835_vm0, %v24223_v1  ;;  %19188 = vmatprep.mubr.msk.f32.mxu1 %vm21835_vm0, %v24223_v1 }
 0x6af   :  { %20834 = vmatpush3.bf16.msra.mxu0 %v22156_v42  ;;  %20852 = vmatpush3.bf16.msra.mxu1 %v22126_v25 }
 0x6b0   :  { %20841 = vmatprep.subr.bf16.mxu0 %v24221_v0  ;;  %20859 = vmatprep.subr.bf16.mxu1 %v24221_v0 }
 0x6b2   :  { %19156 = vmatmul.mubr.f32.vlgmr.msra.gmra.mrb[86].mxu0 %v22718_v18  ;;  %19189 = vmatmul.mubr.f32.vlgmr.msra.gmra.mrb[88].mxu1 %v22715_v6 }
 0x6b3   :  { %20843 = vmatpush3.bf16.msra.mxu0 %v22164_v49  ;;  %20861 = vmatpush3.bf16.msra.mxu1 %v22202_v16 }
 0x6b4   :  { %20844 = vmatprep.subr.bf16.mxu0 %v24221_v0  ;;  %20862 = vmatprep.subr.bf16.mxu1 %v24221_v0 }
 0x6b5   :  { %19177 = vmatprep.mubr.msk.f32.mxu0 %vm21835_vm0, %v24223_v1  ;;  %19210 = vmatprep.mubr.msk.f32.mxu1 %vm21835_vm0, %v24223_v1 }
 0x6b7   :  { %20846 = vmatpush3.bf16.msra.mxu0 %v22172_v55  ;;  %20864 = vmatpush3.bf16.msra.mxu1 %v22212_v21 }
 0x6b8   :  { %20853 = vmatprep.subr.bf16.mxu0 %v24221_v0  ;;  %20871 = vmatprep.subr.bf16.mxu1 %v24221_v0 }
 0x6ba   :  { %19178 = vmatmul.mubr.f32.vlgmr.msra.gmra.mrb[88].mxu0 %v22715_v6  ;;  %19211 = vmatmul.mubr.f32.vlgmr.msra.gmra.mrb[90].mxu1 %v22715_v6 }
 0x6bb   :  { %20855 = vmatpush3.bf16.msra.mxu0 %v22182_v62  ;;  %20873 = vmatpush3.bf16.msra.mxu1 %v22182_v62 }
 0x6bc   :  { %20856 = vmatprep.subr.bf16.mxu0 %v24221_v0  ;;  %20874 = vmatprep.subr.bf16.mxu1 %v24221_v0 }
 0x6bd   :  { %19199 = vmatprep.mubr.msk.f32.mxu0 %vm21835_vm0, %v24223_v1  ;;  %19232 = vmatprep.mubr.msk.f32.mxu1 %vm21835_vm0, %v24223_v1 }
 0x6bf   :  { %20858 = vmatpush3.bf16.msra.mxu0 %v22190_v7  ;;  %20876 = vmatpush3.bf16.msra.mxu1 %v22190_v7 }
 0x6c0   :  { %20865 = vmatprep.subr.bf16.mxu0 %v24221_v0  ;;  %20883 = vmatprep.subr.bf16.mxu1 %v24221_v0 }
 0x6c2   :  { %19200 = vmatmul.mubr.f32.vlgmr.msra.gmra.mrb[90].mxu0 %v22732_v44  ;;  %19233 = vmatmul.mubr.f32.vlgmr.msra.gmra.mrb[92].mxu1 %v22726_v28 }
 0x6c3   :  { %20867 = vmatpush3.bf16.msra.mxu0 %v22204_v17  ;;  %20885 = vmatpush3.bf16.msra.mxu1 %v22182_v62 }
 0x6c4   :  { %20868 = vmatprep.subr.bf16.mxu0 %v24221_v0  ;;  %20886 = vmatprep.subr.bf16.mxu1 %v24221_v0 }
 0x6c5   :  { %19221 = vmatprep.mubr.msk.f32.mxu0 %vm21835_vm0, %v24223_v1  ;;  %19254 = vmatprep.mubr.msk.f32.mxu1 %vm21835_vm0, %v24223_v1 }
 0x6c7   :  { %20870 = vmatpush3.bf16.msra.mxu0 %v22214_v22  ;;  %20888 = vmatpush3.bf16.msra.mxu1 %v22190_v7 }
 0x6c8   :  { %20877 = vmatprep.subr.bf16.mxu0 %v24221_v0  ;;  %20895 = vmatprep.subr.bf16.mxu1 %v24221_v0 }
 0x6ca   :  { %19222 = vmatmul.mubr.f32.vlgmr.msra.gmra.mrb[92].mxu0 %v22718_v18  ;;  %19255 = vmatmul.mubr.f32.vlgmr.msra.gmra.mrb[94].mxu1 %v22715_v6 }
 0x6cb   :  { %20879 = vmatpush3.bf16.msra.mxu0 %v22224_v23  ;;  %19243 = vmatprep.mubr.msk.f32.mxu0 %vm21835_vm0, %v24223_v1 }
 0x6cc   :  { %20880 = vmatprep.subr.bf16.mxu0 %v24221_v0  ;;  %20897 = vmatpush3.bf16.msra.mxu1 %v21995_v31 }
 0x6cd   :  { %20898 = vmatprep.subr.bf16.mxu1 %v24221_v0  ;;  %19276 = vmatprep.mubr.msk.f32.mxu1 %vm21835_vm0, %v24223_v1 }
 0x6cf   :  { %20882 = vmatpush3.bf16.msra.mxu0 %v22232_v24 }
 0x6d0   :  { %20900 = vmatpush3.bf16.msra.mxu1 %v22000_v32  ;;  %20889 = vmatprep.subr.bf16.mxu0 %v24221_v0 }
 0x6d1   :  { %20907 = vmatprep.subr.bf16.mxu1 %v24221_v0 }
 0x6d2   :  { %19244 = vmatmul.mubr.f32.vlgmr.msra.gmra.mrb[94].mxu0 %v22715_v6 }
 0x6d3   :  { %20891 = vmatpush3.bf16.msra.mxu0 %v21985_v10  ;;  %19265 = vmatprep.mubr.msk.f32.mxu0 %vm21835_vm0, %v24223_v1 }
 0x6d4   :  { %20892 = vmatprep.subr.bf16.mxu0 %v24221_v0 }
 0x6d7   :  { %20894 = vmatpush3.bf16.msra.mxu0 %v21988_v15 }
 0x6d8   :  { %20901 = vmatprep.subr.bf16.mxu0 %v24221_v0 }
 0x70a   :  { %v6192_v29 = vpop.xlane.xlu1 %6191 }
 0x70b   :  { %6194 = vst.msk [vmem:[#allocation3 + $0x18] sm:$0xff] %vm121_vm2, %v6192_v29 }
 0x712   :  { %v22911_v45 = vld [vmem:[#allocation3 + $0x18] sm:$0xff] }
 0x713   :  { %v22917_v50 = vsel %vm121_vm2, %v22911_v45, -inf }
 0x714   :  { %v8187_v52 = vmax.f32 %v8184_v63, %v22917_v50 }
 0x716   :  { %v8188_v60 = vmax.f32 %v8186_v51, %v8187_v52 }
 0x718   :  { %vm8189_vm3 = vcmp.ge.f32.partialorder %v22903_v36, %v8188_v60  ;;  %vm8190_vm4 = vcmp.ge.f32.partialorder %v22485_v12, %v8188_v60  ;;  %vm8191_vm5 = vcmp.ge.f32.partialorder %v22689_v9, %v8188_v60  ;;  %vm8192_vm6 = vcmp.ge.f32.partialorder %v22911_v45, %v8188_v60 }
 0x719   :  { %v8193_v37 = vsel %vm8189_vm3, 0, %v21838_v4  ;;  %v8194_v46 = vsel %vm8190_vm4, 1, %v21838_v4  ;;  %v8195_v47 = vsel %vm8191_vm5, 2, %v21838_v4  ;;  %v8196_v40 = vsel %vm8192_vm6, 3, %v21838_v4 }
 0x71a   :  { %v8197_v61 = vsel %vm121_vm2, %v8193_v37, 2147483647  ;;  %v8198_v27 = vsel %vm121_vm2, %v8194_v46, 2147483647  ;;  %v8199_v6 = vsel %vm121_vm2, %v8195_v47, 2147483647 }
 0x71b   :  { %v8200_v18 = vsel %vm121_vm2, %v8196_v40, 2147483647  ;;  %vm8201_vm7 = vcmp.lt.s32.totalorder %v8197_v61, %v8198_v27 }
 0x71c   :  { %v8202_v28 = vsel %vm8201_vm7, %v8197_v61, %v8198_v27  ;;  %vm8203_vm8 = vcmp.lt.s32.totalorder %v8199_v6, %v8200_v18 }
 0x71d   :  { %v8204_v54 = vsel %vm8203_vm8, %v8199_v6, %v8200_v18 }
 0x71e   :  { %vm8205_vm9 = vcmp.lt.s32.totalorder %v8202_v28, %v8204_v54 }
 0x71f   :  { %v8206_v44 = vsel %vm8205_vm9, %v8202_v28, %v8204_v54 }
 0x720   :  { %vm8207_vm10 = vcmp.eq.s32.totalorder %v8206_v44, 0  ;;  %vm8208_vm11 = vcmp.eq.s32.totalorder %v8206_v44, 1  ;;  %vm8209_vm12 = vcmp.eq.s32.totalorder %v8206_v44, 2  ;;  %vm8210_vm13 = vcmp.eq.s32.totalorder %v8206_v44, 3 }
 0x721   :  { %v8211_v56 = vsel %vm8207_vm10, -1e+30, %v22903_v36  ;;  %v8212_v5 = vsel %vm8208_vm11, -1e+30, %v22485_v12  ;;  %v8213_v57 = vsel %vm8209_vm12, -1e+30, %v22689_v9 }
 0x722   :  { %v8214_v29 = vsel %vm8210_vm13, -1e+30, %v22911_v45  ;;  %v8215_v19 = vsel %vm121_vm2, %v8211_v56, -inf  ;;  %v8216_v63 = vsel %vm121_vm2, %v8212_v5, -inf  ;;  %v8217_v51 = vsel %vm121_vm2, %v8213_v57, -inf }
 0x723   :  { %v8218_v52 = vsel %vm121_vm2, %v8214_v29, -inf  ;;  %v8219_v60 = vmax.f32 %v8215_v19, %v8216_v63 }
 0x724   :  { %v8220_v37 = vmax.f32 %v8217_v51, %v8218_v52 }
 0x726   :  { %v8221_v46 = vmax.f32 %v8219_v60, %v8220_v37 }
 0x728   :  { %vm8222_vm14 = vcmp.ge.f32.partialorder %v8211_v56, %v8221_v46  ;;  %vm8223_vm15 = vcmp.ge.f32.partialorder %v8212_v5, %v8221_v46  ;;  %vm8224_vm3 = vcmp.ge.f32.partialorder %v8213_v57, %v8221_v46  ;;  %vm8225_vm4 = vcmp.ge.f32.partialorder %v8214_v29, %v8221_v46 }
 0x729   :  { %v8226_v12 = vsel %vm8222_vm14, 0, %v21838_v4  ;;  %v8227_v47 = vsel %vm8223_vm15, 1, %v21838_v4  ;;  %v8228_v40 = vsel %vm8224_vm3, 2, %v21838_v4  ;;  %v8229_v61 = vsel %vm8225_vm4, 3, %v21838_v4 }
 0x72a   :  { %v8230_v27 = vsel %vm121_vm2, %v8226_v12, 2147483647  ;;  %v8231_v6 = vsel %vm121_vm2, %v8227_v47, 2147483647  ;;  %v8232_v18 = vsel %vm121_vm2, %v8228_v40, 2147483647 }
 0x72b   :  { %v8233_v28 = vsel %vm121_vm2, %v8229_v61, 2147483647  ;;  %vm8234_vm5 = vcmp.lt.s32.totalorder %v8230_v27, %v8231_v6 }
 0x72c   :  { %v8235_v54 = vsel %vm8234_vm5, %v8230_v27, %v8231_v6  ;;  %vm8236_vm6 = vcmp.lt.s32.totalorder %v8232_v18, %v8233_v28 }
 0x72d   :  { %v8237_v44 = vsel %vm8236_vm6, %v8232_v18, %v8233_v28  ;;  %v21648_v18 = vld [vmem:[#allocation3 + $0x8] sm:$0xff] }
 0x72e   :  { %vm8238_vm7 = vcmp.lt.s32.totalorder %v8235_v54, %v8237_v44 }
 0x72f   :  { %v8239_v19 = vsel %vm8238_vm7, %v8235_v54, %v8237_v44 }
 0x730   :  { %vm8240_vm8 = vcmp.eq.s32.totalorder %v8239_v19, 0  ;;  %vm8241_vm9 = vcmp.eq.s32.totalorder %v8239_v19, 1  ;;  %vm8242_vm10 = vcmp.eq.s32.totalorder %v8239_v19, 2  ;;  %vm8243_vm11 = vcmp.eq.s32.totalorder %v8239_v19, 3 }
 0x731   :  { %v8244_v63 = vsel %vm8240_vm8, -1e+30, %v8211_v56  ;;  %v8245_v4 = vsel %vm8241_vm9, -1e+30, %v8212_v5  ;;  %v8246_v51 = vsel %vm8242_vm10, -1e+30, %v8213_v57 }
 0x732   :  { %v8247_v52 = vsel %vm8243_vm11, -1e+30, %v8214_v29  ;;  %v8248_v60 = vsel %vm121_vm2, %v8244_v63, -inf  ;;  %v8249_v37 = vsel %vm121_vm2, %v8245_v4, -inf  ;;  %v8250_v46 = vsel %vm121_vm2, %v8246_v51, -inf }
 0x733   :  { %v8251_v12 = vsel %vm121_vm2, %v8247_v52, -inf  ;;  %v8252_v47 = vmax.f32 %v8248_v60, %v8249_v37 }
 0x734   :  { %v8253_v40 = vmax.f32 %v8250_v46, %v8251_v12 }
 0x736   :  { %v8254_v61 = vmax.f32 %v8252_v47, %v8253_v40 }
 0x738   :  { %v8255_v27 = vadd.f32 1e-07, %v8254_v61 }
 0x73a   :  { %v8256_v6 = vsub.f32 %v22903_v36, %v8255_v27  ;;  %v8257_v28 = vsub.f32 %v21648_v18, %v8255_v27  ;;  %v8258_v56 = vsub.f32 %v22689_v9, %v8255_v27  ;;  %v8259_v5 = vsub.f32 %v22911_v45, %v8255_v27 }
 0x73c   :  { %v8260_v57 = vmax.f32 %v8256_v6, 0.0  ;;  %v8261_v29 = vmax.f32 %v8257_v28, 0.0  ;;  %v8262_v54 = vmax.f32 %v8258_v56, 0.0  ;;  %v8263_v44 = vmax.f32 %v8259_v5, 0.0 }
 0x73e   :  { %v8264_v19 = vsel %vm121_vm2, %v8260_v57, 0.0  ;;  %v8265_v63 = vsel %vm121_vm2, %v8261_v29, 0.0  ;;  %v8267_v51 = vsel %vm121_vm2, %v8262_v54, 0.0  ;;  %v8269_v60 = vsel %vm121_vm2, %v8263_v44, 0.0 }
 0x73f   :  { %v8266_v4 = vadd.f32 %v8265_v63, %v8264_v19 }
 0x741   :  { %v8268_v52 = vadd.f32 %v8267_v51, %v8266_v4 }
 0x743   :  { %v8270_v37 = vadd.f32 %v8269_v60, %v8268_v52 }
 0x745   :  { %v6366_v46 = vpop.f32.mrb[72].mxu1  ;;  %v8271_v12 = vadd.f32 1e-07, %v8270_v37 }
 0x746   :  { %v19014_v9 = vpop.f32.mrb[73].mxu1 }
 0x747   :  { %21545 = vrcp.f32 %v8271_v12 }
 0x74d   :  { %v6523_v47 = vpop.f32.mrb[74].mxu1  ;;  %v6275_v40 = vpop.f32.mrb[72].mxu0 }
 0x74e   :  { %v6367_v61 = vadd.f32 %v6366_v46, %v6275_v40  ;;  %v19036_v27 = vpop.f32.mrb[75].mxu1  ;;  %v19003_v6 = vpop.f32.mrb[73].mxu0 }
 0x751   :  { %v21546_v18 = vpop.eup %21545 }
 0x752   :  { %v8273_v28 = vmul.f32 %v21546_v18, %v8260_v57  ;;  %v8274_v19 = vmul.f32 %v21546_v18, %v8261_v29  ;;  %v8275_v60 = vmul.f32 %v21546_v18, %v8262_v54  ;;  %v8276_v9 = vmul.f32 %v21546_v18, %v8263_v44 }
 0x754   :  { %8279 = vperm.xlu0 %21483, %v8273_v28  }
 0x755   :  { %v6681_v56 = vpop.f32.mrb[76].mxu1  ;;  %v6446_v5 = vpop.f32.mrb[74].mxu0 }
 0x756   :  { %v6447_v63 = vadd.f32 %v6446_v5, %v6367_v61  ;;  %v19025_v4 = vpop.f32.mrb[75].mxu0  ;;  %v19058_v51 = vpop.f32.mrb[77].mxu1 }
 0x758   :  { %8284 = vperm.xlu0 %21483, %v8274_v19   ;;  %v6524_v52 = vadd.f32 %v6523_v47, %v6447_v63 }
 0x75c   :  { %8289 = vperm.xlu0 %21483, %v8275_v60  }
 0x75d   :  { %v6860_v37 = vpop.f32.mrb[78].mxu1  ;;  %v6606_v12 = vpop.f32.mrb[76].mxu0 }
 0x75e   :  { %v6607_v0 = vadd.f32 %v6606_v12, %v6524_v52  ;;  %v19047_v46 = vpop.f32.mrb[77].mxu0  ;;  %v19080_v40 = vpop.f32.mrb[79].mxu1  ;;  %v6196_v52 = vld [vmem:[#allocation4 + $0x18] sm:$0xff] }
 0x75f   :  { %v6693_v12 = vld [vmem:[#allocation7 + $0x18] sm:$0xff] }
 0x760   :  { %8294 = vperm.xlu0 %21483, %v8276_v9   ;;  %v6682_v27 = vadd.f32 %v6681_v56, %v6607_v0 }
 0x762   :  { %v6685_v0 = vadd.f32 %v6682_v27, %v6196_v52 }
 0x764   :  { %v17226_v40 = vmul.f32 -1.442695, %v6685_v0 }
 0x765   :  { %v6769_v57 = vpop.f32.mrb[78].mxu0  ;;  %v7017_v6 = vpop.f32.mrb[80].mxu1 }
 0x766   :  { %v6861_v28 = vadd.f32 %v6860_v37, %v6769_v57  ;;  %v19069_v1 = vpop.f32.mrb[79].mxu0  ;;  %v19102_v29 = vpop.f32.mrb[81].mxu1 }
 0x76d   :  { %v6940_v61 = vpop.f32.mrb[80].mxu0  ;;  %v7175_v5 = vpop.f32.mrb[82].mxu1 }
 0x76e   :  { %v6941_v4 = vadd.f32 %v6940_v61, %v6861_v28  ;;  %v19091_v19 = vpop.f32.mrb[81].mxu0  ;;  %v19124_v47 = vpop.f32.mrb[83].mxu1 }
 0x770   :  { %v7018_v54 = vadd.f32 %v7017_v6, %v6941_v4 }
 0x775   :  { %v7100_v63 = vpop.f32.mrb[82].mxu0  ;;  %v7354_v51 = vpop.f32.mrb[84].mxu1 }
 0x776   :  { %v7101_v60 = vadd.f32 %v7100_v63, %v7018_v54  ;;  %v19113_v44 = vpop.f32.mrb[83].mxu0  ;;  %v19146_v18 = vpop.f32.mrb[85].mxu1 }
 0x778   :  { %v7176_v9 = vadd.f32 %v7175_v5, %v7101_v60 }
 0x77a   :  { %v7179_v56 = vadd.f32 %v7176_v9, %v6693_v12 }
 0x77c   :  { %v17227_v46 = vmul.f32 -1.442695, %v7179_v56 }
 0x77d   :  { %v7263_v37 = vpop.f32.mrb[84].mxu0  ;;  %v7511_v1 = vpop.f32.mrb[86].mxu1 }
 0x77e   :  { %v7355_v57 = vadd.f32 %v7354_v51, %v7263_v37  ;;  %v19135_v29 = vpop.f32.mrb[85].mxu0  ;;  %v19168_v28 = vpop.f32.mrb[87].mxu1  ;;  %21547 = vpow2.f32 %v17227_v46  ;;  %v7187_v51 = vld [vmem:[#allocation9 + $0x18] sm:$0xff] }
 0x77f   :  { %21549 = vpow2.f32 %v17226_v40 }
 0x785   :  { %v7434_v6 = vpop.f32.mrb[86].mxu0  ;;  %v7669_v61 = vpop.f32.mrb[88].mxu1 }
 0x786   :  { %v7435_v4 = vadd.f32 %v7434_v6, %v7355_v57  ;;  %v19157_v19 = vpop.f32.mrb[87].mxu0  ;;  %v19190_v47 = vpop.f32.mrb[89].mxu1 }
 0x788   :  { %v7512_v54 = vadd.f32 %v7511_v1, %v7435_v4  ;;  %v21548_v63 = vpop.eup %21547 }
 0x789   :  { %v21550_v44 = vpop.eup %21549  ;;  %v7183_v60 = vadd.f32 1.0, %v21548_v63 }
 0x78a   :  { %v6689_v9 = vadd.f32 1.0, %v21550_v44 }
 0x78b   :  { %21551 = vrcp.f32 %v7183_v60 }
 0x78c   :  { %21553 = vrcp.f32 %v6689_v9  ;;  %v7676_v9 = vld [vmem:[#allocation10 + $0x18] sm:$0xff] }
 0x78d   :  { %v7594_v5 = vpop.f32.mrb[88].mxu0  ;;  %v7843_v27 = vpop.f32.mrb[90].mxu1 }
 0x78e   :  { %v7595_v18 = vadd.f32 %v7594_v5, %v7512_v54  ;;  %v19179_v52 = vpop.f32.mrb[89].mxu0  ;;  %v19212_v12 = vpop.f32.mrb[91].mxu1 }
 0x790   :  { %v7670_v0 = vadd.f32 %v7669_v61, %v7595_v18 }
 0x792   :  { %v7673_v56 = vadd.f32 %v7670_v0, %v7187_v51 }
 0x794   :  { %21555 = vtanh.f32 %v7673_v56 }
 0x795   :  { %v7752_v46 = vpop.f32.mrb[90].mxu0  ;;  %v8000_v37 = vpop.f32.mrb[92].mxu1 }
 0x796   :  { %v7844_v40 = vadd.f32 %v7843_v27, %v7752_v46  ;;  %v19201_v57 = vpop.f32.mrb[91].mxu0  ;;  %v19234_v1 = vpop.f32.mrb[93].mxu1 }
 0x797   :  { %v21552_v29 = vpop.eup %21551  ;;  %v22957_v1 = vld [vmem:[#allocation2 + $0x8] sm:$0xff] }
 0x798   :  { %v21554_v28 = vpop.eup %21553  ;;  %v8169_v44 = vmul.f32 %v21552_v29, %v22693_v11 }
 0x79d   :  { %v7923_v6 = vpop.f32.mrb[92].mxu0  ;;  %v8158_v4 = vpop.f32.mrb[94].mxu1 }
 0x79e   :  { %v21556_v19 = vpop.eup %21555  ;;  %v7924_v47 = vadd.f32 %v7923_v6, %v7844_v40  ;;  %v19223_v54 = vpop.f32.mrb[93].mxu0  ;;  %v22955_v40 = vld [vmem:[#allocation2] sm:$0xff] }
 0x79f   :  { %v19256_v63 = vpop.f32.mrb[95].mxu1  ;;  %v8170_v61 = vmul.f32 %v21556_v19, %v21554_v28 }
 0x7a0   :  { %v8001_v5 = vadd.f32 %v8000_v37, %v7924_v47 }
 0x7a1   :  { %v22953_v60 = vadd.f32 %v8170_v61, %v8169_v44  ;;  %v22966_v44 = vld [vmem:[#allocation2 + $0x18] sm:$0xff] }
 0x7a5   :  { %v8083_v18 = vpop.f32.mrb[94].mxu0 }
 0x7a6   :  { %v8084_v52 = vadd.f32 %v8083_v18, %v8001_v5  ;;  %v19245_v12 = vpop.f32.mrb[95].mxu0 }
 0x7a8   :  { %v8159_v27 = vadd.f32 %v8158_v4, %v8084_v52 }
 0x7aa   :  { %v8162_v51 = vadd.f32 %v8159_v27, %v7676_v9 }
 0x7ac   :  { %v17228_v0 = vmul.f32 -1.442695, %v8162_v51 }
 0x7ae   :  { %21557 = vpow2.f32 %v17228_v0 }
 0x7b8   :  { %v21558_v56 = vpop.eup %21557 }
 0x7b9   :  { %v8166_v46 = vadd.f32 1.0, %v21558_v56 }
 0x7bb   :  { %21559 = vrcp.f32 %v8166_v46  ;;  %v24266_v46 = vmov 0.0  }
 0x7bc   :  { %21561 = vtanh.f32 %v22953_v60 }
 0x7c5   :  { %v21560_v61 = vpop.eup %21559 }
 0x7c6   :  { %v21562_v52 = vpop.eup %21561 }
 0x7c7   :  { %v8173_v27 = vmul.f32 %v21562_v52, %v21560_v61 }
 0x7d3   :  { %v8280_v57 = vpop.permute.xlu0 %8279 }
 0x7d4   :  { %v8297_v29 = vmul.f32 %v8280_v57, %v22955_v40  ;;  %v24267_v57 = vmov 0.0|0.0  }
 0x7d6   :  { %v8301_v19 = vsel %vm24260_vm1, %v8297_v29, 0.0 }
 0x7d7   :  { %v8285_v11 = vpop.permute.xlu0 %8284 }
 0x7d8   :  { %v8298_v37 = vmul.f32 %v8285_v11, %v22957_v1 }
 0x7da   :  { %v8302_v6 = vsel %vm24260_vm1, %v8298_v37, 0.0 }
 0x7db   :  { %v8290_v28 = vpop.permute.xlu0 %8289  ;;  %v8303_v54 = vadd.f32 %v8302_v6, %v8301_v19  ;;  %v23157_v19 = vld [vmem:[#allocation3 + $0x8] sm:$0xff] }
 0x7dc   :  { %v8299_v4 = vmul.f32 %v8290_v28, %v22701_v30  ;;  %24268 = vst [vmem:[#allocation26_spill] sm:$0xff] %v23157_v19 }
 0x7de   :  { %v8304_v47 = vsel %vm24260_vm1, %v8299_v4, 0.0 }
 0x7df   :  { %v8295_v63 = vpop.permute.xlu0 %8294  ;;  %v8305_v18 = vadd.f32 %v8304_v47, %v8303_v54  ;;  %v23159_v47 = vld [vmem:[#allocation3 + $0x10] sm:$0xff] }
 0x7e0   :  { %v8300_v5 = vmul.f32 %v8295_v63, %v22966_v44  ;;  %24269 = vst [vmem:[#allocation27_spill] sm:$0xff] %v23159_v47 }
 0x7e2   :  { %v8306_v12 = vsel %vm24260_vm1, %v8300_v5, 0.0  ;;  %v23171_v5 = vsel %vm121_vm2, %v23157_v19, -inf }
 0x7e3   :  { %v8307_v9 = vadd.f32 %v8306_v12, %v8305_v18  ;;  %24272 = vst [vmem:[#allocation30_spill] sm:$0xff] %v23171_v5  ;;  %v23175_v18 = vsel %vm121_vm2, %v23159_v47, -inf }
 0x7e4   :  { %24273 = vst [vmem:[#allocation31_spill] sm:$0xff] %v23175_v18  ;;  %v10318_v12 = vmax.f32 %v23175_v18, %v22917_v50 }
 0x7e5   :  { %v8308_v51 = vadd.f32 %v8307_v9, %v8173_v27  ;;  %8312 = vst.msk [vmem:[#allocation14 + $0x18] sm:$0xff] %vm24260_vm1, %v8307_v9 }
 0x7e7   :  { %8310 = vst.msk [vmem:[#allocation13 + $0x18] sm:$0xff] %vm24260_vm1, %v8308_v51  ;;  %8314 = vst.msk [vmem:[#allocation2 + $0x20] sm:$0xff] %vm24260_vm1, %v8308_v51  ;;  %v8325_v30 = vsel %vm24260_vm1, %v8308_v51, 0  ;;  %21563 = vtanh.f32 %v8308_v51 }
 0x7e8   :  { %v22974_v0 = vand.u32 4294901760, %v8325_v30 }
 0x7ea   :  { %v22977_v56 = vsub.f32 %v8325_v30, %v22974_v0  ;;  %19277 = vmatmul.mubr.f32.vlgmr.msra.gmra.mrb[96].mxu1 %v22974_v0 }
 0x7eb   :  { %20909 = vmatpush3.bf16.msra.mxu1 %v21985_v10  ;;  %19298 = vmatprep.mubr.msk.f32.mxu1 %vm21835_vm0, %v24266_v46 }
 0x7ec   :  { %20910 = vmatprep.subr.bf16.mxu1 %v24267_v57  ;;  %v22985_v11 = vand.u32 4294901760, %v22977_v56 }
 0x7ee   :  { %v8399_v37 = vsub.f32 %v22977_v56, %v22985_v11 }
 0x7ef   :  { %20912 = vmatpush3.bf16.msra.mxu1 %v21988_v15 }
 0x7f0   :  { %20919 = vmatprep.subr.bf16.mxu1 %v24267_v57  ;;  %v22991_v29 = vand.u32 4294901760, %v8399_v37 }
 0x7f1   :  { %v21564_v28 = vpop.eup %21563 }
 0x7f2   :  { %19299 = vmatmul.mubr.f32.vlgmr.msra.gmra.mrb[98].mxu1 %v22985_v11  ;;  %19266 = vmatmul.mubr.f32.vlgmr.msra.gmra.mrb[96].mxu0 %v22991_v29  ;;  %v8316_v6 = vmul.f32 %v22739_v13, %v21564_v28 }
 0x7f3   :  { %20903 = vmatpush3.bf16.msra.mxu0 %v21992_v26  ;;  %20921 = vmatpush3.bf16.msra.mxu1 %v21985_v10 }
 0x7f4   :  { %20904 = vmatprep.subr.bf16.mxu0 %v24267_v57  ;;  %20922 = vmatprep.subr.bf16.mxu1 %v24267_v57  ;;  %v8317_v4 = vsel %vm24260_vm1, %v8316_v6, 0.0 }
 0x7f5   :  { %8318 = vadd.xlane.f32.xlu0 %v8317_v4  ;;  %19287 = vmatprep.mubr.msk.f32.mxu0 %vm21835_vm0, %v24266_v46 }
 0x7f6   :  { %19320 = vmatprep.mubr.msk.f32.mxu1 %vm21835_vm0, %v24266_v46 }
 0x7f7   :  { %20906 = vmatpush3.bf16.msra.mxu0 %v22002_v33  ;;  %20924 = vmatpush3.bf16.msra.mxu1 %v21988_v15 }
 0x7f8   :  { %20913 = vmatprep.subr.bf16.mxu0 %v24267_v57  ;;  %20931 = vmatprep.subr.bf16.mxu1 %v24267_v57 }
 0x7fa   :  { %19288 = vmatmul.mubr.f32.vlgmr.msra.gmra.mrb[98].mxu0 %v22977_v56  ;;  %19321 = vmatmul.mubr.f32.vlgmr.msra.gmra.mrb[100].mxu1 %v22974_v0 }
 0x7fb   :  { %20915 = vmatpush3.bf16.msra.mxu0 %v22010_v39  ;;  %20933 = vmatpush3.bf16.msra.mxu1 %v22062_v58 }
 0x7fc   :  { %20916 = vmatprep.subr.bf16.mxu0 %v24267_v57  ;;  %20934 = vmatprep.subr.bf16.mxu1 %v24267_v57 }
 0x7fd   :  { %19309 = vmatprep.mubr.msk.f32.mxu0 %vm21835_vm0, %v24266_v46  ;;  %19342 = vmatprep.mubr.msk.f32.mxu1 %vm21835_vm0, %v24266_v46 }
 0x7ff   :  { %20918 = vmatpush3.bf16.msra.mxu0 %v22020_v43  ;;  %20936 = vmatpush3.bf16.msra.mxu1 %v22074_v2 }
 0x800   :  { %20925 = vmatprep.subr.bf16.mxu0 %v24267_v57  ;;  %20943 = vmatprep.subr.bf16.mxu1 %v24267_v57 }
 0x802   :  { %19310 = vmatmul.mubr.f32.vlgmr.msra.gmra.mrb[100].mxu0 %v22974_v0  ;;  %19343 = vmatmul.mubr.f32.vlgmr.msra.gmra.mrb[102].mxu1 %v22974_v0 }
 0x803   :  { %20927 = vmatpush3.bf16.msra.mxu0 %v22036_v48  ;;  %20945 = vmatpush3.bf16.msra.mxu1 %v22036_v48 }
 0x804   :  { %20928 = vmatprep.subr.bf16.mxu0 %v24267_v57  ;;  %20946 = vmatprep.subr.bf16.mxu1 %v24267_v57 }
 0x805   :  { %19331 = vmatprep.mubr.msk.f32.mxu0 %vm21835_vm0, %v24266_v46  ;;  %19364 = vmatprep.mubr.msk.f32.mxu1 %vm21835_vm0, %v24266_v46 }
 0x807   :  { %20930 = vmatpush3.bf16.msra.mxu0 %v22048_v53  ;;  %20948 = vmatpush3.bf16.msra.mxu1 %v22048_v53 }
 0x808   :  { %20937 = vmatprep.subr.bf16.mxu0 %v24267_v57  ;;  %20955 = vmatprep.subr.bf16.mxu1 %v24267_v57 }
 0x80a   :  { %19332 = vmatmul.mubr.f32.vlgmr.msra.gmra.mrb[102].mxu0 %v22991_v29  ;;  %19365 = vmatmul.mubr.f32.vlgmr.msra.gmra.mrb[104].mxu1 %v22985_v11 }
 0x80b   :  { %20939 = vmatpush3.bf16.msra.mxu0 %v22066_v59  ;;  %20957 = vmatpush3.bf16.msra.mxu1 %v22036_v48 }
 0x80c   :  { %20940 = vmatprep.subr.bf16.mxu0 %v24267_v57  ;;  %20958 = vmatprep.subr.bf16.mxu1 %v24267_v57 }
 0x80d   :  { %19353 = vmatprep.mubr.msk.f32.mxu0 %vm21835_vm0, %v24266_v46  ;;  %19386 = vmatprep.mubr.msk.f32.mxu1 %vm21835_vm0, %v24266_v46 }
 0x80f   :  { %20942 = vmatpush3.bf16.msra.mxu0 %v22078_v3  ;;  %20960 = vmatpush3.bf16.msra.mxu1 %v22048_v53 }
 0x810   :  { %20949 = vmatprep.subr.bf16.mxu0 %v24267_v57  ;;  %20967 = vmatprep.subr.bf16.mxu1 %v24267_v57 }
 0x812   :  { %19354 = vmatmul.mubr.f32.vlgmr.msra.gmra.mrb[104].mxu0 %v22977_v56  ;;  %19387 = vmatmul.mubr.f32.vlgmr.msra.gmra.mrb[106].mxu1 %v22974_v0 }
 0x813   :  { %20951 = vmatpush3.bf16.msra.mxu0 %v22086_v8  ;;  %20969 = vmatpush3.bf16.msra.mxu1 %v22140_v34 }
 0x814   :  { %20952 = vmatprep.subr.bf16.mxu0 %v24267_v57  ;;  %20970 = vmatprep.subr.bf16.mxu1 %v24267_v57 }
 0x815   :  { %19375 = vmatprep.mubr.msk.f32.mxu0 %vm21835_vm0, %v24266_v46  ;;  %19408 = vmatprep.mubr.msk.f32.mxu1 %vm21835_vm0, %v24266_v46 }
 0x817   :  { %20954 = vmatpush3.bf16.msra.mxu0 %v22098_v14  ;;  %20972 = vmatpush3.bf16.msra.mxu1 %v22152_v41 }
 0x818   :  { %20961 = vmatprep.subr.bf16.mxu0 %v24267_v57  ;;  %20979 = vmatprep.subr.bf16.mxu1 %v24267_v57 }
 0x81a   :  { %19376 = vmatmul.mubr.f32.vlgmr.msra.gmra.mrb[106].mxu0 %v22974_v0  ;;  %19409 = vmatmul.mubr.f32.vlgmr.msra.gmra.mrb[108].mxu1 %v22974_v0 }
 0x81b   :  { %20963 = vmatpush3.bf16.msra.mxu0 %v22114_v20  ;;  %20981 = vmatpush3.bf16.msra.mxu1 %v22114_v20 }
 0x81c   :  { %20964 = vmatprep.subr.bf16.mxu0 %v24267_v57  ;;  %20982 = vmatprep.subr.bf16.mxu1 %v24267_v57 }
 0x81d   :  { %19397 = vmatprep.mubr.msk.f32.mxu0 %vm21835_vm0, %v24266_v46  ;;  %19430 = vmatprep.mubr.msk.f32.mxu1 %vm21835_vm0, %v24266_v46 }
 0x81f   :  { %20966 = vmatpush3.bf16.msra.mxu0 %v22126_v25  ;;  %20984 = vmatpush3.bf16.msra.mxu1 %v22126_v25 }
 0x820   :  { %20973 = vmatprep.subr.bf16.mxu0 %v24267_v57  ;;  %20991 = vmatprep.subr.bf16.mxu1 %v24267_v57 }
 0x822   :  { %19398 = vmatmul.mubr.f32.vlgmr.msra.gmra.mrb[108].mxu0 %v22991_v29  ;;  %19431 = vmatmul.mubr.f32.vlgmr.msra.gmra.mrb[110].mxu1 %v22985_v11 }
 0x823   :  { %20975 = vmatpush3.bf16.msra.mxu0 %v22144_v35  ;;  %20993 = vmatpush3.bf16.msra.mxu1 %v22114_v20 }
 0x824   :  { %20976 = vmatprep.subr.bf16.mxu0 %v24267_v57  ;;  %20994 = vmatprep.subr.bf16.mxu1 %v24267_v57 }
 0x825   :  { %19419 = vmatprep.mubr.msk.f32.mxu0 %vm21835_vm0, %v24266_v46  ;;  %19452 = vmatprep.mubr.msk.f32.mxu1 %vm21835_vm0, %v24266_v46 }
 0x827   :  { %20978 = vmatpush3.bf16.msra.mxu0 %v22156_v42  ;;  %20996 = vmatpush3.bf16.msra.mxu1 %v22126_v25 }
 0x828   :  { %20985 = vmatprep.subr.bf16.mxu0 %v24267_v57  ;;  %21003 = vmatprep.subr.bf16.mxu1 %v24267_v57 }
 0x82a   :  { %19420 = vmatmul.mubr.f32.vlgmr.msra.gmra.mrb[110].mxu0 %v22977_v56  ;;  %19453 = vmatmul.mubr.f32.vlgmr.msra.gmra.mrb[112].mxu1 %v22974_v0 }
 0x82b   :  { %20987 = vmatpush3.bf16.msra.mxu0 %v22164_v49  ;;  %21005 = vmatpush3.bf16.msra.mxu1 %v22202_v16 }
 0x82c   :  { %20988 = vmatprep.subr.bf16.mxu0 %v24267_v57  ;;  %21006 = vmatprep.subr.bf16.mxu1 %v24267_v57 }
 0x82d   :  { %19441 = vmatprep.mubr.msk.f32.mxu0 %vm21835_vm0, %v24266_v46  ;;  %19474 = vmatprep.mubr.msk.f32.mxu1 %vm21835_vm0, %v24266_v46 }
 0x82f   :  { %20990 = vmatpush3.bf16.msra.mxu0 %v22172_v55  ;;  %21008 = vmatpush3.bf16.msra.mxu1 %v22212_v21 }
 0x830   :  { %20997 = vmatprep.subr.bf16.mxu0 %v24267_v57  ;;  %21015 = vmatprep.subr.bf16.mxu1 %v24267_v57 }
 0x832   :  { %19442 = vmatmul.mubr.f32.vlgmr.msra.gmra.mrb[112].mxu0 %v22974_v0  ;;  %19475 = vmatmul.mubr.f32.vlgmr.msra.gmra.mrb[114].mxu1 %v22974_v0 }
 0x833   :  { %20999 = vmatpush3.bf16.msra.mxu0 %v22182_v62  ;;  %21017 = vmatpush3.bf16.msra.mxu1 %v22182_v62 }
 0x834   :  { %21000 = vmatprep.subr.bf16.mxu0 %v24267_v57  ;;  %21018 = vmatprep.subr.bf16.mxu1 %v24267_v57 }
 0x835   :  { %19463 = vmatprep.mubr.msk.f32.mxu0 %vm21835_vm0, %v24266_v46  ;;  %19496 = vmatprep.mubr.msk.f32.mxu1 %vm21835_vm0, %v24266_v46 }
 0x837   :  { %21002 = vmatpush3.bf16.msra.mxu0 %v22190_v7  ;;  %21020 = vmatpush3.bf16.msra.mxu1 %v22190_v7 }
 0x838   :  { %21009 = vmatprep.subr.bf16.mxu0 %v24267_v57  ;;  %21027 = vmatprep.subr.bf16.mxu1 %v24267_v57 }
 0x83a   :  { %19464 = vmatmul.mubr.f32.vlgmr.msra.gmra.mrb[114].mxu0 %v22991_v29  ;;  %19497 = vmatmul.mubr.f32.vlgmr.msra.gmra.mrb[116].mxu1 %v22985_v11 }
 0x83b   :  { %21011 = vmatpush3.bf16.msra.mxu0 %v22204_v17  ;;  %21029 = vmatpush3.bf16.msra.mxu1 %v22182_v62 }
 0x83c   :  { %21012 = vmatprep.subr.bf16.mxu0 %v24267_v57  ;;  %21030 = vmatprep.subr.bf16.mxu1 %v24267_v57 }
 0x83d   :  { %19485 = vmatprep.mubr.msk.f32.mxu0 %vm21835_vm0, %v24266_v46  ;;  %19518 = vmatprep.mubr.msk.f32.mxu1 %vm21835_vm0, %v24266_v46 }
 0x83f   :  { %21014 = vmatpush3.bf16.msra.mxu0 %v22214_v22  ;;  %21032 = vmatpush3.bf16.msra.mxu1 %v22190_v7 }
 0x840   :  { %21021 = vmatprep.subr.bf16.mxu0 %v24267_v57  ;;  %21039 = vmatprep.subr.bf16.mxu1 %v24267_v57 }
 0x842   :  { %19486 = vmatmul.mubr.f32.vlgmr.msra.gmra.mrb[116].mxu0 %v22977_v56  ;;  %19519 = vmatmul.mubr.f32.vlgmr.msra.gmra.mrb[118].mxu1 %v22974_v0 }
 0x843   :  { %21023 = vmatpush3.bf16.msra.mxu0 %v22224_v23  ;;  %19507 = vmatprep.mubr.msk.f32.mxu0 %vm21835_vm0, %v24266_v46 }
 0x844   :  { %21024 = vmatprep.subr.bf16.mxu0 %v24267_v57  ;;  %21041 = vmatpush3.bf16.msra.mxu1 %v21995_v31 }
 0x845   :  { %21042 = vmatprep.subr.bf16.mxu1 %v24267_v57  ;;  %19540 = vmatprep.mubr.msk.f32.mxu1 %vm21835_vm0, %v24266_v46 }
 0x847   :  { %21026 = vmatpush3.bf16.msra.mxu0 %v22232_v24 }
 0x848   :  { %21044 = vmatpush3.bf16.msra.mxu1 %v22000_v32  ;;  %21033 = vmatprep.subr.bf16.mxu0 %v24267_v57 }
 0x849   :  { %21051 = vmatprep.subr.bf16.mxu1 %v24267_v57 }
 0x84a   :  { %19508 = vmatmul.mubr.f32.vlgmr.msra.gmra.mrb[118].mxu0 %v22974_v0 }
 0x84b   :  { %21035 = vmatpush3.bf16.msra.mxu0 %v21985_v10  ;;  %19529 = vmatprep.mubr.msk.f32.mxu0 %vm21835_vm0, %v24266_v46 }
 0x84c   :  { %21036 = vmatprep.subr.bf16.mxu0 %v24267_v57 }
 0x84f   :  { %21038 = vmatpush3.bf16.msra.mxu0 %v21988_v15 }
 0x850   :  { %21045 = vmatprep.subr.bf16.mxu0 %v24267_v57 }
 0x882   :  { %v8319_v13 = vpop.xlane.xlu0 %8318 }
 0x883   :  { %8321 = vst.msk [vmem:[#allocation3 + $0x20] sm:$0xff] %vm121_vm2, %v8319_v13 }
 0x88a   :  { %v23161_v54 = vld [vmem:[#allocation3 + $0x20] sm:$0xff] }
 0x88b   :  { %24270 = vst [vmem:[#allocation28_spill] sm:$0xff] %v23161_v54  ;;  %v23165_v63 = vsel %vm121_vm2, %v23161_v54, -inf }
 0x88c   :  { %24271 = vst [vmem:[#allocation29_spill] sm:$0xff] %v23165_v63  ;;  %v10316_v61 = vmax.f32 %v22907_v38, %v23165_v63  ;;  %v21839_v38 = vmov 5  }
 0x88e   :  { %v10317_v52 = vmax.f32 %v10316_v61, %v23171_v5 }
 0x890   :  { %v10319_v27 = vmax.f32 %v10317_v52, %v10318_v12 }
 0x892   :  { %vm10320_vm12 = vcmp.ge.f32.partialorder %v22903_v36, %v10319_v27  ;;  %vm10321_vm13 = vcmp.ge.f32.partialorder %v23157_v19, %v10319_v27  ;;  %vm10322_vm14 = vcmp.ge.f32.partialorder %v23159_v47, %v10319_v27  ;;  %vm10323_vm15 = vcmp.ge.f32.partialorder %v22911_v45, %v10319_v27 }
 0x893   :  { %vm10324_vm3 = vcmp.ge.f32.partialorder %v23161_v54, %v10319_v27  ;;  %v10325_v9 = vsel %vm10320_vm12, 0, %v21839_v38  ;;  %v10327_v51 = vsel %vm10322_vm14, 2, %v21839_v38  ;;  %v10326_v30 = vsel %vm10321_vm13, 1, %v21839_v38 }
 0x894   :  { %v10328_v0 = vsel %vm10323_vm15, 3, %v21839_v38  ;;  %v10329_v56 = vsel %vm10324_vm3, 4, %v21839_v38  ;;  %v10330_v11 = vsel %vm121_vm2, %v10325_v9, 2147483647  ;;  %v10332_v50 = vsel %vm121_vm2, %v10327_v51, 2147483647 }
 0x895   :  { %v10333_v37 = vsel %vm121_vm2, %v10328_v0, 2147483647  ;;  %v10334_v29 = vsel %vm121_vm2, %v10329_v56, 2147483647  ;;  %v10331_v28 = vsel %vm121_vm2, %v10326_v30, 2147483647 }
 0x896   :  { %vm10335_vm4 = vcmp.lt.s32.totalorder %v10330_v11, %v10334_v29  ;;  %vm10339_vm5 = vcmp.lt.s32.totalorder %v10332_v50, %v10333_v37 }
 0x897   :  { %v10336_v6 = vsel %vm10335_vm4, %v10330_v11, %v10334_v29  ;;  %v10340_v13 = vsel %vm10339_vm5, %v10332_v50, %v10333_v37 }
 0x898   :  { %vm10337_vm6 = vcmp.lt.s32.totalorder %v10336_v6, %v10331_v28 }
 0x899   :  { %v10338_v4 = vsel %vm10337_vm6, %v10336_v6, %v10331_v28 }
 0x89a   :  { %vm10341_vm7 = vcmp.lt.s32.totalorder %v10338_v4, %v10340_v13 }
 0x89b   :  { %v10342_v61 = vsel %vm10341_vm7, %v10338_v4, %v10340_v13 }
 0x89c   :  { %vm10343_vm8 = vcmp.eq.s32.totalorder %v10342_v61, 0  ;;  %vm10344_vm9 = vcmp.eq.s32.totalorder %v10342_v61, 1  ;;  %vm10345_vm10 = vcmp.eq.s32.totalorder %v10342_v61, 2  ;;  %vm10346_vm11 = vcmp.eq.s32.totalorder %v10342_v61, 3 }
 0x89d   :  { %vm10347_vm12 = vcmp.eq.s32.totalorder %v10342_v61, 4  ;;  %v10348_v52 = vsel %vm10343_vm8, -1e+30, %v22903_v36  ;;  %v10350_v12 = vsel %vm10345_vm10, -1e+30, %v23159_v47 }
 0x89e   :  { %v10351_v27 = vsel %vm10346_vm11, -1e+30, %v22911_v45  ;;  %v10352_v9 = vsel %vm10347_vm12, -1e+30, %v23161_v54  ;;  %v10349_v51 = vsel %vm10344_vm9, -1e+30, %v23157_v19 }
 0x89f   :  { %v10353_v30 = vsel %vm121_vm2, %v10348_v52, -inf  ;;  %v10355_v0 = vsel %vm121_vm2, %v10350_v12, -inf  ;;  %v10356_v56 = vsel %vm121_vm2, %v10351_v27, -inf  ;;  %v10357_v11 = vsel %vm121_vm2, %v10352_v9, -inf }
 0x8a0   :  { %v10358_v50 = vmax.f32 %v10353_v30, %v10357_v11  ;;  %v10354_v37 = vsel %vm121_vm2, %v10349_v51, -inf  ;;  %v10360_v28 = vmax.f32 %v10355_v0, %v10356_v56 }
 0x8a2   :  { %v10359_v29 = vmax.f32 %v10358_v50, %v10354_v37 }
 0x8a4   :  { %v10361_v6 = vmax.f32 %v10359_v29, %v10360_v28 }
 0x8a6   :  { %vm10362_vm13 = vcmp.ge.f32.partialorder %v10348_v52, %v10361_v6  ;;  %vm10363_vm14 = vcmp.ge.f32.partialorder %v10349_v51, %v10361_v6  ;;  %vm10364_vm15 = vcmp.ge.f32.partialorder %v10350_v12, %v10361_v6  ;;  %vm10365_vm3 = vcmp.ge.f32.partialorder %v10351_v27, %v10361_v6 }
 0x8a7   :  { %vm10366_vm4 = vcmp.ge.f32.partialorder %v10352_v9, %v10361_v6  ;;  %v10367_v4 = vsel %vm10362_vm13, 0, %v21839_v38  ;;  %v10369_v13 = vsel %vm10364_vm15, 2, %v21839_v38  ;;  %v10368_v61 = vsel %vm10363_vm14, 1, %v21839_v38 }
 0x8a8   :  { %v10370_v18 = vsel %vm10365_vm3, 3, %v21839_v38  ;;  %v10371_v5 = vsel %vm10366_vm4, 4, %v21839_v38  ;;  %v10372_v63 = vsel %vm121_vm2, %v10367_v4, 2147483647  ;;  %v10374_v32 = vsel %vm121_vm2, %v10369_v13, 2147483647 }
 0x8a9   :  { %v10375_v30 = vsel %vm121_vm2, %v10370_v18, 2147483647  ;;  %v10376_v11 = vsel %vm121_vm2, %v10371_v5, 2147483647  ;;  %v10373_v0 = vsel %vm121_vm2, %v10368_v61, 2147483647 }
 0x8aa   :  { %vm10377_vm5 = vcmp.lt.s32.totalorder %v10372_v63, %v10376_v11  ;;  %vm10381_vm6 = vcmp.lt.s32.totalorder %v10374_v32, %v10375_v30 }
 0x8ab   :  { %v10378_v56 = vsel %vm10377_vm5, %v10372_v63, %v10376_v11  ;;  %v10382_v37 = vsel %vm10381_vm6, %v10374_v32, %v10375_v30 }
 0x8ac   :  { %vm10379_vm7 = vcmp.lt.s32.totalorder %v10378_v56, %v10373_v0 }
 0x8ad   :  { %v10380_v50 = vsel %vm10379_vm7, %v10378_v56, %v10373_v0 }
 0x8ae   :  { %vm10383_vm8 = vcmp.lt.s32.totalorder %v10380_v50, %v10382_v37 }
 0x8af   :  { %v10384_v29 = vsel %vm10383_vm8, %v10380_v50, %v10382_v37 }
 0x8b0   :  { %vm10385_vm9 = vcmp.eq.s32.totalorder %v10384_v29, 0  ;;  %vm10386_vm10 = vcmp.eq.s32.totalorder %v10384_v29, 1  ;;  %vm10387_vm11 = vcmp.eq.s32.totalorder %v10384_v29, 2  ;;  %vm10388_vm12 = vcmp.eq.s32.totalorder %v10384_v29, 3 }
 0x8b1   :  { %vm10389_vm13 = vcmp.eq.s32.totalorder %v10384_v29, 4  ;;  %v10390_v38 = vsel %vm10385_vm9, -1e+30, %v10348_v52  ;;  %v10392_v28 = vsel %vm10387_vm11, -1e+30, %v10350_v12 }
 0x8b2   :  { %v10393_v18 = vsel %vm10388_vm12, -1e+30, %v10351_v27  ;;  %v10394_v6 = vsel %vm10389_vm13, -1e+30, %v10352_v9  ;;  %v10391_v5 = vsel %vm10386_vm10, -1e+30, %v10349_v51 }
 0x8b3   :  { %v10395_v4 = vsel %vm121_vm2, %v10390_v38, -inf  ;;  %v10397_v13 = vsel %vm121_vm2, %v10392_v28, -inf  ;;  %v10398_v63 = vsel %vm121_vm2, %v10393_v18, -inf  ;;  %v10399_v32 = vsel %vm121_vm2, %v10394_v6, -inf }
 0x8b4   :  { %v10400_v61 = vmax.f32 %v10395_v4, %v10399_v32  ;;  %v10396_v30 = vsel %vm121_vm2, %v10391_v5, -inf  ;;  %v10402_v0 = vmax.f32 %v10397_v13, %v10398_v63 }
 0x8b6   :  { %v10401_v11 = vmax.f32 %v10400_v61, %v10396_v30 }
 0x8b8   :  { %v10403_v56 = vmax.f32 %v10401_v11, %v10402_v0 }
 0x8ba   :  { %v10404_v50 = vadd.f32 1e-07, %v10403_v56 }
 0x8bc   :  { %v10405_v27 = vsub.f32 %v22903_v36, %v10404_v50  ;;  %v10406_v9 = vsub.f32 %v23157_v19, %v10404_v50  ;;  %v10407_v51 = vsub.f32 %v23159_v47, %v10404_v50  ;;  %v10408_v37 = vsub.f32 %v22911_v45, %v10404_v50 }
 0x8bd   :  { %v8493_v52 = vpop.f32.mrb[96].mxu1  ;;  %v10409_v29 = vsub.f32 %v23161_v54, %v10404_v50 }
 0x8be   :  { %v19278_v12 = vpop.f32.mrb[97].mxu1  ;;  %v10410_v38 = vmax.f32 %v10405_v27, 0.0  ;;  %v10411_v28 = vmax.f32 %v10406_v9, 0.0  ;;  %v10412_v18 = vmax.f32 %v10407_v51, 0.0  ;;  %v10413_v6 = vmax.f32 %v10408_v37, 0.0 }
 0x8bf   :  { %v10414_v63 = vmax.f32 %v10409_v29, 0.0 }
 0x8c0   :  { %v10415_v5 = vsel %vm121_vm2, %v10410_v38, 0.0  ;;  %v10416_v4 = vsel %vm121_vm2, %v10411_v28, 0.0  ;;  %v10418_v36 = vsel %vm121_vm2, %v10412_v18, 0.0  ;;  %v10420_v56 = vsel %vm121_vm2, %v10413_v6, 0.0 }
 0x8c1   :  { %v10417_v13 = vadd.f32 %v10416_v4, %v10415_v5  ;;  %v10422_v12 = vsel %vm121_vm2, %v10414_v63, 0.0 }
 0x8c3   :  { %v10419_v30 = vadd.f32 %v10418_v36, %v10417_v13 }
 0x8c5   :  { %v8650_v32 = vpop.f32.mrb[98].mxu1  ;;  %v8402_v61 = vpop.f32.mrb[96].mxu0  ;;  %v10421_v50 = vadd.f32 %v10420_v56, %v10419_v30 }
 0x8c6   :  { %v8494_v11 = vadd.f32 %v8493_v52, %v8402_v61  ;;  %v19300_v0 = vpop.f32.mrb[99].mxu1  ;;  %v19267_v45 = vpop.f32.mrb[97].mxu0 }
 0x8c7   :  { %v10423_v27 = vadd.f32 %v10422_v12, %v10421_v50 }
 0x8c9   :  { %v10424_v9 = vadd.f32 1e-07, %v10423_v27 }
 0x8cb   :  { %21565 = vrcp.f32 %v10424_v9 }
 0x8cd   :  { %v8573_v51 = vpop.f32.mrb[98].mxu0  ;;  %v8808_v37 = vpop.f32.mrb[100].mxu1 }
 0x8ce   :  { %v8574_v5 = vadd.f32 %v8573_v51, %v8494_v11  ;;  %v19289_v29 = vpop.f32.mrb[99].mxu0  ;;  %v19322_v4 = vpop.f32.mrb[101].mxu1 }
 0x8d0   :  { %v8651_v54 = vadd.f32 %v8650_v32, %v8574_v5 }
 0x8d5   :  { %v8987_v47 = vpop.f32.mrb[102].mxu1  ;;  %v8733_v19 = vpop.f32.mrb[100].mxu0 }
 0x8d6   :  { %v8734_v13 = vadd.f32 %v8733_v19, %v8651_v54  ;;  %v19311_v52 = vpop.f32.mrb[101].mxu0  ;;  %v19344_v36 = vpop.f32.mrb[103].mxu1 }
 0x8d7   :  { %v21566_v61 = vpop.eup %21565  ;;  %v8323_v36 = vld [vmem:[#allocation4 + $0x20] sm:$0xff] }
 0x8d8   :  { %v10430_v0 = vmul.f32 %v21566_v61, %v10414_v63  ;;  %v10426_v45 = vmul.f32 %v21566_v61, %v10410_v38  ;;  %v8809_v30 = vadd.f32 %v8808_v37, %v8734_v13  ;;  %v10427_v56 = vmul.f32 %v21566_v61, %v10411_v28 }
 0x8d9   :  { %v10428_v51 = vmul.f32 %v21566_v61, %v10412_v18  ;;  %v10429_v32 = vmul.f32 %v21566_v61, %v10413_v6 }
 0x8da   :  { %10453 = vperm.xlu0 %21483, %v10430_v0   ;;  %10433 = vperm.xlu1 %21484, %v10426_v45   ;;  %v8820_v0 = vld [vmem:[#allocation7 + $0x20] sm:$0xff]  ;;  %v8812_v45 = vadd.f32 %v8809_v30, %v8323_v36 }
 0x8dc   :  { %v17229_v61 = vmul.f32 -1.442695, %v8812_v45 }
 0x8dd   :  { %v9144_v50 = vpop.f32.mrb[104].mxu1  ;;  %v8896_v12 = vpop.f32.mrb[102].mxu0 }
 0x8de   :  { %10438 = vperm.xlu1 %21484, %v10427_v56   ;;  %v8988_v27 = vadd.f32 %v8987_v47, %v8896_v12  ;;  %v19333_v11 = vpop.f32.mrb[103].mxu0  ;;  %v19366_v9 = vpop.f32.mrb[105].mxu1 }
 0x8e2   :  { %10443 = vperm.xlu1 %21484, %v10428_v51  }
 0x8e5   :  { %v9067_v5 = vpop.f32.mrb[104].mxu0  ;;  %v9302_v19 = vpop.f32.mrb[106].mxu1 }
 0x8e6   :  { %10448 = vperm.xlu1 %21484, %v10429_v32   ;;  %v9068_v54 = vadd.f32 %v9067_v5, %v8988_v27  ;;  %v19355_v29 = vpop.f32.mrb[105].mxu0  ;;  %v19388_v63 = vpop.f32.mrb[107].mxu1 }
 0x8e8   :  { %v9145_v38 = vadd.f32 %v9144_v50, %v9068_v54 }
 0x8ed   :  { %v9227_v37 = vpop.f32.mrb[106].mxu0  ;;  %v9481_v4 = vpop.f32.mrb[108].mxu1 }
 0x8ee   :  { %v9228_v13 = vadd.f32 %v9227_v37, %v9145_v38  ;;  %v19377_v28 = vpop.f32.mrb[107].mxu0  ;;  %v19410_v52 = vpop.f32.mrb[109].mxu1 }
 0x8f0   :  { %v9303_v47 = vadd.f32 %v9302_v19, %v9228_v13 }
 0x8f2   :  { %v9306_v56 = vadd.f32 %v9303_v47, %v8820_v0 }
 0x8f4   :  { %v17230_v18 = vmul.f32 -1.442695, %v9306_v56 }
 0x8f5   :  { %v9390_v12 = vpop.f32.mrb[108].mxu0  ;;  %v9638_v6 = vpop.f32.mrb[110].mxu1 }
 0x8f6   :  { %v9482_v11 = vadd.f32 %v9481_v4, %v9390_v12  ;;  %v19399_v9 = vpop.f32.mrb[109].mxu0  ;;  %v19432_v27 = vpop.f32.mrb[111].mxu1  ;;  %21567 = vpow2.f32 %v17230_v18  ;;  %v9314_v4 = vld [vmem:[#allocation9 + $0x20] sm:$0xff] }
 0x8f7   :  { %21569 = vpow2.f32 %v17229_v61 }
 0x8fd   :  { %v9561_v50 = vpop.f32.mrb[110].mxu0  ;;  %v9796_v51 = vpop.f32.mrb[112].mxu1 }
 0x8fe   :  { %v9562_v32 = vadd.f32 %v9561_v50, %v9482_v11  ;;  %v19421_v5 = vpop.f32.mrb[111].mxu0  ;;  %v19454_v54 = vpop.f32.mrb[113].mxu1 }
 0x900   :  { %v9639_v29 = vadd.f32 %v9638_v6, %v9562_v32  ;;  %v21568_v63 = vpop.eup %21567 }
 0x901   :  { %v21570_v38 = vpop.eup %21569  ;;  %v9310_v37 = vadd.f32 1.0, %v21568_v63 }
 0x902   :  { %v8816_v36 = vadd.f32 1.0, %v21570_v38 }
 0x903   :  { %21571 = vrcp.f32 %v9310_v37 }
 0x904   :  { %21573 = vrcp.f32 %v8816_v36 }
 0x905   :  { %v9721_v19 = vpop.f32.mrb[112].mxu0  ;;  %v9970_v30 = vpop.f32.mrb[114].mxu1 }
 0x906   :  { %v9722_v13 = vadd.f32 %v9721_v19, %v9639_v29  ;;  %v19443_v28 = vpop.f32.mrb[113].mxu0  ;;  %v19476_v52 = vpop.f32.mrb[115].mxu1 }
 0x907   :  { %v9803_v28 = vld [vmem:[#allocation10 + $0x20] sm:$0xff] }
 0x908   :  { %v9797_v0 = vadd.f32 %v9796_v51, %v9722_v13 }
 0x90a   :  { %v9800_v47 = vadd.f32 %v9797_v0, %v9314_v4 }
 0x90c   :  { %21575 = vtanh.f32 %v9800_v47 }
 0x90d   :  { %v9879_v45 = vpop.f32.mrb[114].mxu0  ;;  %v10127_v56 = vpop.f32.mrb[116].mxu1 }
 0x90e   :  { %v9971_v18 = vadd.f32 %v9970_v30, %v9879_v45  ;;  %v19465_v12 = vpop.f32.mrb[115].mxu0  ;;  %v19498_v6 = vpop.f32.mrb[117].mxu1 }
 0x90f   :  { %v21572_v61 = vpop.eup %21571 }
 0x910   :  { %v21574_v11 = vpop.eup %21573  ;;  %v10296_v29 = vmul.f32 %v21572_v61, %v22953_v60 }
 0x915   :  { %v10050_v9 = vpop.f32.mrb[116].mxu0  ;;  %v10285_v27 = vpop.f32.mrb[118].mxu1 }
 0x916   :  { %v21576_v50 = vpop.eup %21575  ;;  %v10051_v32 = vadd.f32 %v10050_v9, %v9971_v18  ;;  %v19487_v5 = vpop.f32.mrb[117].mxu0 }
 0x917   :  { %v19520_v54 = vpop.f32.mrb[119].mxu1  ;;  %v10297_v51 = vmul.f32 %v21576_v50, %v21574_v11  ;;  %v23232_v50 = vld [vmem:[#allocation2 + $0x20] sm:$0xff] }
 0x918   :  { %v10128_v63 = vadd.f32 %v10127_v56, %v10051_v32  ;;  %v23226_v56 = vld [vmem:[#allocation2 + $0x10] sm:$0xff] }
 0x919   :  { %v23221_v38 = vadd.f32 %v10297_v51, %v10296_v29 }
 0x91d   :  { %v10210_v19 = vpop.f32.mrb[118].mxu0 }
 0x91e   :  { %v10211_v37 = vadd.f32 %v10210_v19, %v10128_v63  ;;  %v19509_v13 = vpop.f32.mrb[119].mxu0 }
 0x920   :  { %v10286_v30 = vadd.f32 %v10285_v27, %v10211_v37 }
 0x922   :  { %v10289_v52 = vadd.f32 %v10286_v30, %v9803_v28 }
 0x924   :  { %v17231_v36 = vmul.f32 -1.442695, %v10289_v52 }
 0x926   :  { %21577 = vpow2.f32 %v17231_v36 }
 0x930   :  { %v21578_v4 = vpop.eup %21577 }
 0x931   :  { %v10293_v47 = vadd.f32 1.0, %v21578_v4 }
 0x933   :  { %21579 = vrcp.f32 %v10293_v47 }
 0x934   :  { %21581 = vtanh.f32 %v23221_v38 }
 0x93d   :  { %v21580_v29 = vpop.eup %21579 }
 0x93e   :  { %v21582_v19 = vpop.eup %21581 }
 0x93f   :  { %v10300_v13 = vmul.f32 %v21582_v19, %v21580_v29 }
 0x959   :  { %v10434_v0 = vpop.permute.xlu1 %10433  ;;  %v10454_v11 = vpop.permute.xlu0 %10453 }
 0x95a   :  { %v10456_v60 = vmul.f32 %v10434_v0, %v22955_v40  ;;  %v10460_v5 = vmul.f32 %v10454_v11, %v23232_v50  ;;  %v23430_v11 = vld [vmem:[#allocation3] sm:$0xff] }
 0x95b   :  { %24275 = vst [vmem:[#allocation32_spill] sm:$0xff] %v23430_v11 }
 0x95c   :  { %v10461_v9 = vsel %vm24260_vm1, %v10456_v60, 0.0  ;;  %v10468_v37 = vsel %vm24260_vm1, %v10460_v5, 0.0  ;;  %v12475_v5 = vsel %vm121_vm2, %v23430_v11, -inf }
 0x95d   :  { %v10439_v45 = vpop.permute.xlu1 %10438 }
 0x95e   :  { %v10457_v18 = vmul.f32 %v10439_v45, %v22957_v1 }
 0x960   :  { %v10462_v6 = vsel %vm24260_vm1, %v10457_v18, 0.0  ;;  %v23266_v18 = vld [vmem:[%s24218_s6] ss:$0 sm:$0xff] }
 0x961   :  { %v10444_v12 = vpop.permute.xlu1 %10443  ;;  %v10463_v32 = vadd.f32 %v10462_v6, %v10461_v9  ;;  %v24274_v6 = vld [vmem:[#allocation22_spill] sm:$0xff]  ;;  %v23432_v9 = vld [vmem:[#allocation3 + $0x20] sm:$0xff] }
 0x962   :  { %v10458_v61 = vmul.f32 %v10444_v12, %v23226_v56  ;;  %24276 = vst [vmem:[#allocation33_spill] sm:$0xff] %v23432_v9 }
 0x964   :  { %v10464_v27 = vsel %vm24260_vm1, %v10458_v61, 0.0 }
 0x965   :  { %v10449_v1 = vpop.permute.xlu1 %10448  ;;  %v10465_v54 = vadd.f32 %v10464_v27, %v10463_v32  ;;  %v16900_v27 = vld [vmem:[#allocation3] sm:$0xff]  ;;  %v23434_v32 = vld [vmem:[#allocation3 + $0x18] sm:$0xff] }
 0x966   :  { %v10459_v40 = vmul.f32 %v10449_v1, %v22966_v44  ;;  %24277 = vst [vmem:[#allocation34_spill] sm:$0xff] %v23434_v32  ;;  %v23436_v1 = vld [vmem:[#allocation3 + $0x8] sm:$0xff] }
 0x967   :  { %24278 = vst [vmem:[#allocation35_spill] sm:$0xff] %v23436_v1 }
 0x968   :  { %v10466_v51 = vsel %vm24260_vm1, %v10459_v40, 0.0  ;;  %v14678_v40 = vsel %vm121_vm2, %v23432_v9, -inf  ;;  %v24286_v9 = vld [vmem:[#allocation26_spill] sm:$0xff] }
 0x969   :  { %v10467_v63 = vadd.f32 %v10466_v51, %v10465_v54  ;;  %v16908_v54 = vsel %vm121_vm2, %v16900_v27, -inf  ;;  %v23447_v51 = vsel %vm121_vm2, %v23434_v32, -inf }
 0x96a   :  { %24280 = vst [vmem:[#allocation37_spill] sm:$0xff] %v23447_v51 }
 0x96b   :  { %v10469_v30 = vadd.f32 %v10468_v37, %v10467_v63  ;;  %v14675_v63 = vsel %vm121_vm2, %v23436_v1, -inf  ;;  %v24281_v37 = vld [vmem:[#allocation29_spill] sm:$0xff] }
 0x96d   :  { %v10470_v28 = vadd.f32 %v10469_v30, %v10300_v13  ;;  %10474 = vst.msk [vmem:[#allocation14 + $0x20] sm:$0xff] %vm24260_vm1, %v10469_v30  ;;  %v12480_v13 = vmax.f32 %v12475_v5, %v24281_v37 }
 0x96f   :  { %10472 = vst.msk [vmem:[#allocation13 + $0x20] sm:$0xff] %vm24260_vm1, %v10470_v28  ;;  %10476 = vst.msk [vmem:[#allocation2 + $0x28] sm:$0xff] %vm24260_vm1, %v10470_v28  ;;  %v10487_v52 = vsel %vm24260_vm1, %v10470_v28, 0  ;;  %21583 = vtanh.f32 %v10470_v28  ;;  %v14679_v28 = vmax.f32 %v12475_v5, %v14678_v40  ;;  %v24287_v5 = vld [vmem:[#allocation27_spill] sm:$0xff] }
 0x970   :  { %v23242_v44 = vand.u32 4294901760, %v10487_v52 }
 0x972   :  { %v23245_v36 = vsub.f32 %v10487_v52, %v23242_v44  ;;  %19541 = vmatmul.mubr.f32.vlgmr.msra.gmra.mrb[120].mxu1 %v23242_v44 }
 0x973   :  { %21053 = vmatpush3.bf16.msra.mxu1 %v21985_v10  ;;  %19562 = vmatprep.mubr.msk.f32.mxu1 %vm21835_vm0, %v24266_v46 }
 0x974   :  { %21054 = vmatprep.subr.bf16.mxu1 %v24267_v57  ;;  %v23253_v4 = vand.u32 4294901760, %v23245_v36 }
 0x976   :  { %v10561_v0 = vsub.f32 %v23245_v36, %v23253_v4 }
 0x977   :  { %21056 = vmatpush3.bf16.msra.mxu1 %v21988_v15 }
 0x978   :  { %21063 = vmatprep.subr.bf16.mxu1 %v24267_v57  ;;  %v23259_v47 = vand.u32 4294901760, %v10561_v0  ;;  %v16913_v0 = vmax.f32 %v16908_v54, %v14678_v40  ;;  %v21840_v40 = vmov 6  }
 0x979   :  { %v21584_v45 = vpop.eup %21583 }
 0x97a   :  { %19563 = vmatmul.mubr.f32.vlgmr.msra.gmra.mrb[122].mxu1 %v23253_v4  ;;  %19530 = vmatmul.mubr.f32.vlgmr.msra.gmra.mrb[120].mxu0 %v23259_v47  ;;  %v10478_v60 = vmul.f32 %v23266_v18, %v21584_v45 }
 0x97b   :  { %21047 = vmatpush3.bf16.msra.mxu0 %v21992_v26  ;;  %21065 = vmatpush3.bf16.msra.mxu1 %v21985_v10 }
 0x97c   :  { %21048 = vmatprep.subr.bf16.mxu0 %v24267_v57  ;;  %21066 = vmatprep.subr.bf16.mxu1 %v24267_v57  ;;  %v10479_v12 = vsel %vm24260_vm1, %v10478_v60, 0.0  ;;  %v24283_v60 = vld [vmem:[#allocation31_spill] sm:$0xff] }
 0x97d   :  { %10480 = vadd.xlane.f32.xlu1 %v10479_v12  ;;  %19551 = vmatprep.mubr.msk.f32.mxu0 %vm21835_vm0, %v24266_v46  ;;  %v12484_v12 = vmax.f32 %v24283_v60, %v23447_v51 }
 0x97e   :  { %19584 = vmatprep.mubr.msk.f32.mxu1 %vm21835_vm0, %v24266_v46 }
 0x97f   :  { %21050 = vmatpush3.bf16.msra.mxu0 %v22002_v33  ;;  %21068 = vmatpush3.bf16.msra.mxu1 %v21988_v15 }
 0x980   :  { %21057 = vmatprep.subr.bf16.mxu0 %v24267_v57  ;;  %21075 = vmatprep.subr.bf16.mxu1 %v24267_v57 }
 0x982   :  { %19552 = vmatmul.mubr.f32.vlgmr.msra.gmra.mrb[122].mxu0 %v23245_v36  ;;  %19585 = vmatmul.mubr.f32.vlgmr.msra.gmra.mrb[124].mxu1 %v23242_v44 }
 0x983   :  { %21059 = vmatpush3.bf16.msra.mxu0 %v22010_v39  ;;  %21077 = vmatpush3.bf16.msra.mxu1 %v22062_v58 }
 0x984   :  { %21060 = vmatprep.subr.bf16.mxu0 %v24267_v57  ;;  %21078 = vmatprep.subr.bf16.mxu1 %v24267_v57 }
 0x985   :  { %19573 = vmatprep.mubr.msk.f32.mxu0 %vm21835_vm0, %v24266_v46  ;;  %19606 = vmatprep.mubr.msk.f32.mxu1 %vm21835_vm0, %v24266_v46 }
 0x987   :  { %21062 = vmatpush3.bf16.msra.mxu0 %v22020_v43  ;;  %21080 = vmatpush3.bf16.msra.mxu1 %v22074_v2 }
 0x988   :  { %21069 = vmatprep.subr.bf16.mxu0 %v24267_v57  ;;  %21087 = vmatprep.subr.bf16.mxu1 %v24267_v57 }
 0x98a   :  { %19574 = vmatmul.mubr.f32.vlgmr.msra.gmra.mrb[124].mxu0 %v23242_v44  ;;  %19607 = vmatmul.mubr.f32.vlgmr.msra.gmra.mrb[126].mxu1 %v23242_v44 }
 0x98b   :  { %21071 = vmatpush3.bf16.msra.mxu0 %v22036_v48  ;;  %21089 = vmatpush3.bf16.msra.mxu1 %v22036_v48 }
 0x98c   :  { %21072 = vmatprep.subr.bf16.mxu0 %v24267_v57  ;;  %21090 = vmatprep.subr.bf16.mxu1 %v24267_v57 }
 0x98d   :  { %19595 = vmatprep.mubr.msk.f32.mxu0 %vm21835_vm0, %v24266_v46  ;;  %19628 = vmatprep.mubr.msk.f32.mxu1 %vm21835_vm0, %v24266_v46 }
 0x98f   :  { %21074 = vmatpush3.bf16.msra.mxu0 %v22048_v53  ;;  %21092 = vmatpush3.bf16.msra.mxu1 %v22048_v53 }
 0x990   :  { %21081 = vmatprep.subr.bf16.mxu0 %v24267_v57  ;;  %21099 = vmatprep.subr.bf16.mxu1 %v24267_v57 }
 0x992   :  { %19596 = vmatmul.mubr.f32.vlgmr.msra.gmra.mrb[126].mxu0 %v23259_v47  ;;  %19629 = vmatmul.mubr.f32.vlgmr.msra.gmra.mrb[128].mxu1 %v23253_v4 }
 0x993   :  { %21083 = vmatpush3.bf16.msra.mxu0 %v22066_v59  ;;  %21101 = vmatpush3.bf16.msra.mxu1 %v22036_v48 }
 0x994   :  { %21084 = vmatprep.subr.bf16.mxu0 %v24267_v57  ;;  %21102 = vmatprep.subr.bf16.mxu1 %v24267_v57 }
 0x995   :  { %19617 = vmatprep.mubr.msk.f32.mxu0 %vm21835_vm0, %v24266_v46  ;;  %19650 = vmatprep.mubr.msk.f32.mxu1 %vm21835_vm0, %v24266_v46 }
 0x997   :  { %21086 = vmatpush3.bf16.msra.mxu0 %v22078_v3  ;;  %21104 = vmatpush3.bf16.msra.mxu1 %v22048_v53 }
 0x998   :  { %21093 = vmatprep.subr.bf16.mxu0 %v24267_v57  ;;  %21111 = vmatprep.subr.bf16.mxu1 %v24267_v57 }
 0x99a   :  { %19618 = vmatmul.mubr.f32.vlgmr.msra.gmra.mrb[128].mxu0 %v23245_v36  ;;  %19651 = vmatmul.mubr.f32.vlgmr.msra.gmra.mrb[130].mxu1 %v23242_v44 }
 0x99b   :  { %21095 = vmatpush3.bf16.msra.mxu0 %v22086_v8  ;;  %21113 = vmatpush3.bf16.msra.mxu1 %v22140_v34 }
 0x99c   :  { %21096 = vmatprep.subr.bf16.mxu0 %v24267_v57  ;;  %21114 = vmatprep.subr.bf16.mxu1 %v24267_v57 }
 0x99d   :  { %19639 = vmatprep.mubr.msk.f32.mxu0 %vm21835_vm0, %v24266_v46  ;;  %19672 = vmatprep.mubr.msk.f32.mxu1 %vm21835_vm0, %v24266_v46 }
 0x99f   :  { %21098 = vmatpush3.bf16.msra.mxu0 %v22098_v14  ;;  %21116 = vmatpush3.bf16.msra.mxu1 %v22152_v41 }
 0x9a0   :  { %21105 = vmatprep.subr.bf16.mxu0 %v24267_v57  ;;  %21123 = vmatprep.subr.bf16.mxu1 %v24267_v57 }
 0x9a2   :  { %19640 = vmatmul.mubr.f32.vlgmr.msra.gmra.mrb[130].mxu0 %v23242_v44  ;;  %19673 = vmatmul.mubr.f32.vlgmr.msra.gmra.mrb[132].mxu1 %v23242_v44 }
 0x9a3   :  { %21107 = vmatpush3.bf16.msra.mxu0 %v22114_v20  ;;  %21125 = vmatpush3.bf16.msra.mxu1 %v22114_v20 }
 0x9a4   :  { %21108 = vmatprep.subr.bf16.mxu0 %v24267_v57  ;;  %21126 = vmatprep.subr.bf16.mxu1 %v24267_v57 }
 0x9a5   :  { %19661 = vmatprep.mubr.msk.f32.mxu0 %vm21835_vm0, %v24266_v46  ;;  %19694 = vmatprep.mubr.msk.f32.mxu1 %vm21835_vm0, %v24266_v46 }
 0x9a7   :  { %21110 = vmatpush3.bf16.msra.mxu0 %v22126_v25  ;;  %21128 = vmatpush3.bf16.msra.mxu1 %v22126_v25 }
 0x9a8   :  { %21117 = vmatprep.subr.bf16.mxu0 %v24267_v57  ;;  %21135 = vmatprep.subr.bf16.mxu1 %v24267_v57 }
 0x9aa   :  { %19662 = vmatmul.mubr.f32.vlgmr.msra.gmra.mrb[132].mxu0 %v23259_v47  ;;  %19695 = vmatmul.mubr.f32.vlgmr.msra.gmra.mrb[134].mxu1 %v23253_v4 }
 0x9ab   :  { %21119 = vmatpush3.bf16.msra.mxu0 %v22144_v35  ;;  %21137 = vmatpush3.bf16.msra.mxu1 %v22114_v20 }
 0x9ac   :  { %21120 = vmatprep.subr.bf16.mxu0 %v24267_v57  ;;  %21138 = vmatprep.subr.bf16.mxu1 %v24267_v57 }
 0x9ad   :  { %19683 = vmatprep.mubr.msk.f32.mxu0 %vm21835_vm0, %v24266_v46  ;;  %19716 = vmatprep.mubr.msk.f32.mxu1 %vm21835_vm0, %v24266_v46 }
 0x9af   :  { %21122 = vmatpush3.bf16.msra.mxu0 %v22156_v42  ;;  %21140 = vmatpush3.bf16.msra.mxu1 %v22126_v25 }
 0x9b0   :  { %21129 = vmatprep.subr.bf16.mxu0 %v24267_v57  ;;  %21147 = vmatprep.subr.bf16.mxu1 %v24267_v57 }
 0x9b2   :  { %19684 = vmatmul.mubr.f32.vlgmr.msra.gmra.mrb[134].mxu0 %v23245_v36  ;;  %19717 = vmatmul.mubr.f32.vlgmr.msra.gmra.mrb[136].mxu1 %v23242_v44 }
 0x9b3   :  { %21131 = vmatpush3.bf16.msra.mxu0 %v22164_v49  ;;  %21149 = vmatpush3.bf16.msra.mxu1 %v22202_v16 }
 0x9b4   :  { %21132 = vmatprep.subr.bf16.mxu0 %v24267_v57  ;;  %21150 = vmatprep.subr.bf16.mxu1 %v24267_v57 }
 0x9b5   :  { %19705 = vmatprep.mubr.msk.f32.mxu0 %vm21835_vm0, %v24266_v46  ;;  %19738 = vmatprep.mubr.msk.f32.mxu1 %vm21835_vm0, %v24266_v46 }
 0x9b7   :  { %21134 = vmatpush3.bf16.msra.mxu0 %v22172_v55  ;;  %21152 = vmatpush3.bf16.msra.mxu1 %v22212_v21 }
 0x9b8   :  { %21141 = vmatprep.subr.bf16.mxu0 %v24267_v57  ;;  %21159 = vmatprep.subr.bf16.mxu1 %v24267_v57 }
 0x9ba   :  { %19706 = vmatmul.mubr.f32.vlgmr.msra.gmra.mrb[136].mxu0 %v23242_v44  ;;  %19739 = vmatmul.mubr.f32.vlgmr.msra.gmra.mrb[138].mxu1 %v23242_v44 }
 0x9bb   :  { %21143 = vmatpush3.bf16.msra.mxu0 %v22182_v62  ;;  %21161 = vmatpush3.bf16.msra.mxu1 %v22182_v62 }
 0x9bc   :  { %21144 = vmatprep.subr.bf16.mxu0 %v24267_v57  ;;  %21162 = vmatprep.subr.bf16.mxu1 %v24267_v57 }
 0x9bd   :  { %19727 = vmatprep.mubr.msk.f32.mxu0 %vm21835_vm0, %v24266_v46  ;;  %19760 = vmatprep.mubr.msk.f32.mxu1 %vm21835_vm0, %v24266_v46 }
 0x9bf   :  { %21146 = vmatpush3.bf16.msra.mxu0 %v22190_v7  ;;  %21164 = vmatpush3.bf16.msra.mxu1 %v22190_v7 }
 0x9c0   :  { %21153 = vmatprep.subr.bf16.mxu0 %v24267_v57  ;;  %21171 = vmatprep.subr.bf16.mxu1 %v24267_v57 }
 0x9c2   :  { %19728 = vmatmul.mubr.f32.vlgmr.msra.gmra.mrb[138].mxu0 %v23259_v47  ;;  %19761 = vmatmul.mubr.f32.vlgmr.msra.gmra.mrb[140].mxu1 %v23253_v4 }
 0x9c3   :  { %21155 = vmatpush3.bf16.msra.mxu0 %v22204_v17  ;;  %21173 = vmatpush3.bf16.msra.mxu1 %v22182_v62 }
 0x9c4   :  { %21156 = vmatprep.subr.bf16.mxu0 %v24267_v57  ;;  %21174 = vmatprep.subr.bf16.mxu1 %v24267_v57 }
 0x9c5   :  { %19749 = vmatprep.mubr.msk.f32.mxu0 %vm21835_vm0, %v24266_v46  ;;  %19782 = vmatprep.mubr.msk.f32.mxu1 %vm21835_vm0, %v24266_v46 }
 0x9c7   :  { %21158 = vmatpush3.bf16.msra.mxu0 %v22214_v22  ;;  %21176 = vmatpush3.bf16.msra.mxu1 %v22190_v7 }
 0x9c8   :  { %21165 = vmatprep.subr.bf16.mxu0 %v24267_v57  ;;  %21183 = vmatprep.subr.bf16.mxu1 %v24267_v57 }
 0x9ca   :  { %19750 = vmatmul.mubr.f32.vlgmr.msra.gmra.mrb[140].mxu0 %v23245_v36  ;;  %19783 = vmatmul.mubr.f32.vlgmr.msra.gmra.mrb[142].mxu1 %v23242_v44 }
 0x9cb   :  { %21167 = vmatpush3.bf16.msra.mxu0 %v22224_v23  ;;  %19771 = vmatprep.mubr.msk.f32.mxu0 %vm21835_vm0, %v24266_v46 }
 0x9cc   :  { %21168 = vmatprep.subr.bf16.mxu0 %v24267_v57  ;;  %21185 = vmatpush3.bf16.msra.mxu1 %v21995_v31 }
 0x9cd   :  { %21186 = vmatprep.subr.bf16.mxu1 %v24267_v57  ;;  %19804 = vmatprep.mubr.msk.f32.mxu1 %vm21835_vm0, %v24266_v46 }
 0x9cf   :  { %21170 = vmatpush3.bf16.msra.mxu0 %v22232_v24 }
 0x9d0   :  { %21188 = vmatpush3.bf16.msra.mxu1 %v24274_v6  ;;  %21177 = vmatprep.subr.bf16.mxu0 %v24267_v57 }
 0x9d1   :  { %21195 = vmatprep.subr.bf16.mxu1 %v24267_v57 }
 0x9d2   :  { %19772 = vmatmul.mubr.f32.vlgmr.msra.gmra.mrb[142].mxu0 %v23242_v44  ;;  %v24282_v44 = vld [vmem:[#allocation30_spill] sm:$0xff] }
 0x9d3   :  { %21179 = vmatpush3.bf16.msra.mxu0 %v21985_v10  ;;  %19793 = vmatprep.mubr.msk.f32.mxu0 %vm21835_vm0, %v24266_v46 }
 0x9d4   :  { %21180 = vmatprep.subr.bf16.mxu0 %v24267_v57 }
 0x9d7   :  { %21182 = vmatpush3.bf16.msra.mxu0 %v21988_v15 }
 0x9d8   :  { %21189 = vmatprep.subr.bf16.mxu0 %v24267_v57 }
 0xa0a   :  { %v10481_v61 = vpop.xlane.xlu1 %10480 }
 0xa0b   :  { %10483 = vst.msk [vmem:[#allocation3 + $0x28] sm:$0xff] %vm121_vm2, %v10481_v61 }
 0xa12   :  { %v23443_v29 = vld [vmem:[#allocation3 + $0x28] sm:$0xff] }
 0xa13   :  { %24279 = vst [vmem:[#allocation36_spill] sm:$0xff] %v23443_v29  ;;  %v16905_v19 = vld [vmem:[#allocation3 + $0x28] sm:$0xff]  ;;  %v12481_v30 = vsel %vm121_vm2, %v23443_v29, -inf }
 0xa14   :  { %v16914_v52 = vsel %vm121_vm2, %v16905_v19, -inf  ;;  %v12482_v36 = vmax.f32 %v24282_v44, %v12481_v30  ;;  %v14681_v4 = vmax.f32 %v14675_v63, %v12481_v30  ;;  %v24288_v19 = vld [vmem:[#allocation28_spill] sm:$0xff] }
 0xa15   :  { %v16915_v47 = vmax.f32 %v14675_v63, %v16914_v52 }
 0xa16   :  { %v12483_v45 = vmax.f32 %v12480_v13, %v12482_v36  ;;  %v23458_v61 = vmax.f32 %v14679_v28, %v14681_v4 }
 0xa17   :  { %v23460_v27 = vmax.f32 %v16913_v0, %v16915_v47 }
 0xa18   :  { %24284 = vst [vmem:[#allocation29_spill] sm:$0xff] %v23458_v61  ;;  %v12485_v37 = vmax.f32 %v12483_v45, %v12484_v12 }
 0xa19   :  { %24285 = vst [vmem:[#allocation30_spill] sm:$0xff] %v23460_v27 }
 0xa1a   :  { %vm12486_vm14 = vcmp.ge.f32.partialorder %v23430_v11, %v12485_v37  ;;  %vm12487_vm15 = vcmp.ge.f32.partialorder %v24286_v9, %v12485_v37  ;;  %vm12488_vm3 = vcmp.ge.f32.partialorder %v24287_v5, %v12485_v37  ;;  %vm12489_vm4 = vcmp.ge.f32.partialorder %v23434_v32, %v12485_v37 }
 0xa1b   :  { %vm12490_vm5 = vcmp.ge.f32.partialorder %v24288_v19, %v12485_v37  ;;  %vm12491_vm6 = vcmp.ge.f32.partialorder %v23443_v29, %v12485_v37  ;;  %v12492_v54 = vsel %vm12486_vm14, 0, %v21840_v40  ;;  %v12493_v63 = vsel %vm12487_vm15, 1, %v21840_v40 }
 0xa1c   :  { %v12494_v13 = vsel %vm12488_vm3, 2, %v21840_v40  ;;  %v12495_v30 = vsel %vm12489_vm4, 3, %v21840_v40  ;;  %v12496_v28 = vsel %vm12490_vm5, 4, %v21840_v40  ;;  %v12497_v52 = vsel %vm12491_vm6, 5, %v21840_v40 }
 0xa1d   :  { %v12498_v44 = vsel %vm121_vm2, %v12492_v54, 2147483647  ;;  %v12499_v36 = vsel %vm121_vm2, %v12493_v63, 2147483647  ;;  %v12500_v4 = vsel %vm121_vm2, %v12494_v13, 2147483647 }
 0xa1e   :  { %v12501_v0 = vsel %vm121_vm2, %v12495_v30, 2147483647  ;;  %v12502_v47 = vsel %vm121_vm2, %v12496_v28, 2147483647  ;;  %v12505_v45 = vsel %vm121_vm2, %v12497_v52, 2147483647 }
 0xa1f   :  { %vm12503_vm7 = vcmp.lt.s32.totalorder %v12498_v44, %v12502_v47  ;;  %vm12506_vm8 = vcmp.lt.s32.totalorder %v12499_v36, %v12505_v45  ;;  %vm12510_vm9 = vcmp.lt.s32.totalorder %v12500_v4, %v12501_v0 }
 0xa20   :  { %v12504_v60 = vsel %vm12503_vm7, %v12498_v44, %v12502_v47  ;;  %v12507_v12 = vsel %vm12506_vm8, %v12499_v36, %v12505_v45  ;;  %v12511_v27 = vsel %vm12510_vm9, %v12500_v4, %v12501_v0 }
 0xa21   :  { %vm12508_vm10 = vcmp.lt.s32.totalorder %v12504_v60, %v12507_v12 }
 0xa22   :  { %v12509_v37 = vsel %vm12508_vm10, %v12504_v60, %v12507_v12 }
 0xa23   :  { %vm12512_vm11 = vcmp.lt.s32.totalorder %v12509_v37, %v12511_v27 }
 0xa24   :  { %v12513_v54 = vsel %vm12512_vm11, %v12509_v37, %v12511_v27 }
 0xa25   :  { %vm12514_vm12 = vcmp.eq.s32.totalorder %v12513_v54, 0  ;;  %vm12515_vm13 = vcmp.eq.s32.totalorder %v12513_v54, 1  ;;  %vm12516_vm14 = vcmp.eq.s32.totalorder %v12513_v54, 2  ;;  %vm12517_vm15 = vcmp.eq.s32.totalorder %v12513_v54, 3 }
 0xa26   :  { %vm12518_vm3 = vcmp.eq.s32.totalorder %v12513_v54, 4  ;;  %vm12519_vm4 = vcmp.eq.s32.totalorder %v12513_v54, 5  ;;  %v12520_v63 = vsel %vm12514_vm12, -1e+30, %v23430_v11  ;;  %v12521_v13 = vsel %vm12515_vm13, -1e+30, %v24286_v9 }
 0xa27   :  { %v12522_v30 = vsel %vm12516_vm14, -1e+30, %v24287_v5  ;;  %v12523_v28 = vsel %vm12517_vm15, -1e+30, %v23434_v32  ;;  %v12524_v52 = vsel %vm12518_vm3, -1e+30, %v24288_v19 }
 0xa28   :  { %v12525_v44 = vsel %vm12519_vm4, -1e+30, %v23443_v29  ;;  %v12526_v27 = vsel %vm121_vm2, %v12520_v63, -inf  ;;  %v12527_v36 = vsel %vm121_vm2, %v12521_v13, -inf  ;;  %v12528_v4 = vsel %vm121_vm2, %v12522_v30, -inf }
 0xa29   :  { %v12529_v0 = vsel %vm121_vm2, %v12523_v28, -inf  ;;  %v12530_v47 = vsel %vm121_vm2, %v12524_v52, -inf  ;;  %v12532_v9 = vsel %vm121_vm2, %v12525_v44, -inf }
 0xa2a   :  { %v12531_v45 = vmax.f32 %v12526_v27, %v12530_v47  ;;  %v12533_v5 = vmax.f32 %v12527_v36, %v12532_v9  ;;  %v12535_v12 = vmax.f32 %v12528_v4, %v12529_v0 }
 0xa2c   :  { %v12534_v60 = vmax.f32 %v12531_v45, %v12533_v5 }
 0xa2e   :  { %v12536_v37 = vmax.f32 %v12534_v60, %v12535_v12 }
 0xa30   :  { %vm12537_vm5 = vcmp.ge.f32.partialorder %v12520_v63, %v12536_v37  ;;  %vm12538_vm6 = vcmp.ge.f32.partialorder %v12521_v13, %v12536_v37  ;;  %vm12539_vm7 = vcmp.ge.f32.partialorder %v12522_v30, %v12536_v37  ;;  %vm12540_vm8 = vcmp.ge.f32.partialorder %v12523_v28, %v12536_v37 }
 0xa31   :  { %vm12541_vm9 = vcmp.ge.f32.partialorder %v12524_v52, %v12536_v37  ;;  %vm12542_vm10 = vcmp.ge.f32.partialorder %v12525_v44, %v12536_v37  ;;  %v12543_v19 = vsel %vm12537_vm5, 0, %v21840_v40  ;;  %v12544_v54 = vsel %vm12538_vm6, 1, %v21840_v40 }
 0xa32   :  { %v12545_v1 = vsel %vm12539_vm7, 2, %v21840_v40  ;;  %v12546_v61 = vsel %vm12540_vm8, 3, %v21840_v40  ;;  %v12547_v51 = vsel %vm12541_vm9, 4, %v21840_v40  ;;  %v12548_v6 = vsel %vm12542_vm10, 5, %v21840_v40 }
 0xa33   :  { %v12549_v24 = vsel %vm121_vm2, %v12543_v19, 2147483647  ;;  %v12550_v27 = vsel %vm121_vm2, %v12544_v54, 2147483647  ;;  %v12551_v36 = vsel %vm121_vm2, %v12545_v1, 2147483647 }
 0xa34   :  { %v12552_v4 = vsel %vm121_vm2, %v12546_v61, 2147483647  ;;  %v12553_v0 = vsel %vm121_vm2, %v12547_v51, 2147483647  ;;  %v12556_v47 = vsel %vm121_vm2, %v12548_v6, 2147483647 }
 0xa35   :  { %vm12554_vm11 = vcmp.lt.s32.totalorder %v12549_v24, %v12553_v0  ;;  %vm12557_vm12 = vcmp.lt.s32.totalorder %v12550_v27, %v12556_v47  ;;  %vm12561_vm13 = vcmp.lt.s32.totalorder %v12551_v36, %v12552_v4 }
 0xa36   :  { %v12555_v9 = vsel %vm12554_vm11, %v12549_v24, %v12553_v0  ;;  %v12558_v45 = vsel %vm12557_vm12, %v12550_v27, %v12556_v47  ;;  %v12562_v40 = vsel %vm12561_vm13, %v12551_v36, %v12552_v4 }
 0xa37   :  { %vm12559_vm14 = vcmp.lt.s32.totalorder %v12555_v9, %v12558_v45 }
 0xa38   :  { %v12560_v5 = vsel %vm12559_vm14, %v12555_v9, %v12558_v45  ;;  %v21650_v45 = vld [vmem:[#allocation3 + $0x8] sm:$0xff] }
 0xa39   :  { %vm12563_vm15 = vcmp.lt.s32.totalorder %v12560_v5, %v12562_v40 }
 0xa3a   :  { %v12564_v60 = vsel %vm12563_vm15, %v12560_v5, %v12562_v40  ;;  %v21651_v40 = vld [vmem:[#allocation3 + $0x10] sm:$0xff] }
 0xa3b   :  { %vm12565_vm3 = vcmp.eq.s32.totalorder %v12564_v60, 0  ;;  %vm12566_vm4 = vcmp.eq.s32.totalorder %v12564_v60, 1  ;;  %vm12567_vm5 = vcmp.eq.s32.totalorder %v12564_v60, 2  ;;  %vm12568_vm6 = vcmp.eq.s32.totalorder %v12564_v60, 3 }
 0xa3c   :  { %vm12569_vm7 = vcmp.eq.s32.totalorder %v12564_v60, 4  ;;  %vm12570_vm8 = vcmp.eq.s32.totalorder %v12564_v60, 5  ;;  %v12571_v1 = vsel %vm12565_vm3, -1e+30, %v12520_v63  ;;  %v12572_v51 = vsel %vm12566_vm4, -1e+30, %v12521_v13 }
 0xa3d   :  { %v12573_v61 = vsel %vm12567_vm5, -1e+30, %v12522_v30  ;;  %v12574_v6 = vsel %vm12568_vm6, -1e+30, %v12523_v28  ;;  %v12575_v12 = vsel %vm12569_vm7, -1e+30, %v12524_v52 }
 0xa3e   :  { %v12576_v37 = vsel %vm12570_vm8, -1e+30, %v12525_v44  ;;  %v12577_v24 = vsel %vm121_vm2, %v12571_v1, -inf  ;;  %v12578_v19 = vsel %vm121_vm2, %v12572_v51, -inf  ;;  %v12579_v54 = vsel %vm121_vm2, %v12573_v61, -inf  ;;  %v21652_v51 = vld [vmem:[#allocation3 + $0x20] sm:$0xff] }
 0xa3f   :  { %v12580_v27 = vsel %vm121_vm2, %v12574_v6, -inf  ;;  %v12581_v36 = vsel %vm121_vm2, %v12575_v12, -inf  ;;  %v12583_v4 = vsel %vm121_vm2, %v12576_v37, -inf }
 0xa40   :  { %v12582_v0 = vmax.f32 %v12577_v24, %v12581_v36  ;;  %v12584_v47 = vmax.f32 %v12578_v19, %v12583_v4  ;;  %v12586_v13 = vmax.f32 %v12579_v54, %v12580_v27 }
 0xa42   :  { %v12585_v63 = vmax.f32 %v12582_v0, %v12584_v47 }
 0xa44   :  { %v12587_v30 = vmax.f32 %v12585_v63, %v12586_v13 }
 0xa45   :  { %v10655_v28 = vpop.f32.mrb[120].mxu1 }
 0xa46   :  { %v19542_v52 = vpop.f32.mrb[121].mxu1  ;;  %v12588_v44 = vadd.f32 1e-07, %v12587_v30 }
 0xa48   :  { %v12589_v9 = vsub.f32 %v23430_v11, %v12588_v44  ;;  %v12590_v5 = vsub.f32 %v21650_v45, %v12588_v44  ;;  %v12591_v60 = vsub.f32 %v21651_v40, %v12588_v44  ;;  %v12592_v1 = vsub.f32 %v23434_v32, %v12588_v44 }
 0xa49   :  { %v12593_v61 = vsub.f32 %v21652_v51, %v12588_v44  ;;  %v12594_v24 = vsub.f32 %v23443_v29, %v12588_v44 }
 0xa4a   :  { %v12595_v6 = vmax.f32 %v12589_v9, 0.0  ;;  %v12596_v12 = vmax.f32 %v12590_v5, 0.0  ;;  %v12597_v37 = vmax.f32 %v12591_v60, 0.0  ;;  %v12598_v19 = vmax.f32 %v12592_v1, 0.0 }
 0xa4b   :  { %v12599_v30 = vmax.f32 %v12593_v61, 0.0  ;;  %v12600_v9 = vmax.f32 %v12594_v24, 0.0 }
 0xa4c   :  { %v12601_v54 = vsel %vm121_vm2, %v12595_v6, 0.0  ;;  %v12602_v27 = vsel %vm121_vm2, %v12596_v12, 0.0  ;;  %v12604_v52 = vsel %vm121_vm2, %v12597_v37, 0.0  ;;  %v12606_v5 = vsel %vm121_vm2, %v12598_v19, 0.0 }
 0xa4d   :  { %v10812_v36 = vpop.f32.mrb[122].mxu1  ;;  %v10564_v4 = vpop.f32.mrb[120].mxu0  ;;  %v12603_v0 = vadd.f32 %v12602_v27, %v12601_v54  ;;  %v12608_v44 = vsel %vm121_vm2, %v12599_v30, 0.0  ;;  %v12610_v1 = vsel %vm121_vm2, %v12600_v9, 0.0 }
 0xa4e   :  { %v10656_v47 = vadd.f32 %v10655_v28, %v10564_v4  ;;  %v19564_v63 = vpop.f32.mrb[123].mxu1  ;;  %v19531_v13 = vpop.f32.mrb[121].mxu0 }
 0xa4f   :  { %v12605_v45 = vadd.f32 %v12604_v52, %v12603_v0 }
 0xa51   :  { %v12607_v40 = vadd.f32 %v12606_v5, %v12605_v45 }
 0xa53   :  { %v12609_v60 = vadd.f32 %v12608_v44, %v12607_v40 }
 0xa55   :  { %v10735_v51 = vpop.f32.mrb[122].mxu0  ;;  %v10970_v29 = vpop.f32.mrb[124].mxu1  ;;  %v12611_v32 = vadd.f32 %v12610_v1, %v12609_v60 }
 0xa56   :  { %v10736_v54 = vadd.f32 %v10735_v51, %v10656_v47  ;;  %v19553_v28 = vpop.f32.mrb[123].mxu0  ;;  %v19586_v27 = vpop.f32.mrb[125].mxu1 }
 0xa57   :  { %v12612_v4 = vadd.f32 1e-07, %v12611_v32 }
 0xa58   :  { %v10813_v61 = vadd.f32 %v10812_v36, %v10736_v54 }
 0xa59   :  { %21585 = vrcp.f32 %v12612_v4 }
 0xa5d   :  { %v10895_v63 = vpop.f32.mrb[124].mxu0  ;;  %v11149_v0 = vpop.f32.mrb[126].mxu1 }
 0xa5e   :  { %v10896_v24 = vadd.f32 %v10895_v63, %v10813_v61  ;;  %v19575_v13 = vpop.f32.mrb[125].mxu0  ;;  %v19608_v52 = vpop.f32.mrb[127].mxu1 }
 0xa5f   :  { %v10485_v13 = vld [vmem:[#allocation4 + $0x28] sm:$0xff] }
 0xa60   :  { %v10971_v45 = vadd.f32 %v10970_v29, %v10896_v24 }
 0xa63   :  { %v21586_v5 = vpop.eup %21585 }
 0xa64   :  { %v12619_v11 = vmul.f32 %v21586_v5, %v12600_v9  ;;  %v12614_v40 = vmul.f32 %v21586_v5, %v12595_v6  ;;  %v12615_v51 = vmul.f32 %v21586_v5, %v12596_v12  ;;  %v12616_v32 = vmul.f32 %v21586_v5, %v12597_v37  ;;  %v10982_v12 = vld [vmem:[#allocation7 + $0x28] sm:$0xff] }
 0xa65   :  { %v11058_v44 = vpop.f32.mrb[126].mxu0  ;;  %v11306_v31 = vpop.f32.mrb[128].mxu1  ;;  %v12617_v29 = vmul.f32 %v21586_v5, %v12598_v19  ;;  %v12618_v6 = vmul.f32 %v21586_v5, %v12599_v30  ;;  %v10974_v37 = vadd.f32 %v10971_v45, %v10485_v13 }
 0xa66   :  { %12647 = vperm.xlu1 %21484, %v12619_v11   ;;  %12622 = vperm.xlu0 %21483, %v12614_v40   ;;  %v11150_v60 = vadd.f32 %v11149_v0, %v11058_v44  ;;  %v19597_v47 = vpop.f32.mrb[127].mxu0  ;;  %v19630_v1 = vpop.f32.mrb[129].mxu1 }
 0xa67   :  { %v17232_v1 = vmul.f32 -1.442695, %v10974_v37 }
 0xa6a   :  { %12627 = vperm.xlu0 %21483, %v12615_v51  }
 0xa6d   :  { %v11229_v36 = vpop.f32.mrb[128].mxu0  ;;  %v11464_v54 = vpop.f32.mrb[130].mxu1 }
 0xa6e   :  { %12632 = vperm.xlu0 %21483, %v12616_v32   ;;  %v11230_v28 = vadd.f32 %v11229_v36, %v11150_v60  ;;  %v19619_v27 = vpop.f32.mrb[129].mxu0  ;;  %v19652_v4 = vpop.f32.mrb[131].mxu1 }
 0xa70   :  { %v11307_v61 = vadd.f32 %v11306_v31, %v11230_v28 }
 0xa72   :  { %12637 = vperm.xlu0 %21483, %v12617_v29  }
 0xa75   :  { %v11389_v9 = vpop.f32.mrb[130].mxu0  ;;  %v11643_v63 = vpop.f32.mrb[132].mxu1 }
 0xa76   :  { %12642 = vperm.xlu0 %21483, %v12618_v6   ;;  %v11390_v11 = vadd.f32 %v11389_v9, %v11307_v61  ;;  %v19641_v0 = vpop.f32.mrb[131].mxu0  ;;  %v19674_v24 = vpop.f32.mrb[133].mxu1 }
 0xa78   :  { %v11465_v52 = vadd.f32 %v11464_v54, %v11390_v11 }
 0xa7a   :  { %v11468_v40 = vadd.f32 %v11465_v52, %v10982_v12 }
 0xa7c   :  { %v17233_v44 = vmul.f32 -1.442695, %v11468_v40 }
 0xa7d   :  { %v11552_v47 = vpop.f32.mrb[132].mxu0  ;;  %v11800_v60 = vpop.f32.mrb[134].mxu1 }
 0xa7e   :  { %v11644_v51 = vadd.f32 %v11643_v63, %v11552_v47  ;;  %v19663_v19 = vpop.f32.mrb[133].mxu0  ;;  %v19696_v31 = vpop.f32.mrb[135].mxu1  ;;  %21587 = vpow2.f32 %v17233_v44  ;;  %v11476_v63 = vld [vmem:[#allocation9 + $0x28] sm:$0xff] }
 0xa7f   :  { %21589 = vpow2.f32 %v17232_v1 }
 0xa85   :  { %v11723_v30 = vpop.f32.mrb[134].mxu0  ;;  %v11958_v5 = vpop.f32.mrb[136].mxu1 }
 0xa86   :  { %v11724_v32 = vadd.f32 %v11723_v30, %v11644_v51  ;;  %v19685_v36 = vpop.f32.mrb[135].mxu0  ;;  %v19718_v28 = vpop.f32.mrb[137].mxu1 }
 0xa88   :  { %v11801_v27 = vadd.f32 %v11800_v60, %v11724_v32  ;;  %v21588_v4 = vpop.eup %21587 }
 0xa89   :  { %v21590_v29 = vpop.eup %21589  ;;  %v11472_v61 = vadd.f32 1.0, %v21588_v4 }
 0xa8a   :  { %v10978_v0 = vadd.f32 1.0, %v21590_v29 }
 0xa8b   :  { %21591 = vrcp.f32 %v11472_v61  ;;  %v11965_v61 = vld [vmem:[#allocation10 + $0x28] sm:$0xff] }
 0xa8c   :  { %21593 = vrcp.f32 %v10978_v0 }
 0xa8d   :  { %v11883_v54 = vpop.f32.mrb[136].mxu0  ;;  %v12132_v45 = vpop.f32.mrb[138].mxu1 }
 0xa8e   :  { %v11884_v6 = vadd.f32 %v11883_v54, %v11801_v27  ;;  %v19707_v9 = vpop.f32.mrb[137].mxu0  ;;  %v19740_v11 = vpop.f32.mrb[139].mxu1 }
 0xa90   :  { %v11959_v24 = vadd.f32 %v11958_v5, %v11884_v6 }
 0xa92   :  { %v11962_v13 = vadd.f32 %v11959_v24, %v11476_v63 }
 0xa94   :  { %21595 = vtanh.f32 %v11962_v13  ;;  %v23510_v13 = vld [vmem:[#allocation2] sm:$0xff] }
 0xa95   :  { %v12041_v12 = vpop.f32.mrb[138].mxu0  ;;  %v12289_v52 = vpop.f32.mrb[140].mxu1 }
 0xa96   :  { %v12133_v37 = vadd.f32 %v12132_v45, %v12041_v12  ;;  %v19729_v40 = vpop.f32.mrb[139].mxu0  ;;  %v19762_v44 = vpop.f32.mrb[141].mxu1  ;;  %v23512_v12 = vld [vmem:[#allocation2 + $0x8] sm:$0xff] }
 0xa97   :  { %v21592_v47 = vpop.eup %21591 }
 0xa98   :  { %v21594_v60 = vpop.eup %21593  ;;  %v12458_v36 = vmul.f32 %v21592_v47, %v23221_v38  ;;  %v23519_v47 = vld [vmem:[#allocation2 + $0x18] sm:$0xff] }
 0xa9d   :  { %v12212_v1 = vpop.f32.mrb[140].mxu0  ;;  %v12447_v51 = vpop.f32.mrb[142].mxu1 }
 0xa9e   :  { %v21596_v19 = vpop.eup %21595  ;;  %v12213_v31 = vadd.f32 %v12212_v1, %v12133_v37  ;;  %v19751_v30 = vpop.f32.mrb[141].mxu0 }
 0xa9f   :  { %v19784_v32 = vpop.f32.mrb[143].mxu1  ;;  %v12459_v5 = vmul.f32 %v21596_v19, %v21594_v60 }
 0xaa0   :  { %v12290_v28 = vadd.f32 %v12289_v52, %v12213_v31 }
 0xaa1   :  { %v23508_v27 = vadd.f32 %v12459_v5, %v12458_v36  ;;  %v23525_v36 = vld [vmem:[#allocation2 + $0x28] sm:$0xff] }
 0xaa5   :  { %v12372_v4 = vpop.f32.mrb[142].mxu0 }
 0xaa6   :  { %v12373_v29 = vadd.f32 %v12372_v4, %v12290_v28  ;;  %v19773_v54 = vpop.f32.mrb[143].mxu0 }
 0xaa8   :  { %v12448_v45 = vadd.f32 %v12447_v51, %v12373_v29 }
 0xaaa   :  { %v12451_v6 = vadd.f32 %v12448_v45, %v11965_v61 }
 0xaac   :  { %v17234_v9 = vmul.f32 -1.442695, %v12451_v6 }
 0xaae   :  { %21597 = vpow2.f32 %v17234_v9 }
 0xab8   :  { %v21598_v0 = vpop.eup %21597 }
 0xab9   :  { %v12455_v24 = vadd.f32 1.0, %v21598_v0 }
 0xabb   :  { %21599 = vrcp.f32 %v12455_v24 }
 0xabc   :  { %21601 = vtanh.f32 %v23508_v27 }
 0xac5   :  { %v21600_v54 = vpop.eup %21599 }
 0xac6   :  { %v21602_v6 = vpop.eup %21601 }
 0xae5   :  { %v12623_v11 = vpop.permute.xlu0 %12622  ;;  %v12648_v31 = vpop.permute.xlu1 %12647 }
 0xae6   :  { %v12650_v37 = vmul.f32 %v12623_v11, %v23510_v13  ;;  %v12655_v28 = vmul.f32 %v12648_v31, %v23525_v36  ;;  %v12462_v11 = vmul.f32 %v21602_v6, %v21600_v54  ;;  %v24296_v54 = vld [vmem:[#allocation29_spill] sm:$0xff]  ;;  %v24298_v6 = vld [vmem:[#allocation35_spill] sm:$0xff] }
 0xae8   :  { %v12656_v1 = vsel %vm24260_vm1, %v12650_v37, 0.0  ;;  %v12665_v9 = vsel %vm24260_vm1, %v12655_v28, 0.0 }
 0xae9   :  { %v12628_v63 = vpop.permute.xlu0 %12627 }
 0xaea   :  { %v12651_v38 = vmul.f32 %v12628_v63, %v23512_v12 }
 0xaec   :  { %v12657_v44 = vsel %vm24260_vm1, %v12651_v38, 0.0 }
 0xaed   :  { %v12633_v52 = vpop.permute.xlu0 %12632  ;;  %v12658_v30 = vadd.f32 %v12657_v44, %v12656_v1 }
 0xaee   :  { %v12652_v40 = vmul.f32 %v12633_v52, %v23226_v56 }
 0xaf0   :  { %v12659_v51 = vsel %vm24260_vm1, %v12652_v40, 0.0 }
 0xaf1   :  { %v12638_v60 = vpop.permute.xlu0 %12637  ;;  %v12660_v56 = vadd.f32 %v12659_v51, %v12658_v30  ;;  %v24290_v51 = vld [vmem:[#allocation25_spill] sm:$0xff]  ;;  %v23718_v30 = vld [vmem:[#allocation3 + $0x10] sm:$0xff] }
 0xaf2   :  { %v12653_v19 = vmul.f32 %v12638_v60, %v23519_v47  ;;  %24292 = vst [vmem:[#allocation31_spill] sm:$0xff] %v23718_v30 }
 0xaf4   :  { %v12661_v32 = vsel %vm24260_vm1, %v12653_v19, 0.0  ;;  %v24291_v19 = vld [vmem:[#allocation22_spill] sm:$0xff] }
 0xaf5   :  { %v12643_v5 = vpop.permute.xlu0 %12642  ;;  %v12662_v29 = vadd.f32 %v12661_v32, %v12660_v56  ;;  %v14676_v56 = vsel %vm121_vm2, %v23718_v30, -inf }
 0xaf6   :  { %v12654_v4 = vmul.f32 %v12643_v5, %v23232_v50 }
 0xaf8   :  { %v12663_v45 = vsel %vm24260_vm1, %v12654_v4, 0.0  ;;  %v24295_v4 = vld [vmem:[#allocation37_spill] sm:$0xff] }
 0xaf9   :  { %v12664_v61 = vadd.f32 %v12663_v45, %v12662_v29 }
 0xafb   :  { %v12666_v0 = vadd.f32 %v12665_v9, %v12664_v61  ;;  %v24297_v61 = vld [vmem:[#allocation32_spill] sm:$0xff]  ;;  %v24299_v9 = vld [vmem:[#allocation34_spill] sm:$0xff] }
 0xafd   :  { %v12667_v63 = vadd.f32 %v12666_v0, %v12462_v11  ;;  %12671 = vst.msk [vmem:[#allocation14 + $0x28] sm:$0xff] %vm24260_vm1, %v12666_v0  ;;  %v24300_v11 = vld [vmem:[#allocation33_spill] sm:$0xff]  ;;  %v24301_v0 = vld [vmem:[#allocation36_spill] sm:$0xff] }
 0xaff   :  { %12669 = vst.msk [vmem:[#allocation13 + $0x28] sm:$0xff] %vm24260_vm1, %v12667_v63  ;;  %12673 = vst.msk [vmem:[#allocation2 + $0x30] sm:$0xff] %vm24260_vm1, %v12667_v63  ;;  %v12684_v24 = vsel %vm24260_vm1, %v12667_v63, 0  ;;  %21603 = vtanh.f32 %v12667_v63  ;;  %v21841_v63 = vmov 7  }
 0xb00   :  { %v23535_v50 = vand.u32 4294901760, %v12684_v24 }
 0xb02   :  { %v23538_v38 = vsub.f32 %v12684_v24, %v23535_v50  ;;  %19805 = vmatmul.mubr.f32.vlgmr.msra.gmra.mrb[144].mxu1 %v23535_v50 }
 0xb03   :  { %21197 = vmatpush3.bf16.msra.mxu1 %v21985_v10  ;;  %19826 = vmatprep.mubr.msk.f32.mxu1 %vm21835_vm0, %v24266_v46 }
 0xb04   :  { %21198 = vmatprep.subr.bf16.mxu1 %v24267_v57  ;;  %v23546_v52 = vand.u32 4294901760, %v23538_v38 }
 0xb06   :  { %v12758_v37 = vsub.f32 %v23538_v38, %v23546_v52 }
 0xb07   :  { %21200 = vmatpush3.bf16.msra.mxu1 %v21988_v15 }
 0xb08   :  { %21207 = vmatprep.subr.bf16.mxu1 %v24267_v57  ;;  %v23552_v40 = vand.u32 4294901760, %v12758_v37 }
 0xb09   :  { %v21604_v44 = vpop.eup %21603 }
 0xb0a   :  { %19827 = vmatmul.mubr.f32.vlgmr.msra.gmra.mrb[146].mxu1 %v23546_v52  ;;  %19794 = vmatmul.mubr.f32.vlgmr.msra.gmra.mrb[144].mxu0 %v23552_v40  ;;  %v12675_v60 = vmul.f32 %v23266_v18, %v21604_v44  ;;  %v24289_v18 = vld [vmem:[#allocation21_spill] sm:$0xff] }
 0xb0b   :  { %21191 = vmatpush3.bf16.msra.mxu0 %v21992_v26  ;;  %21209 = vmatpush3.bf16.msra.mxu1 %v21985_v10 }
 0xb0c   :  { %21192 = vmatprep.subr.bf16.mxu0 %v24267_v57  ;;  %21210 = vmatprep.subr.bf16.mxu1 %v24267_v57  ;;  %v12676_v1 = vsel %vm24260_vm1, %v12675_v60, 0.0 }
 0xb0d   :  { %12677 = vadd.xlane.f32.xlu0 %v12676_v1  ;;  %19815 = vmatprep.mubr.msk.f32.mxu0 %vm21835_vm0, %v24266_v46 }
 0xb0e   :  { %19848 = vmatprep.mubr.msk.f32.mxu1 %vm21835_vm0, %v24266_v46 }
 0xb0f   :  { %21194 = vmatpush3.bf16.msra.mxu0 %v22002_v33  ;;  %21212 = vmatpush3.bf16.msra.mxu1 %v21988_v15 }
 0xb10   :  { %21201 = vmatprep.subr.bf16.mxu0 %v24267_v57  ;;  %21219 = vmatprep.subr.bf16.mxu1 %v24267_v57 }
 0xb12   :  { %19816 = vmatmul.mubr.f32.vlgmr.msra.gmra.mrb[146].mxu0 %v23538_v38  ;;  %19849 = vmatmul.mubr.f32.vlgmr.msra.gmra.mrb[148].mxu1 %v23535_v50 }
 0xb13   :  { %21203 = vmatpush3.bf16.msra.mxu0 %v22010_v39  ;;  %21221 = vmatpush3.bf16.msra.mxu1 %v22062_v58 }
 0xb14   :  { %21204 = vmatprep.subr.bf16.mxu0 %v24267_v57  ;;  %21222 = vmatprep.subr.bf16.mxu1 %v24267_v57 }
 0xb15   :  { %19837 = vmatprep.mubr.msk.f32.mxu0 %vm21835_vm0, %v24266_v46  ;;  %19870 = vmatprep.mubr.msk.f32.mxu1 %vm21835_vm0, %v24266_v46 }
 0xb17   :  { %21206 = vmatpush3.bf16.msra.mxu0 %v22020_v43  ;;  %21224 = vmatpush3.bf16.msra.mxu1 %v22074_v2 }
 0xb18   :  { %21213 = vmatprep.subr.bf16.mxu0 %v24267_v57  ;;  %21231 = vmatprep.subr.bf16.mxu1 %v24267_v57 }
 0xb1a   :  { %19838 = vmatmul.mubr.f32.vlgmr.msra.gmra.mrb[148].mxu0 %v23535_v50  ;;  %19871 = vmatmul.mubr.f32.vlgmr.msra.gmra.mrb[150].mxu1 %v23535_v50 }
 0xb1b   :  { %21215 = vmatpush3.bf16.msra.mxu0 %v22036_v48  ;;  %21233 = vmatpush3.bf16.msra.mxu1 %v22036_v48 }
 0xb1c   :  { %21216 = vmatprep.subr.bf16.mxu0 %v24267_v57  ;;  %21234 = vmatprep.subr.bf16.mxu1 %v24267_v57 }
 0xb1d   :  { %19859 = vmatprep.mubr.msk.f32.mxu0 %vm21835_vm0, %v24266_v46  ;;  %19892 = vmatprep.mubr.msk.f32.mxu1 %vm21835_vm0, %v24266_v46 }
 0xb1f   :  { %21218 = vmatpush3.bf16.msra.mxu0 %v22048_v53  ;;  %21236 = vmatpush3.bf16.msra.mxu1 %v22048_v53 }
 0xb20   :  { %21225 = vmatprep.subr.bf16.mxu0 %v24267_v57  ;;  %21243 = vmatprep.subr.bf16.mxu1 %v24267_v57 }
 0xb22   :  { %19860 = vmatmul.mubr.f32.vlgmr.msra.gmra.mrb[150].mxu0 %v23552_v40  ;;  %19893 = vmatmul.mubr.f32.vlgmr.msra.gmra.mrb[152].mxu1 %v23546_v52 }
 0xb23   :  { %21227 = vmatpush3.bf16.msra.mxu0 %v22066_v59  ;;  %21245 = vmatpush3.bf16.msra.mxu1 %v22036_v48 }
 0xb24   :  { %21228 = vmatprep.subr.bf16.mxu0 %v24267_v57  ;;  %21246 = vmatprep.subr.bf16.mxu1 %v24267_v57 }
 0xb25   :  { %19881 = vmatprep.mubr.msk.f32.mxu0 %vm21835_vm0, %v24266_v46  ;;  %19914 = vmatprep.mubr.msk.f32.mxu1 %vm21835_vm0, %v24266_v46 }
 0xb27   :  { %21230 = vmatpush3.bf16.msra.mxu0 %v22078_v3  ;;  %21248 = vmatpush3.bf16.msra.mxu1 %v22048_v53 }
 0xb28   :  { %21237 = vmatprep.subr.bf16.mxu0 %v24267_v57  ;;  %21255 = vmatprep.subr.bf16.mxu1 %v24267_v57 }
 0xb2a   :  { %19882 = vmatmul.mubr.f32.vlgmr.msra.gmra.mrb[152].mxu0 %v23538_v38  ;;  %19915 = vmatmul.mubr.f32.vlgmr.msra.gmra.mrb[154].mxu1 %v23535_v50 }
 0xb2b   :  { %21239 = vmatpush3.bf16.msra.mxu0 %v22086_v8  ;;  %21257 = vmatpush3.bf16.msra.mxu1 %v22140_v34 }
 0xb2c   :  { %21240 = vmatprep.subr.bf16.mxu0 %v24267_v57  ;;  %21258 = vmatprep.subr.bf16.mxu1 %v24267_v57 }
 0xb2d   :  { %19903 = vmatprep.mubr.msk.f32.mxu0 %vm21835_vm0, %v24266_v46  ;;  %19936 = vmatprep.mubr.msk.f32.mxu1 %vm21835_vm0, %v24266_v46 }
 0xb2f   :  { %21242 = vmatpush3.bf16.msra.mxu0 %v22098_v14  ;;  %21260 = vmatpush3.bf16.msra.mxu1 %v22152_v41 }
 0xb30   :  { %21249 = vmatprep.subr.bf16.mxu0 %v24267_v57  ;;  %21267 = vmatprep.subr.bf16.mxu1 %v24267_v57 }
 0xb32   :  { %19904 = vmatmul.mubr.f32.vlgmr.msra.gmra.mrb[154].mxu0 %v23535_v50  ;;  %19937 = vmatmul.mubr.f32.vlgmr.msra.gmra.mrb[156].mxu1 %v23535_v50 }
 0xb33   :  { %21251 = vmatpush3.bf16.msra.mxu0 %v22114_v20  ;;  %21269 = vmatpush3.bf16.msra.mxu1 %v22114_v20 }
 0xb34   :  { %21252 = vmatprep.subr.bf16.mxu0 %v24267_v57  ;;  %21270 = vmatprep.subr.bf16.mxu1 %v24267_v57 }
 0xb35   :  { %19925 = vmatprep.mubr.msk.f32.mxu0 %vm21835_vm0, %v24266_v46  ;;  %19958 = vmatprep.mubr.msk.f32.mxu1 %vm21835_vm0, %v24266_v46 }
 0xb37   :  { %21254 = vmatpush3.bf16.msra.mxu0 %v22126_v25  ;;  %21272 = vmatpush3.bf16.msra.mxu1 %v22126_v25 }
 0xb38   :  { %21261 = vmatprep.subr.bf16.mxu0 %v24267_v57  ;;  %21279 = vmatprep.subr.bf16.mxu1 %v24267_v57 }
 0xb3a   :  { %19926 = vmatmul.mubr.f32.vlgmr.msra.gmra.mrb[156].mxu0 %v23552_v40  ;;  %19959 = vmatmul.mubr.f32.vlgmr.msra.gmra.mrb[158].mxu1 %v23546_v52 }
 0xb3b   :  { %21263 = vmatpush3.bf16.msra.mxu0 %v22144_v35  ;;  %21281 = vmatpush3.bf16.msra.mxu1 %v22114_v20 }
 0xb3c   :  { %21264 = vmatprep.subr.bf16.mxu0 %v24267_v57  ;;  %21282 = vmatprep.subr.bf16.mxu1 %v24267_v57 }
 0xb3d   :  { %19947 = vmatprep.mubr.msk.f32.mxu0 %vm21835_vm0, %v24266_v46  ;;  %19980 = vmatprep.mubr.msk.f32.mxu1 %vm21835_vm0, %v24266_v46 }
 0xb3f   :  { %21266 = vmatpush3.bf16.msra.mxu0 %v22156_v42  ;;  %21284 = vmatpush3.bf16.msra.mxu1 %v22126_v25 }
 0xb40   :  { %21273 = vmatprep.subr.bf16.mxu0 %v24267_v57  ;;  %21291 = vmatprep.subr.bf16.mxu1 %v24267_v57 }
 0xb42   :  { %19948 = vmatmul.mubr.f32.vlgmr.msra.gmra.mrb[158].mxu0 %v23538_v38  ;;  %19981 = vmatmul.mubr.f32.vlgmr.msra.gmra.mrb[160].mxu1 %v23535_v50 }
 0xb43   :  { %21275 = vmatpush3.bf16.msra.mxu0 %v22164_v49  ;;  %21293 = vmatpush3.bf16.msra.mxu1 %v22202_v16 }
 0xb44   :  { %21276 = vmatprep.subr.bf16.mxu0 %v24267_v57  ;;  %21294 = vmatprep.subr.bf16.mxu1 %v24267_v57 }
 0xb45   :  { %19969 = vmatprep.mubr.msk.f32.mxu0 %vm21835_vm0, %v24266_v46  ;;  %20002 = vmatprep.mubr.msk.f32.mxu1 %vm21835_vm0, %v24266_v46 }
 0xb47   :  { %21278 = vmatpush3.bf16.msra.mxu0 %v22172_v55  ;;  %21296 = vmatpush3.bf16.msra.mxu1 %v22212_v21 }
 0xb48   :  { %21285 = vmatprep.subr.bf16.mxu0 %v24267_v57  ;;  %21303 = vmatprep.subr.bf16.mxu1 %v24267_v57 }
 0xb4a   :  { %19970 = vmatmul.mubr.f32.vlgmr.msra.gmra.mrb[160].mxu0 %v23535_v50  ;;  %20003 = vmatmul.mubr.f32.vlgmr.msra.gmra.mrb[162].mxu1 %v23535_v50 }
 0xb4b   :  { %21287 = vmatpush3.bf16.msra.mxu0 %v22182_v62  ;;  %21305 = vmatpush3.bf16.msra.mxu1 %v22182_v62 }
 0xb4c   :  { %21288 = vmatprep.subr.bf16.mxu0 %v24267_v57  ;;  %21306 = vmatprep.subr.bf16.mxu1 %v24267_v57 }
 0xb4d   :  { %19991 = vmatprep.mubr.msk.f32.mxu0 %vm21835_vm0, %v24266_v46  ;;  %20024 = vmatprep.mubr.msk.f32.mxu1 %vm21835_vm0, %v24266_v46 }
 0xb4f   :  { %21290 = vmatpush3.bf16.msra.mxu0 %v22190_v7  ;;  %21308 = vmatpush3.bf16.msra.mxu1 %v22190_v7 }
 0xb50   :  { %21297 = vmatprep.subr.bf16.mxu0 %v24267_v57  ;;  %21315 = vmatprep.subr.bf16.mxu1 %v24267_v57 }
 0xb52   :  { %19992 = vmatmul.mubr.f32.vlgmr.msra.gmra.mrb[162].mxu0 %v23552_v40  ;;  %20025 = vmatmul.mubr.f32.vlgmr.msra.gmra.mrb[164].mxu1 %v23546_v52 }
 0xb53   :  { %21299 = vmatpush3.bf16.msra.mxu0 %v22204_v17  ;;  %21317 = vmatpush3.bf16.msra.mxu1 %v22182_v62 }
 0xb54   :  { %21300 = vmatprep.subr.bf16.mxu0 %v24267_v57  ;;  %21318 = vmatprep.subr.bf16.mxu1 %v24267_v57 }
 0xb55   :  { %20013 = vmatprep.mubr.msk.f32.mxu0 %vm21835_vm0, %v24266_v46  ;;  %20046 = vmatprep.mubr.msk.f32.mxu1 %vm21835_vm0, %v24266_v46 }
 0xb57   :  { %21302 = vmatpush3.bf16.msra.mxu0 %v22214_v22  ;;  %21320 = vmatpush3.bf16.msra.mxu1 %v22190_v7 }
 0xb58   :  { %21309 = vmatprep.subr.bf16.mxu0 %v24267_v57  ;;  %21327 = vmatprep.subr.bf16.mxu1 %v24267_v57 }
 0xb5a   :  { %20014 = vmatmul.mubr.f32.vlgmr.msra.gmra.mrb[164].mxu0 %v23538_v38  ;;  %20047 = vmatmul.mubr.f32.vlgmr.msra.gmra.mrb[166].mxu1 %v23535_v50 }
 0xb5b   :  { %21311 = vmatpush3.bf16.msra.mxu0 %v22224_v23  ;;  %20035 = vmatprep.mubr.msk.f32.mxu0 %vm21835_vm0, %v24266_v46 }
 0xb5c   :  { %21312 = vmatprep.subr.bf16.mxu0 %v24267_v57  ;;  %21329 = vmatpush3.bf16.msra.mxu1 %v24289_v18 }
 0xb5d   :  { %21330 = vmatprep.subr.bf16.mxu1 %v24267_v57  ;;  %20068 = vmatprep.mubr.msk.f32.mxu1 %vm21835_vm0, %v24266_v46 }
 0xb5f   :  { %21314 = vmatpush3.bf16.msra.mxu0 %v24290_v51 }
 0xb60   :  { %21332 = vmatpush3.bf16.msra.mxu1 %v24291_v19  ;;  %21321 = vmatprep.subr.bf16.mxu0 %v24267_v57 }
 0xb61   :  { %21339 = vmatprep.subr.bf16.mxu1 %v24267_v57 }
 0xb62   :  { %20036 = vmatmul.mubr.f32.vlgmr.msra.gmra.mrb[166].mxu0 %v23535_v50 }
 0xb63   :  { %21323 = vmatpush3.bf16.msra.mxu0 %v21985_v10  ;;  %20057 = vmatprep.mubr.msk.f32.mxu0 %vm21835_vm0, %v24266_v46 }
 0xb64   :  { %21324 = vmatprep.subr.bf16.mxu0 %v24267_v57 }
 0xb67   :  { %21326 = vmatpush3.bf16.msra.mxu0 %v21988_v15 }
 0xb68   :  { %21333 = vmatprep.subr.bf16.mxu0 %v24267_v57 }
 0xb9a   :  { %v12678_v31 = vpop.xlane.xlu0 %12677 }
 0xb9b   :  { %12680 = vst.msk [vmem:[#allocation3 + $0x30] sm:$0xff] %vm121_vm2, %v12678_v31 }
 0xba2   :  { %v23720_v32 = vld [vmem:[#allocation3 + $0x30] sm:$0xff] }
 0xba3   :  { %24293 = vst [vmem:[#allocation26_spill] sm:$0xff] %v23720_v32  ;;  %v14682_v5 = vsel %vm121_vm2, %v23720_v32, -inf }
 0xba4   :  { %v23726_v28 = vmax.f32 %v14676_v56, %v14682_v5 }
 0xba6   :  { %24294 = vst [vmem:[#allocation27_spill] sm:$0xff] %v23726_v28  ;;  %v14685_v29 = vmax.f32 %v23726_v28, %v24295_v4 }
 0xba8   :  { %v14686_v45 = vmax.f32 %v24296_v54, %v14685_v29 }
 0xbaa   :  { %vm14687_vm9 = vcmp.ge.f32.partialorder %v24297_v61, %v14686_v45  ;;  %vm14688_vm10 = vcmp.ge.f32.partialorder %v24298_v6, %v14686_v45  ;;  %vm14689_vm11 = vcmp.ge.f32.partialorder %v23718_v30, %v14686_v45  ;;  %vm14690_vm12 = vcmp.ge.f32.partialorder %v24299_v9, %v14686_v45 }
 0xbab   :  { %vm14691_vm13 = vcmp.ge.f32.partialorder %v24300_v11, %v14686_v45  ;;  %vm14692_vm14 = vcmp.ge.f32.partialorder %v24301_v0, %v14686_v45  ;;  %vm14693_vm15 = vcmp.ge.f32.partialorder %v23720_v32, %v14686_v45  ;;  %v14694_v24 = vsel %vm14687_vm9, 0, %v21841_v63 }
 0xbac   :  { %v14695_v50 = vsel %vm14688_vm10, 1, %v21841_v63  ;;  %v14696_v38 = vsel %vm14689_vm11, 2, %v21841_v63  ;;  %v14698_v52 = vsel %vm14691_vm13, 4, %v21841_v63  ;;  %v14699_v37 = vsel %vm14692_vm14, 5, %v21841_v63 }
 0xbad   :  { %v14700_v40 = vsel %vm14693_vm15, 6, %v21841_v63  ;;  %v14701_v44 = vsel %vm121_vm2, %v14694_v24, 2147483647  ;;  %v14702_v60 = vsel %vm121_vm2, %v14695_v50, 2147483647  ;;  %v14697_v1 = vsel %vm14690_vm12, 3, %v21841_v63 }
 0xbae   :  { %v14703_v18 = vsel %vm121_vm2, %v14696_v38, 2147483647  ;;  %v14705_v19 = vsel %vm121_vm2, %v14698_v52, 2147483647  ;;  %v14708_v31 = vsel %vm121_vm2, %v14699_v37, 2147483647 }
 0xbaf   :  { %vm14706_vm3 = vcmp.lt.s32.totalorder %v14701_v44, %v14705_v19  ;;  %v14711_v56 = vsel %vm121_vm2, %v14700_v40, 2147483647  ;;  %vm14709_vm4 = vcmp.lt.s32.totalorder %v14702_v60, %v14708_v31  ;;  %v14704_v4 = vsel %vm121_vm2, %v14697_v1, 2147483647 }
 0xbb0   :  { %v14707_v5 = vsel %vm14706_vm3, %v14701_v44, %v14705_v19  ;;  %vm14712_vm5 = vcmp.lt.s32.totalorder %v14703_v18, %v14711_v56  ;;  %v14710_v29 = vsel %vm14709_vm4, %v14702_v60, %v14708_v31 }
 0xbb1   :  { %v14713_v54 = vsel %vm14712_vm5, %v14703_v18, %v14711_v56  ;;  %vm14714_vm6 = vcmp.lt.s32.totalorder %v14707_v5, %v14710_v29 }
 0xbb2   :  { %vm14716_vm7 = vcmp.lt.s32.totalorder %v14713_v54, %v14704_v4  ;;  %v14715_v45 = vsel %vm14714_vm6, %v14707_v5, %v14710_v29 }
 0xbb3   :  { %v14717_v24 = vsel %vm14716_vm7, %v14713_v54, %v14704_v4 }
 0xbb4   :  { %vm14718_vm8 = vcmp.lt.s32.totalorder %v14715_v45, %v14717_v24 }
 0xbb5   :  { %v14719_v50 = vsel %vm14718_vm8, %v14715_v45, %v14717_v24 }
 0xbb6   :  { %vm14720_vm9 = vcmp.eq.s32.totalorder %v14719_v50, 0  ;;  %vm14721_vm10 = vcmp.eq.s32.totalorder %v14719_v50, 1  ;;  %vm14722_vm11 = vcmp.eq.s32.totalorder %v14719_v50, 2  ;;  %vm14723_vm12 = vcmp.eq.s32.totalorder %v14719_v50, 3 }
 0xbb7   :  { %vm14724_vm13 = vcmp.eq.s32.totalorder %v14719_v50, 4  ;;  %vm14725_vm14 = vcmp.eq.s32.totalorder %v14719_v50, 5  ;;  %vm14726_vm15 = vcmp.eq.s32.totalorder %v14719_v50, 6  ;;  %v14727_v38 = vsel %vm14720_vm9, -1e+30, %v24297_v61 }
 0xbb8   :  { %v14728_v52 = vsel %vm14721_vm10, -1e+30, %v24298_v6  ;;  %v14729_v37 = vsel %vm14722_vm11, -1e+30, %v23718_v30  ;;  %v14731_v40 = vsel %vm14724_vm13, -1e+30, %v24300_v11 }
 0xbb9   :  { %v14732_v44 = vsel %vm14725_vm14, -1e+30, %v24301_v0  ;;  %v14733_v60 = vsel %vm14726_vm15, -1e+30, %v23720_v32  ;;  %v14730_v1 = vsel %vm14723_vm12, -1e+30, %v24299_v9 }
 0xbba   :  { %v14734_v18 = vsel %vm121_vm2, %v14727_v38, -inf  ;;  %v14735_v19 = vsel %vm121_vm2, %v14728_v52, -inf  ;;  %v14736_v31 = vsel %vm121_vm2, %v14729_v37, -inf  ;;  %v14738_v61 = vsel %vm121_vm2, %v14731_v40, -inf }
 0xbbb   :  { %v14740_v6 = vsel %vm121_vm2, %v14732_v44, -inf  ;;  %v14742_v56 = vsel %vm121_vm2, %v14733_v60, -inf  ;;  %v14739_v5 = vmax.f32 %v14734_v18, %v14738_v61  ;;  %v14737_v0 = vsel %vm121_vm2, %v14730_v1, -inf }
 0xbbc   :  { %v14741_v11 = vmax.f32 %v14735_v19, %v14740_v6  ;;  %v14743_v4 = vmax.f32 %v14736_v31, %v14742_v56 }
 0xbbe   :  { %v14744_v29 = vmax.f32 %v14739_v5, %v14741_v11  ;;  %v14745_v54 = vmax.f32 %v14743_v4, %v14737_v0 }
 0xbc0   :  { %v14746_v9 = vmax.f32 %v14744_v29, %v14745_v54 }
 0xbc2   :  { %vm14747_vm3 = vcmp.ge.f32.partialorder %v14727_v38, %v14746_v9  ;;  %vm14748_vm4 = vcmp.ge.f32.partialorder %v14728_v52, %v14746_v9  ;;  %vm14749_vm5 = vcmp.ge.f32.partialorder %v14729_v37, %v14746_v9  ;;  %vm14750_vm6 = vcmp.ge.f32.partialorder %v14730_v1, %v14746_v9 }
 0xbc3   :  { %vm14751_vm7 = vcmp.ge.f32.partialorder %v14731_v40, %v14746_v9  ;;  %vm14752_vm8 = vcmp.ge.f32.partialorder %v14732_v44, %v14746_v9  ;;  %vm14753_vm9 = vcmp.ge.f32.partialorder %v14733_v60, %v14746_v9  ;;  %v14754_v45 = vsel %vm14747_vm3, 0, %v21841_v63 }
 0xbc4   :  { %v14755_v24 = vsel %vm14748_vm4, 1, %v21841_v63  ;;  %v14756_v50 = vsel %vm14749_vm5, 2, %v21841_v63  ;;  %v14758_v18 = vsel %vm14751_vm7, 4, %v21841_v63  ;;  %v14759_v19 = vsel %vm14752_vm8, 5, %v21841_v63 }
 0xbc5   :  { %v14760_v31 = vsel %vm14753_vm9, 6, %v21841_v63  ;;  %v14761_v61 = vsel %vm121_vm2, %v14754_v45, 2147483647  ;;  %v14762_v6 = vsel %vm121_vm2, %v14755_v24, 2147483647  ;;  %v14757_v56 = vsel %vm14750_vm6, 3, %v21841_v63 }
 0xbc6   :  { %v14763_v5 = vsel %vm121_vm2, %v14756_v50, 2147483647  ;;  %v14765_v11 = vsel %vm121_vm2, %v14758_v18, 2147483647  ;;  %v14768_v4 = vsel %vm121_vm2, %v14759_v19, 2147483647 }
 0xbc7   :  { %vm14766_vm10 = vcmp.lt.s32.totalorder %v14761_v61, %v14765_v11  ;;  %v14771_v0 = vsel %vm121_vm2, %v14760_v31, 2147483647  ;;  %vm14769_vm11 = vcmp.lt.s32.totalorder %v14762_v6, %v14768_v4  ;;  %v14764_v54 = vsel %vm121_vm2, %v14757_v56, 2147483647 }
 0xbc8   :  { %v14767_v29 = vsel %vm14766_vm10, %v14761_v61, %v14765_v11  ;;  %vm14772_vm12 = vcmp.lt.s32.totalorder %v14763_v5, %v14771_v0  ;;  %v14770_v9 = vsel %vm14769_vm11, %v14762_v6, %v14768_v4 }
 0xbc9   :  { %v14773_v45 = vsel %vm14772_vm12, %v14763_v5, %v14771_v0  ;;  %vm14774_vm13 = vcmp.lt.s32.totalorder %v14767_v29, %v14770_v9 }
 0xbca   :  { %vm14776_vm14 = vcmp.lt.s32.totalorder %v14773_v45, %v14764_v54  ;;  %v14775_v24 = vsel %vm14774_vm13, %v14767_v29, %v14770_v9 }
 0xbcb   :  { %v14777_v63 = vsel %vm14776_vm14, %v14773_v45, %v14764_v54 }
 0xbcc   :  { %vm14778_vm15 = vcmp.lt.s32.totalorder %v14775_v24, %v14777_v63 }
 0xbcd   :  { %v14779_v50 = vsel %vm14778_vm15, %v14775_v24, %v14777_v63 }
 0xbce   :  { %vm14780_vm3 = vcmp.eq.s32.totalorder %v14779_v50, 0  ;;  %vm14781_vm4 = vcmp.eq.s32.totalorder %v14779_v50, 1  ;;  %vm14782_vm5 = vcmp.eq.s32.totalorder %v14779_v50, 2  ;;  %vm14783_vm6 = vcmp.eq.s32.totalorder %v14779_v50, 3 }
 0xbcf   :  { %vm14784_vm7 = vcmp.eq.s32.totalorder %v14779_v50, 4  ;;  %vm14785_vm8 = vcmp.eq.s32.totalorder %v14779_v50, 5  ;;  %vm14786_vm9 = vcmp.eq.s32.totalorder %v14779_v50, 6  ;;  %v14787_v18 = vsel %vm14780_vm3, -1e+30, %v14727_v38  ;;  %v21653_v50 = vld [vmem:[#allocation3] sm:$0xff] }
 0xbd0   :  { %v14788_v19 = vsel %vm14781_vm4, -1e+30, %v14728_v52  ;;  %v14789_v31 = vsel %vm14782_vm5, -1e+30, %v14729_v37  ;;  %v14791_v61 = vsel %vm14784_vm7, -1e+30, %v14731_v40 }
 0xbd1   :  { %v14792_v56 = vsel %vm14785_vm8, -1e+30, %v14732_v44  ;;  %v14793_v6 = vsel %vm14786_vm9, -1e+30, %v14733_v60  ;;  %v14790_v5 = vsel %vm14783_vm6, -1e+30, %v14730_v1 }
 0xbd2   :  { %v14794_v11 = vsel %vm121_vm2, %v14787_v18, -inf  ;;  %v14795_v4 = vsel %vm121_vm2, %v14788_v19, -inf  ;;  %v14796_v0 = vsel %vm121_vm2, %v14789_v31, -inf  ;;  %v14798_v29 = vsel %vm121_vm2, %v14791_v61, -inf  ;;  %v23787_v19 = vld [vmem:[#allocation3 + $0x8] sm:$0xff] }
 0xbd3   :  { %v14800_v54 = vsel %vm121_vm2, %v14792_v56, -inf  ;;  %v14802_v9 = vsel %vm121_vm2, %v14793_v6, -inf  ;;  %v14799_v45 = vmax.f32 %v14794_v11, %v14798_v29  ;;  %v14797_v40 = vsel %vm121_vm2, %v14790_v5, -inf  ;;  %24302 = vst [vmem:[#allocation28_spill] sm:$0xff] %v23787_v19  ;;  %v21655_v56 = vld [vmem:[#allocation3 + $0x18] sm:$0xff] }
 0xbd4   :  { %v14801_v38 = vmax.f32 %v14795_v4, %v14800_v54  ;;  %v14803_v52 = vmax.f32 %v14796_v0, %v14802_v9  ;;  %v23791_v0 = vld [vmem:[#allocation3 + $0x20] sm:$0xff] }
 0xbd5   :  { %v12852_v37 = vpop.f32.mrb[144].mxu1  ;;  %24303 = vst [vmem:[#allocation21_spill] sm:$0xff] %v23791_v0 }
 0xbd6   :  { %v19806_v44 = vpop.f32.mrb[145].mxu1  ;;  %v14804_v60 = vmax.f32 %v14799_v45, %v14801_v38  ;;  %v14805_v1 = vmax.f32 %v14803_v52, %v14797_v40  ;;  %v21657_v40 = vld [vmem:[#allocation3 + $0x28] sm:$0xff] }
 0xbd8   :  { %v14806_v24 = vmax.f32 %v14804_v60, %v14805_v1 }
 0xbda   :  { %v14807_v63 = vadd.f32 1e-07, %v14806_v24 }
 0xbdc   :  { %v14808_v18 = vsub.f32 %v21653_v50, %v14807_v63  ;;  %v14809_v31 = vsub.f32 %v23787_v19, %v14807_v63  ;;  %v14810_v61 = vsub.f32 %v23718_v30, %v14807_v63  ;;  %v14811_v6 = vsub.f32 %v21655_v56, %v14807_v63 }
 0xbdd   :  { %v13009_v11 = vpop.f32.mrb[146].mxu1  ;;  %v12761_v4 = vpop.f32.mrb[144].mxu0  ;;  %v14812_v5 = vsub.f32 %v23791_v0, %v14807_v63  ;;  %v14813_v44 = vsub.f32 %v21657_v40, %v14807_v63  ;;  %v14814_v56 = vsub.f32 %v23720_v32, %v14807_v63 }
 0xbde   :  { %v12853_v29 = vadd.f32 %v12852_v37, %v12761_v4  ;;  %v19828_v54 = vpop.f32.mrb[147].mxu1  ;;  %v19795_v9 = vpop.f32.mrb[145].mxu0  ;;  %v14815_v45 = vmax.f32 %v14808_v18, 0.0  ;;  %v14816_v38 = vmax.f32 %v14809_v31, 0.0  ;;  %v14817_v52 = vmax.f32 %v14810_v61, 0.0 }
 0xbdf   :  { %v14818_v60 = vmax.f32 %v14811_v6, 0.0  ;;  %v14819_v30 = vmax.f32 %v14812_v5, 0.0  ;;  %v14820_v37 = vmax.f32 %v14813_v44, 0.0  ;;  %v14821_v40 = vmax.f32 %v14814_v56, 0.0 }
 0xbe0   :  { %v14822_v1 = vsel %vm121_vm2, %v14815_v45, 0.0  ;;  %v14823_v24 = vsel %vm121_vm2, %v14816_v38, 0.0  ;;  %v14825_v19 = vsel %vm121_vm2, %v14817_v52, 0.0 }
 0xbe1   :  { %v14824_v50 = vadd.f32 %v14823_v24, %v14822_v1  ;;  %v14827_v4 = vsel %vm121_vm2, %v14818_v60, 0.0  ;;  %v14829_v28 = vsel %vm121_vm2, %v14819_v30, 0.0  ;;  %v14831_v63 = vsel %vm121_vm2, %v14820_v37, 0.0 }
 0xbe2   :  { %v14833_v24 = vsel %vm121_vm2, %v14821_v40, 0.0 }
 0xbe3   :  { %v14826_v0 = vadd.f32 %v14825_v19, %v14824_v50 }
 0xbe5   :  { %v12932_v18 = vpop.f32.mrb[146].mxu0  ;;  %v13167_v31 = vpop.f32.mrb[148].mxu1  ;;  %v14828_v61 = vadd.f32 %v14827_v4, %v14826_v0 }
 0xbe6   :  { %v12933_v54 = vadd.f32 %v12932_v18, %v12853_v29  ;;  %v19817_v9 = vpop.f32.mrb[147].mxu0  ;;  %v19850_v6 = vpop.f32.mrb[149].mxu1 }
 0xbe7   :  { %v14830_v51 = vadd.f32 %v14829_v28, %v14828_v61 }
 0xbe8   :  { %v13010_v1 = vadd.f32 %v13009_v11, %v12933_v54 }
 0xbe9   :  { %v14832_v5 = vadd.f32 %v14831_v63, %v14830_v51 }
 0xbeb   :  { %v14834_v19 = vadd.f32 %v14833_v24, %v14832_v5 }
 0xbed   :  { %v13092_v44 = vpop.f32.mrb[148].mxu0  ;;  %v13346_v50 = vpop.f32.mrb[150].mxu1  ;;  %v14835_v32 = vadd.f32 1e-07, %v14834_v19 }
 0xbee   :  { %v13093_v23 = vadd.f32 %v13092_v44, %v13010_v1  ;;  %v19839_v22 = vpop.f32.mrb[149].mxu0  ;;  %v19872_v0 = vpop.f32.mrb[151].mxu1 }
 0xbef   :  { %21605 = vrcp.f32 %v14835_v32 }
 0xbf0   :  { %v13168_v29 = vadd.f32 %v13167_v31, %v13093_v23 }
 0xbf5   :  { %v13503_v4 = vpop.f32.mrb[152].mxu1  ;;  %v13255_v56 = vpop.f32.mrb[150].mxu0 }
 0xbf6   :  { %v13347_v18 = vadd.f32 %v13346_v50, %v13255_v56  ;;  %v19861_v9 = vpop.f32.mrb[151].mxu0  ;;  %v19894_v28 = vpop.f32.mrb[153].mxu1 }
 0xbf9   :  { %v21606_v11 = vpop.eup %21605 }
 0xbfa   :  { %v14842_v61 = vmul.f32 %v21606_v11, %v14820_v37  ;;  %v14837_v54 = vmul.f32 %v21606_v11, %v14815_v45  ;;  %v14838_v63 = vmul.f32 %v21606_v11, %v14816_v38  ;;  %v14839_v32 = vmul.f32 %v21606_v11, %v14817_v52  ;;  %v12682_v37 = vld [vmem:[#allocation4 + $0x30] sm:$0xff] }
 0xbfb   :  { %v14840_v19 = vmul.f32 %v21606_v11, %v14818_v60  ;;  %v13179_v45 = vld [vmem:[#allocation7 + $0x30] sm:$0xff]  ;;  %v13171_v9 = vadd.f32 %v13168_v29, %v12682_v37  ;;  %v14841_v28 = vmul.f32 %v21606_v11, %v14819_v30  ;;  %v14843_v52 = vmul.f32 %v21606_v11, %v14821_v40 }
 0xbfc   :  { %14871 = vperm.xlu0 %21483, %v14842_v61   ;;  %14846 = vperm.xlu1 %21484, %v14837_v54  }
 0xbfd   :  { %v13661_v51 = vpop.f32.mrb[154].mxu1  ;;  %v13426_v6 = vpop.f32.mrb[152].mxu0 }
 0xbfe   :  { %v13427_v5 = vadd.f32 %v13426_v6, %v13347_v18  ;;  %v19883_v24 = vpop.f32.mrb[153].mxu0  ;;  %v19916_v1 = vpop.f32.mrb[155].mxu1 }
 0xc00   :  { %14851 = vperm.xlu1 %21484, %v14838_v63   ;;  %v13504_v22 = vadd.f32 %v13503_v4, %v13427_v5  ;;  %v17235_v4 = vmul.f32 -1.442695, %v13171_v9 }
 0xc04   :  { %14856 = vperm.xlu1 %21484, %v14839_v32  }
 0xc05   :  { %v13840_v23 = vpop.f32.mrb[156].mxu1  ;;  %v13586_v31 = vpop.f32.mrb[154].mxu0 }
 0xc06   :  { %v13587_v44 = vadd.f32 %v13586_v31, %v13504_v22  ;;  %v19905_v50 = vpop.f32.mrb[155].mxu0  ;;  %v19938_v0 = vpop.f32.mrb[157].mxu1 }
 0xc08   :  { %14861 = vperm.xlu1 %21484, %v14840_v19   ;;  %v13662_v56 = vadd.f32 %v13661_v51, %v13587_v44 }
 0xc0a   :  { %v13665_v38 = vadd.f32 %v13662_v56, %v13179_v45 }
 0xc0c   :  { %14866 = vperm.xlu1 %21484, %v14841_v28   ;;  %v17236_v18 = vmul.f32 -1.442695, %v13665_v38 }
 0xc0d   :  { %v13749_v61 = vpop.f32.mrb[156].mxu0  ;;  %v13997_v54 = vpop.f32.mrb[158].mxu1 }
 0xc0e   :  { %v13841_v6 = vadd.f32 %v13840_v23, %v13749_v61  ;;  %v19927_v63 = vpop.f32.mrb[157].mxu0  ;;  %v19960_v5 = vpop.f32.mrb[159].mxu1  ;;  %21607 = vpow2.f32 %v17236_v18  ;;  %v13673_v23 = vld [vmem:[#allocation9 + $0x30] sm:$0xff] }
 0xc0f   :  { %21609 = vpow2.f32 %v17235_v4 }
 0xc10   :  { %14876 = vperm.xlu1 %21484, %v14843_v52  }
 0xc15   :  { %v13920_v60 = vpop.f32.mrb[158].mxu0  ;;  %v14155_v24 = vpop.f32.mrb[160].mxu1 }
 0xc16   :  { %v13921_v1 = vadd.f32 %v13920_v60, %v13841_v6  ;;  %v19949_v22 = vpop.f32.mrb[159].mxu0  ;;  %v19982_v51 = vpop.f32.mrb[161].mxu1 }
 0xc18   :  { %v13998_v29 = vadd.f32 %v13997_v54, %v13921_v1  ;;  %v21608_v30 = vpop.eup %21607 }
 0xc19   :  { %v21610_v32 = vpop.eup %21609  ;;  %v13669_v44 = vadd.f32 1.0, %v21608_v30 }
 0xc1a   :  { %v13175_v11 = vadd.f32 1.0, %v21610_v32 }
 0xc1b   :  { %21611 = vrcp.f32 %v13669_v44 }
 0xc1c   :  { %21613 = vrcp.f32 %v13175_v11 }
 0xc1d   :  { %v14080_v31 = vpop.f32.mrb[160].mxu0  ;;  %v14329_v19 = vpop.f32.mrb[162].mxu1 }
 0xc1e   :  { %v14081_v50 = vadd.f32 %v14080_v31, %v13998_v29  ;;  %v19971_v0 = vpop.f32.mrb[161].mxu0  ;;  %v20004_v40 = vpop.f32.mrb[163].mxu1 }
 0xc20   :  { %v14156_v37 = vadd.f32 %v14155_v24, %v14081_v50 }
 0xc22   :  { %v14159_v45 = vadd.f32 %v14156_v37, %v13673_v23 }
 0xc24   :  { %21615 = vtanh.f32 %v14159_v45  ;;  %v23806_v45 = vld [vmem:[#allocation2 + $0x10] sm:$0xff] }
 0xc25   :  { %v14238_v56 = vpop.f32.mrb[162].mxu0  ;;  %v14486_v9 = vpop.f32.mrb[164].mxu1 }
 0xc26   :  { %v14330_v28 = vadd.f32 %v14329_v19, %v14238_v56  ;;  %v19993_v38 = vpop.f32.mrb[163].mxu0  ;;  %v20026_v18 = vpop.f32.mrb[165].mxu1  ;;  %v14162_v19 = vld [vmem:[#allocation10 + $0x30] sm:$0xff] }
 0xc27   :  { %v21612_v61 = vpop.eup %21611 }
 0xc28   :  { %v21614_v54 = vpop.eup %21613  ;;  %v14655_v1 = vmul.f32 %v21612_v61, %v23508_v27 }
 0xc2d   :  { %v14409_v4 = vpop.f32.mrb[164].mxu0  ;;  %v14644_v52 = vpop.f32.mrb[166].mxu1 }
 0xc2e   :  { %v21616_v6 = vpop.eup %21615  ;;  %v14410_v63 = vadd.f32 %v14409_v4, %v14330_v28  ;;  %v20015_v5 = vpop.f32.mrb[165].mxu0 }
 0xc2f   :  { %v20048_v60 = vpop.f32.mrb[167].mxu1  ;;  %v14656_v24 = vmul.f32 %v21616_v6, %v21614_v54 }
 0xc30   :  { %v14487_v22 = vadd.f32 %v14486_v9, %v14410_v63 }
 0xc31   :  { %v23803_v51 = vadd.f32 %v14656_v24, %v14655_v1 }
 0xc35   :  { %v14569_v29 = vpop.f32.mrb[166].mxu0 }
 0xc36   :  { %v14570_v30 = vadd.f32 %v14569_v29, %v14487_v22  ;;  %v20037_v32 = vpop.f32.mrb[167].mxu0 }
 0xc38   :  { %v14645_v31 = vadd.f32 %v14644_v52, %v14570_v30 }
 0xc3a   :  { %v14648_v44 = vadd.f32 %v14645_v31, %v14162_v19 }
 0xc3c   :  { %v17237_v50 = vmul.f32 -1.442695, %v14648_v44 }
 0xc3e   :  { %21617 = vpow2.f32 %v17237_v50 }
 0xc48   :  { %v21618_v40 = vpop.eup %21617 }
 0xc49   :  { %v14652_v23 = vadd.f32 1.0, %v21618_v40 }
 0xc4b   :  { %21619 = vrcp.f32 %v14652_v23 }
 0xc4c   :  { %21621 = vtanh.f32 %v23803_v51 }
 0xc55   :  { %v21620_v30 = vpop.eup %21619 }
 0xc56   :  { %v21622_v44 = vpop.eup %21621 }
 0xc7b   :  { %v14847_v0 = vpop.permute.xlu1 %14846 }
 0xc7c   :  { %v14879_v56 = vmul.f32 %v14847_v0, %v23510_v13  ;;  %v23816_v13 = vld [vmem:[#allocation2 + $0x20] sm:$0xff]  ;;  %v14659_v0 = vmul.f32 %v21622_v44, %v21620_v30 }
 0xc7e   :  { %v14886_v18 = vsel %vm24260_vm1, %v14879_v56, 0.0 }
 0xc7f   :  { %v14852_v11 = vpop.permute.xlu1 %14851 }
 0xc80   :  { %v14880_v37 = vmul.f32 %v14852_v11, %v23512_v12  ;;  %v14872_v12 = vpop.permute.xlu0 %14871 }
 0xc81   :  { %v14884_v5 = vmul.f32 %v14872_v12, %v23525_v36 }
 0xc82   :  { %v14887_v28 = vsel %vm24260_vm1, %v14880_v37, 0.0 }
 0xc83   :  { %v14857_v27 = vpop.permute.xlu1 %14856  ;;  %v14888_v4 = vadd.f32 %v14887_v28, %v14886_v18  ;;  %v14895_v32 = vsel %vm24260_vm1, %v14884_v5, 0.0 }
 0xc84   :  { %v14881_v9 = vmul.f32 %v14857_v27, %v23806_v45 }
 0xc86   :  { %v14889_v61 = vsel %vm24260_vm1, %v14881_v9, 0.0 }
 0xc87   :  { %v14862_v38 = vpop.permute.xlu1 %14861  ;;  %v14890_v6 = vadd.f32 %v14889_v61, %v14888_v4 }
 0xc88   :  { %v14882_v54 = vmul.f32 %v14862_v38, %v23519_v47  ;;  %v23821_v47 = vld [vmem:[#allocation2 + $0x30] sm:$0xff]  ;;  %v23854_v38 = vld [vmem:[%s24218_s6] ss:$0 sm:$0xff]  ;;  %s21843_s6 = smov [#allocation13]  }
 0xc89   :  { %s17185_s0 = sshll.u32 %s21843_s6, 4  ;;  %s17186_s0 = int_to_ptr.vmem [resolvable:$true] %s17185_s0 }
 0xc8a   :  { %v14891_v52 = vsel %vm24260_vm1, %v14882_v54, 0.0  ;;  %s21773_s11 = scalar_lea.vmem %s17186_s0, 1024  ;;  %p21778_p13 = scmp.lt.s32.totalorder %s17186_s0, %s17186_s0 }
 0xc8b   :  { %v14867_v63 = vpop.permute.xlu1 %14866  ;;  %v14892_v1 = vadd.f32 %v14891_v52, %v14890_v6  ;;  %p21774_p12 = scmp.ne.s32.totalorder %s17186_s0, %s21773_s11  ;;  %p21779_p0 = scmp.lt.s32.totalorder %s21773_s11, %s21773_s11 }
 0xc8c   :  { %v14883_v60 = vmul.f32 %v14867_v63, %v23816_v13 }
 0xc8d   :  { %p21780_p1 = por %p21779_p0, %p21778_p13 }
 0xc8e   :  { %v14893_v24 = vsel %vm24260_vm1, %v14883_v60, 0.0 }
 0xc8f   :  { %v14894_v22 = vadd.f32 %v14893_v24, %v14892_v1  ;;  %v14877_v29 = vpop.permute.xlu1 %14876  ;;  %p21781_p2 = pnand %p21780_p1, %p21774_p12 }
 0xc90   :  { %v14885_v31 = vmul.f32 %v14877_v29, %v23821_v47 }
 0xc91   :  { %v14896_v19 = vadd.f32 %v14895_v32, %v14894_v22 }
 0xc92   :  { %v14897_v50 = vsel %vm24260_vm1, %v14885_v31, 0.0 }
 0xc93   :  { %v14898_v36 = vadd.f32 %v14897_v50, %v14896_v19 }
 0xc95   :  { %v14899_v40 = vadd.f32 %v14898_v36, %v14659_v0  ;;  %14903 = vst.msk [vmem:[#allocation14 + $0x30] sm:$0xff] %vm24260_vm1, %v14898_v36 }
 0xc97   :  { %14901 = vst.msk [vmem:[#allocation13 + $0x30] sm:$0xff] %vm24260_vm1, %v14899_v40  ;;  %14905 = vst.msk [vmem:[#allocation2 + $0x38] sm:$0xff] %vm24260_vm1, %v14899_v40  ;;  %v14916_v11 = vsel %vm24260_vm1, %v14899_v40, 0  ;;  %21623 = vtanh.f32 %v14899_v40  ;;  %v24060_v40 = vld [vmem:[#allocation3 + $0x30] sm:$0xff] }
 0xc98   :  { %v23830_v23 = vand.u32 4294901760, %v14916_v11 }
 0xc9a   :  { %v23833_v37 = vsub.f32 %v14916_v11, %v23830_v23  ;;  %20069 = vmatmul.mubr.f32.vlgmr.msra.gmra.mrb[168].mxu1 %v23830_v23 }
 0xc9b   :  { %21341 = vmatpush3.bf16.msra.mxu1 %v21985_v10  ;;  %20090 = vmatprep.mubr.msk.f32.mxu1 %vm21835_vm0, %v24266_v46 }
 0xc9c   :  { %21342 = vmatprep.subr.bf16.mxu1 %v24267_v57  ;;  %v23841_v27 = vand.u32 4294901760, %v23833_v37 }
 0xc9e   :  { %v14990_v56 = vsub.f32 %v23833_v37, %v23841_v27 }
 0xc9f   :  { %21344 = vmatpush3.bf16.msra.mxu1 %v21988_v15 }
 0xca0   :  { %21351 = vmatprep.subr.bf16.mxu1 %v24267_v57  ;;  %v23847_v9 = vand.u32 4294901760, %v14990_v56 }
 0xca1   :  { %v21624_v28 = vpop.eup %21623 }
 0xca2   :  { %20091 = vmatmul.mubr.f32.vlgmr.msra.gmra.mrb[170].mxu1 %v23841_v27  ;;  %20058 = vmatmul.mubr.f32.vlgmr.msra.gmra.mrb[168].mxu0 %v23847_v9  ;;  %v14907_v18 = vmul.f32 %v23854_v38, %v21624_v28 }
 0xca3   :  { %21335 = vmatpush3.bf16.msra.mxu0 %v21992_v26  ;;  %21353 = vmatpush3.bf16.msra.mxu1 %v21985_v10  ;;  %v24304_v10 = vld [vmem:[#allocation23_spill] sm:$0xff]  ;;  %v24306_v26 = vld [vmem:[#allocation25_spill] sm:$0xff] }
 0xca4   :  { %21336 = vmatprep.subr.bf16.mxu0 %v24267_v57  ;;  %21354 = vmatprep.subr.bf16.mxu1 %v24267_v57  ;;  %v14908_v61 = vsel %vm24260_vm1, %v14907_v18, 0.0 }
 0xca5   :  { %14909 = vadd.xlane.f32.xlu1 %v14908_v61  ;;  %20079 = vmatprep.mubr.msk.f32.mxu0 %vm21835_vm0, %v24266_v46 }
 0xca6   :  { %20112 = vmatprep.mubr.msk.f32.mxu1 %vm21835_vm0, %v24266_v46 }
 0xca7   :  { %21338 = vmatpush3.bf16.msra.mxu0 %v22002_v33  ;;  %21356 = vmatpush3.bf16.msra.mxu1 %v21988_v15  ;;  %v24305_v15 = vld [vmem:[#allocation24_spill] sm:$0xff] }
 0xca8   :  { %21345 = vmatprep.subr.bf16.mxu0 %v24267_v57  ;;  %21363 = vmatprep.subr.bf16.mxu1 %v24267_v57 }
 0xcaa   :  { %20080 = vmatmul.mubr.f32.vlgmr.msra.gmra.mrb[170].mxu0 %v23833_v37  ;;  %20113 = vmatmul.mubr.f32.vlgmr.msra.gmra.mrb[172].mxu1 %v23830_v23 }
 0xcab   :  { %21347 = vmatpush3.bf16.msra.mxu0 %v22010_v39  ;;  %21365 = vmatpush3.bf16.msra.mxu1 %v22062_v58  ;;  %v24004_v39 = vld [vmem:[#allocation3 + $0x18] sm:$0xff] }
 0xcac   :  { %21348 = vmatprep.subr.bf16.mxu0 %v24267_v57  ;;  %21366 = vmatprep.subr.bf16.mxu1 %v24267_v57 }
 0xcad   :  { %20101 = vmatprep.mubr.msk.f32.mxu0 %vm21835_vm0, %v24266_v46  ;;  %20134 = vmatprep.mubr.msk.f32.mxu1 %vm21835_vm0, %v24266_v46 }
 0xcaf   :  { %21350 = vmatpush3.bf16.msra.mxu0 %v22020_v43  ;;  %21368 = vmatpush3.bf16.msra.mxu1 %v22074_v2 }
 0xcb0   :  { %21357 = vmatprep.subr.bf16.mxu0 %v24267_v57  ;;  %21375 = vmatprep.subr.bf16.mxu1 %v24267_v57 }
 0xcb2   :  { %20102 = vmatmul.mubr.f32.vlgmr.msra.gmra.mrb[172].mxu0 %v23830_v23  ;;  %20135 = vmatmul.mubr.f32.vlgmr.msra.gmra.mrb[174].mxu1 %v23830_v23 }
 0xcb3   :  { %21359 = vmatpush3.bf16.msra.mxu0 %v22036_v48  ;;  %21377 = vmatpush3.bf16.msra.mxu1 %v22036_v48 }
 0xcb4   :  { %21360 = vmatprep.subr.bf16.mxu0 %v24267_v57  ;;  %21378 = vmatprep.subr.bf16.mxu1 %v24267_v57 }
 0xcb5   :  { %20123 = vmatprep.mubr.msk.f32.mxu0 %vm21835_vm0, %v24266_v46  ;;  %20156 = vmatprep.mubr.msk.f32.mxu1 %vm21835_vm0, %v24266_v46 }
 0xcb7   :  { %21362 = vmatpush3.bf16.msra.mxu0 %v22048_v53  ;;  %21380 = vmatpush3.bf16.msra.mxu1 %v22048_v53 }
 0xcb8   :  { %21369 = vmatprep.subr.bf16.mxu0 %v24267_v57  ;;  %21387 = vmatprep.subr.bf16.mxu1 %v24267_v57 }
 0xcba   :  { %20124 = vmatmul.mubr.f32.vlgmr.msra.gmra.mrb[174].mxu0 %v23847_v9  ;;  %20157 = vmatmul.mubr.f32.vlgmr.msra.gmra.mrb[176].mxu1 %v23841_v27 }
 0xcbb   :  { %21371 = vmatpush3.bf16.msra.mxu0 %v22066_v59  ;;  %21389 = vmatpush3.bf16.msra.mxu1 %v22036_v48  ;;  %v16911_v48 = vsel %vm121_vm2, %v24004_v39, -inf  ;;  %v24307_v59 = vld [vmem:[#allocation27_spill] sm:$0xff] }
 0xcbc   :  { %21372 = vmatprep.subr.bf16.mxu0 %v24267_v57  ;;  %21390 = vmatprep.subr.bf16.mxu1 %v24267_v57 }
 0xcbd   :  { %20145 = vmatprep.mubr.msk.f32.mxu0 %vm21835_vm0, %v24266_v46  ;;  %20178 = vmatprep.mubr.msk.f32.mxu1 %vm21835_vm0, %v24266_v46 }
 0xcbf   :  { %21374 = vmatpush3.bf16.msra.mxu0 %v22078_v3  ;;  %21392 = vmatpush3.bf16.msra.mxu1 %v22048_v53  ;;  %v24308_v3 = vld [vmem:[#allocation30_spill] sm:$0xff] }
 0xcc0   :  { %21381 = vmatprep.subr.bf16.mxu0 %v24267_v57  ;;  %21399 = vmatprep.subr.bf16.mxu1 %v24267_v57 }
 0xcc2   :  { %20146 = vmatmul.mubr.f32.vlgmr.msra.gmra.mrb[176].mxu0 %v23833_v37  ;;  %20179 = vmatmul.mubr.f32.vlgmr.msra.gmra.mrb[178].mxu1 %v23830_v23 }
 0xcc3   :  { %21383 = vmatpush3.bf16.msra.mxu0 %v22086_v8  ;;  %21401 = vmatpush3.bf16.msra.mxu1 %v22140_v34  ;;  %v24311_v34 = vld [vmem:[#allocation21_spill] sm:$0xff] }
 0xcc4   :  { %21384 = vmatprep.subr.bf16.mxu0 %v24267_v57  ;;  %21402 = vmatprep.subr.bf16.mxu1 %v24267_v57 }
 0xcc5   :  { %20167 = vmatprep.mubr.msk.f32.mxu0 %vm21835_vm0, %v24266_v46  ;;  %20200 = vmatprep.mubr.msk.f32.mxu1 %vm21835_vm0, %v24266_v46 }
 0xcc7   :  { %21386 = vmatpush3.bf16.msra.mxu0 %v22098_v14  ;;  %21404 = vmatpush3.bf16.msra.mxu1 %v22152_v41  ;;  %v24014_v14 = vld [vmem:[#allocation3] sm:$0xff]  ;;  %v24312_v41 = vld [vmem:[#allocation26_spill] sm:$0xff] }
 0xcc8   :  { %21393 = vmatprep.subr.bf16.mxu0 %v24267_v57  ;;  %21411 = vmatprep.subr.bf16.mxu1 %v24267_v57 }
 0xcca   :  { %20168 = vmatmul.mubr.f32.vlgmr.msra.gmra.mrb[178].mxu0 %v23830_v23  ;;  %20201 = vmatmul.mubr.f32.vlgmr.msra.gmra.mrb[180].mxu1 %v23830_v23 }
 0xccb   :  { %21395 = vmatpush3.bf16.msra.mxu0 %v22114_v20  ;;  %21413 = vmatpush3.bf16.msra.mxu1 %v22114_v20 }
 0xccc   :  { %21396 = vmatprep.subr.bf16.mxu0 %v24267_v57  ;;  %21414 = vmatprep.subr.bf16.mxu1 %v24267_v57 }
 0xccd   :  { %20189 = vmatprep.mubr.msk.f32.mxu0 %vm21835_vm0, %v24266_v46  ;;  %20222 = vmatprep.mubr.msk.f32.mxu1 %vm21835_vm0, %v24266_v46 }
 0xccf   :  { %21398 = vmatpush3.bf16.msra.mxu0 %v22126_v25  ;;  %21416 = vmatpush3.bf16.msra.mxu1 %v22126_v25 }
 0xcd0   :  { %21405 = vmatprep.subr.bf16.mxu0 %v24267_v57  ;;  %21423 = vmatprep.subr.bf16.mxu1 %v24267_v57 }
 0xcd2   :  { %20190 = vmatmul.mubr.f32.vlgmr.msra.gmra.mrb[180].mxu0 %v23847_v9  ;;  %20223 = vmatmul.mubr.f32.vlgmr.msra.gmra.mrb[182].mxu1 %v23841_v27 }
 0xcd3   :  { %21407 = vmatpush3.bf16.msra.mxu0 %v22144_v35  ;;  %21425 = vmatpush3.bf16.msra.mxu1 %v22114_v20  ;;  %v24309_v20 = vld [vmem:[#allocation28_spill] sm:$0xff]  ;;  %v24021_v35 = vld [vmem:[#allocation3 + $0x28] sm:$0xff] }
 0xcd4   :  { %21408 = vmatprep.subr.bf16.mxu0 %v24267_v57  ;;  %21426 = vmatprep.subr.bf16.mxu1 %v24267_v57 }
 0xcd5   :  { %20211 = vmatprep.mubr.msk.f32.mxu0 %vm21835_vm0, %v24266_v46  ;;  %20244 = vmatprep.mubr.msk.f32.mxu1 %vm21835_vm0, %v24266_v46 }
 0xcd7   :  { %21410 = vmatpush3.bf16.msra.mxu0 %v22156_v42  ;;  %21428 = vmatpush3.bf16.msra.mxu1 %v22126_v25  ;;  %v24310_v25 = vld [vmem:[#allocation31_spill] sm:$0xff]  ;;  %v21842_v42 = vmov 8  }
 0xcd8   :  { %21417 = vmatprep.subr.bf16.mxu0 %v24267_v57  ;;  %21435 = vmatprep.subr.bf16.mxu1 %v24267_v57 }
 0xcda   :  { %20212 = vmatmul.mubr.f32.vlgmr.msra.gmra.mrb[182].mxu0 %v23833_v37  ;;  %20245 = vmatmul.mubr.f32.vlgmr.msra.gmra.mrb[184].mxu1 %v23830_v23 }
 0xcdb   :  { %21419 = vmatpush3.bf16.msra.mxu0 %v22164_v49  ;;  %21437 = vmatpush3.bf16.msra.mxu1 %v22202_v16 }
 0xcdc   :  { %21420 = vmatprep.subr.bf16.mxu0 %v24267_v57  ;;  %21438 = vmatprep.subr.bf16.mxu1 %v24267_v57 }
 0xcdd   :  { %20233 = vmatprep.mubr.msk.f32.mxu0 %vm21835_vm0, %v24266_v46  ;;  %20266 = vmatprep.mubr.msk.f32.mxu1 %vm21835_vm0, %v24266_v46 }
 0xcdf   :  { %21422 = vmatpush3.bf16.msra.mxu0 %v22172_v55  ;;  %21440 = vmatpush3.bf16.msra.mxu1 %v22212_v21 }
 0xce0   :  { %21429 = vmatprep.subr.bf16.mxu0 %v24267_v57  ;;  %21447 = vmatprep.subr.bf16.mxu1 %v24267_v57 }
 0xce2   :  { %20234 = vmatmul.mubr.f32.vlgmr.msra.gmra.mrb[184].mxu0 %v23830_v23  ;;  %20267 = vmatmul.mubr.f32.vlgmr.msra.gmra.mrb[186].mxu1 %v23830_v23 }
 0xce3   :  { %21431 = vmatpush3.bf16.msra.mxu0 %v22182_v62  ;;  %21449 = vmatpush3.bf16.msra.mxu1 %v22182_v62 }
 0xce4   :  { %21432 = vmatprep.subr.bf16.mxu0 %v24267_v57  ;;  %21450 = vmatprep.subr.bf16.mxu1 %v24267_v57 }
 0xce5   :  { %20255 = vmatprep.mubr.msk.f32.mxu0 %vm21835_vm0, %v24266_v46  ;;  %20288 = vmatprep.mubr.msk.f32.mxu1 %vm21835_vm0, %v24266_v46 }
 0xce7   :  { %21434 = vmatpush3.bf16.msra.mxu0 %v22190_v7  ;;  %21452 = vmatpush3.bf16.msra.mxu1 %v22190_v7 }
 0xce8   :  { %21441 = vmatprep.subr.bf16.mxu0 %v24267_v57  ;;  %21459 = vmatprep.subr.bf16.mxu1 %v24267_v57 }
 0xcea   :  { %20256 = vmatmul.mubr.f32.vlgmr.msra.gmra.mrb[186].mxu0 %v23847_v9  ;;  %20289 = vmatmul.mubr.f32.vlgmr.msra.gmra.mrb[188].mxu1 %v23841_v27 }
 0xceb   :  { %21443 = vmatpush3.bf16.msra.mxu0 %v22204_v17  ;;  %21461 = vmatpush3.bf16.msra.mxu1 %v22182_v62 }
 0xcec   :  { %21444 = vmatprep.subr.bf16.mxu0 %v24267_v57  ;;  %21462 = vmatprep.subr.bf16.mxu1 %v24267_v57 }
 0xced   :  { %20277 = vmatprep.mubr.msk.f32.mxu0 %vm21835_vm0, %v24266_v46  ;;  %20310 = vmatprep.mubr.msk.f32.mxu1 %vm21835_vm0, %v24266_v46 }
 0xcef   :  { %21446 = vmatpush3.bf16.msra.mxu0 %v24304_v10  ;;  %21464 = vmatpush3.bf16.msra.mxu1 %v22190_v7 }
 0xcf0   :  { %21453 = vmatprep.subr.bf16.mxu0 %v24267_v57 }
 0xcf2   :  { %20278 = vmatmul.mubr.f32.vlgmr.msra.gmra.mrb[188].mxu0 %v23833_v37  ;;  %20311 = vmatmul.mubr.f32.vlgmr.msra.gmra.mrb[190].mxu1 %v23830_v23 }
 0xcf3   :  { %21455 = vmatpush3.bf16.msra.mxu0 %v24305_v15  ;;  %20299 = vmatprep.mubr.msk.f32.mxu0 %vm21835_vm0, %v24266_v46 }
 0xcf4   :  { %21456 = vmatprep.subr.bf16.mxu0 %v24267_v57 }
 0xcf7   :  { %21458 = vmatpush3.bf16.msra.mxu0 %v24306_v26 }
 0xcfa   :  { %20300 = vmatmul.mubr.f32.vlgmr.msra.gmra.mrb[190].mxu0 %v23830_v23 }
 0xd32   :  { %v14910_v33 = vpop.xlane.xlu1 %14909 }
 0xd33   :  { %14912 = vst.msk [vmem:[#allocation3 + $0x38] sm:$0xff] %vm121_vm2, %v14910_v33 }
 0xd3a   :  { %v24006_v43 = vld [vmem:[#allocation3 + $0x38] sm:$0xff] }
 0xd3b   :  { %v16918_v53 = vsel %vm121_vm2, %v24006_v43, -inf }
 0xd3c   :  { %v16919_v58 = vmax.f32 %v16911_v48, %v16918_v53 }
 0xd3e   :  { %v16921_v2 = vmax.f32 %v24307_v59, %v16919_v58 }
 0xd40   :  { %v16922_v8 = vmax.f32 %v24308_v3, %v16921_v2 }
 0xd42   :  { %vm16923_vm0 = vcmp.ge.f32.partialorder %v24014_v14, %v16922_v8  ;;  %vm16924_vm10 = vcmp.ge.f32.partialorder %v24309_v20, %v16922_v8  ;;  %vm16925_vm11 = vcmp.ge.f32.partialorder %v24310_v25, %v16922_v8  ;;  %vm16926_vm12 = vcmp.ge.f32.partialorder %v24004_v39, %v16922_v8 }
 0xd43   :  { %vm16927_vm13 = vcmp.ge.f32.partialorder %v24311_v34, %v16922_v8  ;;  %vm16928_vm14 = vcmp.ge.f32.partialorder %v24021_v35, %v16922_v8  ;;  %vm16929_vm15 = vcmp.ge.f32.partialorder %v24312_v41, %v16922_v8  ;;  %vm16930_vm3 = vcmp.ge.f32.partialorder %v24006_v43, %v16922_v8 }
 0xd44   :  { %v16931_v49 = vsel %vm16923_vm0, 0, %v21842_v42  ;;  %v16932_v55 = vsel %vm16924_vm10, 1, %v21842_v42  ;;  %v16933_v62 = vsel %vm16925_vm11, 2, %v21842_v42  ;;  %v16934_v7 = vsel %vm16926_vm12, 3, %v21842_v42 }
 0xd45   :  { %v16935_v16 = vsel %vm16927_vm13, 4, %v21842_v42  ;;  %v16936_v17 = vsel %vm16928_vm14, 5, %v21842_v42  ;;  %v16937_v21 = vsel %vm16929_vm15, 6, %v21842_v42  ;;  %v16938_v46 = vsel %vm16930_vm3, 7, %v21842_v42 }
 0xd46   :  { %v16939_v57 = vsel %vm121_vm2, %v16931_v49, 2147483647  ;;  %v16940_v54 = vsel %vm121_vm2, %v16932_v55, 2147483647  ;;  %v16941_v12 = vsel %vm121_vm2, %v16933_v62, 2147483647 }
 0xd47   :  { %v16942_v4 = vsel %vm121_vm2, %v16934_v7, 2147483647  ;;  %v16943_v52 = vsel %vm121_vm2, %v16935_v16, 2147483647  ;;  %v16946_v6 = vsel %vm121_vm2, %v16936_v17, 2147483647 }
 0xd48   :  { %vm16944_vm4 = vcmp.lt.s32.totalorder %v16939_v57, %v16943_v52  ;;  %vm16947_vm5 = vcmp.lt.s32.totalorder %v16940_v54, %v16946_v6  ;;  %v16949_v63 = vsel %vm121_vm2, %v16937_v21, 2147483647  ;;  %v16952_v5 = vsel %vm121_vm2, %v16938_v46, 2147483647 }
 0xd49   :  { %v16945_v60 = vsel %vm16944_vm4, %v16939_v57, %v16943_v52  ;;  %v16948_v1 = vsel %vm16947_vm5, %v16940_v54, %v16946_v6  ;;  %vm16950_vm6 = vcmp.lt.s32.totalorder %v16941_v12, %v16949_v63  ;;  %vm16953_vm7 = vcmp.lt.s32.totalorder %v16942_v4, %v16952_v5 }
 0xd4a   :  { %v16951_v24 = vsel %vm16950_vm6, %v16941_v12, %v16949_v63  ;;  %v16954_v22 = vsel %vm16953_vm7, %v16942_v4, %v16952_v5  ;;  %vm16955_vm8 = vcmp.lt.s32.totalorder %v16945_v60, %v16948_v1 }
 0xd4b   :  { %v16956_v29 = vsel %vm16955_vm8, %v16945_v60, %v16948_v1  ;;  %vm16957_vm9 = vcmp.lt.s32.totalorder %v16951_v24, %v16954_v22 }
 0xd4c   :  { %v16958_v30 = vsel %vm16957_vm9, %v16951_v24, %v16954_v22 }
 0xd4d   :  { %vm16959_vm0 = vcmp.lt.s32.totalorder %v16956_v29, %v16958_v30 }
 0xd4e   :  { %v16960_v32 = vsel %vm16959_vm0, %v16956_v29, %v16958_v30 }
 0xd4f   :  { %vm16961_vm10 = vcmp.eq.s32.totalorder %v16960_v32, 0  ;;  %vm16962_vm11 = vcmp.eq.s32.totalorder %v16960_v32, 1  ;;  %vm16963_vm12 = vcmp.eq.s32.totalorder %v16960_v32, 2  ;;  %vm16964_vm13 = vcmp.eq.s32.totalorder %v16960_v32, 3 }
 0xd50   :  { %vm16965_vm14 = vcmp.eq.s32.totalorder %v16960_v32, 4  ;;  %vm16966_vm15 = vcmp.eq.s32.totalorder %v16960_v32, 5  ;;  %vm16967_vm3 = vcmp.eq.s32.totalorder %v16960_v32, 6  ;;  %vm16968_vm1 = vcmp.eq.s32.totalorder %v16960_v32, 7 }
 0xd51   :  { %v24043_v31 = vsel %vm16961_vm10, -1e+30, %v24014_v14  ;;  %v24046_v19 = vsel %vm16962_vm11, -1e+30, %v24309_v20  ;;  %v24049_v44 = vsel %vm16963_vm12, -1e+30, %v24310_v25 }
 0xd52   :  { %v24052_v50 = vsel %vm16964_vm13, -1e+30, %v24004_v39  ;;  %v24055_v0 = vsel %vm16965_vm14, -1e+30, %v24311_v34  ;;  %v24058_v36 = vsel %vm16966_vm15, -1e+30, %v24021_v35 }
 0xd53   :  { %v24063_v11 = vsel %vm16967_vm3, -1e+30, %v24060_v40  ;;  %v24066_v23 = vsel %vm16968_vm1, -1e+30, %v24006_v43  ;;  %v16977_v37 = vsel %vm121_vm2, %v24043_v31, -inf  ;;  %v16978_v27 = vsel %vm121_vm2, %v24046_v19, -inf }
 0xd54   :  { %v16979_v56 = vsel %vm121_vm2, %v24049_v44, -inf  ;;  %v16980_v9 = vsel %vm121_vm2, %v24052_v50, -inf  ;;  %v16981_v28 = vsel %vm121_vm2, %v24055_v0, -inf  ;;  %v16983_v18 = vsel %vm121_vm2, %v24058_v36, -inf }
 0xd55   :  { %v16982_v61 = vmax.f32 %v16977_v37, %v16981_v28  ;;  %v16984_v10 = vmax.f32 %v16978_v27, %v16983_v18  ;;  %v16985_v15 = vsel %vm121_vm2, %v24063_v11, -inf  ;;  %v16987_v26 = vsel %vm121_vm2, %v24066_v23, -inf }
 0xd56   :  { %v16986_v33 = vmax.f32 %v16979_v56, %v16985_v15  ;;  %v16988_v48 = vmax.f32 %v16980_v9, %v16987_v26 }
 0xd57   :  { %v16989_v53 = vmax.f32 %v16982_v61, %v16984_v10 }
 0xd58   :  { %v16990_v58 = vmax.f32 %v16986_v33, %v16988_v48 }
 0xd5a   :  { %v16991_v59 = vmax.f32 %v16989_v53, %v16990_v58 }
 0xd5c   :  { %vm16992_vm1 = vcmp.ge.f32.partialorder %v24043_v31, %v16991_v59  ;;  %vm16993_vm4 = vcmp.ge.f32.partialorder %v24046_v19, %v16991_v59  ;;  %vm16994_vm5 = vcmp.ge.f32.partialorder %v24049_v44, %v16991_v59  ;;  %vm16995_vm6 = vcmp.ge.f32.partialorder %v24052_v50, %v16991_v59 }
 0xd5d   :  { %vm16996_vm7 = vcmp.ge.f32.partialorder %v24055_v0, %v16991_v59  ;;  %vm16997_vm8 = vcmp.ge.f32.partialorder %v24058_v36, %v16991_v59  ;;  %vm16998_vm9 = vcmp.ge.f32.partialorder %v24063_v11, %v16991_v59  ;;  %vm16999_vm0 = vcmp.ge.f32.partialorder %v24066_v23, %v16991_v59 }
 0xd5e   :  { %v17000_v2 = vsel %vm16992_vm1, 0, %v21842_v42  ;;  %v17001_v3 = vsel %vm16993_vm4, 1, %v21842_v42  ;;  %v17002_v8 = vsel %vm16994_vm5, 2, %v21842_v42  ;;  %v17003_v25 = vsel %vm16995_vm6, 3, %v21842_v42 }
 0xd5f   :  { %v17004_v41 = vsel %vm16996_vm7, 4, %v21842_v42  ;;  %v17005_v49 = vsel %vm16997_vm8, 5, %v21842_v42  ;;  %v17006_v55 = vsel %vm16998_vm9, 6, %v21842_v42  ;;  %v17007_v62 = vsel %vm16999_vm0, 7, %v21842_v42 }
 0xd60   :  { %v17008_v7 = vsel %vm121_vm2, %v17000_v2, 2147483647  ;;  %v17009_v16 = vsel %vm121_vm2, %v17001_v3, 2147483647  ;;  %v17010_v17 = vsel %vm121_vm2, %v17002_v8, 2147483647 }
 0xd61   :  { %v17011_v21 = vsel %vm121_vm2, %v17003_v25, 2147483647  ;;  %v17012_v46 = vsel %vm121_vm2, %v17004_v41, 2147483647  ;;  %v17015_v57 = vsel %vm121_vm2, %v17005_v49, 2147483647 }
 0xd62   :  { %vm17013_vm10 = vcmp.lt.s32.totalorder %v17008_v7, %v17012_v46  ;;  %vm17016_vm11 = vcmp.lt.s32.totalorder %v17009_v16, %v17015_v57  ;;  %v17018_v54 = vsel %vm121_vm2, %v17006_v55, 2147483647  ;;  %v17021_v12 = vsel %vm121_vm2, %v17007_v62, 2147483647  ;;  %v21662_v41 = vld [vmem:[#allocation3 + $0x10] sm:$0xff] }
 0xd63   :  { %v17014_v4 = vsel %vm17013_vm10, %v17008_v7, %v17012_v46  ;;  %v17017_v42 = vsel %vm17016_vm11, %v17009_v16, %v17015_v57  ;;  %vm17019_vm12 = vcmp.lt.s32.totalorder %v17010_v17, %v17018_v54  ;;  %vm17022_vm13 = vcmp.lt.s32.totalorder %v17011_v21, %v17021_v12 }
 0xd64   :  { %v17020_v52 = vsel %vm17019_vm12, %v17010_v17, %v17018_v54  ;;  %v17023_v6 = vsel %vm17022_vm13, %v17011_v21, %v17021_v12  ;;  %vm17024_vm14 = vcmp.lt.s32.totalorder %v17014_v4, %v17017_v42 }
 0xd65   :  { %v17025_v63 = vsel %vm17024_vm14, %v17014_v4, %v17017_v42  ;;  %vm17026_vm15 = vcmp.lt.s32.totalorder %v17020_v52, %v17023_v6 }
 0xd66   :  { %v17027_v5 = vsel %vm17026_vm15, %v17020_v52, %v17023_v6 }
 0xd67   :  { %vm17028_vm3 = vcmp.lt.s32.totalorder %v17025_v63, %v17027_v5 }
 0xd68   :  { %v17029_v60 = vsel %vm17028_vm3, %v17025_v63, %v17027_v5 }
 0xd69   :  { %vm17030_vm1 = vcmp.eq.s32.totalorder %v17029_v60, 0  ;;  %vm17031_vm4 = vcmp.eq.s32.totalorder %v17029_v60, 1  ;;  %vm17032_vm5 = vcmp.eq.s32.totalorder %v17029_v60, 2  ;;  %vm17033_vm6 = vcmp.eq.s32.totalorder %v17029_v60, 3 }
 0xd6a   :  { %vm17034_vm7 = vcmp.eq.s32.totalorder %v17029_v60, 4  ;;  %vm17035_vm8 = vcmp.eq.s32.totalorder %v17029_v60, 5  ;;  %vm17036_vm9 = vcmp.eq.s32.totalorder %v17029_v60, 6  ;;  %vm17037_vm0 = vcmp.eq.s32.totalorder %v17029_v60, 7 }
 0xd6b   :  { %v17038_v1 = vsel %vm17030_vm1, -1e+30, %v24043_v31  ;;  %v17039_v24 = vsel %vm17031_vm4, -1e+30, %v24046_v19  ;;  %v17040_v22 = vsel %vm17032_vm5, -1e+30, %v24049_v44 }
 0xd6c   :  { %v17041_v29 = vsel %vm17033_vm6, -1e+30, %v24052_v50  ;;  %v17042_v30 = vsel %vm17034_vm7, -1e+30, %v24055_v0  ;;  %v17043_v32 = vsel %vm17035_vm8, -1e+30, %v24058_v36 }
 0xd6d   :  { %v15084_v37 = vpop.f32.mrb[168].mxu1  ;;  %v17044_v27 = vsel %vm17036_vm9, -1e+30, %v24063_v11  ;;  %v17045_v56 = vsel %vm17037_vm0, -1e+30, %v24066_v23  ;;  %v17046_v9 = vsel %vm121_vm2, %v17038_v1, -inf }
 0xd6e   :  { %v20070_v28 = vpop.f32.mrb[169].mxu1  ;;  %v17047_v31 = vsel %vm121_vm2, %v17039_v24, -inf  ;;  %v17048_v19 = vsel %vm121_vm2, %v17040_v22, -inf  ;;  %v17049_v44 = vsel %vm121_vm2, %v17041_v29, -inf  ;;  %v17050_v50 = vsel %vm121_vm2, %v17042_v30, -inf }
 0xd6f   :  { %v17051_v18 = vmax.f32 %v17046_v9, %v17050_v50  ;;  %v17052_v0 = vsel %vm121_vm2, %v17043_v32, -inf  ;;  %v17054_v36 = vsel %vm121_vm2, %v17044_v27, -inf  ;;  %v17056_v11 = vsel %vm121_vm2, %v17045_v56, -inf }
 0xd70   :  { %v17053_v61 = vmax.f32 %v17047_v31, %v17052_v0  ;;  %v17055_v23 = vmax.f32 %v17048_v19, %v17054_v36  ;;  %v17057_v10 = vmax.f32 %v17049_v44, %v17056_v11 }
 0xd72   :  { %v17058_v15 = vmax.f32 %v17051_v18, %v17053_v61  ;;  %v17059_v26 = vmax.f32 %v17055_v23, %v17057_v10 }
 0xd74   :  { %v17060_v33 = vmax.f32 %v17058_v15, %v17059_v26 }
 0xd75   :  { %v15241_v48 = vpop.f32.mrb[170].mxu1  ;;  %v14993_v53 = vpop.f32.mrb[168].mxu0 }
 0xd76   :  { %v15085_v58 = vadd.f32 %v15084_v37, %v14993_v53  ;;  %v20092_v59 = vpop.f32.mrb[171].mxu1  ;;  %v20059_v2 = vpop.f32.mrb[169].mxu0  ;;  %v17061_v3 = vadd.f32 1e-07, %v17060_v33 }
 0xd78   :  { %v17062_v8 = vsub.f32 %v24014_v14, %v17061_v3  ;;  %v17063_v25 = vsub.f32 %v24309_v20, %v17061_v3  ;;  %v17064_v49 = vsub.f32 %v21662_v41, %v17061_v3  ;;  %v17065_v55 = vsub.f32 %v24004_v39, %v17061_v3 }
 0xd79   :  { %v17066_v62 = vsub.f32 %v24311_v34, %v17061_v3  ;;  %v17067_v21 = vsub.f32 %v24021_v35, %v17061_v3  ;;  %v17068_v34 = vsub.f32 %v24060_v40, %v17061_v3  ;;  %v17069_v5 = vsub.f32 %v24006_v43, %v17061_v3 }
 0xd7a   :  { %v17070_v7 = vmax.f32 %v17062_v8, 0.0  ;;  %v17071_v16 = vmax.f32 %v17063_v25, 0.0  ;;  %v24128_v17 = vmax.f32 %v17064_v49, 0.0  ;;  %v24131_v46 = vmax.f32 %v17065_v55, 0.0 }
 0xd7b   :  { %v24136_v52 = vmax.f32 %v17066_v62, 0.0  ;;  %v24141_v60 = vmax.f32 %v17067_v21, 0.0  ;;  %v17076_v22 = vmax.f32 %v17068_v34, 0.0  ;;  %v24147_v30 = vmax.f32 %v17069_v5, 0.0  ;;  %v14914_v21 = vld [vmem:[#allocation4 + $0x38] sm:$0xff] }
 0xd7c   :  { %v17078_v57 = vsel %vm121_vm2, %v17070_v7, 0.0  ;;  %v17079_v14 = vsel %vm121_vm2, %v17071_v16, 0.0  ;;  %v17081_v6 = vsel %vm121_vm2, %v24128_v17, 0.0  ;;  %v17083_v1 = vsel %vm121_vm2, %v24131_v46, 0.0 }
 0xd7d   :  { %v15164_v54 = vpop.f32.mrb[170].mxu0  ;;  %v15399_v20 = vpop.f32.mrb[172].mxu1  ;;  %v17080_v12 = vadd.f32 %v17079_v14, %v17078_v57  ;;  %v17085_v29 = vsel %vm121_vm2, %v24136_v52, 0.0  ;;  %v17087_v32 = vsel %vm121_vm2, %v24141_v60, 0.0  ;;  %v17089_v31 = vsel %vm121_vm2, %v17076_v22, 0.0  ;;  %v15411_v57 = vld [vmem:[#allocation7 + $0x38] sm:$0xff] }
 0xd7e   :  { %v15165_v4 = vadd.f32 %v15164_v54, %v15085_v58  ;;  %v20081_v42 = vpop.f32.mrb[171].mxu0  ;;  %v20114_v39 = vpop.f32.mrb[173].mxu1  ;;  %v17091_v50 = vsel %vm121_vm2, %v24147_v30, 0.0  ;;  %vm24313_vm2 = vcmask 261120  }
 0xd7f   :  { %v17082_v35 = vadd.f32 %v17081_v6, %v17080_v12  ;;  %vm24314_vm10 = vmmov %vm24313_vm2 }
 0xd80   :  { %v15242_v63 = vadd.f32 %v15241_v48, %v15165_v4  ;;  %vm24315_vm11 = vmmov %vm24313_vm2 }
 0xd81   :  { %v17084_v24 = vadd.f32 %v17083_v1, %v17082_v35  ;;  %vm24316_vm12 = vmmov %vm24313_vm2 }
 0xd82   :  { %vm24317_vm13 = vmmov %vm24313_vm2 }
 0xd83   :  { %v17086_v40 = vadd.f32 %v17085_v29, %v17084_v24  ;;  %vm24318_vm14 = vmmov %vm24313_vm2 }
 0xd84   :  { %vm24319_vm15 = vmmov %vm24313_vm2 }
 0xd85   :  { %v15324_v37 = vpop.f32.mrb[172].mxu0  ;;  %v15578_v27 = vpop.f32.mrb[174].mxu1  ;;  %v17088_v56 = vadd.f32 %v17087_v32, %v17086_v40  ;;  %vm24320_vm3 = vmmov %vm24313_vm2 }
 0xd86   :  { %v15325_v43 = vadd.f32 %v15324_v37, %v15242_v63  ;;  %v20103_v9 = vpop.f32.mrb[173].mxu0  ;;  %v20136_v28 = vpop.f32.mrb[175].mxu1  ;;  %vm24321_vm1 = vmmov %vm24313_vm2 }
 0xd87   :  { %v17090_v19 = vadd.f32 %v17089_v31, %v17088_v56  ;;  %vm24322_vm4 = vmmov %vm24321_vm1 }
 0xd88   :  { %v15400_v44 = vadd.f32 %v15399_v20, %v15325_v43  ;;  %vm24323_vm5 = vmmov %vm24321_vm1 }
 0xd89   :  { %v17092_v18 = vadd.f32 %v17091_v50, %v17090_v19 }
 0xd8a   :  { %v15403_v20 = vadd.f32 %v15400_v44, %v14914_v21 }
 0xd8b   :  { %v17093_v0 = vadd.f32 1e-07, %v17092_v18 }
 0xd8d   :  { %21625 = vrcp.f32 %v17093_v0  ;;  %v15487_v36 = vpop.f32.mrb[174].mxu0  ;;  %v15735_v11 = vpop.f32.mrb[176].mxu1 }
 0xd8e   :  { %v15579_v61 = vadd.f32 %v15578_v27, %v15487_v36  ;;  %v20125_v23 = vpop.f32.mrb[175].mxu0  ;;  %v20158_v10 = vpop.f32.mrb[177].mxu1 }
 0xd95   :  { %v15658_v15 = vpop.f32.mrb[176].mxu0  ;;  %v15893_v26 = vpop.f32.mrb[178].mxu1 }
 0xd96   :  { %v15659_v33 = vadd.f32 %v15658_v15, %v15579_v61  ;;  %v20147_v48 = vpop.f32.mrb[177].mxu0  ;;  %v20180_v53 = vpop.f32.mrb[179].mxu1 }
 0xd97   :  { %v21626_v58 = vpop.eup %21625 }
 0xd98   :  { %v17101_v59 = vmul.f32 %v21626_v58, %v17076_v22  ;;  %v17095_v2 = vmul.f32 %v21626_v58, %v17070_v7  ;;  %v15736_v3 = vadd.f32 %v15735_v11, %v15659_v33  ;;  %v17096_v8 = vmul.f32 %v21626_v58, %v17071_v16 }
 0xd99   :  { %v17097_v14 = vmul.f32 %v21626_v58, %v24128_v17  ;;  %v17098_v7 = vmul.f32 %v21626_v58, %v24131_v46  ;;  %v17238_v16 = vmul.f32 -1.442695, %v15403_v20  ;;  %v17099_v63 = vmul.f32 %v21626_v58, %v24136_v52 }
 0xd9a   :  { %17135 = vperm.xlu1 %21484, %v17101_v59   ;;  %17105 = vperm.xlu0 %21483, %v17095_v2   ;;  %v17100_v17 = vmul.f32 %v21626_v58, %v24141_v60  ;;  %v17102_v29 = vmul.f32 %v21626_v58, %v24147_v30  ;;  %v15905_v60 = vld [vmem:[#allocation9 + $0x38] sm:$0xff] }
 0xd9d   :  { %v15818_v25 = vpop.f32.mrb[178].mxu0  ;;  %v16072_v41 = vpop.f32.mrb[180].mxu1 }
 0xd9e   :  { %17110 = vperm.xlu0 %21483, %v17096_v8   ;;  %v15819_v49 = vadd.f32 %v15818_v25, %v15736_v3  ;;  %v20169_v55 = vpop.f32.mrb[179].mxu0  ;;  %v20202_v62 = vpop.f32.mrb[181].mxu1 }
 0xda0   :  { %v15894_v54 = vadd.f32 %v15893_v26, %v15819_v49 }
 0xda2   :  { %17115 = vperm.xlu0 %21483, %v17097_v14   ;;  %v15897_v12 = vadd.f32 %v15894_v54, %v15411_v57 }
 0xda4   :  { %v17239_v4 = vmul.f32 -1.442695, %v15897_v12 }
 0xda5   :  { %v15981_v42 = vpop.f32.mrb[180].mxu0  ;;  %v16229_v39 = vpop.f32.mrb[182].mxu1 }
 0xda6   :  { %17120 = vperm.xlu0 %21483, %v17098_v7   ;;  %v16073_v34 = vadd.f32 %v16072_v41, %v15981_v42  ;;  %v20191_v6 = vpop.f32.mrb[181].mxu0  ;;  %v20224_v35 = vpop.f32.mrb[183].mxu1  ;;  %21627 = vpow2.f32 %v17239_v4  ;;  %v16394_v41 = vld [vmem:[#allocation10 + $0x38] sm:$0xff]  ;;  %v16892_v7 = vld [vmem:[#allocation2] sm:$0xff] }
 0xda7   :  { %21629 = vpow2.f32 %v17238_v16  ;;  %v16893_v4 = vld [vmem:[#allocation2 + $0x8] sm:$0xff]  ;;  %v16895_v6 = vld [vmem:[#allocation2 + $0x18] sm:$0xff] }
 0xdaa   :  { %17125 = vperm.xlu0 %21483, %v17099_v63  }
 0xdad   :  { %v16152_v5 = vpop.f32.mrb[182].mxu0  ;;  %v16387_v1 = vpop.f32.mrb[184].mxu1 }
 0xdae   :  { %17130 = vperm.xlu0 %21483, %v17100_v17   ;;  %v16153_v24 = vadd.f32 %v16152_v5, %v16073_v34  ;;  %v20213_v46 = vpop.f32.mrb[183].mxu0  ;;  %v20246_v22 = vpop.f32.mrb[185].mxu1 }
 0xdb0   :  { %v16230_v40 = vadd.f32 %v16229_v39, %v16153_v24  ;;  %v21628_v32 = vpop.eup %21627 }
 0xdb1   :  { %v21630_v37 = vpop.eup %21629  ;;  %v15901_v52 = vadd.f32 1.0, %v21628_v32 }
 0xdb2   :  { %17140 = vperm.xlu0 %21483, %v17102_v29   ;;  %v15407_v31 = vadd.f32 1.0, %v21630_v37 }
 0xdb3   :  { %21631 = vrcp.f32 %v15901_v52 }
 0xdb4   :  { %21633 = vrcp.f32 %v15407_v31 }
 0xdb5   :  { %v16312_v27 = vpop.f32.mrb[184].mxu0  ;;  %v16561_v56 = vpop.f32.mrb[186].mxu1 }
 0xdb6   :  { %v16313_v43 = vadd.f32 %v16312_v27, %v16230_v40  ;;  %v20235_v9 = vpop.f32.mrb[185].mxu0  ;;  %v20268_v28 = vpop.f32.mrb[187].mxu1  ;;  %v16897_v27 = vld [vmem:[#allocation2 + $0x28] sm:$0xff] }
 0xdb8   :  { %v16388_v19 = vadd.f32 %v16387_v1, %v16313_v43 }
 0xdba   :  { %v16391_v44 = vadd.f32 %v16388_v19, %v15905_v60  ;;  %v16899_v19 = vld [vmem:[#allocation2 + $0x38] sm:$0xff] }
 0xdbc   :  { %21635 = vtanh.f32 %v16391_v44 }
 0xdbd   :  { %v16470_v50 = vpop.f32.mrb[186].mxu0  ;;  %v16718_v18 = vpop.f32.mrb[188].mxu1 }
 0xdbe   :  { %v16562_v30 = vadd.f32 %v16561_v56, %v16470_v50  ;;  %v20257_v0 = vpop.f32.mrb[187].mxu0  ;;  %v20290_v36 = vpop.f32.mrb[189].mxu1 }
 0xdbf   :  { %v21632_v11 = vpop.eup %21631 }
 0xdc0   :  { %v21634_v61 = vpop.eup %21633  ;;  %v16887_v53 = vmul.f32 %v21632_v11, %v23803_v51 }
 0xdc5   :  { %v16641_v23 = vpop.f32.mrb[188].mxu0  ;;  %v16876_v10 = vpop.f32.mrb[190].mxu1 }
 0xdc6   :  { %v21636_v15 = vpop.eup %21635  ;;  %v16642_v26 = vadd.f32 %v16641_v23, %v16562_v30  ;;  %v20279_v33 = vpop.f32.mrb[189].mxu0 }
 0xdc7   :  { %v20312_v48 = vpop.f32.mrb[191].mxu1  ;;  %v16888_v58 = vmul.f32 %v21636_v15, %v21634_v61 }
 0xdc8   :  { %v16719_v59 = vadd.f32 %v16718_v18, %v16642_v26 }
 0xdc9   :  { %v16889_v2 = vadd.f32 %v16888_v58, %v16887_v53 }
 0xdcd   :  { %v16801_v3 = vpop.f32.mrb[190].mxu0 }
 0xdce   :  { %v16802_v8 = vadd.f32 %v16801_v3, %v16719_v59  ;;  %v20301_v25 = vpop.f32.mrb[191].mxu0 }
 0xdd0   :  { %v16877_v49 = vadd.f32 %v16876_v10, %v16802_v8 }
 0xdd2   :  { %v16880_v55 = vadd.f32 %v16877_v49, %v16394_v41 }
 0xdd4   :  { %v17240_v62 = vmul.f32 -1.442695, %v16880_v55 }
 0xdd6   :  { %21637 = vpow2.f32 %v17240_v62 }
 0xdd7   :  { %21639 = vtanh.f32 %v16889_v2 }
 0xde0   :  { %v21638_v21 = vpop.eup %21637 }
 0xde1   :  { %v16884_v57 = vadd.f32 1.0, %v21638_v21  ;;  %v21640_v14 = vpop.eup %21639 }
 0xde3   :  { %21641 = vrcp.f32 %v16884_v57 }
 0xded   :  { %v21642_v54 = vpop.eup %21641 }
 0xdee   :  { %v16891_v20 = vmul.f32 %v21642_v54, %v21640_v14 }
 0xe19   :  { %v17106_v12 = vpop.permute.xlu0 %17105  ;;  %v17136_v40 = vpop.permute.xlu1 %17135 }
 0xe1a   :  { %v17143_v16 = vmul.f32 %v17106_v12, %v16892_v7  ;;  %v17149_v52 = vmul.f32 %v17136_v40, %v23821_v47 }
 0xe1c   :  { %v17151_v5 = vsel %vm24314_vm10, %v17143_v16, 0.0  ;;  %v17162_v44 = vsel %vm24319_vm15, %v17149_v52, 0.0 }
 0xe1d   :  { %v17111_v51 = vpop.permute.xlu0 %17110 }
 0xe1e   :  { %v17144_v39 = vmul.f32 %v17111_v51, %v16893_v4 }
 0xe20   :  { %v17152_v63 = vsel %vm24313_vm2, %v17144_v39, 0.0 }
 0xe21   :  { %v17116_v42 = vpop.permute.xlu0 %17115  ;;  %v17153_v24 = vadd.f32 %v17152_v63, %v17151_v5 }
 0xe22   :  { %v17145_v34 = vmul.f32 %v17116_v42, %v23806_v45 }
 0xe24   :  { %v17154_v1 = vsel %vm24315_vm11, %v17145_v34, 0.0 }
 0xe25   :  { %v17121_v35 = vpop.permute.xlu0 %17120  ;;  %v17155_v32 = vadd.f32 %v17154_v1, %v17153_v24 }
 0xe26   :  { %v17146_v17 = vmul.f32 %v17121_v35, %v16895_v6 }
 0xe28   :  { %v17156_v22 = vsel %vm24316_vm12, %v17146_v17, 0.0 }
 0xe29   :  { %v17126_v46 = vpop.permute.xlu0 %17125  ;;  %v17157_v45 = vadd.f32 %v17156_v22, %v17155_v32 }
 0xe2a   :  { %v17147_v29 = vmul.f32 %v17126_v46, %v23816_v13 }
 0xe2c   :  { %v17158_v37 = vsel %vm24317_vm13, %v17147_v29, 0.0 }
 0xe2d   :  { %v17131_v56 = vpop.permute.xlu0 %17130  ;;  %v17159_v9 = vadd.f32 %v17158_v37, %v17157_v45 }
 0xe2e   :  { %v17148_v43 = vmul.f32 %v17131_v56, %v16897_v27 }
 0xe30   :  { %v17160_v28 = vsel %vm24318_vm14, %v17148_v43, 0.0 }
 0xe31   :  { %v17161_v31 = vadd.f32 %v17160_v28, %v17159_v9  ;;  %v17141_v60 = vpop.permute.xlu0 %17140 }
 0xe32   :  { %v17150_v50 = vmul.f32 %v17141_v60, %v16899_v19 }
 0xe33   :  { %v17163_v13 = vadd.f32 %v17162_v44, %v17161_v31 }
 0xe34   :  { %v17164_v18 = vsel %vm24320_vm3, %v17150_v50, 0.0 }
 0xe35   :  { %v17165_v30 = vadd.f32 %v17164_v18, %v17163_v13 }
 0xe37   :  { %v17166_v0 = vadd.f32 %v17165_v30, %v16891_v20  ;;  %17170 = vst.msk [vmem:[#allocation14 + $0x38] sm:$0xff] %vm24321_vm1, %v17165_v30 }
 0xe39   :  { %17168 = vst.msk [vmem:[#allocation13 + $0x38] sm:$0xff] %vm24322_vm4, %v17166_v0  ;;  %21643 = vtanh.f32 %v17166_v0 }
 0xe43   :  { %v21644_v47 = vpop.eup %21643 }
 0xe44   :  { %v17174_v36 = vmul.f32 %v23854_v38, %v21644_v47 }
 0xe46   :  { %v17175_v11 = vsel %vm24323_vm5, %v17174_v36, 0.0 }
 0xe47   :  { %17176 = vadd.xlane.f32.xlu0 %v17175_v11 }
 0xe48   :  { %21784 = shalt.err (!%p21781_p2)
}
 0xe49   :  { %s21785_s15 = scalar_lea.hbm %s24219_s7, 1024 }
 0xe4a   :  { %p21786_p3 = scmp.ne.s32.totalorder %s24219_s7, %s21785_s15  ;;  %p21789_p4 = scmp.lt.u32.totalorder %s21785_s15, %s24219_s7 }
 0xe4c   :  { %p21791_p5 = pnand %p21789_p4, %p21786_p3 }
 0xe4e   :  { %21794 = shalt.err (!%p21791_p5)
}
 0xe4f   :  { %17191 = dma.vmem_to_hbm [thread:$0]  %s17186_s0, 1024, %s24219_s7, [#allocation6], %s21829_s17, %s21829_s17, %s21830_s18  }
 0xe50   :  { %s21795_s12 = scalar_lea.vmem %s24175_s10, 1024  ;;  %p21800_p7 = scmp.lt.s32.totalorder %s24175_s10, %s24175_s10 }
 0xe51   :  { %p21796_p6 = scmp.ne.s32.totalorder %s24175_s10, %s21795_s12  ;;  %p21801_p8 = scmp.lt.s32.totalorder %s21795_s12, %s21795_s12 }
 0xe53   :  { %p21802_p9 = por %p21801_p8, %p21800_p7 }
 0xe55   :  { %p21803_p10 = pnand %p21802_p9, %p21796_p6 }
 0xe57   :  { %21806 = shalt.err (!%p21803_p10)
}
 0xe58   :  { %s21807_s22 = scalar_lea.hbm %s24220_s8, 1024 }
 0xe59   :  { %p21808_p11 = scmp.ne.s32.totalorder %s24220_s8, %s21807_s22  ;;  %p21811_p12 = scmp.lt.u32.totalorder %s21807_s22, %s24220_s8 }
 0xe5b   :  { %p21813_p13 = pnand %p21811_p12, %p21808_p11 }
 0xe5d   :  { %21816 = shalt.err (!%p21813_p13)
}
 0xe5e   :  { %17203 = dma.vmem_to_hbm [thread:$0]  %s24175_s10, 1024, %s24220_s8, [#allocation15], %s21829_s17, %s21829_s17, %s21830_s18  }
 0xed4   :  { %v17177_v38 = vpop.xlane.xlu0 %17176 }
 0xed5   :  { %21823 = dma.done.wait [#allocation6], 1024  }
 0xed6   :  { %21824 = vsyncadd [#allocation6], 4294966272 }
 0xed7   :  { %21825 = dma.done.wait [#allocation15], 1024  }
 0xed8   :  { %21826 = vsyncadd [#allocation15], 4294966272 }
 0xed9   :  { %17210 = vsyncpa [#allocation5], 1 }
 0xeda   :  { %17211 = vsyncpa [#allocation8], 1 }
 0xedb   :  { %17212 = vsyncpa [#allocation11], 1 }
 0xedc   :  { %17213 = vsyncpa [#allocation6], 1 }
 0xedd   :  { %17214 = vsyncpa [#allocation15], 1 }

</bundles_post_ra>
